<compile_context>
chip_gen: v7x
topology: tpu7x:2x2x1
jax: 0.10.0
libtpu: 0.0.40
codegen_flags: <defaults>
</compile_context>

<pallas_src>
import math

import jax
import jax.numpy as jnp
from jax.experimental import pallas as pl
from jax.experimental.pallas import tpu as pltpu

# ---------------- small, forward-implied config (reference sizes in comments) -----
IMG_SIZE    = 16                   # reference: 224
PATCH       = 8
IN_CHANS    = 3
NUM_PATCHES = (IMG_SIZE // PATCH) ** 2
VIT_WIDTH   = 32                   # reference ViT-base: 768
VIT_DEPTH   = 2                    # reference: 12
VIT_HEADS   = 4
EMBED_DIM   = 32                   # reference: 512
BIN_NUM     = 5
N_CLASS     = BIN_NUM + 2          # PerformerLM vocab
GENE_NUM    = 8                    # reference: 16906
SEQ_LEN     = GENE_NUM + 1
GENE_DIM    = EMBED_DIM            # TODO(synk): reference PerformerLM dim=200 is shape-incompatible
                                   # with embed_dim=512 in the reference forward; tied here.
GENE_DEPTH  = 2                    # reference: 6
GENE_HEADS  = 2                    # reference: 10
NB_FEATURES = 16                   # performer random features
LOGIT_SCALE = math.log(1.0 / 0.07) # TODO(synk): self.logit_scale is undefined in reference __init__


# ------------------------------- fused Pallas kernel --------------------------------
def make_fused_kernel(treedef, B):
    S_IMG = NUM_PATCHES + 1
    D = VIT_WIDTH
    DH_V = D // VIT_HEADS
    GD = GENE_DIM
    DH_G = GD // GENE_HEADS
    SM_SCALE = DH_V ** -0.5
    F_DN = DH_G ** -0.25
    F_RATIO = NB_FEATURES ** -0.5
    F_EPS = 1e-4
    LSCALE = math.exp(LOGIT_SCALE)                   # static: logit_scale.exp()

    def layernorm(x, g, b):
        mu = jnp.mean(x, axis=-1, keepdims=True)
        xc = x - mu
        var = jnp.mean(xc * xc, axis=-1, keepdims=True)
        return xc * jax.lax.rsqrt(var + 1e-5) * g + b

    def linear(x, w, b=None, act=None):
        y = jnp.dot(x, w, preferred_element_type=jnp.float32)
        if b is not None:
            y = y + b
        if act == "gelu":
            # TODO(synk): PyTorch nn.GELU default is exact erf; tanh approximation used here.
            y = jax.nn.gelu(y, approximate=True)
        return y

    def kernel(*refs):
        patches_ref, genex_ref = refs[0], refs[1]
        param_refs = refs[2:-1]
        out_ref = refs[-1]

        # reconstruct the named weight pytree from the flat ref list and load to values
        W = jax.tree_util.tree_unflatten(treedef, list(param_refs))
        W = jax.tree_util.tree_map(lambda r: r[...], W)

        # -------------------------- image encoder (ViT) ------------------------------
        x0 = linear(patches_ref[...], W["patch_w"], W["patch_b"])        # [B*NP, D]
        pos = W["pos_embed"]                                             # [S_IMG, D]
        img_feats = []
        for b in range(B):                                               # unrolled (B small)
            # [cls; patches] + positional embedding (concat along sublane axis)
            xb = jnp.concatenate(
                [W["cls_token"], x0[b * NUM_PATCHES:(b + 1) * NUM_PATCHES, :]],
                axis=0) + pos                                            # [S_IMG, D]
            for blk in W["vit_blocks"]:
                h = layernorm(xb, blk["ln1_g"], blk["ln1_b"])
                qkv = linear(h, blk["qkv_w"], blk["qkv_b"])              # [S, 3D]
                attn_out = None
                for hh in range(VIT_HEADS):                              # heads via lane slices
                    lo, hi = hh * DH_V, (hh + 1) * DH_V
                    qh = qkv[:, lo:hi]
                    kh = qkv[:, D + lo:D + hi]
                    vh = qkv[:, 2 * D + lo:2 * D + hi]
                    s = jnp.dot(qh, kh.T, preferred_element_type=jnp.float32) * SM_SCALE
                    p = jax.nn.softmax(s, axis=-1)
                    oh = jnp.dot(p, vh, preferred_element_type=jnp.float32)
                    # fuse head-merge with output projection (avoids lane concat)
                    contrib = jnp.dot(oh, blk["proj_w"][lo:hi, :],
                                      preferred_element_type=jnp.float32)
                    attn_out = contrib if attn_out is None else attn_out + contrib
                xb = xb + attn_out + blk["proj_b"]
                h = layernorm(xb, blk["ln2_g"], blk["ln2_b"])
                h = linear(h, blk["fc1_w"], blk["fc1_b"], act="gelu")
                xb = xb + linear(h, blk["fc2_w"], blk["fc2_b"])
            h = layernorm(xb, W["vit_lnf_g"], W["vit_lnf_b"])
            feat = linear(h[0:1, :], W["vproj_w"], W["vproj_b"])         # [1, E] (CLS token)
            ssq = jnp.sum(feat * feat, axis=-1, keepdims=True)
            # F.normalize: x / max(||x||, 1e-12)  ==  x * rsqrt(max(||x||^2, 1e-24))
            img_feats.append(feat * jax.lax.rsqrt(jnp.maximum(ssq, 1e-24)))

        # ------------------------ gene encoder (Performer) ---------------------------
        gx = genex_ref[...]                                              # [B*SEQ, GD]
        gene_feats = []
        for b in range(B):
            xb = gx[b * SEQ_LEN:(b + 1) * SEQ_LEN, :]
            for blk in W["gene_blocks"]:
                h = layernorm(xb, blk["ln1_g"], blk["ln1_b"])
                q = linear(h, blk["wq"])
                k = linear(h, blk["wk"])
                v = linear(h, blk["wv"])
                projT = blk["proj_feat"].T                               # [Dh, M]
                attn_out = None
                for hh in range(GENE_HEADS):
                    lo, hi = hh * DH_G, (hh + 1) * DH_G
                    qh = q[:, lo:hi] * F_DN
                    kh = k[:, lo:hi] * F_DN
                    vh = v[:, lo:hi]
                    # FAVOR+ softmax-kernel features, non-causal linear attention
                    qd = jnp.dot(qh, projT, preferred_element_type=jnp.float32)   # [S, M]
                    kd = jnp.dot(kh, projT, preferred_element_type=jnp.float32)   # [S, M]
                    qdiag = 0.5 * jnp.sum(qh * qh, axis=-1, keepdims=True)
                    kdiag = 0.5 * jnp.sum(kh * kh, axis=-1, keepdims=True)
                    qp = F_RATIO * (jnp.exp(qd - qdiag
                                            - jnp.max(qd, axis=-1, keepdims=True)) + F_EPS)
                    kp = F_RATIO * (jnp.exp(kd - kdiag
                                            - jnp.max(kd, axis=(0, 1), keepdims=True)) + F_EPS)
                    kv = jnp.dot(kp.T, vh, preferred_element_type=jnp.float32)    # [M, Dh]
                    z = jnp.sum(kp, axis=0, keepdims=True)                        # [1, M]
                    num = jnp.dot(qp, kv, preferred_element_type=jnp.float32)     # [S, Dh]
                    den = jnp.sum(qp * z, axis=-1, keepdims=True)                 # [S, 1]
                    oh = num / den
                    contrib = jnp.dot(oh, blk["out_w"][lo:hi, :],
                                      preferred_element_type=jnp.float32)
                    attn_out = contrib if attn_out is None else attn_out + contrib
                xb = xb + attn_out + blk["out_b"]
                h = layernorm(xb, blk["ln2_g"], blk["ln2_b"])
                h = linear(h, blk["ff1_w"], blk["ff1_b"], act="gelu")
                xb = xb + linear(h, blk["ff2_w"], blk["ff2_b"])
            h = layernorm(xb, W["gene_lnf_g"], W["gene_lnf_b"])
            # TODO(synk): reference PerformerLM returns [B, S, num_tokens] logits which are
            # shape-incompatible with the CLIP matmul; first-token encoding is used instead.
            feat = h[0:1, :]
            ssq = jnp.sum(feat * feat, axis=-1, keepdims=True)
            gene_feats.append(feat * jax.lax.rsqrt(ssq))                 # x / x.norm() (no clamp)

        # --------------------------- scaled CLIP logits ------------------------------
        img_f = jnp.concatenate(img_feats, axis=0)                        # [B, E]
        gene_f = jnp.concatenate(gene_feats, axis=0)                      # [B, E]
        out_ref[...] = LSCALE * jnp.dot(img_f, gene_f.T,
                                        preferred_element_type=jnp.float32)

    return kernel


# ------------------------------------ forward ---------------------------------------
def forward(image, gene, P):
    B = image.shape[0]
    nph = IMG_SIZE // PATCH

    # layout glue only: NCHW -> non-overlapping PATCHxPATCH patch vectors
    x = jnp.transpose(image, (0, 2, 3, 1))
    x = x.reshape(B, nph, PATCH, nph, PATCH, IN_CHANS)
    patches = x.transpose(0, 1, 3, 2, 4, 5).reshape(
        B * nph * nph, PATCH * PATCH * IN_CHANS)

    # glue: gene token embedding gather + positional embedding
    gx = (P["tok_emb"][gene] + P["gene_pos_emb"][None, :, :]).reshape(
        B * SEQ_LEN, GENE_DIM)

    # all weights consumed by the fused kernel (embedding tables handled above)
    kparams = {k: v for k, v in P.items() if k not in ("tok_emb", "gene_pos_emb")}
    flat, treedef = jax.tree_util.tree_flatten(kparams)

    kernel = make_fused_kernel(treedef, B)
    return pl.pallas_call(
        kernel,
        out_shape=jax.ShapeDtypeStruct((B, B), jnp.float32),
        compiler_params=pltpu.CompilerParams(vmem_limit_bytes=32 * 1024 * 1024),
    )(patches, gx, *flat)


# ------------------------------- parameter init ------------------------------------
def init_params(key):
    keys = iter(jax.random.split(key, 128))

    def nrm(shape, std=0.02):
        return std * jax.random.normal(next(keys), shape, jnp.float32)

    zeros = lambda s: jnp.zeros(s, jnp.float32)
    ones = lambda s: jnp.ones(s, jnp.float32)

    vit_blocks = []
    for _ in range(VIT_DEPTH):
        vit_blocks.append(dict(
            ln1_g=ones((1, VIT_WIDTH)), ln1_b=zeros((1, VIT_WIDTH)),
            qkv_w=nrm((VIT_WIDTH, 3 * VIT_WIDTH)), qkv_b=zeros((1, 3 * VIT_WIDTH)),
            proj_w=nrm((VIT_WIDTH, VIT_WIDTH)), proj_b=zeros((1, VIT_WIDTH)),
            ln2_g=ones((1, VIT_WIDTH)), ln2_b=zeros((1, VIT_WIDTH)),
            fc1_w=nrm((VIT_WIDTH, 4 * VIT_WIDTH)), fc1_b=zeros((1, 4 * VIT_WIDTH)),
            fc2_w=nrm((4 * VIT_WIDTH, VIT_WIDTH)), fc2_b=zeros((1, VIT_WIDTH)),
        ))

    gene_blocks = []
    for _ in range(GENE_DEPTH):
        gene_blocks.append(dict(
            ln1_g=ones((1, GENE_DIM)), ln1_b=zeros((1, GENE_DIM)),
            wq=nrm((GENE_DIM, GENE_DIM)), wk=nrm((GENE_DIM, GENE_DIM)),
            wv=nrm((GENE_DIM, GENE_DIM)),
            out_w=nrm((GENE_DIM, GENE_DIM)), out_b=zeros((1, GENE_DIM)),
            # TODO(synk): reference Performer uses orthogonal random features; plain Gaussian here.
            proj_feat=jax.random.normal(next(keys),
                                        (NB_FEATURES, GENE_DIM // GENE_HEADS), jnp.float32),
            ln2_g=ones((1, GENE_DIM)), ln2_b=zeros((1, GENE_DIM)),
            ff1_w=nrm((GENE_DIM, 4 * GENE_DIM)), ff1_b=zeros((1, 4 * GENE_DIM)),
            ff2_w=nrm((4 * GENE_DIM, GENE_DIM)), ff2_b=zeros((1, GENE_DIM)),
        ))

    return dict(
        patch_w=nrm((PATCH * PATCH * IN_CHANS, VIT_WIDTH)), patch_b=zeros((1, VIT_WIDTH)),
        cls_token=nrm((1, VIT_WIDTH)),
        pos_embed=nrm((NUM_PATCHES + 1, VIT_WIDTH)),
        vit_blocks=vit_blocks,
        vit_lnf_g=ones((1, VIT_WIDTH)), vit_lnf_b=zeros((1, VIT_WIDTH)),
        vproj_w=nrm((VIT_WIDTH, EMBED_DIM)), vproj_b=zeros((1, EMBED_DIM)),
        tok_emb=nrm((N_CLASS, GENE_DIM)),
        gene_pos_emb=nrm((SEQ_LEN, GENE_DIM)),   # TODO(synk): Gene2vec file-based pos emb replaced
        gene_blocks=gene_blocks,
        gene_lnf_g=ones((1, GENE_DIM)), gene_lnf_b=zeros((1, GENE_DIM)),
    )


# ------------------------------------ main -----------------------------------------
if __name__ == "__main__":
    root = jax.random.PRNGKey(0)
    k_img, k_gene, k_par = jax.random.split(root, 3)
    image = jax.random.normal(k_img, (2, IN_CHANS, IMG_SIZE, IMG_SIZE), jnp.float32)  # NCHW
    gene = jax.random.randint(k_gene, (2, SEQ_LEN), 0, N_CLASS, jnp.int32)
    params = init_params(k_par)

    logits_per_image_gene = jax.jit(forward)(image, gene, params)
    jax.block_until_ready(logits_per_image_gene)
    assert logits_per_image_gene.shape == (2, 2)
    assert bool(jnp.all(jnp.isfinite(logits_per_image_gene)))
    print("KERNEL_OK")
</pallas_src>

<mosaic_0001>
module attributes {stable_mosaic.version = 11 : i64} {
  func.func @kernel(%arg0: memref<8x192xf32, #tpu.memory_space<vmem>>, %arg1: memref<18x32xf32, #tpu.memory_space<vmem>>, %arg2: memref<1x32xf32, #tpu.memory_space<vmem>>, %arg3: memref<1x128xf32, #tpu.memory_space<vmem>>, %arg4: memref<32x128xf32, #tpu.memory_space<vmem>>, %arg5: memref<1x32xf32, #tpu.memory_space<vmem>>, %arg6: memref<128x32xf32, #tpu.memory_space<vmem>>, %arg7: memref<1x32xf32, #tpu.memory_space<vmem>>, %arg8: memref<1x32xf32, #tpu.memory_space<vmem>>, %arg9: memref<1x32xf32, #tpu.memory_space<vmem>>, %arg10: memref<1x32xf32, #tpu.memory_space<vmem>>, %arg11: memref<1x32xf32, #tpu.memory_space<vmem>>, %arg12: memref<32x32xf32, #tpu.memory_space<vmem>>, %arg13: memref<16x16xf32, #tpu.memory_space<vmem>>, %arg14: memref<32x32xf32, #tpu.memory_space<vmem>>, %arg15: memref<32x32xf32, #tpu.memory_space<vmem>>, %arg16: memref<32x32xf32, #tpu.memory_space<vmem>>, %arg17: memref<1x128xf32, #tpu.memory_space<vmem>>, %arg18: memref<32x128xf32, #tpu.memory_space<vmem>>, %arg19: memref<1x32xf32, #tpu.memory_space<vmem>>, %arg20: memref<128x32xf32, #tpu.memory_space<vmem>>, %arg21: memref<1x32xf32, #tpu.memory_space<vmem>>, %arg22: memref<1x32xf32, #tpu.memory_space<vmem>>, %arg23: memref<1x32xf32, #tpu.memory_space<vmem>>, %arg24: memref<1x32xf32, #tpu.memory_space<vmem>>, %arg25: memref<1x32xf32, #tpu.memory_space<vmem>>, %arg26: memref<32x32xf32, #tpu.memory_space<vmem>>, %arg27: memref<16x16xf32, #tpu.memory_space<vmem>>, %arg28: memref<32x32xf32, #tpu.memory_space<vmem>>, %arg29: memref<32x32xf32, #tpu.memory_space<vmem>>, %arg30: memref<32x32xf32, #tpu.memory_space<vmem>>, %arg31: memref<1x32xf32, #tpu.memory_space<vmem>>, %arg32: memref<1x32xf32, #tpu.memory_space<vmem>>, %arg33: memref<1x32xf32, #tpu.memory_space<vmem>>, %arg34: memref<192x32xf32, #tpu.memory_space<vmem>>, %arg35: memref<5x32xf32, #tpu.memory_space<vmem>>, %arg36: memref<1x128xf32, #tpu.memory_space<vmem>>, %arg37: memref<32x128xf32, #tpu.memory_space<vmem>>, %arg38: memref<1x32xf32, #tpu.memory_space<vmem>>, %arg39: memref<128x32xf32, #tpu.memory_space<vmem>>, %arg40: memref<1x32xf32, #tpu.memory_space<vmem>>, %arg41: memref<1x32xf32, #tpu.memory_space<vmem>>, %arg42: memref<1x32xf32, #tpu.memory_space<vmem>>, %arg43: memref<1x32xf32, #tpu.memory_space<vmem>>, %arg44: memref<1x32xf32, #tpu.memory_space<vmem>>, %arg45: memref<32x32xf32, #tpu.memory_space<vmem>>, %arg46: memref<1x96xf32, #tpu.memory_space<vmem>>, %arg47: memref<32x96xf32, #tpu.memory_space<vmem>>, %arg48: memref<1x128xf32, #tpu.memory_space<vmem>>, %arg49: memref<32x128xf32, #tpu.memory_space<vmem>>, %arg50: memref<1x32xf32, #tpu.memory_space<vmem>>, %arg51: memref<128x32xf32, #tpu.memory_space<vmem>>, %arg52: memref<1x32xf32, #tpu.memory_space<vmem>>, %arg53: memref<1x32xf32, #tpu.memory_space<vmem>>, %arg54: memref<1x32xf32, #tpu.memory_space<vmem>>, %arg55: memref<1x32xf32, #tpu.memory_space<vmem>>, %arg56: memref<1x32xf32, #tpu.memory_space<vmem>>, %arg57: memref<32x32xf32, #tpu.memory_space<vmem>>, %arg58: memref<1x96xf32, #tpu.memory_space<vmem>>, %arg59: memref<32x96xf32, #tpu.memory_space<vmem>>, %arg60: memref<1x32xf32, #tpu.memory_space<vmem>>, %arg61: memref<1x32xf32, #tpu.memory_space<vmem>>, %arg62: memref<1x32xf32, #tpu.memory_space<vmem>>, %arg63: memref<32x32xf32, #tpu.memory_space<vmem>>, %arg64: memref<2x2xf32, #tpu.memory_space<vmem>>) attributes {dimension_semantics = [], scalar_prefetch = 0 : i64, scratch_operands = 0 : i64, tpu.core_type = #tpu.core_type<tc>} {
    %c0 = arith.constant 0 : index
    %c0_0 = arith.constant 0 : index
    %0 = vector.load %arg2[%c0, %c0_0] : memref<1x32xf32, #tpu.memory_space<vmem>>, vector<1x32xf32>
    %c0_1 = arith.constant 0 : index
    %c0_2 = arith.constant 0 : index
    %1 = vector.load %arg3[%c0_1, %c0_2] : memref<1x128xf32, #tpu.memory_space<vmem>>, vector<1x128xf32>
    %c0_3 = arith.constant 0 : index
    %c0_4 = arith.constant 0 : index
    %2 = vector.load %arg4[%c0_3, %c0_4] : memref<32x128xf32, #tpu.memory_space<vmem>>, vector<32x128xf32>
    %c0_5 = arith.constant 0 : index
    %c0_6 = arith.constant 0 : index
    %3 = vector.load %arg5[%c0_5, %c0_6] : memref<1x32xf32, #tpu.memory_space<vmem>>, vector<1x32xf32>
    %c0_7 = arith.constant 0 : index
    %c0_8 = arith.constant 0 : index
    %4 = vector.load %arg6[%c0_7, %c0_8] : memref<128x32xf32, #tpu.memory_space<vmem>>, vector<128x32xf32>
    %c0_9 = arith.constant 0 : index
    %c0_10 = arith.constant 0 : index
    %5 = vector.load %arg7[%c0_9, %c0_10] : memref<1x32xf32, #tpu.memory_space<vmem>>, vector<1x32xf32>
    %c0_11 = arith.constant 0 : index
    %c0_12 = arith.constant 0 : index
    %6 = vector.load %arg8[%c0_11, %c0_12] : memref<1x32xf32, #tpu.memory_space<vmem>>, vector<1x32xf32>
    %c0_13 = arith.constant 0 : index
    %c0_14 = arith.constant 0 : index
    %7 = vector.load %arg9[%c0_13, %c0_14] : memref<1x32xf32, #tpu.memory_space<vmem>>, vector<1x32xf32>
    %c0_15 = arith.constant 0 : index
    %c0_16 = arith.constant 0 : index
    %8 = vector.load %arg10[%c0_15, %c0_16] : memref<1x32xf32, #tpu.memory_space<vmem>>, vector<1x32xf32>
    %c0_17 = arith.constant 0 : index
    %c0_18 = arith.constant 0 : index
    %9 = vector.load %arg11[%c0_17, %c0_18] : memref<1x32xf32, #tpu.memory_space<vmem>>, vector<1x32xf32>
    %c0_19 = arith.constant 0 : index
    %c0_20 = arith.constant 0 : index
    %10 = vector.load %arg12[%c0_19, %c0_20] : memref<32x32xf32, #tpu.memory_space<vmem>>, vector<32x32xf32>
    %c0_21 = arith.constant 0 : index
    %c0_22 = arith.constant 0 : index
    %11 = vector.load %arg13[%c0_21, %c0_22] : memref<16x16xf32, #tpu.memory_space<vmem>>, vector<16x16xf32>
    %c0_23 = arith.constant 0 : index
    %c0_24 = arith.constant 0 : index
    %12 = vector.load %arg14[%c0_23, %c0_24] : memref<32x32xf32, #tpu.memory_space<vmem>>, vector<32x32xf32>
    %c0_25 = arith.constant 0 : index
    %c0_26 = arith.constant 0 : index
    %13 = vector.load %arg15[%c0_25, %c0_26] : memref<32x32xf32, #tpu.memory_space<vmem>>, vector<32x32xf32>
    %c0_27 = arith.constant 0 : index
    %c0_28 = arith.constant 0 : index
    %14 = vector.load %arg16[%c0_27, %c0_28] : memref<32x32xf32, #tpu.memory_space<vmem>>, vector<32x32xf32>
    %c0_29 = arith.constant 0 : index
    %c0_30 = arith.constant 0 : index
    %15 = vector.load %arg17[%c0_29, %c0_30] : memref<1x128xf32, #tpu.memory_space<vmem>>, vector<1x128xf32>
    %c0_31 = arith.constant 0 : index
    %c0_32 = arith.constant 0 : index
    %16 = vector.load %arg18[%c0_31, %c0_32] : memref<32x128xf32, #tpu.memory_space<vmem>>, vector<32x128xf32>
    %c0_33 = arith.constant 0 : index
    %c0_34 = arith.constant 0 : index
    %17 = vector.load %arg19[%c0_33, %c0_34] : memref<1x32xf32, #tpu.memory_space<vmem>>, vector<1x32xf32>
    %c0_35 = arith.constant 0 : index
    %c0_36 = arith.constant 0 : index
    %18 = vector.load %arg20[%c0_35, %c0_36] : memref<128x32xf32, #tpu.memory_space<vmem>>, vector<128x32xf32>
    %c0_37 = arith.constant 0 : index
    %c0_38 = arith.constant 0 : index
    %19 = vector.load %arg21[%c0_37, %c0_38] : memref<1x32xf32, #tpu.memory_space<vmem>>, vector<1x32xf32>
    %c0_39 = arith.constant 0 : index
    %c0_40 = arith.constant 0 : index
    %20 = vector.load %arg22[%c0_39, %c0_40] : memref<1x32xf32, #tpu.memory_space<vmem>>, vector<1x32xf32>
    %c0_41 = arith.constant 0 : index
    %c0_42 = arith.constant 0 : index
    %21 = vector.load %arg23[%c0_41, %c0_42] : memref<1x32xf32, #tpu.memory_space<vmem>>, vector<1x32xf32>
    %c0_43 = arith.constant 0 : index
    %c0_44 = arith.constant 0 : index
    %22 = vector.load %arg24[%c0_43, %c0_44] : memref<1x32xf32, #tpu.memory_space<vmem>>, vector<1x32xf32>
    %c0_45 = arith.constant 0 : index
    %c0_46 = arith.constant 0 : index
    %23 = vector.load %arg25[%c0_45, %c0_46] : memref<1x32xf32, #tpu.memory_space<vmem>>, vector<1x32xf32>
    %c0_47 = arith.constant 0 : index
    %c0_48 = arith.constant 0 : index
    %24 = vector.load %arg26[%c0_47, %c0_48] : memref<32x32xf32, #tpu.memory_space<vmem>>, vector<32x32xf32>
    %c0_49 = arith.constant 0 : index
    %c0_50 = arith.constant 0 : index
    %25 = vector.load %arg27[%c0_49, %c0_50] : memref<16x16xf32, #tpu.memory_space<vmem>>, vector<16x16xf32>
    %c0_51 = arith.constant 0 : index
    %c0_52 = arith.constant 0 : index
    %26 = vector.load %arg28[%c0_51, %c0_52] : memref<32x32xf32, #tpu.memory_space<vmem>>, vector<32x32xf32>
    %c0_53 = arith.constant 0 : index
    %c0_54 = arith.constant 0 : index
    %27 = vector.load %arg29[%c0_53, %c0_54] : memref<32x32xf32, #tpu.memory_space<vmem>>, vector<32x32xf32>
    %c0_55 = arith.constant 0 : index
    %c0_56 = arith.constant 0 : index
    %28 = vector.load %arg30[%c0_55, %c0_56] : memref<32x32xf32, #tpu.memory_space<vmem>>, vector<32x32xf32>
    %c0_57 = arith.constant 0 : index
    %c0_58 = arith.constant 0 : index
    %29 = vector.load %arg31[%c0_57, %c0_58] : memref<1x32xf32, #tpu.memory_space<vmem>>, vector<1x32xf32>
    %c0_59 = arith.constant 0 : index
    %c0_60 = arith.constant 0 : index
    %30 = vector.load %arg32[%c0_59, %c0_60] : memref<1x32xf32, #tpu.memory_space<vmem>>, vector<1x32xf32>
    %c0_61 = arith.constant 0 : index
    %c0_62 = arith.constant 0 : index
    %31 = vector.load %arg33[%c0_61, %c0_62] : memref<1x32xf32, #tpu.memory_space<vmem>>, vector<1x32xf32>
    %c0_63 = arith.constant 0 : index
    %c0_64 = arith.constant 0 : index
    %32 = vector.load %arg34[%c0_63, %c0_64] : memref<192x32xf32, #tpu.memory_space<vmem>>, vector<192x32xf32>
    %c0_65 = arith.constant 0 : index
    %c0_66 = arith.constant 0 : index
    %33 = vector.load %arg35[%c0_65, %c0_66] : memref<5x32xf32, #tpu.memory_space<vmem>>, vector<5x32xf32>
    %c0_67 = arith.constant 0 : index
    %c0_68 = arith.constant 0 : index
    %34 = vector.load %arg36[%c0_67, %c0_68] : memref<1x128xf32, #tpu.memory_space<vmem>>, vector<1x128xf32>
    %c0_69 = arith.constant 0 : index
    %c0_70 = arith.constant 0 : index
    %35 = vector.load %arg37[%c0_69, %c0_70] : memref<32x128xf32, #tpu.memory_space<vmem>>, vector<32x128xf32>
    %c0_71 = arith.constant 0 : index
    %c0_72 = arith.constant 0 : index
    %36 = vector.load %arg38[%c0_71, %c0_72] : memref<1x32xf32, #tpu.memory_space<vmem>>, vector<1x32xf32>
    %c0_73 = arith.constant 0 : index
    %c0_74 = arith.constant 0 : index
    %37 = vector.load %arg39[%c0_73, %c0_74] : memref<128x32xf32, #tpu.memory_space<vmem>>, vector<128x32xf32>
    %c0_75 = arith.constant 0 : index
    %c0_76 = arith.constant 0 : index
    %38 = vector.load %arg40[%c0_75, %c0_76] : memref<1x32xf32, #tpu.memory_space<vmem>>, vector<1x32xf32>
    %c0_77 = arith.constant 0 : index
    %c0_78 = arith.constant 0 : index
    %39 = vector.load %arg41[%c0_77, %c0_78] : memref<1x32xf32, #tpu.memory_space<vmem>>, vector<1x32xf32>
    %c0_79 = arith.constant 0 : index
    %c0_80 = arith.constant 0 : index
    %40 = vector.load %arg42[%c0_79, %c0_80] : memref<1x32xf32, #tpu.memory_space<vmem>>, vector<1x32xf32>
    %c0_81 = arith.constant 0 : index
    %c0_82 = arith.constant 0 : index
    %41 = vector.load %arg43[%c0_81, %c0_82] : memref<1x32xf32, #tpu.memory_space<vmem>>, vector<1x32xf32>
    %c0_83 = arith.constant 0 : index
    %c0_84 = arith.constant 0 : index
    %42 = vector.load %arg44[%c0_83, %c0_84] : memref<1x32xf32, #tpu.memory_space<vmem>>, vector<1x32xf32>
    %c0_85 = arith.constant 0 : index
    %c0_86 = arith.constant 0 : index
    %43 = vector.load %arg45[%c0_85, %c0_86] : memref<32x32xf32, #tpu.memory_space<vmem>>, vector<32x32xf32>
    %c0_87 = arith.constant 0 : index
    %c0_88 = arith.constant 0 : index
    %44 = vector.load %arg46[%c0_87, %c0_88] : memref<1x96xf32, #tpu.memory_space<vmem>>, vector<1x96xf32>
    %c0_89 = arith.constant 0 : index
    %c0_90 = arith.constant 0 : index
    %45 = vector.load %arg47[%c0_89, %c0_90] : memref<32x96xf32, #tpu.memory_space<vmem>>, vector<32x96xf32>
    %c0_91 = arith.constant 0 : index
    %c0_92 = arith.constant 0 : index
    %46 = vector.load %arg48[%c0_91, %c0_92] : memref<1x128xf32, #tpu.memory_space<vmem>>, vector<1x128xf32>
    %c0_93 = arith.constant 0 : index
    %c0_94 = arith.constant 0 : index
    %47 = vector.load %arg49[%c0_93, %c0_94] : memref<32x128xf32, #tpu.memory_space<vmem>>, vector<32x128xf32>
    %c0_95 = arith.constant 0 : index
    %c0_96 = arith.constant 0 : index
    %48 = vector.load %arg50[%c0_95, %c0_96] : memref<1x32xf32, #tpu.memory_space<vmem>>, vector<1x32xf32>
    %c0_97 = arith.constant 0 : index
    %c0_98 = arith.constant 0 : index
    %49 = vector.load %arg51[%c0_97, %c0_98] : memref<128x32xf32, #tpu.memory_space<vmem>>, vector<128x32xf32>
    %c0_99 = arith.constant 0 : index
    %c0_100 = arith.constant 0 : index
    %50 = vector.load %arg52[%c0_99, %c0_100] : memref<1x32xf32, #tpu.memory_space<vmem>>, vector<1x32xf32>
    %c0_101 = arith.constant 0 : index
    %c0_102 = arith.constant 0 : index
    %51 = vector.load %arg53[%c0_101, %c0_102] : memref<1x32xf32, #tpu.memory_space<vmem>>, vector<1x32xf32>
    %c0_103 = arith.constant 0 : index
    %c0_104 = arith.constant 0 : index
    %52 = vector.load %arg54[%c0_103, %c0_104] : memref<1x32xf32, #tpu.memory_space<vmem>>, vector<1x32xf32>
    %c0_105 = arith.constant 0 : index
    %c0_106 = arith.constant 0 : index
    %53 = vector.load %arg55[%c0_105, %c0_106] : memref<1x32xf32, #tpu.memory_space<vmem>>, vector<1x32xf32>
    %c0_107 = arith.constant 0 : index
    %c0_108 = arith.constant 0 : index
    %54 = vector.load %arg56[%c0_107, %c0_108] : memref<1x32xf32, #tpu.memory_space<vmem>>, vector<1x32xf32>
    %c0_109 = arith.constant 0 : index
    %c0_110 = arith.constant 0 : index
    %55 = vector.load %arg57[%c0_109, %c0_110] : memref<32x32xf32, #tpu.memory_space<vmem>>, vector<32x32xf32>
    %c0_111 = arith.constant 0 : index
    %c0_112 = arith.constant 0 : index
    %56 = vector.load %arg58[%c0_111, %c0_112] : memref<1x96xf32, #tpu.memory_space<vmem>>, vector<1x96xf32>
    %c0_113 = arith.constant 0 : index
    %c0_114 = arith.constant 0 : index
    %57 = vector.load %arg59[%c0_113, %c0_114] : memref<32x96xf32, #tpu.memory_space<vmem>>, vector<32x96xf32>
    %c0_115 = arith.constant 0 : index
    %c0_116 = arith.constant 0 : index
    %58 = vector.load %arg60[%c0_115, %c0_116] : memref<1x32xf32, #tpu.memory_space<vmem>>, vector<1x32xf32>
    %c0_117 = arith.constant 0 : index
    %c0_118 = arith.constant 0 : index
    %59 = vector.load %arg61[%c0_117, %c0_118] : memref<1x32xf32, #tpu.memory_space<vmem>>, vector<1x32xf32>
    %c0_119 = arith.constant 0 : index
    %c0_120 = arith.constant 0 : index
    %60 = vector.load %arg62[%c0_119, %c0_120] : memref<1x32xf32, #tpu.memory_space<vmem>>, vector<1x32xf32>
    %c0_121 = arith.constant 0 : index
    %c0_122 = arith.constant 0 : index
    %61 = vector.load %arg63[%c0_121, %c0_122] : memref<32x32xf32, #tpu.memory_space<vmem>>, vector<32x32xf32>
    %c0_123 = arith.constant 0 : index
    %c0_124 = arith.constant 0 : index
    %62 = vector.load %arg0[%c0_123, %c0_124] : memref<8x192xf32, #tpu.memory_space<vmem>>, vector<8x192xf32>
    %cst = arith.constant dense<0.000000e+00> : vector<8x32xf32>
    %63 = tpu.matmul %62, %32, %cst {dimension_numbers = #tpu.dot_dimension_numbers<[1], [0], [0], [1], [0, 0, 1, 1], [], []>} : vector<8x192xf32>, vector<192x32xf32>, vector<8x32xf32> -> vector<8x32xf32>
    %64 = vector.broadcast %31 : vector<1x32xf32> to vector<8x32xf32>
    %65 = arith.addf %63, %64 : vector<8x32xf32>
    %66 = vector.extract_strided_slice %65 {offsets = [0, 0], sizes = [4, 32], strides = [1, 1]} : vector<8x32xf32> to vector<4x32xf32>
    %67 = tpu.concatenate %0, %66 in 0 : vector<1x32xf32>, vector<4x32xf32> -> vector<5x32xf32>
    %68 = arith.addf %67, %33 : vector<5x32xf32>
    %cst_125 = arith.constant dense<0.000000e+00> : vector<5xf32>
    %69 = vector.multi_reduction <add>, %68, %cst_125 [1] : vector<5x32xf32> to vector<5xf32>
    %70 = vector.shape_cast %69 : vector<5xf32> to vector<5x1xf32>
    %cst_126 = arith.constant 3.200000e+01 : f32
    %71 = vector.broadcast %cst_126 : f32 to vector<5x1xf32>
    %72 = arith.divf %70, %71 : vector<5x1xf32>
    %73 = vector.broadcast %72 : vector<5x1xf32> to vector<5x32xf32>
    %74 = arith.subf %68, %73 : vector<5x32xf32>
    %75 = arith.mulf %74, %74 : vector<5x32xf32>
    %cst_127 = arith.constant dense<0.000000e+00> : vector<5xf32>
    %76 = vector.multi_reduction <add>, %75, %cst_127 [1] : vector<5x32xf32> to vector<5xf32>
    %77 = vector.shape_cast %76 : vector<5xf32> to vector<5x1xf32>
    %cst_128 = arith.constant 3.200000e+01 : f32
    %78 = vector.broadcast %cst_128 : f32 to vector<5x1xf32>
    %79 = arith.divf %77, %78 : vector<5x1xf32>
    %cst_129 = arith.constant 9.99999974E-6 : f32
    %80 = vector.broadcast %cst_129 : f32 to vector<5x1xf32>
    %81 = arith.addf %79, %80 : vector<5x1xf32>
    %82 = math.rsqrt %81 : vector<5x1xf32>
    %83 = vector.broadcast %82 : vector<5x1xf32> to vector<5x32xf32>
    %84 = arith.mulf %74, %83 : vector<5x32xf32>
    %85 = vector.broadcast %39 : vector<1x32xf32> to vector<5x32xf32>
    %86 = arith.mulf %84, %85 : vector<5x32xf32>
    %87 = vector.broadcast %38 : vector<1x32xf32> to vector<5x32xf32>
    %88 = arith.addf %86, %87 : vector<5x32xf32>
    %cst_130 = arith.constant dense<0.000000e+00> : vector<5x96xf32>
    %89 = tpu.matmul %88, %45, %cst_130 {dimension_numbers = #tpu.dot_dimension_numbers<[1], [0], [0], [1], [0, 0, 1, 1], [], []>} : vector<5x32xf32>, vector<32x96xf32>, vector<5x96xf32> -> vector<5x96xf32>
    %90 = vector.broadcast %44 : vector<1x96xf32> to vector<5x96xf32>
    %91 = arith.addf %89, %90 : vector<5x96xf32>
    %92 = vector.extract_strided_slice %91 {offsets = [0, 0], sizes = [5, 8], strides = [1, 1]} : vector<5x96xf32> to vector<5x8xf32>
    %93 = vector.extract_strided_slice %91 {offsets = [0, 32], sizes = [5, 8], strides = [1, 1]} : vector<5x96xf32> to vector<5x8xf32>
    %94 = vector.extract_strided_slice %91 {offsets = [0, 64], sizes = [5, 8], strides = [1, 1]} : vector<5x96xf32> to vector<5x8xf32>
    %95 = tpu.transpose %93, [1, 0] : vector<5x8xf32> -> vector<8x5xf32>
    %cst_131 = arith.constant dense<0.000000e+00> : vector<5x5xf32>
    %96 = tpu.matmul %92, %95, %cst_131 {dimension_numbers = #tpu.dot_dimension_numbers<[1], [0], [0], [1], [0, 0, 1, 1], [], []>} : vector<5x8xf32>, vector<8x5xf32>, vector<5x5xf32> -> vector<5x5xf32>
    %cst_132 = arith.constant 0.353553385 : f32
    %97 = vector.broadcast %cst_132 : f32 to vector<5x5xf32>
    %98 = arith.mulf %96, %97 : vector<5x5xf32>
    %cst_133 = arith.constant dense<0xFF800000> : vector<5xf32>
    %99 = vector.multi_reduction <maximumf>, %98, %cst_133 [1] : vector<5x5xf32> to vector<5xf32>
    %cst_134 = arith.constant 0xFF800000 : f32
    %100 = vector.broadcast %cst_134 : f32 to vector<5xf32>
    %101 = arith.maximumf %100, %99 : vector<5xf32>
    %102 = vector.shape_cast %101 : vector<5xf32> to vector<5x1xf32>
    %103 = vector.broadcast %102 : vector<5x1xf32> to vector<5x5xf32>
    %104 = arith.subf %98, %103 : vector<5x5xf32>
    %105 = math.exp %104 : vector<5x5xf32>
    %cst_135 = arith.constant dense<0.000000e+00> : vector<5xf32>
    %106 = vector.multi_reduction <add>, %105, %cst_135 [1] : vector<5x5xf32> to vector<5xf32>
    %107 = vector.shape_cast %106 : vector<5xf32> to vector<5x1xf32>
    %108 = vector.broadcast %107 : vector<5x1xf32> to vector<5x5xf32>
    %109 = arith.divf %105, %108 : vector<5x5xf32>
    %cst_136 = arith.constant dense<0.000000e+00> : vector<5x8xf32>
    %110 = tpu.matmul %109, %94, %cst_136 {dimension_numbers = #tpu.dot_dimension_numbers<[1], [0], [0], [1], [0, 0, 1, 1], [], []>} : vector<5x5xf32>, vector<5x8xf32>, vector<5x8xf32> -> vector<5x8xf32>
    %111 = vector.extract_strided_slice %43 {offsets = [0, 0], sizes = [8, 32], strides = [1, 1]} : vector<32x32xf32> to vector<8x32xf32>
    %cst_137 = arith.constant dense<0.000000e+00> : vector<5x32xf32>
    %112 = tpu.matmul %110, %111, %cst_137 {dimension_numbers = #tpu.dot_dimension_numbers<[1], [0], [0], [1], [0, 0, 1, 1], [], []>} : vector<5x8xf32>, vector<8x32xf32>, vector<5x32xf32> -> vector<5x32xf32>
    %113 = vector.extract_strided_slice %91 {offsets = [0, 8], sizes = [5, 8], strides = [1, 1]} : vector<5x96xf32> to vector<5x8xf32>
    %114 = vector.extract_strided_slice %91 {offsets = [0, 40], sizes = [5, 8], strides = [1, 1]} : vector<5x96xf32> to vector<5x8xf32>
    %115 = vector.extract_strided_slice %91 {offsets = [0, 72], sizes = [5, 8], strides = [1, 1]} : vector<5x96xf32> to vector<5x8xf32>
    %116 = tpu.transpose %114, [1, 0] : vector<5x8xf32> -> vector<8x5xf32>
    %cst_138 = arith.constant dense<0.000000e+00> : vector<5x5xf32>
    %117 = tpu.matmul %113, %116, %cst_138 {dimension_numbers = #tpu.dot_dimension_numbers<[1], [0], [0], [1], [0, 0, 1, 1], [], []>} : vector<5x8xf32>, vector<8x5xf32>, vector<5x5xf32> -> vector<5x5xf32>
    %cst_139 = arith.constant 0.353553385 : f32
    %118 = vector.broadcast %cst_139 : f32 to vector<5x5xf32>
    %119 = arith.mulf %117, %118 : vector<5x5xf32>
    %cst_140 = arith.constant dense<0xFF800000> : vector<5xf32>
    %120 = vector.multi_reduction <maximumf>, %119, %cst_140 [1] : vector<5x5xf32> to vector<5xf32>
    %cst_141 = arith.constant 0xFF800000 : f32
    %121 = vector.broadcast %cst_141 : f32 to vector<5xf32>
    %122 = arith.maximumf %121, %120 : vector<5xf32>
    %123 = vector.shape_cast %122 : vector<5xf32> to vector<5x1xf32>
    %124 = vector.broadcast %123 : vector<5x1xf32> to vector<5x5xf32>
    %125 = arith.subf %119, %124 : vector<5x5xf32>
    %126 = math.exp %125 : vector<5x5xf32>
    %cst_142 = arith.constant dense<0.000000e+00> : vector<5xf32>
    %127 = vector.multi_reduction <add>, %126, %cst_142 [1] : vector<5x5xf32> to vector<5xf32>
    %128 = vector.shape_cast %127 : vector<5xf32> to vector<5x1xf32>
    %129 = vector.broadcast %128 : vector<5x1xf32> to vector<5x5xf32>
    %130 = arith.divf %126, %129 : vector<5x5xf32>
    %cst_143 = arith.constant dense<0.000000e+00> : vector<5x8xf32>
    %131 = tpu.matmul %130, %115, %cst_143 {dimension_numbers = #tpu.dot_dimension_numbers<[1], [0], [0], [1], [0, 0, 1, 1], [], []>} : vector<5x5xf32>, vector<5x8xf32>, vector<5x8xf32> -> vector<5x8xf32>
    %132 = vector.extract_strided_slice %43 {offsets = [8, 0], sizes = [8, 32], strides = [1, 1]} : vector<32x32xf32> to vector<8x32xf32>
    %cst_144 = arith.constant dense<0.000000e+00> : vector<5x32xf32>
    %133 = tpu.matmul %131, %132, %cst_144 {dimension_numbers = #tpu.dot_dimension_numbers<[1], [0], [0], [1], [0, 0, 1, 1], [], []>} : vector<5x8xf32>, vector<8x32xf32>, vector<5x32xf32> -> vector<5x32xf32>
    %134 = arith.addf %112, %133 : vector<5x32xf32>
    %135 = vector.extract_strided_slice %91 {offsets = [0, 16], sizes = [5, 8], strides = [1, 1]} : vector<5x96xf32> to vector<5x8xf32>
    %136 = vector.extract_strided_slice %91 {offsets = [0, 48], sizes = [5, 8], strides = [1, 1]} : vector<5x96xf32> to vector<5x8xf32>
    %137 = vector.extract_strided_slice %91 {offsets = [0, 80], sizes = [5, 8], strides = [1, 1]} : vector<5x96xf32> to vector<5x8xf32>
    %138 = tpu.transpose %136, [1, 0] : vector<5x8xf32> -> vector<8x5xf32>
    %cst_145 = arith.constant dense<0.000000e+00> : vector<5x5xf32>
    %139 = tpu.matmul %135, %138, %cst_145 {dimension_numbers = #tpu.dot_dimension_numbers<[1], [0], [0], [1], [0, 0, 1, 1], [], []>} : vector<5x8xf32>, vector<8x5xf32>, vector<5x5xf32> -> vector<5x5xf32>
    %cst_146 = arith.constant 0.353553385 : f32
    %140 = vector.broadcast %cst_146 : f32 to vector<5x5xf32>
    %141 = arith.mulf %139, %140 : vector<5x5xf32>
    %cst_147 = arith.constant dense<0xFF800000> : vector<5xf32>
    %142 = vector.multi_reduction <maximumf>, %141, %cst_147 [1] : vector<5x5xf32> to vector<5xf32>
    %cst_148 = arith.constant 0xFF800000 : f32
    %143 = vector.broadcast %cst_148 : f32 to vector<5xf32>
    %144 = arith.maximumf %143, %142 : vector<5xf32>
    %145 = vector.shape_cast %144 : vector<5xf32> to vector<5x1xf32>
    %146 = vector.broadcast %145 : vector<5x1xf32> to vector<5x5xf32>
    %147 = arith.subf %141, %146 : vector<5x5xf32>
    %148 = math.exp %147 : vector<5x5xf32>
    %cst_149 = arith.constant dense<0.000000e+00> : vector<5xf32>
    %149 = vector.multi_reduction <add>, %148, %cst_149 [1] : vector<5x5xf32> to vector<5xf32>
    %150 = vector.shape_cast %149 : vector<5xf32> to vector<5x1xf32>
    %151 = vector.broadcast %150 : vector<5x1xf32> to vector<5x5xf32>
    %152 = arith.divf %148, %151 : vector<5x5xf32>
    %cst_150 = arith.constant dense<0.000000e+00> : vector<5x8xf32>
    %153 = tpu.matmul %152, %137, %cst_150 {dimension_numbers = #tpu.dot_dimension_numbers<[1], [0], [0], [1], [0, 0, 1, 1], [], []>} : vector<5x5xf32>, vector<5x8xf32>, vector<5x8xf32> -> vector<5x8xf32>
    %154 = vector.extract_strided_slice %43 {offsets = [16, 0], sizes = [8, 32], strides = [1, 1]} : vector<32x32xf32> to vector<8x32xf32>
    %cst_151 = arith.constant dense<0.000000e+00> : vector<5x32xf32>
    %155 = tpu.matmul %153, %154, %cst_151 {dimension_numbers = #tpu.dot_dimension_numbers<[1], [0], [0], [1], [0, 0, 1, 1], [], []>} : vector<5x8xf32>, vector<8x32xf32>, vector<5x32xf32> -> vector<5x32xf32>
    %156 = arith.addf %134, %155 : vector<5x32xf32>
    %157 = vector.extract_strided_slice %91 {offsets = [0, 24], sizes = [5, 8], strides = [1, 1]} : vector<5x96xf32> to vector<5x8xf32>
    %158 = vector.extract_strided_slice %91 {offsets = [0, 56], sizes = [5, 8], strides = [1, 1]} : vector<5x96xf32> to vector<5x8xf32>
    %159 = vector.extract_strided_slice %91 {offsets = [0, 88], sizes = [5, 8], strides = [1, 1]} : vector<5x96xf32> to vector<5x8xf32>
    %160 = tpu.transpose %158, [1, 0] : vector<5x8xf32> -> vector<8x5xf32>
    %cst_152 = arith.constant dense<0.000000e+00> : vector<5x5xf32>
    %161 = tpu.matmul %157, %160, %cst_152 {dimension_numbers = #tpu.dot_dimension_numbers<[1], [0], [0], [1], [0, 0, 1, 1], [], []>} : vector<5x8xf32>, vector<8x5xf32>, vector<5x5xf32> -> vector<5x5xf32>
    %cst_153 = arith.constant 0.353553385 : f32
    %162 = vector.broadcast %cst_153 : f32 to vector<5x5xf32>
    %163 = arith.mulf %161, %162 : vector<5x5xf32>
    %cst_154 = arith.constant dense<0xFF800000> : vector<5xf32>
    %164 = vector.multi_reduction <maximumf>, %163, %cst_154 [1] : vector<5x5xf32> to vector<5xf32>
    %cst_155 = arith.constant 0xFF800000 : f32
    %165 = vector.broadcast %cst_155 : f32 to vector<5xf32>
    %166 = arith.maximumf %165, %164 : vector<5xf32>
    %167 = vector.shape_cast %166 : vector<5xf32> to vector<5x1xf32>
    %168 = vector.broadcast %167 : vector<5x1xf32> to vector<5x5xf32>
    %169 = arith.subf %163, %168 : vector<5x5xf32>
    %170 = math.exp %169 : vector<5x5xf32>
    %cst_156 = arith.constant dense<0.000000e+00> : vector<5xf32>
    %171 = vector.multi_reduction <add>, %170, %cst_156 [1] : vector<5x5xf32> to vector<5xf32>
    %172 = vector.shape_cast %171 : vector<5xf32> to vector<5x1xf32>
    %173 = vector.broadcast %172 : vector<5x1xf32> to vector<5x5xf32>
    %174 = arith.divf %170, %173 : vector<5x5xf32>
    %cst_157 = arith.constant dense<0.000000e+00> : vector<5x8xf32>
    %175 = tpu.matmul %174, %159, %cst_157 {dimension_numbers = #tpu.dot_dimension_numbers<[1], [0], [0], [1], [0, 0, 1, 1], [], []>} : vector<5x5xf32>, vector<5x8xf32>, vector<5x8xf32> -> vector<5x8xf32>
    %176 = vector.extract_strided_slice %43 {offsets = [24, 0], sizes = [8, 32], strides = [1, 1]} : vector<32x32xf32> to vector<8x32xf32>
    %cst_158 = arith.constant dense<0.000000e+00> : vector<5x32xf32>
    %177 = tpu.matmul %175, %176, %cst_158 {dimension_numbers = #tpu.dot_dimension_numbers<[1], [0], [0], [1], [0, 0, 1, 1], [], []>} : vector<5x8xf32>, vector<8x32xf32>, vector<5x32xf32> -> vector<5x32xf32>
    %178 = arith.addf %156, %177 : vector<5x32xf32>
    %179 = arith.addf %68, %178 : vector<5x32xf32>
    %180 = vector.broadcast %42 : vector<1x32xf32> to vector<5x32xf32>
    %181 = arith.addf %179, %180 : vector<5x32xf32>
    %cst_159 = arith.constant dense<0.000000e+00> : vector<5xf32>
    %182 = vector.multi_reduction <add>, %181, %cst_159 [1] : vector<5x32xf32> to vector<5xf32>
    %183 = vector.shape_cast %182 : vector<5xf32> to vector<5x1xf32>
    %cst_160 = arith.constant 3.200000e+01 : f32
    %184 = vector.broadcast %cst_160 : f32 to vector<5x1xf32>
    %185 = arith.divf %183, %184 : vector<5x1xf32>
    %186 = vector.broadcast %185 : vector<5x1xf32> to vector<5x32xf32>
    %187 = arith.subf %181, %186 : vector<5x32xf32>
    %188 = arith.mulf %187, %187 : vector<5x32xf32>
    %cst_161 = arith.constant dense<0.000000e+00> : vector<5xf32>
    %189 = vector.multi_reduction <add>, %188, %cst_161 [1] : vector<5x32xf32> to vector<5xf32>
    %190 = vector.shape_cast %189 : vector<5xf32> to vector<5x1xf32>
    %cst_162 = arith.constant 3.200000e+01 : f32
    %191 = vector.broadcast %cst_162 : f32 to vector<5x1xf32>
    %192 = arith.divf %190, %191 : vector<5x1xf32>
    %cst_163 = arith.constant 9.99999974E-6 : f32
    %193 = vector.broadcast %cst_163 : f32 to vector<5x1xf32>
    %194 = arith.addf %192, %193 : vector<5x1xf32>
    %195 = math.rsqrt %194 : vector<5x1xf32>
    %196 = vector.broadcast %195 : vector<5x1xf32> to vector<5x32xf32>
    %197 = arith.mulf %187, %196 : vector<5x32xf32>
    %198 = vector.broadcast %41 : vector<1x32xf32> to vector<5x32xf32>
    %199 = arith.mulf %197, %198 : vector<5x32xf32>
    %200 = vector.broadcast %40 : vector<1x32xf32> to vector<5x32xf32>
    %201 = arith.addf %199, %200 : vector<5x32xf32>
    %cst_164 = arith.constant dense<0.000000e+00> : vector<5x128xf32>
    %202 = tpu.matmul %201, %35, %cst_164 {dimension_numbers = #tpu.dot_dimension_numbers<[1], [0], [0], [1], [0, 0, 1, 1], [], []>} : vector<5x32xf32>, vector<32x128xf32>, vector<5x128xf32> -> vector<5x128xf32>
    %203 = vector.broadcast %34 : vector<1x128xf32> to vector<5x128xf32>
    %204 = arith.addf %202, %203 : vector<5x128xf32>
    %205 = arith.mulf %204, %204 : vector<5x128xf32>
    %206 = arith.mulf %204, %205 : vector<5x128xf32>
    %cst_165 = arith.constant 4.471500e-02 : f32
    %207 = vector.broadcast %cst_165 : f32 to vector<5x128xf32>
    %208 = arith.mulf %207, %206 : vector<5x128xf32>
    %209 = arith.addf %204, %208 : vector<5x128xf32>
    %cst_166 = arith.constant 0.797884583 : f32
    %210 = vector.broadcast %cst_166 : f32 to vector<5x128xf32>
    %211 = arith.mulf %210, %209 : vector<5x128xf32>
    %212 = math.tanh %211 : vector<5x128xf32>
    %cst_167 = arith.constant 1.000000e+00 : f32
    %213 = vector.broadcast %cst_167 : f32 to vector<5x128xf32>
    %214 = arith.addf %213, %212 : vector<5x128xf32>
    %cst_168 = arith.constant 5.000000e-01 : f32
    %215 = vector.broadcast %cst_168 : f32 to vector<5x128xf32>
    %216 = arith.mulf %215, %214 : vector<5x128xf32>
    %217 = arith.mulf %204, %216 : vector<5x128xf32>
    %cst_169 = arith.constant dense<0.000000e+00> : vector<5x32xf32>
    %218 = tpu.matmul %217, %37, %cst_169 {dimension_numbers = #tpu.dot_dimension_numbers<[1], [0], [0], [1], [0, 0, 1, 1], [], []>} : vector<5x128xf32>, vector<128x32xf32>, vector<5x32xf32> -> vector<5x32xf32>
    %219 = vector.broadcast %36 : vector<1x32xf32> to vector<5x32xf32>
    %220 = arith.addf %218, %219 : vector<5x32xf32>
    %221 = arith.addf %181, %220 : vector<5x32xf32>
    %cst_170 = arith.constant dense<0.000000e+00> : vector<5xf32>
    %222 = vector.multi_reduction <add>, %221, %cst_170 [1] : vector<5x32xf32> to vector<5xf32>
    %223 = vector.shape_cast %222 : vector<5xf32> to vector<5x1xf32>
    %cst_171 = arith.constant 3.200000e+01 : f32
    %224 = vector.broadcast %cst_171 : f32 to vector<5x1xf32>
    %225 = arith.divf %223, %224 : vector<5x1xf32>
    %226 = vector.broadcast %225 : vector<5x1xf32> to vector<5x32xf32>
    %227 = arith.subf %221, %226 : vector<5x32xf32>
    %228 = arith.mulf %227, %227 : vector<5x32xf32>
    %cst_172 = arith.constant dense<0.000000e+00> : vector<5xf32>
    %229 = vector.multi_reduction <add>, %228, %cst_172 [1] : vector<5x32xf32> to vector<5xf32>
    %230 = vector.shape_cast %229 : vector<5xf32> to vector<5x1xf32>
    %cst_173 = arith.constant 3.200000e+01 : f32
    %231 = vector.broadcast %cst_173 : f32 to vector<5x1xf32>
    %232 = arith.divf %230, %231 : vector<5x1xf32>
    %cst_174 = arith.constant 9.99999974E-6 : f32
    %233 = vector.broadcast %cst_174 : f32 to vector<5x1xf32>
    %234 = arith.addf %232, %233 : vector<5x1xf32>
    %235 = math.rsqrt %234 : vector<5x1xf32>
    %236 = vector.broadcast %235 : vector<5x1xf32> to vector<5x32xf32>
    %237 = arith.mulf %227, %236 : vector<5x32xf32>
    %238 = vector.broadcast %51 : vector<1x32xf32> to vector<5x32xf32>
    %239 = arith.mulf %237, %238 : vector<5x32xf32>
    %240 = vector.broadcast %50 : vector<1x32xf32> to vector<5x32xf32>
    %241 = arith.addf %239, %240 : vector<5x32xf32>
    %cst_175 = arith.constant dense<0.000000e+00> : vector<5x96xf32>
    %242 = tpu.matmul %241, %57, %cst_175 {dimension_numbers = #tpu.dot_dimension_numbers<[1], [0], [0], [1], [0, 0, 1, 1], [], []>} : vector<5x32xf32>, vector<32x96xf32>, vector<5x96xf32> -> vector<5x96xf32>
    %243 = vector.broadcast %56 : vector<1x96xf32> to vector<5x96xf32>
    %244 = arith.addf %242, %243 : vector<5x96xf32>
    %245 = vector.extract_strided_slice %244 {offsets = [0, 0], sizes = [5, 8], strides = [1, 1]} : vector<5x96xf32> to vector<5x8xf32>
    %246 = vector.extract_strided_slice %244 {offsets = [0, 32], sizes = [5, 8], strides = [1, 1]} : vector<5x96xf32> to vector<5x8xf32>
    %247 = vector.extract_strided_slice %244 {offsets = [0, 64], sizes = [5, 8], strides = [1, 1]} : vector<5x96xf32> to vector<5x8xf32>
    %248 = tpu.transpose %246, [1, 0] : vector<5x8xf32> -> vector<8x5xf32>
    %cst_176 = arith.constant dense<0.000000e+00> : vector<5x5xf32>
    %249 = tpu.matmul %245, %248, %cst_176 {dimension_numbers = #tpu.dot_dimension_numbers<[1], [0], [0], [1], [0, 0, 1, 1], [], []>} : vector<5x8xf32>, vector<8x5xf32>, vector<5x5xf32> -> vector<5x5xf32>
    %cst_177 = arith.constant 0.353553385 : f32
    %250 = vector.broadcast %cst_177 : f32 to vector<5x5xf32>
    %251 = arith.mulf %249, %250 : vector<5x5xf32>
    %cst_178 = arith.constant dense<0xFF800000> : vector<5xf32>
    %252 = vector.multi_reduction <maximumf>, %251, %cst_178 [1] : vector<5x5xf32> to vector<5xf32>
    %cst_179 = arith.constant 0xFF800000 : f32
    %253 = vector.broadcast %cst_179 : f32 to vector<5xf32>
    %254 = arith.maximumf %253, %252 : vector<5xf32>
    %255 = vector.shape_cast %254 : vector<5xf32> to vector<5x1xf32>
    %256 = vector.broadcast %255 : vector<5x1xf32> to vector<5x5xf32>
    %257 = arith.subf %251, %256 : vector<5x5xf32>
    %258 = math.exp %257 : vector<5x5xf32>
    %cst_180 = arith.constant dense<0.000000e+00> : vector<5xf32>
    %259 = vector.multi_reduction <add>, %258, %cst_180 [1] : vector<5x5xf32> to vector<5xf32>
    %260 = vector.shape_cast %259 : vector<5xf32> to vector<5x1xf32>
    %261 = vector.broadcast %260 : vector<5x1xf32> to vector<5x5xf32>
    %262 = arith.divf %258, %261 : vector<5x5xf32>
    %cst_181 = arith.constant dense<0.000000e+00> : vector<5x8xf32>
    %263 = tpu.matmul %262, %247, %cst_181 {dimension_numbers = #tpu.dot_dimension_numbers<[1], [0], [0], [1], [0, 0, 1, 1], [], []>} : vector<5x5xf32>, vector<5x8xf32>, vector<5x8xf32> -> vector<5x8xf32>
    %264 = vector.extract_strided_slice %55 {offsets = [0, 0], sizes = [8, 32], strides = [1, 1]} : vector<32x32xf32> to vector<8x32xf32>
    %cst_182 = arith.constant dense<0.000000e+00> : vector<5x32xf32>
    %265 = tpu.matmul %263, %264, %cst_182 {dimension_numbers = #tpu.dot_dimension_numbers<[1], [0], [0], [1], [0, 0, 1, 1], [], []>} : vector<5x8xf32>, vector<8x32xf32>, vector<5x32xf32> -> vector<5x32xf32>
    %266 = vector.extract_strided_slice %244 {offsets = [0, 8], sizes = [5, 8], strides = [1, 1]} : vector<5x96xf32> to vector<5x8xf32>
    %267 = vector.extract_strided_slice %244 {offsets = [0, 40], sizes = [5, 8], strides = [1, 1]} : vector<5x96xf32> to vector<5x8xf32>
    %268 = vector.extract_strided_slice %244 {offsets = [0, 72], sizes = [5, 8], strides = [1, 1]} : vector<5x96xf32> to vector<5x8xf32>
    %269 = tpu.transpose %267, [1, 0] : vector<5x8xf32> -> vector<8x5xf32>
    %cst_183 = arith.constant dense<0.000000e+00> : vector<5x5xf32>
    %270 = tpu.matmul %266, %269, %cst_183 {dimension_numbers = #tpu.dot_dimension_numbers<[1], [0], [0], [1], [0, 0, 1, 1], [], []>} : vector<5x8xf32>, vector<8x5xf32>, vector<5x5xf32> -> vector<5x5xf32>
    %cst_184 = arith.constant 0.353553385 : f32
    %271 = vector.broadcast %cst_184 : f32 to vector<5x5xf32>
    %272 = arith.mulf %270, %271 : vector<5x5xf32>
    %cst_185 = arith.constant dense<0xFF800000> : vector<5xf32>
    %273 = vector.multi_reduction <maximumf>, %272, %cst_185 [1] : vector<5x5xf32> to vector<5xf32>
    %cst_186 = arith.constant 0xFF800000 : f32
    %274 = vector.broadcast %cst_186 : f32 to vector<5xf32>
    %275 = arith.maximumf %274, %273 : vector<5xf32>
    %276 = vector.shape_cast %275 : vector<5xf32> to vector<5x1xf32>
    %277 = vector.broadcast %276 : vector<5x1xf32> to vector<5x5xf32>
    %278 = arith.subf %272, %277 : vector<5x5xf32>
    %279 = math.exp %278 : vector<5x5xf32>
    %cst_187 = arith.constant dense<0.000000e+00> : vector<5xf32>
    %280 = vector.multi_reduction <add>, %279, %cst_187 [1] : vector<5x5xf32> to vector<5xf32>
    %281 = vector.shape_cast %280 : vector<5xf32> to vector<5x1xf32>
    %282 = vector.broadcast %281 : vector<5x1xf32> to vector<5x5xf32>
    %283 = arith.divf %279, %282 : vector<5x5xf32>
    %cst_188 = arith.constant dense<0.000000e+00> : vector<5x8xf32>
    %284 = tpu.matmul %283, %268, %cst_188 {dimension_numbers = #tpu.dot_dimension_numbers<[1], [0], [0], [1], [0, 0, 1, 1], [], []>} : vector<5x5xf32>, vector<5x8xf32>, vector<5x8xf32> -> vector<5x8xf32>
    %285 = vector.extract_strided_slice %55 {offsets = [8, 0], sizes = [8, 32], strides = [1, 1]} : vector<32x32xf32> to vector<8x32xf32>
    %cst_189 = arith.constant dense<0.000000e+00> : vector<5x32xf32>
    %286 = tpu.matmul %284, %285, %cst_189 {dimension_numbers = #tpu.dot_dimension_numbers<[1], [0], [0], [1], [0, 0, 1, 1], [], []>} : vector<5x8xf32>, vector<8x32xf32>, vector<5x32xf32> -> vector<5x32xf32>
    %287 = arith.addf %265, %286 : vector<5x32xf32>
    %288 = vector.extract_strided_slice %244 {offsets = [0, 16], sizes = [5, 8], strides = [1, 1]} : vector<5x96xf32> to vector<5x8xf32>
    %289 = vector.extract_strided_slice %244 {offsets = [0, 48], sizes = [5, 8], strides = [1, 1]} : vector<5x96xf32> to vector<5x8xf32>
    %290 = vector.extract_strided_slice %244 {offsets = [0, 80], sizes = [5, 8], strides = [1, 1]} : vector<5x96xf32> to vector<5x8xf32>
    %291 = tpu.transpose %289, [1, 0] : vector<5x8xf32> -> vector<8x5xf32>
    %cst_190 = arith.constant dense<0.000000e+00> : vector<5x5xf32>
    %292 = tpu.matmul %288, %291, %cst_190 {dimension_numbers = #tpu.dot_dimension_numbers<[1], [0], [0], [1], [0, 0, 1, 1], [], []>} : vector<5x8xf32>, vector<8x5xf32>, vector<5x5xf32> -> vector<5x5xf32>
    %cst_191 = arith.constant 0.353553385 : f32
    %293 = vector.broadcast %cst_191 : f32 to vector<5x5xf32>
    %294 = arith.mulf %292, %293 : vector<5x5xf32>
    %cst_192 = arith.constant dense<0xFF800000> : vector<5xf32>
    %295 = vector.multi_reduction <maximumf>, %294, %cst_192 [1] : vector<5x5xf32> to vector<5xf32>
    %cst_193 = arith.constant 0xFF800000 : f32
    %296 = vector.broadcast %cst_193 : f32 to vector<5xf32>
    %297 = arith.maximumf %296, %295 : vector<5xf32>
    %298 = vector.shape_cast %297 : vector<5xf32> to vector<5x1xf32>
    %299 = vector.broadcast %298 : vector<5x1xf32> to vector<5x5xf32>
    %300 = arith.subf %294, %299 : vector<5x5xf32>
    %301 = math.exp %300 : vector<5x5xf32>
    %cst_194 = arith.constant dense<0.000000e+00> : vector<5xf32>
    %302 = vector.multi_reduction <add>, %301, %cst_194 [1] : vector<5x5xf32> to vector<5xf32>
    %303 = vector.shape_cast %302 : vector<5xf32> to vector<5x1xf32>
    %304 = vector.broadcast %303 : vector<5x1xf32> to vector<5x5xf32>
    %305 = arith.divf %301, %304 : vector<5x5xf32>
    %cst_195 = arith.constant dense<0.000000e+00> : vector<5x8xf32>
    %306 = tpu.matmul %305, %290, %cst_195 {dimension_numbers = #tpu.dot_dimension_numbers<[1], [0], [0], [1], [0, 0, 1, 1], [], []>} : vector<5x5xf32>, vector<5x8xf32>, vector<5x8xf32> -> vector<5x8xf32>
    %307 = vector.extract_strided_slice %55 {offsets = [16, 0], sizes = [8, 32], strides = [1, 1]} : vector<32x32xf32> to vector<8x32xf32>
    %cst_196 = arith.constant dense<0.000000e+00> : vector<5x32xf32>
    %308 = tpu.matmul %306, %307, %cst_196 {dimension_numbers = #tpu.dot_dimension_numbers<[1], [0], [0], [1], [0, 0, 1, 1], [], []>} : vector<5x8xf32>, vector<8x32xf32>, vector<5x32xf32> -> vector<5x32xf32>
    %309 = arith.addf %287, %308 : vector<5x32xf32>
    %310 = vector.extract_strided_slice %244 {offsets = [0, 24], sizes = [5, 8], strides = [1, 1]} : vector<5x96xf32> to vector<5x8xf32>
    %311 = vector.extract_strided_slice %244 {offsets = [0, 56], sizes = [5, 8], strides = [1, 1]} : vector<5x96xf32> to vector<5x8xf32>
    %312 = vector.extract_strided_slice %244 {offsets = [0, 88], sizes = [5, 8], strides = [1, 1]} : vector<5x96xf32> to vector<5x8xf32>
    %313 = tpu.transpose %311, [1, 0] : vector<5x8xf32> -> vector<8x5xf32>
    %cst_197 = arith.constant dense<0.000000e+00> : vector<5x5xf32>
    %314 = tpu.matmul %310, %313, %cst_197 {dimension_numbers = #tpu.dot_dimension_numbers<[1], [0], [0], [1], [0, 0, 1, 1], [], []>} : vector<5x8xf32>, vector<8x5xf32>, vector<5x5xf32> -> vector<5x5xf32>
    %cst_198 = arith.constant 0.353553385 : f32
    %315 = vector.broadcast %cst_198 : f32 to vector<5x5xf32>
    %316 = arith.mulf %314, %315 : vector<5x5xf32>
    %cst_199 = arith.constant dense<0xFF800000> : vector<5xf32>
    %317 = vector.multi_reduction <maximumf>, %316, %cst_199 [1] : vector<5x5xf32> to vector<5xf32>
    %cst_200 = arith.constant 0xFF800000 : f32
    %318 = vector.broadcast %cst_200 : f32 to vector<5xf32>
    %319 = arith.maximumf %318, %317 : vector<5xf32>
    %320 = vector.shape_cast %319 : vector<5xf32> to vector<5x1xf32>
    %321 = vector.broadcast %320 : vector<5x1xf32> to vector<5x5xf32>
    %322 = arith.subf %316, %321 : vector<5x5xf32>
    %323 = math.exp %322 : vector<5x5xf32>
    %cst_201 = arith.constant dense<0.000000e+00> : vector<5xf32>
    %324 = vector.multi_reduction <add>, %323, %cst_201 [1] : vector<5x5xf32> to vector<5xf32>
    %325 = vector.shape_cast %324 : vector<5xf32> to vector<5x1xf32>
    %326 = vector.broadcast %325 : vector<5x1xf32> to vector<5x5xf32>
    %327 = arith.divf %323, %326 : vector<5x5xf32>
    %cst_202 = arith.constant dense<0.000000e+00> : vector<5x8xf32>
    %328 = tpu.matmul %327, %312, %cst_202 {dimension_numbers = #tpu.dot_dimension_numbers<[1], [0], [0], [1], [0, 0, 1, 1], [], []>} : vector<5x5xf32>, vector<5x8xf32>, vector<5x8xf32> -> vector<5x8xf32>
    %329 = vector.extract_strided_slice %55 {offsets = [24, 0], sizes = [8, 32], strides = [1, 1]} : vector<32x32xf32> to vector<8x32xf32>
    %cst_203 = arith.constant dense<0.000000e+00> : vector<5x32xf32>
    %330 = tpu.matmul %328, %329, %cst_203 {dimension_numbers = #tpu.dot_dimension_numbers<[1], [0], [0], [1], [0, 0, 1, 1], [], []>} : vector<5x8xf32>, vector<8x32xf32>, vector<5x32xf32> -> vector<5x32xf32>
    %331 = arith.addf %309, %330 : vector<5x32xf32>
    %332 = arith.addf %221, %331 : vector<5x32xf32>
    %333 = vector.broadcast %54 : vector<1x32xf32> to vector<5x32xf32>
    %334 = arith.addf %332, %333 : vector<5x32xf32>
    %cst_204 = arith.constant dense<0.000000e+00> : vector<5xf32>
    %335 = vector.multi_reduction <add>, %334, %cst_204 [1] : vector<5x32xf32> to vector<5xf32>
    %336 = vector.shape_cast %335 : vector<5xf32> to vector<5x1xf32>
    %cst_205 = arith.constant 3.200000e+01 : f32
    %337 = vector.broadcast %cst_205 : f32 to vector<5x1xf32>
    %338 = arith.divf %336, %337 : vector<5x1xf32>
    %339 = vector.broadcast %338 : vector<5x1xf32> to vector<5x32xf32>
    %340 = arith.subf %334, %339 : vector<5x32xf32>
    %341 = arith.mulf %340, %340 : vector<5x32xf32>
    %cst_206 = arith.constant dense<0.000000e+00> : vector<5xf32>
    %342 = vector.multi_reduction <add>, %341, %cst_206 [1] : vector<5x32xf32> to vector<5xf32>
    %343 = vector.shape_cast %342 : vector<5xf32> to vector<5x1xf32>
    %cst_207 = arith.constant 3.200000e+01 : f32
    %344 = vector.broadcast %cst_207 : f32 to vector<5x1xf32>
    %345 = arith.divf %343, %344 : vector<5x1xf32>
    %cst_208 = arith.constant 9.99999974E-6 : f32
    %346 = vector.broadcast %cst_208 : f32 to vector<5x1xf32>
    %347 = arith.addf %345, %346 : vector<5x1xf32>
    %348 = math.rsqrt %347 : vector<5x1xf32>
    %349 = vector.broadcast %348 : vector<5x1xf32> to vector<5x32xf32>
    %350 = arith.mulf %340, %349 : vector<5x32xf32>
    %351 = vector.broadcast %53 : vector<1x32xf32> to vector<5x32xf32>
    %352 = arith.mulf %350, %351 : vector<5x32xf32>
    %353 = vector.broadcast %52 : vector<1x32xf32> to vector<5x32xf32>
    %354 = arith.addf %352, %353 : vector<5x32xf32>
    %cst_209 = arith.constant dense<0.000000e+00> : vector<5x128xf32>
    %355 = tpu.matmul %354, %47, %cst_209 {dimension_numbers = #tpu.dot_dimension_numbers<[1], [0], [0], [1], [0, 0, 1, 1], [], []>} : vector<5x32xf32>, vector<32x128xf32>, vector<5x128xf32> -> vector<5x128xf32>
    %356 = vector.broadcast %46 : vector<1x128xf32> to vector<5x128xf32>
    %357 = arith.addf %355, %356 : vector<5x128xf32>
    %358 = arith.mulf %357, %357 : vector<5x128xf32>
    %359 = arith.mulf %357, %358 : vector<5x128xf32>
    %cst_210 = arith.constant 4.471500e-02 : f32
    %360 = vector.broadcast %cst_210 : f32 to vector<5x128xf32>
    %361 = arith.mulf %360, %359 : vector<5x128xf32>
    %362 = arith.addf %357, %361 : vector<5x128xf32>
    %cst_211 = arith.constant 0.797884583 : f32
    %363 = vector.broadcast %cst_211 : f32 to vector<5x128xf32>
    %364 = arith.mulf %363, %362 : vector<5x128xf32>
    %365 = math.tanh %364 : vector<5x128xf32>
    %cst_212 = arith.constant 1.000000e+00 : f32
    %366 = vector.broadcast %cst_212 : f32 to vector<5x128xf32>
    %367 = arith.addf %366, %365 : vector<5x128xf32>
    %cst_213 = arith.constant 5.000000e-01 : f32
    %368 = vector.broadcast %cst_213 : f32 to vector<5x128xf32>
    %369 = arith.mulf %368, %367 : vector<5x128xf32>
    %370 = arith.mulf %357, %369 : vector<5x128xf32>
    %cst_214 = arith.constant dense<0.000000e+00> : vector<5x32xf32>
    %371 = tpu.matmul %370, %49, %cst_214 {dimension_numbers = #tpu.dot_dimension_numbers<[1], [0], [0], [1], [0, 0, 1, 1], [], []>} : vector<5x128xf32>, vector<128x32xf32>, vector<5x32xf32> -> vector<5x32xf32>
    %372 = vector.broadcast %48 : vector<1x32xf32> to vector<5x32xf32>
    %373 = arith.addf %371, %372 : vector<5x32xf32>
    %374 = arith.addf %334, %373 : vector<5x32xf32>
    %cst_215 = arith.constant dense<0.000000e+00> : vector<5xf32>
    %375 = vector.multi_reduction <add>, %374, %cst_215 [1] : vector<5x32xf32> to vector<5xf32>
    %376 = vector.shape_cast %375 : vector<5xf32> to vector<5x1xf32>
    %cst_216 = arith.constant 3.200000e+01 : f32
    %377 = vector.broadcast %cst_216 : f32 to vector<5x1xf32>
    %378 = arith.divf %376, %377 : vector<5x1xf32>
    %379 = vector.broadcast %378 : vector<5x1xf32> to vector<5x32xf32>
    %380 = arith.subf %374, %379 : vector<5x32xf32>
    %381 = arith.mulf %380, %380 : vector<5x32xf32>
    %cst_217 = arith.constant dense<0.000000e+00> : vector<5xf32>
    %382 = vector.multi_reduction <add>, %381, %cst_217 [1] : vector<5x32xf32> to vector<5xf32>
    %383 = vector.shape_cast %382 : vector<5xf32> to vector<5x1xf32>
    %cst_218 = arith.constant 3.200000e+01 : f32
    %384 = vector.broadcast %cst_218 : f32 to vector<5x1xf32>
    %385 = arith.divf %383, %384 : vector<5x1xf32>
    %cst_219 = arith.constant 9.99999974E-6 : f32
    %386 = vector.broadcast %cst_219 : f32 to vector<5x1xf32>
    %387 = arith.addf %385, %386 : vector<5x1xf32>
    %388 = math.rsqrt %387 : vector<5x1xf32>
    %389 = vector.broadcast %388 : vector<5x1xf32> to vector<5x32xf32>
    %390 = arith.mulf %380, %389 : vector<5x32xf32>
    %391 = vector.broadcast %59 : vector<1x32xf32> to vector<5x32xf32>
    %392 = arith.mulf %390, %391 : vector<5x32xf32>
    %393 = vector.broadcast %58 : vector<1x32xf32> to vector<5x32xf32>
    %394 = arith.addf %392, %393 : vector<5x32xf32>
    %395 = vector.extract_strided_slice %394 {offsets = [0, 0], sizes = [1, 32], strides = [1, 1]} : vector<5x32xf32> to vector<1x32xf32>
    %cst_220 = arith.constant dense<0.000000e+00> : vector<1x32xf32>
    %396 = tpu.matmul %395, %61, %cst_220 {dimension_numbers = #tpu.dot_dimension_numbers<[1], [0], [0], [1], [0, 0, 1, 1], [], []>} : vector<1x32xf32>, vector<32x32xf32>, vector<1x32xf32> -> vector<1x32xf32>
    %397 = arith.addf %396, %60 : vector<1x32xf32>
    %398 = arith.mulf %397, %397 : vector<1x32xf32>
    %cst_221 = arith.constant dense<0.000000e+00> : vector<1xf32>
    %399 = vector.multi_reduction <add>, %398, %cst_221 [1] : vector<1x32xf32> to vector<1xf32>
    %400 = vector.shape_cast %399 : vector<1xf32> to vector<1x1xf32>
    %cst_222 = arith.constant 1.000000e-24 : f32
    %401 = vector.broadcast %cst_222 : f32 to vector<1x1xf32>
    %402 = arith.maximumf %400, %401 : vector<1x1xf32>
    %403 = math.rsqrt %402 : vector<1x1xf32>
    %404 = vector.broadcast %403 : vector<1x1xf32> to vector<1x32xf32>
    %405 = arith.mulf %397, %404 : vector<1x32xf32>
    %406 = vector.extract_strided_slice %65 {offsets = [4, 0], sizes = [4, 32], strides = [1, 1]} : vector<8x32xf32> to vector<4x32xf32>
    %407 = tpu.concatenate %0, %406 in 0 : vector<1x32xf32>, vector<4x32xf32> -> vector<5x32xf32>
    %408 = arith.addf %407, %33 : vector<5x32xf32>
    %cst_223 = arith.constant dense<0.000000e+00> : vector<5xf32>
    %409 = vector.multi_reduction <add>, %408, %cst_223 [1] : vector<5x32xf32> to vector<5xf32>
    %410 = vector.shape_cast %409 : vector<5xf32> to vector<5x1xf32>
    %cst_224 = arith.constant 3.200000e+01 : f32
    %411 = vector.broadcast %cst_224 : f32 to vector<5x1xf32>
    %412 = arith.divf %410, %411 : vector<5x1xf32>
    %413 = vector.broadcast %412 : vector<5x1xf32> to vector<5x32xf32>
    %414 = arith.subf %408, %413 : vector<5x32xf32>
    %415 = arith.mulf %414, %414 : vector<5x32xf32>
    %cst_225 = arith.constant dense<0.000000e+00> : vector<5xf32>
    %416 = vector.multi_reduction <add>, %415, %cst_225 [1] : vector<5x32xf32> to vector<5xf32>
    %417 = vector.shape_cast %416 : vector<5xf32> to vector<5x1xf32>
    %cst_226 = arith.constant 3.200000e+01 : f32
    %418 = vector.broadcast %cst_226 : f32 to vector<5x1xf32>
    %419 = arith.divf %417, %418 : vector<5x1xf32>
    %cst_227 = arith.constant 9.99999974E-6 : f32
    %420 = vector.broadcast %cst_227 : f32 to vector<5x1xf32>
    %421 = arith.addf %419, %420 : vector<5x1xf32>
    %422 = math.rsqrt %421 : vector<5x1xf32>
    %423 = vector.broadcast %422 : vector<5x1xf32> to vector<5x32xf32>
    %424 = arith.mulf %414, %423 : vector<5x32xf32>
    %425 = vector.broadcast %39 : vector<1x32xf32> to vector<5x32xf32>
    %426 = arith.mulf %424, %425 : vector<5x32xf32>
    %427 = vector.broadcast %38 : vector<1x32xf32> to vector<5x32xf32>
    %428 = arith.addf %426, %427 : vector<5x32xf32>
    %cst_228 = arith.constant dense<0.000000e+00> : vector<5x96xf32>
    %429 = tpu.matmul %428, %45, %cst_228 {dimension_numbers = #tpu.dot_dimension_numbers<[1], [0], [0], [1], [0, 0, 1, 1], [], []>} : vector<5x32xf32>, vector<32x96xf32>, vector<5x96xf32> -> vector<5x96xf32>
    %430 = vector.broadcast %44 : vector<1x96xf32> to vector<5x96xf32>
    %431 = arith.addf %429, %430 : vector<5x96xf32>
    %432 = vector.extract_strided_slice %431 {offsets = [0, 0], sizes = [5, 8], strides = [1, 1]} : vector<5x96xf32> to vector<5x8xf32>
    %433 = vector.extract_strided_slice %431 {offsets = [0, 32], sizes = [5, 8], strides = [1, 1]} : vector<5x96xf32> to vector<5x8xf32>
    %434 = vector.extract_strided_slice %431 {offsets = [0, 64], sizes = [5, 8], strides = [1, 1]} : vector<5x96xf32> to vector<5x8xf32>
    %435 = tpu.transpose %433, [1, 0] : vector<5x8xf32> -> vector<8x5xf32>
    %cst_229 = arith.constant dense<0.000000e+00> : vector<5x5xf32>
    %436 = tpu.matmul %432, %435, %cst_229 {dimension_numbers = #tpu.dot_dimension_numbers<[1], [0], [0], [1], [0, 0, 1, 1], [], []>} : vector<5x8xf32>, vector<8x5xf32>, vector<5x5xf32> -> vector<5x5xf32>
    %cst_230 = arith.constant 0.353553385 : f32
    %437 = vector.broadcast %cst_230 : f32 to vector<5x5xf32>
    %438 = arith.mulf %436, %437 : vector<5x5xf32>
    %cst_231 = arith.constant dense<0xFF800000> : vector<5xf32>
    %439 = vector.multi_reduction <maximumf>, %438, %cst_231 [1] : vector<5x5xf32> to vector<5xf32>
    %cst_232 = arith.constant 0xFF800000 : f32
    %440 = vector.broadcast %cst_232 : f32 to vector<5xf32>
    %441 = arith.maximumf %440, %439 : vector<5xf32>
    %442 = vector.shape_cast %441 : vector<5xf32> to vector<5x1xf32>
    %443 = vector.broadcast %442 : vector<5x1xf32> to vector<5x5xf32>
    %444 = arith.subf %438, %443 : vector<5x5xf32>
    %445 = math.exp %444 : vector<5x5xf32>
    %cst_233 = arith.constant dense<0.000000e+00> : vector<5xf32>
    %446 = vector.multi_reduction <add>, %445, %cst_233 [1] : vector<5x5xf32> to vector<5xf32>
    %447 = vector.shape_cast %446 : vector<5xf32> to vector<5x1xf32>
    %448 = vector.broadcast %447 : vector<5x1xf32> to vector<5x5xf32>
    %449 = arith.divf %445, %448 : vector<5x5xf32>
    %cst_234 = arith.constant dense<0.000000e+00> : vector<5x8xf32>
    %450 = tpu.matmul %449, %434, %cst_234 {dimension_numbers = #tpu.dot_dimension_numbers<[1], [0], [0], [1], [0, 0, 1, 1], [], []>} : vector<5x5xf32>, vector<5x8xf32>, vector<5x8xf32> -> vector<5x8xf32>
    %451 = vector.extract_strided_slice %43 {offsets = [0, 0], sizes = [8, 32], strides = [1, 1]} : vector<32x32xf32> to vector<8x32xf32>
    %cst_235 = arith.constant dense<0.000000e+00> : vector<5x32xf32>
    %452 = tpu.matmul %450, %451, %cst_235 {dimension_numbers = #tpu.dot_dimension_numbers<[1], [0], [0], [1], [0, 0, 1, 1], [], []>} : vector<5x8xf32>, vector<8x32xf32>, vector<5x32xf32> -> vector<5x32xf32>
    %453 = vector.extract_strided_slice %431 {offsets = [0, 8], sizes = [5, 8], strides = [1, 1]} : vector<5x96xf32> to vector<5x8xf32>
    %454 = vector.extract_strided_slice %431 {offsets = [0, 40], sizes = [5, 8], strides = [1, 1]} : vector<5x96xf32> to vector<5x8xf32>
    %455 = vector.extract_strided_slice %431 {offsets = [0, 72], sizes = [5, 8], strides = [1, 1]} : vector<5x96xf32> to vector<5x8xf32>
    %456 = tpu.transpose %454, [1, 0] : vector<5x8xf32> -> vector<8x5xf32>
    %cst_236 = arith.constant dense<0.000000e+00> : vector<5x5xf32>
    %457 = tpu.matmul %453, %456, %cst_236 {dimension_numbers = #tpu.dot_dimension_numbers<[1], [0], [0], [1], [0, 0, 1, 1], [], []>} : vector<5x8xf32>, vector<8x5xf32>, vector<5x5xf32> -> vector<5x5xf32>
    %cst_237 = arith.constant 0.353553385 : f32
    %458 = vector.broadcast %cst_237 : f32 to vector<5x5xf32>
    %459 = arith.mulf %457, %458 : vector<5x5xf32>
    %cst_238 = arith.constant dense<0xFF800000> : vector<5xf32>
    %460 = vector.multi_reduction <maximumf>, %459, %cst_238 [1] : vector<5x5xf32> to vector<5xf32>
    %cst_239 = arith.constant 0xFF800000 : f32
    %461 = vector.broadcast %cst_239 : f32 to vector<5xf32>
    %462 = arith.maximumf %461, %460 : vector<5xf32>
    %463 = vector.shape_cast %462 : vector<5xf32> to vector<5x1xf32>
    %464 = vector.broadcast %463 : vector<5x1xf32> to vector<5x5xf32>
    %465 = arith.subf %459, %464 : vector<5x5xf32>
    %466 = math.exp %465 : vector<5x5xf32>
    %cst_240 = arith.constant dense<0.000000e+00> : vector<5xf32>
    %467 = vector.multi_reduction <add>, %466, %cst_240 [1] : vector<5x5xf32> to vector<5xf32>
    %468 = vector.shape_cast %467 : vector<5xf32> to vector<5x1xf32>
    %469 = vector.broadcast %468 : vector<5x1xf32> to vector<5x5xf32>
    %470 = arith.divf %466, %469 : vector<5x5xf32>
    %cst_241 = arith.constant dense<0.000000e+00> : vector<5x8xf32>
    %471 = tpu.matmul %470, %455, %cst_241 {dimension_numbers = #tpu.dot_dimension_numbers<[1], [0], [0], [1], [0, 0, 1, 1], [], []>} : vector<5x5xf32>, vector<5x8xf32>, vector<5x8xf32> -> vector<5x8xf32>
    %472 = vector.extract_strided_slice %43 {offsets = [8, 0], sizes = [8, 32], strides = [1, 1]} : vector<32x32xf32> to vector<8x32xf32>
    %cst_242 = arith.constant dense<0.000000e+00> : vector<5x32xf32>
    %473 = tpu.matmul %471, %472, %cst_242 {dimension_numbers = #tpu.dot_dimension_numbers<[1], [0], [0], [1], [0, 0, 1, 1], [], []>} : vector<5x8xf32>, vector<8x32xf32>, vector<5x32xf32> -> vector<5x32xf32>
    %474 = arith.addf %452, %473 : vector<5x32xf32>
    %475 = vector.extract_strided_slice %431 {offsets = [0, 16], sizes = [5, 8], strides = [1, 1]} : vector<5x96xf32> to vector<5x8xf32>
    %476 = vector.extract_strided_slice %431 {offsets = [0, 48], sizes = [5, 8], strides = [1, 1]} : vector<5x96xf32> to vector<5x8xf32>
    %477 = vector.extract_strided_slice %431 {offsets = [0, 80], sizes = [5, 8], strides = [1, 1]} : vector<5x96xf32> to vector<5x8xf32>
    %478 = tpu.transpose %476, [1, 0] : vector<5x8xf32> -> vector<8x5xf32>
    %cst_243 = arith.constant dense<0.000000e+00> : vector<5x5xf32>
    %479 = tpu.matmul %475, %478, %cst_243 {dimension_numbers = #tpu.dot_dimension_numbers<[1], [0], [0], [1], [0, 0, 1, 1], [], []>} : vector<5x8xf32>, vector<8x5xf32>, vector<5x5xf32> -> vector<5x5xf32>
    %cst_244 = arith.constant 0.353553385 : f32
    %480 = vector.broadcast %cst_244 : f32 to vector<5x5xf32>
    %481 = arith.mulf %479, %480 : vector<5x5xf32>
    %cst_245 = arith.constant dense<0xFF800000> : vector<5xf32>
    %482 = vector.multi_reduction <maximumf>, %481, %cst_245 [1] : vector<5x5xf32> to vector<5xf32>
    %cst_246 = arith.constant 0xFF800000 : f32
    %483 = vector.broadcast %cst_246 : f32 to vector<5xf32>
    %484 = arith.maximumf %483, %482 : vector<5xf32>
    %485 = vector.shape_cast %484 : vector<5xf32> to vector<5x1xf32>
    %486 = vector.broadcast %485 : vector<5x1xf32> to vector<5x5xf32>
    %487 = arith.subf %481, %486 : vector<5x5xf32>
    %488 = math.exp %487 : vector<5x5xf32>
    %cst_247 = arith.constant dense<0.000000e+00> : vector<5xf32>
    %489 = vector.multi_reduction <add>, %488, %cst_247 [1] : vector<5x5xf32> to vector<5xf32>
    %490 = vector.shape_cast %489 : vector<5xf32> to vector<5x1xf32>
    %491 = vector.broadcast %490 : vector<5x1xf32> to vector<5x5xf32>
    %492 = arith.divf %488, %491 : vector<5x5xf32>
    %cst_248 = arith.constant dense<0.000000e+00> : vector<5x8xf32>
    %493 = tpu.matmul %492, %477, %cst_248 {dimension_numbers = #tpu.dot_dimension_numbers<[1], [0], [0], [1], [0, 0, 1, 1], [], []>} : vector<5x5xf32>, vector<5x8xf32>, vector<5x8xf32> -> vector<5x8xf32>
    %494 = vector.extract_strided_slice %43 {offsets = [16, 0], sizes = [8, 32], strides = [1, 1]} : vector<32x32xf32> to vector<8x32xf32>
    %cst_249 = arith.constant dense<0.000000e+00> : vector<5x32xf32>
    %495 = tpu.matmul %493, %494, %cst_249 {dimension_numbers = #tpu.dot_dimension_numbers<[1], [0], [0], [1], [0, 0, 1, 1], [], []>} : vector<5x8xf32>, vector<8x32xf32>, vector<5x32xf32> -> vector<5x32xf32>
    %496 = arith.addf %474, %495 : vector<5x32xf32>
    %497 = vector.extract_strided_slice %431 {offsets = [0, 24], sizes = [5, 8], strides = [1, 1]} : vector<5x96xf32> to vector<5x8xf32>
    %498 = vector.extract_strided_slice %431 {offsets = [0, 56], sizes = [5, 8], strides = [1, 1]} : vector<5x96xf32> to vector<5x8xf32>
    %499 = vector.extract_strided_slice %431 {offsets = [0, 88], sizes = [5, 8], strides = [1, 1]} : vector<5x96xf32> to vector<5x8xf32>
    %500 = tpu.transpose %498, [1, 0] : vector<5x8xf32> -> vector<8x5xf32>
    %cst_250 = arith.constant dense<0.000000e+00> : vector<5x5xf32>
    %501 = tpu.matmul %497, %500, %cst_250 {dimension_numbers = #tpu.dot_dimension_numbers<[1], [0], [0], [1], [0, 0, 1, 1], [], []>} : vector<5x8xf32>, vector<8x5xf32>, vector<5x5xf32> -> vector<5x5xf32>
    %cst_251 = arith.constant 0.353553385 : f32
    %502 = vector.broadcast %cst_251 : f32 to vector<5x5xf32>
    %503 = arith.mulf %501, %502 : vector<5x5xf32>
    %cst_252 = arith.constant dense<0xFF800000> : vector<5xf32>
    %504 = vector.multi_reduction <maximumf>, %503, %cst_252 [1] : vector<5x5xf32> to vector<5xf32>
    %cst_253 = arith.constant 0xFF800000 : f32
    %505 = vector.broadcast %cst_253 : f32 to vector<5xf32>
    %506 = arith.maximumf %505, %504 : vector<5xf32>
    %507 = vector.shape_cast %506 : vector<5xf32> to vector<5x1xf32>
    %508 = vector.broadcast %507 : vector<5x1xf32> to vector<5x5xf32>
    %509 = arith.subf %503, %508 : vector<5x5xf32>
    %510 = math.exp %509 : vector<5x5xf32>
    %cst_254 = arith.constant dense<0.000000e+00> : vector<5xf32>
    %511 = vector.multi_reduction <add>, %510, %cst_254 [1] : vector<5x5xf32> to vector<5xf32>
    %512 = vector.shape_cast %511 : vector<5xf32> to vector<5x1xf32>
    %513 = vector.broadcast %512 : vector<5x1xf32> to vector<5x5xf32>
    %514 = arith.divf %510, %513 : vector<5x5xf32>
    %cst_255 = arith.constant dense<0.000000e+00> : vector<5x8xf32>
    %515 = tpu.matmul %514, %499, %cst_255 {dimension_numbers = #tpu.dot_dimension_numbers<[1], [0], [0], [1], [0, 0, 1, 1], [], []>} : vector<5x5xf32>, vector<5x8xf32>, vector<5x8xf32> -> vector<5x8xf32>
    %516 = vector.extract_strided_slice %43 {offsets = [24, 0], sizes = [8, 32], strides = [1, 1]} : vector<32x32xf32> to vector<8x32xf32>
    %cst_256 = arith.constant dense<0.000000e+00> : vector<5x32xf32>
    %517 = tpu.matmul %515, %516, %cst_256 {dimension_numbers = #tpu.dot_dimension_numbers<[1], [0], [0], [1], [0, 0, 1, 1], [], []>} : vector<5x8xf32>, vector<8x32xf32>, vector<5x32xf32> -> vector<5x32xf32>
    %518 = arith.addf %496, %517 : vector<5x32xf32>
    %519 = arith.addf %408, %518 : vector<5x32xf32>
    %520 = vector.broadcast %42 : vector<1x32xf32> to vector<5x32xf32>
    %521 = arith.addf %519, %520 : vector<5x32xf32>
    %cst_257 = arith.constant dense<0.000000e+00> : vector<5xf32>
    %522 = vector.multi_reduction <add>, %521, %cst_257 [1] : vector<5x32xf32> to vector<5xf32>
    %523 = vector.shape_cast %522 : vector<5xf32> to vector<5x1xf32>
    %cst_258 = arith.constant 3.200000e+01 : f32
    %524 = vector.broadcast %cst_258 : f32 to vector<5x1xf32>
    %525 = arith.divf %523, %524 : vector<5x1xf32>
    %526 = vector.broadcast %525 : vector<5x1xf32> to vector<5x32xf32>
    %527 = arith.subf %521, %526 : vector<5x32xf32>
    %528 = arith.mulf %527, %527 : vector<5x32xf32>
    %cst_259 = arith.constant dense<0.000000e+00> : vector<5xf32>
    %529 = vector.multi_reduction <add>, %528, %cst_259 [1] : vector<5x32xf32> to vector<5xf32>
    %530 = vector.shape_cast %529 : vector<5xf32> to vector<5x1xf32>
    %cst_260 = arith.constant 3.200000e+01 : f32
    %531 = vector.broadcast %cst_260 : f32 to vector<5x1xf32>
    %532 = arith.divf %530, %531 : vector<5x1xf32>
    %cst_261 = arith.constant 9.99999974E-6 : f32
    %533 = vector.broadcast %cst_261 : f32 to vector<5x1xf32>
    %534 = arith.addf %532, %533 : vector<5x1xf32>
    %535 = math.rsqrt %534 : vector<5x1xf32>
    %536 = vector.broadcast %535 : vector<5x1xf32> to vector<5x32xf32>
    %537 = arith.mulf %527, %536 : vector<5x32xf32>
    %538 = vector.broadcast %41 : vector<1x32xf32> to vector<5x32xf32>
    %539 = arith.mulf %537, %538 : vector<5x32xf32>
    %540 = vector.broadcast %40 : vector<1x32xf32> to vector<5x32xf32>
    %541 = arith.addf %539, %540 : vector<5x32xf32>
    %cst_262 = arith.constant dense<0.000000e+00> : vector<5x128xf32>
    %542 = tpu.matmul %541, %35, %cst_262 {dimension_numbers = #tpu.dot_dimension_numbers<[1], [0], [0], [1], [0, 0, 1, 1], [], []>} : vector<5x32xf32>, vector<32x128xf32>, vector<5x128xf32> -> vector<5x128xf32>
    %543 = vector.broadcast %34 : vector<1x128xf32> to vector<5x128xf32>
    %544 = arith.addf %542, %543 : vector<5x128xf32>
    %545 = arith.mulf %544, %544 : vector<5x128xf32>
    %546 = arith.mulf %544, %545 : vector<5x128xf32>
    %cst_263 = arith.constant 4.471500e-02 : f32
    %547 = vector.broadcast %cst_263 : f32 to vector<5x128xf32>
    %548 = arith.mulf %547, %546 : vector<5x128xf32>
    %549 = arith.addf %544, %548 : vector<5x128xf32>
    %cst_264 = arith.constant 0.797884583 : f32
    %550 = vector.broadcast %cst_264 : f32 to vector<5x128xf32>
    %551 = arith.mulf %550, %549 : vector<5x128xf32>
    %552 = math.tanh %551 : vector<5x128xf32>
    %cst_265 = arith.constant 1.000000e+00 : f32
    %553 = vector.broadcast %cst_265 : f32 to vector<5x128xf32>
    %554 = arith.addf %553, %552 : vector<5x128xf32>
    %cst_266 = arith.constant 5.000000e-01 : f32
    %555 = vector.broadcast %cst_266 : f32 to vector<5x128xf32>
    %556 = arith.mulf %555, %554 : vector<5x128xf32>
    %557 = arith.mulf %544, %556 : vector<5x128xf32>
    %cst_267 = arith.constant dense<0.000000e+00> : vector<5x32xf32>
    %558 = tpu.matmul %557, %37, %cst_267 {dimension_numbers = #tpu.dot_dimension_numbers<[1], [0], [0], [1], [0, 0, 1, 1], [], []>} : vector<5x128xf32>, vector<128x32xf32>, vector<5x32xf32> -> vector<5x32xf32>
    %559 = vector.broadcast %36 : vector<1x32xf32> to vector<5x32xf32>
    %560 = arith.addf %558, %559 : vector<5x32xf32>
    %561 = arith.addf %521, %560 : vector<5x32xf32>
    %cst_268 = arith.constant dense<0.000000e+00> : vector<5xf32>
    %562 = vector.multi_reduction <add>, %561, %cst_268 [1] : vector<5x32xf32> to vector<5xf32>
    %563 = vector.shape_cast %562 : vector<5xf32> to vector<5x1xf32>
    %cst_269 = arith.constant 3.200000e+01 : f32
    %564 = vector.broadcast %cst_269 : f32 to vector<5x1xf32>
    %565 = arith.divf %563, %564 : vector<5x1xf32>
    %566 = vector.broadcast %565 : vector<5x1xf32> to vector<5x32xf32>
    %567 = arith.subf %561, %566 : vector<5x32xf32>
    %568 = arith.mulf %567, %567 : vector<5x32xf32>
    %cst_270 = arith.constant dense<0.000000e+00> : vector<5xf32>
    %569 = vector.multi_reduction <add>, %568, %cst_270 [1] : vector<5x32xf32> to vector<5xf32>
    %570 = vector.shape_cast %569 : vector<5xf32> to vector<5x1xf32>
    %cst_271 = arith.constant 3.200000e+01 : f32
    %571 = vector.broadcast %cst_271 : f32 to vector<5x1xf32>
    %572 = arith.divf %570, %571 : vector<5x1xf32>
    %cst_272 = arith.constant 9.99999974E-6 : f32
    %573 = vector.broadcast %cst_272 : f32 to vector<5x1xf32>
    %574 = arith.addf %572, %573 : vector<5x1xf32>
    %575 = math.rsqrt %574 : vector<5x1xf32>
    %576 = vector.broadcast %575 : vector<5x1xf32> to vector<5x32xf32>
    %577 = arith.mulf %567, %576 : vector<5x32xf32>
    %578 = vector.broadcast %51 : vector<1x32xf32> to vector<5x32xf32>
    %579 = arith.mulf %577, %578 : vector<5x32xf32>
    %580 = vector.broadcast %50 : vector<1x32xf32> to vector<5x32xf32>
    %581 = arith.addf %579, %580 : vector<5x32xf32>
    %cst_273 = arith.constant dense<0.000000e+00> : vector<5x96xf32>
    %582 = tpu.matmul %581, %57, %cst_273 {dimension_numbers = #tpu.dot_dimension_numbers<[1], [0], [0], [1], [0, 0, 1, 1], [], []>} : vector<5x32xf32>, vector<32x96xf32>, vector<5x96xf32> -> vector<5x96xf32>
    %583 = vector.broadcast %56 : vector<1x96xf32> to vector<5x96xf32>
    %584 = arith.addf %582, %583 : vector<5x96xf32>
    %585 = vector.extract_strided_slice %584 {offsets = [0, 0], sizes = [5, 8], strides = [1, 1]} : vector<5x96xf32> to vector<5x8xf32>
    %586 = vector.extract_strided_slice %584 {offsets = [0, 32], sizes = [5, 8], strides = [1, 1]} : vector<5x96xf32> to vector<5x8xf32>
    %587 = vector.extract_strided_slice %584 {offsets = [0, 64], sizes = [5, 8], strides = [1, 1]} : vector<5x96xf32> to vector<5x8xf32>
    %588 = tpu.transpose %586, [1, 0] : vector<5x8xf32> -> vector<8x5xf32>
    %cst_274 = arith.constant dense<0.000000e+00> : vector<5x5xf32>
    %589 = tpu.matmul %585, %588, %cst_274 {dimension_numbers = #tpu.dot_dimension_numbers<[1], [0], [0], [1], [0, 0, 1, 1], [], []>} : vector<5x8xf32>, vector<8x5xf32>, vector<5x5xf32> -> vector<5x5xf32>
    %cst_275 = arith.constant 0.353553385 : f32
    %590 = vector.broadcast %cst_275 : f32 to vector<5x5xf32>
    %591 = arith.mulf %589, %590 : vector<5x5xf32>
    %cst_276 = arith.constant dense<0xFF800000> : vector<5xf32>
    %592 = vector.multi_reduction <maximumf>, %591, %cst_276 [1] : vector<5x5xf32> to vector<5xf32>
    %cst_277 = arith.constant 0xFF800000 : f32
    %593 = vector.broadcast %cst_277 : f32 to vector<5xf32>
    %594 = arith.maximumf %593, %592 : vector<5xf32>
    %595 = vector.shape_cast %594 : vector<5xf32> to vector<5x1xf32>
    %596 = vector.broadcast %595 : vector<5x1xf32> to vector<5x5xf32>
    %597 = arith.subf %591, %596 : vector<5x5xf32>
    %598 = math.exp %597 : vector<5x5xf32>
    %cst_278 = arith.constant dense<0.000000e+00> : vector<5xf32>
    %599 = vector.multi_reduction <add>, %598, %cst_278 [1] : vector<5x5xf32> to vector<5xf32>
    %600 = vector.shape_cast %599 : vector<5xf32> to vector<5x1xf32>
    %601 = vector.broadcast %600 : vector<5x1xf32> to vector<5x5xf32>
    %602 = arith.divf %598, %601 : vector<5x5xf32>
    %cst_279 = arith.constant dense<0.000000e+00> : vector<5x8xf32>
    %603 = tpu.matmul %602, %587, %cst_279 {dimension_numbers = #tpu.dot_dimension_numbers<[1], [0], [0], [1], [0, 0, 1, 1], [], []>} : vector<5x5xf32>, vector<5x8xf32>, vector<5x8xf32> -> vector<5x8xf32>
    %604 = vector.extract_strided_slice %55 {offsets = [0, 0], sizes = [8, 32], strides = [1, 1]} : vector<32x32xf32> to vector<8x32xf32>
    %cst_280 = arith.constant dense<0.000000e+00> : vector<5x32xf32>
    %605 = tpu.matmul %603, %604, %cst_280 {dimension_numbers = #tpu.dot_dimension_numbers<[1], [0], [0], [1], [0, 0, 1, 1], [], []>} : vector<5x8xf32>, vector<8x32xf32>, vector<5x32xf32> -> vector<5x32xf32>
    %606 = vector.extract_strided_slice %584 {offsets = [0, 8], sizes = [5, 8], strides = [1, 1]} : vector<5x96xf32> to vector<5x8xf32>
    %607 = vector.extract_strided_slice %584 {offsets = [0, 40], sizes = [5, 8], strides = [1, 1]} : vector<5x96xf32> to vector<5x8xf32>
    %608 = vector.extract_strided_slice %584 {offsets = [0, 72], sizes = [5, 8], strides = [1, 1]} : vector<5x96xf32> to vector<5x8xf32>
    %609 = tpu.transpose %607, [1, 0] : vector<5x8xf32> -> vector<8x5xf32>
    %cst_281 = arith.constant dense<0.000000e+00> : vector<5x5xf32>
    %610 = tpu.matmul %606, %609, %cst_281 {dimension_numbers = #tpu.dot_dimension_numbers<[1], [0], [0], [1], [0, 0, 1, 1], [], []>} : vector<5x8xf32>, vector<8x5xf32>, vector<5x5xf32> -> vector<5x5xf32>
    %cst_282 = arith.constant 0.353553385 : f32
    %611 = vector.broadcast %cst_282 : f32 to vector<5x5xf32>
    %612 = arith.mulf %610, %611 : vector<5x5xf32>
    %cst_283 = arith.constant dense<0xFF800000> : vector<5xf32>
    %613 = vector.multi_reduction <maximumf>, %612, %cst_283 [1] : vector<5x5xf32> to vector<5xf32>
    %cst_284 = arith.constant 0xFF800000 : f32
    %614 = vector.broadcast %cst_284 : f32 to vector<5xf32>
    %615 = arith.maximumf %614, %613 : vector<5xf32>
    %616 = vector.shape_cast %615 : vector<5xf32> to vector<5x1xf32>
    %617 = vector.broadcast %616 : vector<5x1xf32> to vector<5x5xf32>
    %618 = arith.subf %612, %617 : vector<5x5xf32>
    %619 = math.exp %618 : vector<5x5xf32>
    %cst_285 = arith.constant dense<0.000000e+00> : vector<5xf32>
    %620 = vector.multi_reduction <add>, %619, %cst_285 [1] : vector<5x5xf32> to vector<5xf32>
    %621 = vector.shape_cast %620 : vector<5xf32> to vector<5x1xf32>
    %622 = vector.broadcast %621 : vector<5x1xf32> to vector<5x5xf32>
    %623 = arith.divf %619, %622 : vector<5x5xf32>
    %cst_286 = arith.constant dense<0.000000e+00> : vector<5x8xf32>
    %624 = tpu.matmul %623, %608, %cst_286 {dimension_numbers = #tpu.dot_dimension_numbers<[1], [0], [0], [1], [0, 0, 1, 1], [], []>} : vector<5x5xf32>, vector<5x8xf32>, vector<5x8xf32> -> vector<5x8xf32>
    %625 = vector.extract_strided_slice %55 {offsets = [8, 0], sizes = [8, 32], strides = [1, 1]} : vector<32x32xf32> to vector<8x32xf32>
    %cst_287 = arith.constant dense<0.000000e+00> : vector<5x32xf32>
    %626 = tpu.matmul %624, %625, %cst_287 {dimension_numbers = #tpu.dot_dimension_numbers<[1], [0], [0], [1], [0, 0, 1, 1], [], []>} : vector<5x8xf32>, vector<8x32xf32>, vector<5x32xf32> -> vector<5x32xf32>
    %627 = arith.addf %605, %626 : vector<5x32xf32>
    %628 = vector.extract_strided_slice %584 {offsets = [0, 16], sizes = [5, 8], strides = [1, 1]} : vector<5x96xf32> to vector<5x8xf32>
    %629 = vector.extract_strided_slice %584 {offsets = [0, 48], sizes = [5, 8], strides = [1, 1]} : vector<5x96xf32> to vector<5x8xf32>
    %630 = vector.extract_strided_slice %584 {offsets = [0, 80], sizes = [5, 8], strides = [1, 1]} : vector<5x96xf32> to vector<5x8xf32>
    %631 = tpu.transpose %629, [1, 0] : vector<5x8xf32> -> vector<8x5xf32>
    %cst_288 = arith.constant dense<0.000000e+00> : vector<5x5xf32>
    %632 = tpu.matmul %628, %631, %cst_288 {dimension_numbers = #tpu.dot_dimension_numbers<[1], [0], [0], [1], [0, 0, 1, 1], [], []>} : vector<5x8xf32>, vector<8x5xf32>, vector<5x5xf32> -> vector<5x5xf32>
    %cst_289 = arith.constant 0.353553385 : f32
    %633 = vector.broadcast %cst_289 : f32 to vector<5x5xf32>
    %634 = arith.mulf %632, %633 : vector<5x5xf32>
    %cst_290 = arith.constant dense<0xFF800000> : vector<5xf32>
    %635 = vector.multi_reduction <maximumf>, %634, %cst_290 [1] : vector<5x5xf32> to vector<5xf32>
    %cst_291 = arith.constant 0xFF800000 : f32
    %636 = vector.broadcast %cst_291 : f32 to vector<5xf32>
    %637 = arith.maximumf %636, %635 : vector<5xf32>
    %638 = vector.shape_cast %637 : vector<5xf32> to vector<5x1xf32>
    %639 = vector.broadcast %638 : vector<5x1xf32> to vector<5x5xf32>
    %640 = arith.subf %634, %639 : vector<5x5xf32>
    %641 = math.exp %640 : vector<5x5xf32>
    %cst_292 = arith.constant dense<0.000000e+00> : vector<5xf32>
    %642 = vector.multi_reduction <add>, %641, %cst_292 [1] : vector<5x5xf32> to vector<5xf32>
    %643 = vector.shape_cast %642 : vector<5xf32> to vector<5x1xf32>
    %644 = vector.broadcast %643 : vector<5x1xf32> to vector<5x5xf32>
    %645 = arith.divf %641, %644 : vector<5x5xf32>
    %cst_293 = arith.constant dense<0.000000e+00> : vector<5x8xf32>
    %646 = tpu.matmul %645, %630, %cst_293 {dimension_numbers = #tpu.dot_dimension_numbers<[1], [0], [0], [1], [0, 0, 1, 1], [], []>} : vector<5x5xf32>, vector<5x8xf32>, vector<5x8xf32> -> vector<5x8xf32>
    %647 = vector.extract_strided_slice %55 {offsets = [16, 0], sizes = [8, 32], strides = [1, 1]} : vector<32x32xf32> to vector<8x32xf32>
    %cst_294 = arith.constant dense<0.000000e+00> : vector<5x32xf32>
    %648 = tpu.matmul %646, %647, %cst_294 {dimension_numbers = #tpu.dot_dimension_numbers<[1], [0], [0], [1], [0, 0, 1, 1], [], []>} : vector<5x8xf32>, vector<8x32xf32>, vector<5x32xf32> -> vector<5x32xf32>
    %649 = arith.addf %627, %648 : vector<5x32xf32>
    %650 = vector.extract_strided_slice %584 {offsets = [0, 24], sizes = [5, 8], strides = [1, 1]} : vector<5x96xf32> to vector<5x8xf32>
    %651 = vector.extract_strided_slice %584 {offsets = [0, 56], sizes = [5, 8], strides = [1, 1]} : vector<5x96xf32> to vector<5x8xf32>
    %652 = vector.extract_strided_slice %584 {offsets = [0, 88], sizes = [5, 8], strides = [1, 1]} : vector<5x96xf32> to vector<5x8xf32>
    %653 = tpu.transpose %651, [1, 0] : vector<5x8xf32> -> vector<8x5xf32>
    %cst_295 = arith.constant dense<0.000000e+00> : vector<5x5xf32>
    %654 = tpu.matmul %650, %653, %cst_295 {dimension_numbers = #tpu.dot_dimension_numbers<[1], [0], [0], [1], [0, 0, 1, 1], [], []>} : vector<5x8xf32>, vector<8x5xf32>, vector<5x5xf32> -> vector<5x5xf32>
    %cst_296 = arith.constant 0.353553385 : f32
    %655 = vector.broadcast %cst_296 : f32 to vector<5x5xf32>
    %656 = arith.mulf %654, %655 : vector<5x5xf32>
    %cst_297 = arith.constant dense<0xFF800000> : vector<5xf32>
    %657 = vector.multi_reduction <maximumf>, %656, %cst_297 [1] : vector<5x5xf32> to vector<5xf32>
    %cst_298 = arith.constant 0xFF800000 : f32
    %658 = vector.broadcast %cst_298 : f32 to vector<5xf32>
    %659 = arith.maximumf %658, %657 : vector<5xf32>
    %660 = vector.shape_cast %659 : vector<5xf32> to vector<5x1xf32>
    %661 = vector.broadcast %660 : vector<5x1xf32> to vector<5x5xf32>
    %662 = arith.subf %656, %661 : vector<5x5xf32>
    %663 = math.exp %662 : vector<5x5xf32>
    %cst_299 = arith.constant dense<0.000000e+00> : vector<5xf32>
    %664 = vector.multi_reduction <add>, %663, %cst_299 [1] : vector<5x5xf32> to vector<5xf32>
    %665 = vector.shape_cast %664 : vector<5xf32> to vector<5x1xf32>
    %666 = vector.broadcast %665 : vector<5x1xf32> to vector<5x5xf32>
    %667 = arith.divf %663, %666 : vector<5x5xf32>
    %cst_300 = arith.constant dense<0.000000e+00> : vector<5x8xf32>
    %668 = tpu.matmul %667, %652, %cst_300 {dimension_numbers = #tpu.dot_dimension_numbers<[1], [0], [0], [1], [0, 0, 1, 1], [], []>} : vector<5x5xf32>, vector<5x8xf32>, vector<5x8xf32> -> vector<5x8xf32>
    %669 = vector.extract_strided_slice %55 {offsets = [24, 0], sizes = [8, 32], strides = [1, 1]} : vector<32x32xf32> to vector<8x32xf32>
    %cst_301 = arith.constant dense<0.000000e+00> : vector<5x32xf32>
    %670 = tpu.matmul %668, %669, %cst_301 {dimension_numbers = #tpu.dot_dimension_numbers<[1], [0], [0], [1], [0, 0, 1, 1], [], []>} : vector<5x8xf32>, vector<8x32xf32>, vector<5x32xf32> -> vector<5x32xf32>
    %671 = arith.addf %649, %670 : vector<5x32xf32>
    %672 = arith.addf %561, %671 : vector<5x32xf32>
    %673 = vector.broadcast %54 : vector<1x32xf32> to vector<5x32xf32>
    %674 = arith.addf %672, %673 : vector<5x32xf32>
    %cst_302 = arith.constant dense<0.000000e+00> : vector<5xf32>
    %675 = vector.multi_reduction <add>, %674, %cst_302 [1] : vector<5x32xf32> to vector<5xf32>
    %676 = vector.shape_cast %675 : vector<5xf32> to vector<5x1xf32>
    %cst_303 = arith.constant 3.200000e+01 : f32
    %677 = vector.broadcast %cst_303 : f32 to vector<5x1xf32>
    %678 = arith.divf %676, %677 : vector<5x1xf32>
    %679 = vector.broadcast %678 : vector<5x1xf32> to vector<5x32xf32>
    %680 = arith.subf %674, %679 : vector<5x32xf32>
    %681 = arith.mulf %680, %680 : vector<5x32xf32>
    %cst_304 = arith.constant dense<0.000000e+00> : vector<5xf32>
    %682 = vector.multi_reduction <add>, %681, %cst_304 [1] : vector<5x32xf32> to vector<5xf32>
    %683 = vector.shape_cast %682 : vector<5xf32> to vector<5x1xf32>
    %cst_305 = arith.constant 3.200000e+01 : f32
    %684 = vector.broadcast %cst_305 : f32 to vector<5x1xf32>
    %685 = arith.divf %683, %684 : vector<5x1xf32>
    %cst_306 = arith.constant 9.99999974E-6 : f32
    %686 = vector.broadcast %cst_306 : f32 to vector<5x1xf32>
    %687 = arith.addf %685, %686 : vector<5x1xf32>
    %688 = math.rsqrt %687 : vector<5x1xf32>
    %689 = vector.broadcast %688 : vector<5x1xf32> to vector<5x32xf32>
    %690 = arith.mulf %680, %689 : vector<5x32xf32>
    %691 = vector.broadcast %53 : vector<1x32xf32> to vector<5x32xf32>
    %692 = arith.mulf %690, %691 : vector<5x32xf32>
    %693 = vector.broadcast %52 : vector<1x32xf32> to vector<5x32xf32>
    %694 = arith.addf %692, %693 : vector<5x32xf32>
    %cst_307 = arith.constant dense<0.000000e+00> : vector<5x128xf32>
    %695 = tpu.matmul %694, %47, %cst_307 {dimension_numbers = #tpu.dot_dimension_numbers<[1], [0], [0], [1], [0, 0, 1, 1], [], []>} : vector<5x32xf32>, vector<32x128xf32>, vector<5x128xf32> -> vector<5x128xf32>
    %696 = vector.broadcast %46 : vector<1x128xf32> to vector<5x128xf32>
    %697 = arith.addf %695, %696 : vector<5x128xf32>
    %698 = arith.mulf %697, %697 : vector<5x128xf32>
    %699 = arith.mulf %697, %698 : vector<5x128xf32>
    %cst_308 = arith.constant 4.471500e-02 : f32
    %700 = vector.broadcast %cst_308 : f32 to vector<5x128xf32>
    %701 = arith.mulf %700, %699 : vector<5x128xf32>
    %702 = arith.addf %697, %701 : vector<5x128xf32>
    %cst_309 = arith.constant 0.797884583 : f32
    %703 = vector.broadcast %cst_309 : f32 to vector<5x128xf32>
    %704 = arith.mulf %703, %702 : vector<5x128xf32>
    %705 = math.tanh %704 : vector<5x128xf32>
    %cst_310 = arith.constant 1.000000e+00 : f32
    %706 = vector.broadcast %cst_310 : f32 to vector<5x128xf32>
    %707 = arith.addf %706, %705 : vector<5x128xf32>
    %cst_311 = arith.constant 5.000000e-01 : f32
    %708 = vector.broadcast %cst_311 : f32 to vector<5x128xf32>
    %709 = arith.mulf %708, %707 : vector<5x128xf32>
    %710 = arith.mulf %697, %709 : vector<5x128xf32>
    %cst_312 = arith.constant dense<0.000000e+00> : vector<5x32xf32>
    %711 = tpu.matmul %710, %49, %cst_312 {dimension_numbers = #tpu.dot_dimension_numbers<[1], [0], [0], [1], [0, 0, 1, 1], [], []>} : vector<5x128xf32>, vector<128x32xf32>, vector<5x32xf32> -> vector<5x32xf32>
    %712 = vector.broadcast %48 : vector<1x32xf32> to vector<5x32xf32>
    %713 = arith.addf %711, %712 : vector<5x32xf32>
    %714 = arith.addf %674, %713 : vector<5x32xf32>
    %cst_313 = arith.constant dense<0.000000e+00> : vector<5xf32>
    %715 = vector.multi_reduction <add>, %714, %cst_313 [1] : vector<5x32xf32> to vector<5xf32>
    %716 = vector.shape_cast %715 : vector<5xf32> to vector<5x1xf32>
    %cst_314 = arith.constant 3.200000e+01 : f32
    %717 = vector.broadcast %cst_314 : f32 to vector<5x1xf32>
    %718 = arith.divf %716, %717 : vector<5x1xf32>
    %719 = vector.broadcast %718 : vector<5x1xf32> to vector<5x32xf32>
    %720 = arith.subf %714, %719 : vector<5x32xf32>
    %721 = arith.mulf %720, %720 : vector<5x32xf32>
    %cst_315 = arith.constant dense<0.000000e+00> : vector<5xf32>
    %722 = vector.multi_reduction <add>, %721, %cst_315 [1] : vector<5x32xf32> to vector<5xf32>
    %723 = vector.shape_cast %722 : vector<5xf32> to vector<5x1xf32>
    %cst_316 = arith.constant 3.200000e+01 : f32
    %724 = vector.broadcast %cst_316 : f32 to vector<5x1xf32>
    %725 = arith.divf %723, %724 : vector<5x1xf32>
    %cst_317 = arith.constant 9.99999974E-6 : f32
    %726 = vector.broadcast %cst_317 : f32 to vector<5x1xf32>
    %727 = arith.addf %725, %726 : vector<5x1xf32>
    %728 = math.rsqrt %727 : vector<5x1xf32>
    %729 = vector.broadcast %728 : vector<5x1xf32> to vector<5x32xf32>
    %730 = arith.mulf %720, %729 : vector<5x32xf32>
    %731 = vector.broadcast %59 : vector<1x32xf32> to vector<5x32xf32>
    %732 = arith.mulf %730, %731 : vector<5x32xf32>
    %733 = vector.broadcast %58 : vector<1x32xf32> to vector<5x32xf32>
    %734 = arith.addf %732, %733 : vector<5x32xf32>
    %735 = vector.extract_strided_slice %734 {offsets = [0, 0], sizes = [1, 32], strides = [1, 1]} : vector<5x32xf32> to vector<1x32xf32>
    %cst_318 = arith.constant dense<0.000000e+00> : vector<1x32xf32>
    %736 = tpu.matmul %735, %61, %cst_318 {dimension_numbers = #tpu.dot_dimension_numbers<[1], [0], [0], [1], [0, 0, 1, 1], [], []>} : vector<1x32xf32>, vector<32x32xf32>, vector<1x32xf32> -> vector<1x32xf32>
    %737 = arith.addf %736, %60 : vector<1x32xf32>
    %738 = arith.mulf %737, %737 : vector<1x32xf32>
    %cst_319 = arith.constant dense<0.000000e+00> : vector<1xf32>
    %739 = vector.multi_reduction <add>, %738, %cst_319 [1] : vector<1x32xf32> to vector<1xf32>
    %740 = vector.shape_cast %739 : vector<1xf32> to vector<1x1xf32>
    %cst_320 = arith.constant 1.000000e-24 : f32
    %741 = vector.broadcast %cst_320 : f32 to vector<1x1xf32>
    %742 = arith.maximumf %740, %741 : vector<1x1xf32>
    %743 = math.rsqrt %742 : vector<1x1xf32>
    %744 = vector.broadcast %743 : vector<1x1xf32> to vector<1x32xf32>
    %745 = arith.mulf %737, %744 : vector<1x32xf32>
    %c0_321 = arith.constant 0 : index
    %c0_322 = arith.constant 0 : index
    %746 = vector.load %arg1[%c0_321, %c0_322] : memref<18x32xf32, #tpu.memory_space<vmem>>, vector<18x32xf32>
    %747 = vector.extract_strided_slice %746 {offsets = [0, 0], sizes = [9, 32], strides = [1, 1]} : vector<18x32xf32> to vector<9x32xf32>
    %cst_323 = arith.constant dense<0.000000e+00> : vector<9xf32>
    %748 = vector.multi_reduction <add>, %747, %cst_323 [1] : vector<9x32xf32> to vector<9xf32>
    %749 = vector.shape_cast %748 : vector<9xf32> to vector<9x1xf32>
    %cst_324 = arith.constant 3.200000e+01 : f32
    %750 = vector.broadcast %cst_324 : f32 to vector<9x1xf32>
    %751 = arith.divf %749, %750 : vector<9x1xf32>
    %752 = vector.broadcast %751 : vector<9x1xf32> to vector<9x32xf32>
    %753 = arith.subf %747, %752 : vector<9x32xf32>
    %754 = arith.mulf %753, %753 : vector<9x32xf32>
    %cst_325 = arith.constant dense<0.000000e+00> : vector<9xf32>
    %755 = vector.multi_reduction <add>, %754, %cst_325 [1] : vector<9x32xf32> to vector<9xf32>
    %756 = vector.shape_cast %755 : vector<9xf32> to vector<9x1xf32>
    %cst_326 = arith.constant 3.200000e+01 : f32
    %757 = vector.broadcast %cst_326 : f32 to vector<9x1xf32>
    %758 = arith.divf %756, %757 : vector<9x1xf32>
    %cst_327 = arith.constant 9.99999974E-6 : f32
    %759 = vector.broadcast %cst_327 : f32 to vector<9x1xf32>
    %760 = arith.addf %758, %759 : vector<9x1xf32>
    %761 = math.rsqrt %760 : vector<9x1xf32>
    %762 = vector.broadcast %761 : vector<9x1xf32> to vector<9x32xf32>
    %763 = arith.mulf %753, %762 : vector<9x32xf32>
    %764 = vector.broadcast %6 : vector<1x32xf32> to vector<9x32xf32>
    %765 = arith.mulf %763, %764 : vector<9x32xf32>
    %766 = vector.broadcast %5 : vector<1x32xf32> to vector<9x32xf32>
    %767 = arith.addf %765, %766 : vector<9x32xf32>
    %cst_328 = arith.constant dense<0.000000e+00> : vector<9x32xf32>
    %768 = tpu.matmul %767, %13, %cst_328 {dimension_numbers = #tpu.dot_dimension_numbers<[1], [0], [0], [1], [0, 0, 1, 1], [], []>} : vector<9x32xf32>, vector<32x32xf32>, vector<9x32xf32> -> vector<9x32xf32>
    %cst_329 = arith.constant dense<0.000000e+00> : vector<9x32xf32>
    %769 = tpu.matmul %767, %12, %cst_329 {dimension_numbers = #tpu.dot_dimension_numbers<[1], [0], [0], [1], [0, 0, 1, 1], [], []>} : vector<9x32xf32>, vector<32x32xf32>, vector<9x32xf32> -> vector<9x32xf32>
    %cst_330 = arith.constant dense<0.000000e+00> : vector<9x32xf32>
    %770 = tpu.matmul %767, %14, %cst_330 {dimension_numbers = #tpu.dot_dimension_numbers<[1], [0], [0], [1], [0, 0, 1, 1], [], []>} : vector<9x32xf32>, vector<32x32xf32>, vector<9x32xf32> -> vector<9x32xf32>
    %771 = tpu.transpose %11, [1, 0] : vector<16x16xf32> -> vector<16x16xf32>
    %772 = vector.extract_strided_slice %768 {offsets = [0, 0], sizes = [9, 16], strides = [1, 1]} : vector<9x32xf32> to vector<9x16xf32>
    %cst_331 = arith.constant 5.000000e-01 : f32
    %773 = vector.broadcast %cst_331 : f32 to vector<9x16xf32>
    %774 = arith.mulf %772, %773 : vector<9x16xf32>
    %775 = vector.extract_strided_slice %769 {offsets = [0, 0], sizes = [9, 16], strides = [1, 1]} : vector<9x32xf32> to vector<9x16xf32>
    %cst_332 = arith.constant 5.000000e-01 : f32
    %776 = vector.broadcast %cst_332 : f32 to vector<9x16xf32>
    %777 = arith.mulf %775, %776 : vector<9x16xf32>
    %778 = vector.extract_strided_slice %770 {offsets = [0, 0], sizes = [9, 16], strides = [1, 1]} : vector<9x32xf32> to vector<9x16xf32>
    %cst_333 = arith.constant dense<0.000000e+00> : vector<9x16xf32>
    %779 = tpu.matmul %774, %771, %cst_333 {dimension_numbers = #tpu.dot_dimension_numbers<[1], [0], [0], [1], [0, 0, 1, 1], [], []>} : vector<9x16xf32>, vector<16x16xf32>, vector<9x16xf32> -> vector<9x16xf32>
    %cst_334 = arith.constant dense<0.000000e+00> : vector<9x16xf32>
    %780 = tpu.matmul %777, %771, %cst_334 {dimension_numbers = #tpu.dot_dimension_numbers<[1], [0], [0], [1], [0, 0, 1, 1], [], []>} : vector<9x16xf32>, vector<16x16xf32>, vector<9x16xf32> -> vector<9x16xf32>
    %781 = arith.mulf %774, %774 : vector<9x16xf32>
    %cst_335 = arith.constant dense<0.000000e+00> : vector<9xf32>
    %782 = vector.multi_reduction <add>, %781, %cst_335 [1] : vector<9x16xf32> to vector<9xf32>
    %783 = vector.shape_cast %782 : vector<9xf32> to vector<9x1xf32>
    %cst_336 = arith.constant 5.000000e-01 : f32
    %784 = vector.broadcast %cst_336 : f32 to vector<9x1xf32>
    %785 = arith.mulf %784, %783 : vector<9x1xf32>
    %786 = arith.mulf %777, %777 : vector<9x16xf32>
    %cst_337 = arith.constant dense<0.000000e+00> : vector<9xf32>
    %787 = vector.multi_reduction <add>, %786, %cst_337 [1] : vector<9x16xf32> to vector<9xf32>
    %788 = vector.shape_cast %787 : vector<9xf32> to vector<9x1xf32>
    %cst_338 = arith.constant 5.000000e-01 : f32
    %789 = vector.broadcast %cst_338 : f32 to vector<9x1xf32>
    %790 = arith.mulf %789, %788 : vector<9x1xf32>
    %791 = vector.broadcast %785 : vector<9x1xf32> to vector<9x16xf32>
    %792 = arith.subf %779, %791 : vector<9x16xf32>
    %cst_339 = arith.constant dense<0xFF800000> : vector<9xf32>
    %793 = vector.multi_reduction <maximumf>, %779, %cst_339 [1] : vector<9x16xf32> to vector<9xf32>
    %794 = vector.shape_cast %793 : vector<9xf32> to vector<9x1xf32>
    %795 = vector.broadcast %794 : vector<9x1xf32> to vector<9x16xf32>
    %796 = arith.subf %792, %795 : vector<9x16xf32>
    %797 = math.exp %796 : vector<9x16xf32>
    %cst_340 = arith.constant 9.99999974E-5 : f32
    %798 = vector.broadcast %cst_340 : f32 to vector<9x16xf32>
    %799 = arith.addf %797, %798 : vector<9x16xf32>
    %cst_341 = arith.constant 2.500000e-01 : f32
    %800 = vector.broadcast %cst_341 : f32 to vector<9x16xf32>
    %801 = arith.mulf %800, %799 : vector<9x16xf32>
    %802 = vector.broadcast %790 : vector<9x1xf32> to vector<9x16xf32>
    %803 = arith.subf %780, %802 : vector<9x16xf32>
    %804 = vector.shape_cast %780 : vector<9x16xf32> to vector<1x9x16xf32>
    %cst_342 = arith.constant dense<0xFF800000> : vector<1xf32>
    %805 = vector.multi_reduction <maximumf>, %804, %cst_342 [1, 2] : vector<1x9x16xf32> to vector<1xf32>
    %806 = vector.shape_cast %805 : vector<1xf32> to vector<1x1x1xf32>
    %807 = vector.extract %806[0, 0, 0] : f32 from vector<1x1x1xf32>
    %808 = vector.broadcast %807 : f32 to vector<1x1xf32>
    %809 = vector.broadcast %808 : vector<1x1xf32> to vector<9x16xf32>
    %810 = arith.subf %803, %809 : vector<9x16xf32>
    %811 = math.exp %810 : vector<9x16xf32>
    %cst_343 = arith.constant 9.99999974E-5 : f32
    %812 = vector.broadcast %cst_343 : f32 to vector<9x16xf32>
    %813 = arith.addf %811, %812 : vector<9x16xf32>
    %cst_344 = arith.constant 2.500000e-01 : f32
    %814 = vector.broadcast %cst_344 : f32 to vector<9x16xf32>
    %815 = arith.mulf %814, %813 : vector<9x16xf32>
    %816 = tpu.transpose %815, [1, 0] : vector<9x16xf32> -> vector<16x9xf32>
    %cst_345 = arith.constant dense<0.000000e+00> : vector<16x16xf32>
    %817 = tpu.matmul %816, %778, %cst_345 {dimension_numbers = #tpu.dot_dimension_numbers<[1], [0], [0], [1], [0, 0, 1, 1], [], []>} : vector<16x9xf32>, vector<9x16xf32>, vector<16x16xf32> -> vector<16x16xf32>
    %cst_346 = arith.constant dense<0.000000e+00> : vector<16xf32>
    %818 = vector.multi_reduction <add>, %815, %cst_346 [0] : vector<9x16xf32> to vector<16xf32>
    %819 = vector.shape_cast %818 : vector<16xf32> to vector<1x16xf32>
    %cst_347 = arith.constant dense<0.000000e+00> : vector<9x16xf32>
    %820 = tpu.matmul %801, %817, %cst_347 {dimension_numbers = #tpu.dot_dimension_numbers<[1], [0], [0], [1], [0, 0, 1, 1], [], []>} : vector<9x16xf32>, vector<16x16xf32>, vector<9x16xf32> -> vector<9x16xf32>
    %821 = vector.broadcast %819 : vector<1x16xf32> to vector<9x16xf32>
    %822 = arith.mulf %801, %821 : vector<9x16xf32>
    %cst_348 = arith.constant dense<0.000000e+00> : vector<9xf32>
    %823 = vector.multi_reduction <add>, %822, %cst_348 [1] : vector<9x16xf32> to vector<9xf32>
    %824 = vector.shape_cast %823 : vector<9xf32> to vector<9x1xf32>
    %825 = vector.broadcast %824 : vector<9x1xf32> to vector<9x16xf32>
    %826 = arith.divf %820, %825 : vector<9x16xf32>
    %827 = vector.extract_strided_slice %10 {offsets = [0, 0], sizes = [16, 32], strides = [1, 1]} : vector<32x32xf32> to vector<16x32xf32>
    %cst_349 = arith.constant dense<0.000000e+00> : vector<9x32xf32>
    %828 = tpu.matmul %826, %827, %cst_349 {dimension_numbers = #tpu.dot_dimension_numbers<[1], [0], [0], [1], [0, 0, 1, 1], [], []>} : vector<9x16xf32>, vector<16x32xf32>, vector<9x32xf32> -> vector<9x32xf32>
    %829 = vector.extract_strided_slice %768 {offsets = [0, 16], sizes = [9, 16], strides = [1, 1]} : vector<9x32xf32> to vector<9x16xf32>
    %cst_350 = arith.constant 5.000000e-01 : f32
    %830 = vector.broadcast %cst_350 : f32 to vector<9x16xf32>
    %831 = arith.mulf %829, %830 : vector<9x16xf32>
    %832 = vector.extract_strided_slice %769 {offsets = [0, 16], sizes = [9, 16], strides = [1, 1]} : vector<9x32xf32> to vector<9x16xf32>
    %cst_351 = arith.constant 5.000000e-01 : f32
    %833 = vector.broadcast %cst_351 : f32 to vector<9x16xf32>
    %834 = arith.mulf %832, %833 : vector<9x16xf32>
    %835 = vector.extract_strided_slice %770 {offsets = [0, 16], sizes = [9, 16], strides = [1, 1]} : vector<9x32xf32> to vector<9x16xf32>
    %cst_352 = arith.constant dense<0.000000e+00> : vector<9x16xf32>
    %836 = tpu.matmul %831, %771, %cst_352 {dimension_numbers = #tpu.dot_dimension_numbers<[1], [0], [0], [1], [0, 0, 1, 1], [], []>} : vector<9x16xf32>, vector<16x16xf32>, vector<9x16xf32> -> vector<9x16xf32>
    %cst_353 = arith.constant dense<0.000000e+00> : vector<9x16xf32>
    %837 = tpu.matmul %834, %771, %cst_353 {dimension_numbers = #tpu.dot_dimension_numbers<[1], [0], [0], [1], [0, 0, 1, 1], [], []>} : vector<9x16xf32>, vector<16x16xf32>, vector<9x16xf32> -> vector<9x16xf32>
    %838 = arith.mulf %831, %831 : vector<9x16xf32>
    %cst_354 = arith.constant dense<0.000000e+00> : vector<9xf32>
    %839 = vector.multi_reduction <add>, %838, %cst_354 [1] : vector<9x16xf32> to vector<9xf32>
    %840 = vector.shape_cast %839 : vector<9xf32> to vector<9x1xf32>
    %cst_355 = arith.constant 5.000000e-01 : f32
    %841 = vector.broadcast %cst_355 : f32 to vector<9x1xf32>
    %842 = arith.mulf %841, %840 : vector<9x1xf32>
    %843 = arith.mulf %834, %834 : vector<9x16xf32>
    %cst_356 = arith.constant dense<0.000000e+00> : vector<9xf32>
    %844 = vector.multi_reduction <add>, %843, %cst_356 [1] : vector<9x16xf32> to vector<9xf32>
    %845 = vector.shape_cast %844 : vector<9xf32> to vector<9x1xf32>
    %cst_357 = arith.constant 5.000000e-01 : f32
    %846 = vector.broadcast %cst_357 : f32 to vector<9x1xf32>
    %847 = arith.mulf %846, %845 : vector<9x1xf32>
    %848 = vector.broadcast %842 : vector<9x1xf32> to vector<9x16xf32>
    %849 = arith.subf %836, %848 : vector<9x16xf32>
    %cst_358 = arith.constant dense<0xFF800000> : vector<9xf32>
    %850 = vector.multi_reduction <maximumf>, %836, %cst_358 [1] : vector<9x16xf32> to vector<9xf32>
    %851 = vector.shape_cast %850 : vector<9xf32> to vector<9x1xf32>
    %852 = vector.broadcast %851 : vector<9x1xf32> to vector<9x16xf32>
    %853 = arith.subf %849, %852 : vector<9x16xf32>
    %854 = math.exp %853 : vector<9x16xf32>
    %cst_359 = arith.constant 9.99999974E-5 : f32
    %855 = vector.broadcast %cst_359 : f32 to vector<9x16xf32>
    %856 = arith.addf %854, %855 : vector<9x16xf32>
    %cst_360 = arith.constant 2.500000e-01 : f32
    %857 = vector.broadcast %cst_360 : f32 to vector<9x16xf32>
    %858 = arith.mulf %857, %856 : vector<9x16xf32>
    %859 = vector.broadcast %847 : vector<9x1xf32> to vector<9x16xf32>
    %860 = arith.subf %837, %859 : vector<9x16xf32>
    %861 = vector.shape_cast %837 : vector<9x16xf32> to vector<1x9x16xf32>
    %cst_361 = arith.constant dense<0xFF800000> : vector<1xf32>
    %862 = vector.multi_reduction <maximumf>, %861, %cst_361 [1, 2] : vector<1x9x16xf32> to vector<1xf32>
    %863 = vector.shape_cast %862 : vector<1xf32> to vector<1x1x1xf32>
    %864 = vector.extract %863[0, 0, 0] : f32 from vector<1x1x1xf32>
    %865 = vector.broadcast %864 : f32 to vector<1x1xf32>
    %866 = vector.broadcast %865 : vector<1x1xf32> to vector<9x16xf32>
    %867 = arith.subf %860, %866 : vector<9x16xf32>
    %868 = math.exp %867 : vector<9x16xf32>
    %cst_362 = arith.constant 9.99999974E-5 : f32
    %869 = vector.broadcast %cst_362 : f32 to vector<9x16xf32>
    %870 = arith.addf %868, %869 : vector<9x16xf32>
    %cst_363 = arith.constant 2.500000e-01 : f32
    %871 = vector.broadcast %cst_363 : f32 to vector<9x16xf32>
    %872 = arith.mulf %871, %870 : vector<9x16xf32>
    %873 = tpu.transpose %872, [1, 0] : vector<9x16xf32> -> vector<16x9xf32>
    %cst_364 = arith.constant dense<0.000000e+00> : vector<16x16xf32>
    %874 = tpu.matmul %873, %835, %cst_364 {dimension_numbers = #tpu.dot_dimension_numbers<[1], [0], [0], [1], [0, 0, 1, 1], [], []>} : vector<16x9xf32>, vector<9x16xf32>, vector<16x16xf32> -> vector<16x16xf32>
    %cst_365 = arith.constant dense<0.000000e+00> : vector<16xf32>
    %875 = vector.multi_reduction <add>, %872, %cst_365 [0] : vector<9x16xf32> to vector<16xf32>
    %876 = vector.shape_cast %875 : vector<16xf32> to vector<1x16xf32>
    %cst_366 = arith.constant dense<0.000000e+00> : vector<9x16xf32>
    %877 = tpu.matmul %858, %874, %cst_366 {dimension_numbers = #tpu.dot_dimension_numbers<[1], [0], [0], [1], [0, 0, 1, 1], [], []>} : vector<9x16xf32>, vector<16x16xf32>, vector<9x16xf32> -> vector<9x16xf32>
    %878 = vector.broadcast %876 : vector<1x16xf32> to vector<9x16xf32>
    %879 = arith.mulf %858, %878 : vector<9x16xf32>
    %cst_367 = arith.constant dense<0.000000e+00> : vector<9xf32>
    %880 = vector.multi_reduction <add>, %879, %cst_367 [1] : vector<9x16xf32> to vector<9xf32>
    %881 = vector.shape_cast %880 : vector<9xf32> to vector<9x1xf32>
    %882 = vector.broadcast %881 : vector<9x1xf32> to vector<9x16xf32>
    %883 = arith.divf %877, %882 : vector<9x16xf32>
    %884 = vector.extract_strided_slice %10 {offsets = [16, 0], sizes = [16, 32], strides = [1, 1]} : vector<32x32xf32> to vector<16x32xf32>
    %cst_368 = arith.constant dense<0.000000e+00> : vector<9x32xf32>
    %885 = tpu.matmul %883, %884, %cst_368 {dimension_numbers = #tpu.dot_dimension_numbers<[1], [0], [0], [1], [0, 0, 1, 1], [], []>} : vector<9x16xf32>, vector<16x32xf32>, vector<9x32xf32> -> vector<9x32xf32>
    %886 = arith.addf %828, %885 : vector<9x32xf32>
    %887 = arith.addf %747, %886 : vector<9x32xf32>
    %888 = vector.broadcast %9 : vector<1x32xf32> to vector<9x32xf32>
    %889 = arith.addf %887, %888 : vector<9x32xf32>
    %cst_369 = arith.constant dense<0.000000e+00> : vector<9xf32>
    %890 = vector.multi_reduction <add>, %889, %cst_369 [1] : vector<9x32xf32> to vector<9xf32>
    %891 = vector.shape_cast %890 : vector<9xf32> to vector<9x1xf32>
    %cst_370 = arith.constant 3.200000e+01 : f32
    %892 = vector.broadcast %cst_370 : f32 to vector<9x1xf32>
    %893 = arith.divf %891, %892 : vector<9x1xf32>
    %894 = vector.broadcast %893 : vector<9x1xf32> to vector<9x32xf32>
    %895 = arith.subf %889, %894 : vector<9x32xf32>
    %896 = arith.mulf %895, %895 : vector<9x32xf32>
    %cst_371 = arith.constant dense<0.000000e+00> : vector<9xf32>
    %897 = vector.multi_reduction <add>, %896, %cst_371 [1] : vector<9x32xf32> to vector<9xf32>
    %898 = vector.shape_cast %897 : vector<9xf32> to vector<9x1xf32>
    %cst_372 = arith.constant 3.200000e+01 : f32
    %899 = vector.broadcast %cst_372 : f32 to vector<9x1xf32>
    %900 = arith.divf %898, %899 : vector<9x1xf32>
    %cst_373 = arith.constant 9.99999974E-6 : f32
    %901 = vector.broadcast %cst_373 : f32 to vector<9x1xf32>
    %902 = arith.addf %900, %901 : vector<9x1xf32>
    %903 = math.rsqrt %902 : vector<9x1xf32>
    %904 = vector.broadcast %903 : vector<9x1xf32> to vector<9x32xf32>
    %905 = arith.mulf %895, %904 : vector<9x32xf32>
    %906 = vector.broadcast %8 : vector<1x32xf32> to vector<9x32xf32>
    %907 = arith.mulf %905, %906 : vector<9x32xf32>
    %908 = vector.broadcast %7 : vector<1x32xf32> to vector<9x32xf32>
    %909 = arith.addf %907, %908 : vector<9x32xf32>
    %cst_374 = arith.constant dense<0.000000e+00> : vector<9x128xf32>
    %910 = tpu.matmul %909, %2, %cst_374 {dimension_numbers = #tpu.dot_dimension_numbers<[1], [0], [0], [1], [0, 0, 1, 1], [], []>} : vector<9x32xf32>, vector<32x128xf32>, vector<9x128xf32> -> vector<9x128xf32>
    %911 = vector.broadcast %1 : vector<1x128xf32> to vector<9x128xf32>
    %912 = arith.addf %910, %911 : vector<9x128xf32>
    %913 = arith.mulf %912, %912 : vector<9x128xf32>
    %914 = arith.mulf %912, %913 : vector<9x128xf32>
    %cst_375 = arith.constant 4.471500e-02 : f32
    %915 = vector.broadcast %cst_375 : f32 to vector<9x128xf32>
    %916 = arith.mulf %915, %914 : vector<9x128xf32>
    %917 = arith.addf %912, %916 : vector<9x128xf32>
    %cst_376 = arith.constant 0.797884583 : f32
    %918 = vector.broadcast %cst_376 : f32 to vector<9x128xf32>
    %919 = arith.mulf %918, %917 : vector<9x128xf32>
    %920 = math.tanh %919 : vector<9x128xf32>
    %cst_377 = arith.constant 1.000000e+00 : f32
    %921 = vector.broadcast %cst_377 : f32 to vector<9x128xf32>
    %922 = arith.addf %921, %920 : vector<9x128xf32>
    %cst_378 = arith.constant 5.000000e-01 : f32
    %923 = vector.broadcast %cst_378 : f32 to vector<9x128xf32>
    %924 = arith.mulf %923, %922 : vector<9x128xf32>
    %925 = arith.mulf %912, %924 : vector<9x128xf32>
    %cst_379 = arith.constant dense<0.000000e+00> : vector<9x32xf32>
    %926 = tpu.matmul %925, %4, %cst_379 {dimension_numbers = #tpu.dot_dimension_numbers<[1], [0], [0], [1], [0, 0, 1, 1], [], []>} : vector<9x128xf32>, vector<128x32xf32>, vector<9x32xf32> -> vector<9x32xf32>
    %927 = vector.broadcast %3 : vector<1x32xf32> to vector<9x32xf32>
    %928 = arith.addf %926, %927 : vector<9x32xf32>
    %929 = arith.addf %889, %928 : vector<9x32xf32>
    %cst_380 = arith.constant dense<0.000000e+00> : vector<9xf32>
    %930 = vector.multi_reduction <add>, %929, %cst_380 [1] : vector<9x32xf32> to vector<9xf32>
    %931 = vector.shape_cast %930 : vector<9xf32> to vector<9x1xf32>
    %cst_381 = arith.constant 3.200000e+01 : f32
    %932 = vector.broadcast %cst_381 : f32 to vector<9x1xf32>
    %933 = arith.divf %931, %932 : vector<9x1xf32>
    %934 = vector.broadcast %933 : vector<9x1xf32> to vector<9x32xf32>
    %935 = arith.subf %929, %934 : vector<9x32xf32>
    %936 = arith.mulf %935, %935 : vector<9x32xf32>
    %cst_382 = arith.constant dense<0.000000e+00> : vector<9xf32>
    %937 = vector.multi_reduction <add>, %936, %cst_382 [1] : vector<9x32xf32> to vector<9xf32>
    %938 = vector.shape_cast %937 : vector<9xf32> to vector<9x1xf32>
    %cst_383 = arith.constant 3.200000e+01 : f32
    %939 = vector.broadcast %cst_383 : f32 to vector<9x1xf32>
    %940 = arith.divf %938, %939 : vector<9x1xf32>
    %cst_384 = arith.constant 9.99999974E-6 : f32
    %941 = vector.broadcast %cst_384 : f32 to vector<9x1xf32>
    %942 = arith.addf %940, %941 : vector<9x1xf32>
    %943 = math.rsqrt %942 : vector<9x1xf32>
    %944 = vector.broadcast %943 : vector<9x1xf32> to vector<9x32xf32>
    %945 = arith.mulf %935, %944 : vector<9x32xf32>
    %946 = vector.broadcast %20 : vector<1x32xf32> to vector<9x32xf32>
    %947 = arith.mulf %945, %946 : vector<9x32xf32>
    %948 = vector.broadcast %19 : vector<1x32xf32> to vector<9x32xf32>
    %949 = arith.addf %947, %948 : vector<9x32xf32>
    %cst_385 = arith.constant dense<0.000000e+00> : vector<9x32xf32>
    %950 = tpu.matmul %949, %27, %cst_385 {dimension_numbers = #tpu.dot_dimension_numbers<[1], [0], [0], [1], [0, 0, 1, 1], [], []>} : vector<9x32xf32>, vector<32x32xf32>, vector<9x32xf32> -> vector<9x32xf32>
    %cst_386 = arith.constant dense<0.000000e+00> : vector<9x32xf32>
    %951 = tpu.matmul %949, %26, %cst_386 {dimension_numbers = #tpu.dot_dimension_numbers<[1], [0], [0], [1], [0, 0, 1, 1], [], []>} : vector<9x32xf32>, vector<32x32xf32>, vector<9x32xf32> -> vector<9x32xf32>
    %cst_387 = arith.constant dense<0.000000e+00> : vector<9x32xf32>
    %952 = tpu.matmul %949, %28, %cst_387 {dimension_numbers = #tpu.dot_dimension_numbers<[1], [0], [0], [1], [0, 0, 1, 1], [], []>} : vector<9x32xf32>, vector<32x32xf32>, vector<9x32xf32> -> vector<9x32xf32>
    %953 = tpu.transpose %25, [1, 0] : vector<16x16xf32> -> vector<16x16xf32>
    %954 = vector.extract_strided_slice %950 {offsets = [0, 0], sizes = [9, 16], strides = [1, 1]} : vector<9x32xf32> to vector<9x16xf32>
    %cst_388 = arith.constant 5.000000e-01 : f32
    %955 = vector.broadcast %cst_388 : f32 to vector<9x16xf32>
    %956 = arith.mulf %954, %955 : vector<9x16xf32>
    %957 = vector.extract_strided_slice %951 {offsets = [0, 0], sizes = [9, 16], strides = [1, 1]} : vector<9x32xf32> to vector<9x16xf32>
    %cst_389 = arith.constant 5.000000e-01 : f32
    %958 = vector.broadcast %cst_389 : f32 to vector<9x16xf32>
    %959 = arith.mulf %957, %958 : vector<9x16xf32>
    %960 = vector.extract_strided_slice %952 {offsets = [0, 0], sizes = [9, 16], strides = [1, 1]} : vector<9x32xf32> to vector<9x16xf32>
    %cst_390 = arith.constant dense<0.000000e+00> : vector<9x16xf32>
    %961 = tpu.matmul %956, %953, %cst_390 {dimension_numbers = #tpu.dot_dimension_numbers<[1], [0], [0], [1], [0, 0, 1, 1], [], []>} : vector<9x16xf32>, vector<16x16xf32>, vector<9x16xf32> -> vector<9x16xf32>
    %cst_391 = arith.constant dense<0.000000e+00> : vector<9x16xf32>
    %962 = tpu.matmul %959, %953, %cst_391 {dimension_numbers = #tpu.dot_dimension_numbers<[1], [0], [0], [1], [0, 0, 1, 1], [], []>} : vector<9x16xf32>, vector<16x16xf32>, vector<9x16xf32> -> vector<9x16xf32>
    %963 = arith.mulf %956, %956 : vector<9x16xf32>
    %cst_392 = arith.constant dense<0.000000e+00> : vector<9xf32>
    %964 = vector.multi_reduction <add>, %963, %cst_392 [1] : vector<9x16xf32> to vector<9xf32>
    %965 = vector.shape_cast %964 : vector<9xf32> to vector<9x1xf32>
    %cst_393 = arith.constant 5.000000e-01 : f32
    %966 = vector.broadcast %cst_393 : f32 to vector<9x1xf32>
    %967 = arith.mulf %966, %965 : vector<9x1xf32>
    %968 = arith.mulf %959, %959 : vector<9x16xf32>
    %cst_394 = arith.constant dense<0.000000e+00> : vector<9xf32>
    %969 = vector.multi_reduction <add>, %968, %cst_394 [1] : vector<9x16xf32> to vector<9xf32>
    %970 = vector.shape_cast %969 : vector<9xf32> to vector<9x1xf32>
    %cst_395 = arith.constant 5.000000e-01 : f32
    %971 = vector.broadcast %cst_395 : f32 to vector<9x1xf32>
    %972 = arith.mulf %971, %970 : vector<9x1xf32>
    %973 = vector.broadcast %967 : vector<9x1xf32> to vector<9x16xf32>
    %974 = arith.subf %961, %973 : vector<9x16xf32>
    %cst_396 = arith.constant dense<0xFF800000> : vector<9xf32>
    %975 = vector.multi_reduction <maximumf>, %961, %cst_396 [1] : vector<9x16xf32> to vector<9xf32>
    %976 = vector.shape_cast %975 : vector<9xf32> to vector<9x1xf32>
    %977 = vector.broadcast %976 : vector<9x1xf32> to vector<9x16xf32>
    %978 = arith.subf %974, %977 : vector<9x16xf32>
    %979 = math.exp %978 : vector<9x16xf32>
    %cst_397 = arith.constant 9.99999974E-5 : f32
    %980 = vector.broadcast %cst_397 : f32 to vector<9x16xf32>
    %981 = arith.addf %979, %980 : vector<9x16xf32>
    %cst_398 = arith.constant 2.500000e-01 : f32
    %982 = vector.broadcast %cst_398 : f32 to vector<9x16xf32>
    %983 = arith.mulf %982, %981 : vector<9x16xf32>
    %984 = vector.broadcast %972 : vector<9x1xf32> to vector<9x16xf32>
    %985 = arith.subf %962, %984 : vector<9x16xf32>
    %986 = vector.shape_cast %962 : vector<9x16xf32> to vector<1x9x16xf32>
    %cst_399 = arith.constant dense<0xFF800000> : vector<1xf32>
    %987 = vector.multi_reduction <maximumf>, %986, %cst_399 [1, 2] : vector<1x9x16xf32> to vector<1xf32>
    %988 = vector.shape_cast %987 : vector<1xf32> to vector<1x1x1xf32>
    %989 = vector.extract %988[0, 0, 0] : f32 from vector<1x1x1xf32>
    %990 = vector.broadcast %989 : f32 to vector<1x1xf32>
    %991 = vector.broadcast %990 : vector<1x1xf32> to vector<9x16xf32>
    %992 = arith.subf %985, %991 : vector<9x16xf32>
    %993 = math.exp %992 : vector<9x16xf32>
    %cst_400 = arith.constant 9.99999974E-5 : f32
    %994 = vector.broadcast %cst_400 : f32 to vector<9x16xf32>
    %995 = arith.addf %993, %994 : vector<9x16xf32>
    %cst_401 = arith.constant 2.500000e-01 : f32
    %996 = vector.broadcast %cst_401 : f32 to vector<9x16xf32>
    %997 = arith.mulf %996, %995 : vector<9x16xf32>
    %998 = tpu.transpose %997, [1, 0] : vector<9x16xf32> -> vector<16x9xf32>
    %cst_402 = arith.constant dense<0.000000e+00> : vector<16x16xf32>
    %999 = tpu.matmul %998, %960, %cst_402 {dimension_numbers = #tpu.dot_dimension_numbers<[1], [0], [0], [1], [0, 0, 1, 1], [], []>} : vector<16x9xf32>, vector<9x16xf32>, vector<16x16xf32> -> vector<16x16xf32>
    %cst_403 = arith.constant dense<0.000000e+00> : vector<16xf32>
    %1000 = vector.multi_reduction <add>, %997, %cst_403 [0] : vector<9x16xf32> to vector<16xf32>
    %1001 = vector.shape_cast %1000 : vector<16xf32> to vector<1x16xf32>
    %cst_404 = arith.constant dense<0.000000e+00> : vector<9x16xf32>
    %1002 = tpu.matmul %983, %999, %cst_404 {dimension_numbers = #tpu.dot_dimension_numbers<[1], [0], [0], [1], [0, 0, 1, 1], [], []>} : vector<9x16xf32>, vector<16x16xf32>, vector<9x16xf32> -> vector<9x16xf32>
    %1003 = vector.broadcast %1001 : vector<1x16xf32> to vector<9x16xf32>
    %1004 = arith.mulf %983, %1003 : vector<9x16xf32>
    %cst_405 = arith.constant dense<0.000000e+00> : vector<9xf32>
    %1005 = vector.multi_reduction <add>, %1004, %cst_405 [1] : vector<9x16xf32> to vector<9xf32>
    %1006 = vector.shape_cast %1005 : vector<9xf32> to vector<9x1xf32>
    %1007 = vector.broadcast %1006 : vector<9x1xf32> to vector<9x16xf32>
    %1008 = arith.divf %1002, %1007 : vector<9x16xf32>
    %1009 = vector.extract_strided_slice %24 {offsets = [0, 0], sizes = [16, 32], strides = [1, 1]} : vector<32x32xf32> to vector<16x32xf32>
    %cst_406 = arith.constant dense<0.000000e+00> : vector<9x32xf32>
    %1010 = tpu.matmul %1008, %1009, %cst_406 {dimension_numbers = #tpu.dot_dimension_numbers<[1], [0], [0], [1], [0, 0, 1, 1], [], []>} : vector<9x16xf32>, vector<16x32xf32>, vector<9x32xf32> -> vector<9x32xf32>
    %1011 = vector.extract_strided_slice %950 {offsets = [0, 16], sizes = [9, 16], strides = [1, 1]} : vector<9x32xf32> to vector<9x16xf32>
    %cst_407 = arith.constant 5.000000e-01 : f32
    %1012 = vector.broadcast %cst_407 : f32 to vector<9x16xf32>
    %1013 = arith.mulf %1011, %1012 : vector<9x16xf32>
    %1014 = vector.extract_strided_slice %951 {offsets = [0, 16], sizes = [9, 16], strides = [1, 1]} : vector<9x32xf32> to vector<9x16xf32>
    %cst_408 = arith.constant 5.000000e-01 : f32
    %1015 = vector.broadcast %cst_408 : f32 to vector<9x16xf32>
    %1016 = arith.mulf %1014, %1015 : vector<9x16xf32>
    %1017 = vector.extract_strided_slice %952 {offsets = [0, 16], sizes = [9, 16], strides = [1, 1]} : vector<9x32xf32> to vector<9x16xf32>
    %cst_409 = arith.constant dense<0.000000e+00> : vector<9x16xf32>
    %1018 = tpu.matmul %1013, %953, %cst_409 {dimension_numbers = #tpu.dot_dimension_numbers<[1], [0], [0], [1], [0, 0, 1, 1], [], []>} : vector<9x16xf32>, vector<16x16xf32>, vector<9x16xf32> -> vector<9x16xf32>
    %cst_410 = arith.constant dense<0.000000e+00> : vector<9x16xf32>
    %1019 = tpu.matmul %1016, %953, %cst_410 {dimension_numbers = #tpu.dot_dimension_numbers<[1], [0], [0], [1], [0, 0, 1, 1], [], []>} : vector<9x16xf32>, vector<16x16xf32>, vector<9x16xf32> -> vector<9x16xf32>
    %1020 = arith.mulf %1013, %1013 : vector<9x16xf32>
    %cst_411 = arith.constant dense<0.000000e+00> : vector<9xf32>
    %1021 = vector.multi_reduction <add>, %1020, %cst_411 [1] : vector<9x16xf32> to vector<9xf32>
    %1022 = vector.shape_cast %1021 : vector<9xf32> to vector<9x1xf32>
    %cst_412 = arith.constant 5.000000e-01 : f32
    %1023 = vector.broadcast %cst_412 : f32 to vector<9x1xf32>
    %1024 = arith.mulf %1023, %1022 : vector<9x1xf32>
    %1025 = arith.mulf %1016, %1016 : vector<9x16xf32>
    %cst_413 = arith.constant dense<0.000000e+00> : vector<9xf32>
    %1026 = vector.multi_reduction <add>, %1025, %cst_413 [1] : vector<9x16xf32> to vector<9xf32>
    %1027 = vector.shape_cast %1026 : vector<9xf32> to vector<9x1xf32>
    %cst_414 = arith.constant 5.000000e-01 : f32
    %1028 = vector.broadcast %cst_414 : f32 to vector<9x1xf32>
    %1029 = arith.mulf %1028, %1027 : vector<9x1xf32>
    %1030 = vector.broadcast %1024 : vector<9x1xf32> to vector<9x16xf32>
    %1031 = arith.subf %1018, %1030 : vector<9x16xf32>
    %cst_415 = arith.constant dense<0xFF800000> : vector<9xf32>
    %1032 = vector.multi_reduction <maximumf>, %1018, %cst_415 [1] : vector<9x16xf32> to vector<9xf32>
    %1033 = vector.shape_cast %1032 : vector<9xf32> to vector<9x1xf32>
    %1034 = vector.broadcast %1033 : vector<9x1xf32> to vector<9x16xf32>
    %1035 = arith.subf %1031, %1034 : vector<9x16xf32>
    %1036 = math.exp %1035 : vector<9x16xf32>
    %cst_416 = arith.constant 9.99999974E-5 : f32
    %1037 = vector.broadcast %cst_416 : f32 to vector<9x16xf32>
    %1038 = arith.addf %1036, %1037 : vector<9x16xf32>
    %cst_417 = arith.constant 2.500000e-01 : f32
    %1039 = vector.broadcast %cst_417 : f32 to vector<9x16xf32>
    %1040 = arith.mulf %1039, %1038 : vector<9x16xf32>
    %1041 = vector.broadcast %1029 : vector<9x1xf32> to vector<9x16xf32>
    %1042 = arith.subf %1019, %1041 : vector<9x16xf32>
    %1043 = vector.shape_cast %1019 : vector<9x16xf32> to vector<1x9x16xf32>
    %cst_418 = arith.constant dense<0xFF800000> : vector<1xf32>
    %1044 = vector.multi_reduction <maximumf>, %1043, %cst_418 [1, 2] : vector<1x9x16xf32> to vector<1xf32>
    %1045 = vector.shape_cast %1044 : vector<1xf32> to vector<1x1x1xf32>
    %1046 = vector.extract %1045[0, 0, 0] : f32 from vector<1x1x1xf32>
    %1047 = vector.broadcast %1046 : f32 to vector<1x1xf32>
    %1048 = vector.broadcast %1047 : vector<1x1xf32> to vector<9x16xf32>
    %1049 = arith.subf %1042, %1048 : vector<9x16xf32>
    %1050 = math.exp %1049 : vector<9x16xf32>
    %cst_419 = arith.constant 9.99999974E-5 : f32
    %1051 = vector.broadcast %cst_419 : f32 to vector<9x16xf32>
    %1052 = arith.addf %1050, %1051 : vector<9x16xf32>
    %cst_420 = arith.constant 2.500000e-01 : f32
    %1053 = vector.broadcast %cst_420 : f32 to vector<9x16xf32>
    %1054 = arith.mulf %1053, %1052 : vector<9x16xf32>
    %1055 = tpu.transpose %1054, [1, 0] : vector<9x16xf32> -> vector<16x9xf32>
    %cst_421 = arith.constant dense<0.000000e+00> : vector<16x16xf32>
    %1056 = tpu.matmul %1055, %1017, %cst_421 {dimension_numbers = #tpu.dot_dimension_numbers<[1], [0], [0], [1], [0, 0, 1, 1], [], []>} : vector<16x9xf32>, vector<9x16xf32>, vector<16x16xf32> -> vector<16x16xf32>
    %cst_422 = arith.constant dense<0.000000e+00> : vector<16xf32>
    %1057 = vector.multi_reduction <add>, %1054, %cst_422 [0] : vector<9x16xf32> to vector<16xf32>
    %1058 = vector.shape_cast %1057 : vector<16xf32> to vector<1x16xf32>
    %cst_423 = arith.constant dense<0.000000e+00> : vector<9x16xf32>
    %1059 = tpu.matmul %1040, %1056, %cst_423 {dimension_numbers = #tpu.dot_dimension_numbers<[1], [0], [0], [1], [0, 0, 1, 1], [], []>} : vector<9x16xf32>, vector<16x16xf32>, vector<9x16xf32> -> vector<9x16xf32>
    %1060 = vector.broadcast %1058 : vector<1x16xf32> to vector<9x16xf32>
    %1061 = arith.mulf %1040, %1060 : vector<9x16xf32>
    %cst_424 = arith.constant dense<0.000000e+00> : vector<9xf32>
    %1062 = vector.multi_reduction <add>, %1061, %cst_424 [1] : vector<9x16xf32> to vector<9xf32>
    %1063 = vector.shape_cast %1062 : vector<9xf32> to vector<9x1xf32>
    %1064 = vector.broadcast %1063 : vector<9x1xf32> to vector<9x16xf32>
    %1065 = arith.divf %1059, %1064 : vector<9x16xf32>
    %1066 = vector.extract_strided_slice %24 {offsets = [16, 0], sizes = [16, 32], strides = [1, 1]} : vector<32x32xf32> to vector<16x32xf32>
    %cst_425 = arith.constant dense<0.000000e+00> : vector<9x32xf32>
    %1067 = tpu.matmul %1065, %1066, %cst_425 {dimension_numbers = #tpu.dot_dimension_numbers<[1], [0], [0], [1], [0, 0, 1, 1], [], []>} : vector<9x16xf32>, vector<16x32xf32>, vector<9x32xf32> -> vector<9x32xf32>
    %1068 = arith.addf %1010, %1067 : vector<9x32xf32>
    %1069 = arith.addf %929, %1068 : vector<9x32xf32>
    %1070 = vector.broadcast %23 : vector<1x32xf32> to vector<9x32xf32>
    %1071 = arith.addf %1069, %1070 : vector<9x32xf32>
    %cst_426 = arith.constant dense<0.000000e+00> : vector<9xf32>
    %1072 = vector.multi_reduction <add>, %1071, %cst_426 [1] : vector<9x32xf32> to vector<9xf32>
    %1073 = vector.shape_cast %1072 : vector<9xf32> to vector<9x1xf32>
    %cst_427 = arith.constant 3.200000e+01 : f32
    %1074 = vector.broadcast %cst_427 : f32 to vector<9x1xf32>
    %1075 = arith.divf %1073, %1074 : vector<9x1xf32>
    %1076 = vector.broadcast %1075 : vector<9x1xf32> to vector<9x32xf32>
    %1077 = arith.subf %1071, %1076 : vector<9x32xf32>
    %1078 = arith.mulf %1077, %1077 : vector<9x32xf32>
    %cst_428 = arith.constant dense<0.000000e+00> : vector<9xf32>
    %1079 = vector.multi_reduction <add>, %1078, %cst_428 [1] : vector<9x32xf32> to vector<9xf32>
    %1080 = vector.shape_cast %1079 : vector<9xf32> to vector<9x1xf32>
    %cst_429 = arith.constant 3.200000e+01 : f32
    %1081 = vector.broadcast %cst_429 : f32 to vector<9x1xf32>
    %1082 = arith.divf %1080, %1081 : vector<9x1xf32>
    %cst_430 = arith.constant 9.99999974E-6 : f32
    %1083 = vector.broadcast %cst_430 : f32 to vector<9x1xf32>
    %1084 = arith.addf %1082, %1083 : vector<9x1xf32>
    %1085 = math.rsqrt %1084 : vector<9x1xf32>
    %1086 = vector.broadcast %1085 : vector<9x1xf32> to vector<9x32xf32>
    %1087 = arith.mulf %1077, %1086 : vector<9x32xf32>
    %1088 = vector.broadcast %22 : vector<1x32xf32> to vector<9x32xf32>
    %1089 = arith.mulf %1087, %1088 : vector<9x32xf32>
    %1090 = vector.broadcast %21 : vector<1x32xf32> to vector<9x32xf32>
    %1091 = arith.addf %1089, %1090 : vector<9x32xf32>
    %cst_431 = arith.constant dense<0.000000e+00> : vector<9x128xf32>
    %1092 = tpu.matmul %1091, %16, %cst_431 {dimension_numbers = #tpu.dot_dimension_numbers<[1], [0], [0], [1], [0, 0, 1, 1], [], []>} : vector<9x32xf32>, vector<32x128xf32>, vector<9x128xf32> -> vector<9x128xf32>
    %1093 = vector.broadcast %15 : vector<1x128xf32> to vector<9x128xf32>
    %1094 = arith.addf %1092, %1093 : vector<9x128xf32>
    %1095 = arith.mulf %1094, %1094 : vector<9x128xf32>
    %1096 = arith.mulf %1094, %1095 : vector<9x128xf32>
    %cst_432 = arith.constant 4.471500e-02 : f32
    %1097 = vector.broadcast %cst_432 : f32 to vector<9x128xf32>
    %1098 = arith.mulf %1097, %1096 : vector<9x128xf32>
    %1099 = arith.addf %1094, %1098 : vector<9x128xf32>
    %cst_433 = arith.constant 0.797884583 : f32
    %1100 = vector.broadcast %cst_433 : f32 to vector<9x128xf32>
    %1101 = arith.mulf %1100, %1099 : vector<9x128xf32>
    %1102 = math.tanh %1101 : vector<9x128xf32>
    %cst_434 = arith.constant 1.000000e+00 : f32
    %1103 = vector.broadcast %cst_434 : f32 to vector<9x128xf32>
    %1104 = arith.addf %1103, %1102 : vector<9x128xf32>
    %cst_435 = arith.constant 5.000000e-01 : f32
    %1105 = vector.broadcast %cst_435 : f32 to vector<9x128xf32>
    %1106 = arith.mulf %1105, %1104 : vector<9x128xf32>
    %1107 = arith.mulf %1094, %1106 : vector<9x128xf32>
    %cst_436 = arith.constant dense<0.000000e+00> : vector<9x32xf32>
    %1108 = tpu.matmul %1107, %18, %cst_436 {dimension_numbers = #tpu.dot_dimension_numbers<[1], [0], [0], [1], [0, 0, 1, 1], [], []>} : vector<9x128xf32>, vector<128x32xf32>, vector<9x32xf32> -> vector<9x32xf32>
    %1109 = vector.broadcast %17 : vector<1x32xf32> to vector<9x32xf32>
    %1110 = arith.addf %1108, %1109 : vector<9x32xf32>
    %1111 = arith.addf %1071, %1110 : vector<9x32xf32>
    %cst_437 = arith.constant dense<0.000000e+00> : vector<9xf32>
    %1112 = vector.multi_reduction <add>, %1111, %cst_437 [1] : vector<9x32xf32> to vector<9xf32>
    %1113 = vector.shape_cast %1112 : vector<9xf32> to vector<9x1xf32>
    %cst_438 = arith.constant 3.200000e+01 : f32
    %1114 = vector.broadcast %cst_438 : f32 to vector<9x1xf32>
    %1115 = arith.divf %1113, %1114 : vector<9x1xf32>
    %1116 = vector.broadcast %1115 : vector<9x1xf32> to vector<9x32xf32>
    %1117 = arith.subf %1111, %1116 : vector<9x32xf32>
    %1118 = arith.mulf %1117, %1117 : vector<9x32xf32>
    %cst_439 = arith.constant dense<0.000000e+00> : vector<9xf32>
    %1119 = vector.multi_reduction <add>, %1118, %cst_439 [1] : vector<9x32xf32> to vector<9xf32>
    %1120 = vector.shape_cast %1119 : vector<9xf32> to vector<9x1xf32>
    %cst_440 = arith.constant 3.200000e+01 : f32
    %1121 = vector.broadcast %cst_440 : f32 to vector<9x1xf32>
    %1122 = arith.divf %1120, %1121 : vector<9x1xf32>
    %cst_441 = arith.constant 9.99999974E-6 : f32
    %1123 = vector.broadcast %cst_441 : f32 to vector<9x1xf32>
    %1124 = arith.addf %1122, %1123 : vector<9x1xf32>
    %1125 = math.rsqrt %1124 : vector<9x1xf32>
    %1126 = vector.broadcast %1125 : vector<9x1xf32> to vector<9x32xf32>
    %1127 = arith.mulf %1117, %1126 : vector<9x32xf32>
    %1128 = vector.broadcast %30 : vector<1x32xf32> to vector<9x32xf32>
    %1129 = arith.mulf %1127, %1128 : vector<9x32xf32>
    %1130 = vector.broadcast %29 : vector<1x32xf32> to vector<9x32xf32>
    %1131 = arith.addf %1129, %1130 : vector<9x32xf32>
    %1132 = vector.extract_strided_slice %1131 {offsets = [0, 0], sizes = [1, 32], strides = [1, 1]} : vector<9x32xf32> to vector<1x32xf32>
    %1133 = arith.mulf %1132, %1132 : vector<1x32xf32>
    %cst_442 = arith.constant dense<0.000000e+00> : vector<1xf32>
    %1134 = vector.multi_reduction <add>, %1133, %cst_442 [1] : vector<1x32xf32> to vector<1xf32>
    %1135 = vector.shape_cast %1134 : vector<1xf32> to vector<1x1xf32>
    %1136 = math.rsqrt %1135 : vector<1x1xf32>
    %1137 = vector.broadcast %1136 : vector<1x1xf32> to vector<1x32xf32>
    %1138 = arith.mulf %1132, %1137 : vector<1x32xf32>
    %1139 = vector.extract_strided_slice %746 {offsets = [9, 0], sizes = [9, 32], strides = [1, 1]} : vector<18x32xf32> to vector<9x32xf32>
    %cst_443 = arith.constant dense<0.000000e+00> : vector<9xf32>
    %1140 = vector.multi_reduction <add>, %1139, %cst_443 [1] : vector<9x32xf32> to vector<9xf32>
    %1141 = vector.shape_cast %1140 : vector<9xf32> to vector<9x1xf32>
    %cst_444 = arith.constant 3.200000e+01 : f32
    %1142 = vector.broadcast %cst_444 : f32 to vector<9x1xf32>
    %1143 = arith.divf %1141, %1142 : vector<9x1xf32>
    %1144 = vector.broadcast %1143 : vector<9x1xf32> to vector<9x32xf32>
    %1145 = arith.subf %1139, %1144 : vector<9x32xf32>
    %1146 = arith.mulf %1145, %1145 : vector<9x32xf32>
    %cst_445 = arith.constant dense<0.000000e+00> : vector<9xf32>
    %1147 = vector.multi_reduction <add>, %1146, %cst_445 [1] : vector<9x32xf32> to vector<9xf32>
    %1148 = vector.shape_cast %1147 : vector<9xf32> to vector<9x1xf32>
    %cst_446 = arith.constant 3.200000e+01 : f32
    %1149 = vector.broadcast %cst_446 : f32 to vector<9x1xf32>
    %1150 = arith.divf %1148, %1149 : vector<9x1xf32>
    %cst_447 = arith.constant 9.99999974E-6 : f32
    %1151 = vector.broadcast %cst_447 : f32 to vector<9x1xf32>
    %1152 = arith.addf %1150, %1151 : vector<9x1xf32>
    %1153 = math.rsqrt %1152 : vector<9x1xf32>
    %1154 = vector.broadcast %1153 : vector<9x1xf32> to vector<9x32xf32>
    %1155 = arith.mulf %1145, %1154 : vector<9x32xf32>
    %1156 = vector.broadcast %6 : vector<1x32xf32> to vector<9x32xf32>
    %1157 = arith.mulf %1155, %1156 : vector<9x32xf32>
    %1158 = vector.broadcast %5 : vector<1x32xf32> to vector<9x32xf32>
    %1159 = arith.addf %1157, %1158 : vector<9x32xf32>
    %cst_448 = arith.constant dense<0.000000e+00> : vector<9x32xf32>
    %1160 = tpu.matmul %1159, %13, %cst_448 {dimension_numbers = #tpu.dot_dimension_numbers<[1], [0], [0], [1], [0, 0, 1, 1], [], []>} : vector<9x32xf32>, vector<32x32xf32>, vector<9x32xf32> -> vector<9x32xf32>
    %cst_449 = arith.constant dense<0.000000e+00> : vector<9x32xf32>
    %1161 = tpu.matmul %1159, %12, %cst_449 {dimension_numbers = #tpu.dot_dimension_numbers<[1], [0], [0], [1], [0, 0, 1, 1], [], []>} : vector<9x32xf32>, vector<32x32xf32>, vector<9x32xf32> -> vector<9x32xf32>
    %cst_450 = arith.constant dense<0.000000e+00> : vector<9x32xf32>
    %1162 = tpu.matmul %1159, %14, %cst_450 {dimension_numbers = #tpu.dot_dimension_numbers<[1], [0], [0], [1], [0, 0, 1, 1], [], []>} : vector<9x32xf32>, vector<32x32xf32>, vector<9x32xf32> -> vector<9x32xf32>
    %1163 = tpu.transpose %11, [1, 0] : vector<16x16xf32> -> vector<16x16xf32>
    %1164 = vector.extract_strided_slice %1160 {offsets = [0, 0], sizes = [9, 16], strides = [1, 1]} : vector<9x32xf32> to vector<9x16xf32>
    %cst_451 = arith.constant 5.000000e-01 : f32
    %1165 = vector.broadcast %cst_451 : f32 to vector<9x16xf32>
    %1166 = arith.mulf %1164, %1165 : vector<9x16xf32>
    %1167 = vector.extract_strided_slice %1161 {offsets = [0, 0], sizes = [9, 16], strides = [1, 1]} : vector<9x32xf32> to vector<9x16xf32>
    %cst_452 = arith.constant 5.000000e-01 : f32
    %1168 = vector.broadcast %cst_452 : f32 to vector<9x16xf32>
    %1169 = arith.mulf %1167, %1168 : vector<9x16xf32>
    %1170 = vector.extract_strided_slice %1162 {offsets = [0, 0], sizes = [9, 16], strides = [1, 1]} : vector<9x32xf32> to vector<9x16xf32>
    %cst_453 = arith.constant dense<0.000000e+00> : vector<9x16xf32>
    %1171 = tpu.matmul %1166, %1163, %cst_453 {dimension_numbers = #tpu.dot_dimension_numbers<[1], [0], [0], [1], [0, 0, 1, 1], [], []>} : vector<9x16xf32>, vector<16x16xf32>, vector<9x16xf32> -> vector<9x16xf32>
    %cst_454 = arith.constant dense<0.000000e+00> : vector<9x16xf32>
    %1172 = tpu.matmul %1169, %1163, %cst_454 {dimension_numbers = #tpu.dot_dimension_numbers<[1], [0], [0], [1], [0, 0, 1, 1], [], []>} : vector<9x16xf32>, vector<16x16xf32>, vector<9x16xf32> -> vector<9x16xf32>
    %1173 = arith.mulf %1166, %1166 : vector<9x16xf32>
    %cst_455 = arith.constant dense<0.000000e+00> : vector<9xf32>
    %1174 = vector.multi_reduction <add>, %1173, %cst_455 [1] : vector<9x16xf32> to vector<9xf32>
    %1175 = vector.shape_cast %1174 : vector<9xf32> to vector<9x1xf32>
    %cst_456 = arith.constant 5.000000e-01 : f32
    %1176 = vector.broadcast %cst_456 : f32 to vector<9x1xf32>
    %1177 = arith.mulf %1176, %1175 : vector<9x1xf32>
    %1178 = arith.mulf %1169, %1169 : vector<9x16xf32>
    %cst_457 = arith.constant dense<0.000000e+00> : vector<9xf32>
    %1179 = vector.multi_reduction <add>, %1178, %cst_457 [1] : vector<9x16xf32> to vector<9xf32>
    %1180 = vector.shape_cast %1179 : vector<9xf32> to vector<9x1xf32>
    %cst_458 = arith.constant 5.000000e-01 : f32
    %1181 = vector.broadcast %cst_458 : f32 to vector<9x1xf32>
    %1182 = arith.mulf %1181, %1180 : vector<9x1xf32>
    %1183 = vector.broadcast %1177 : vector<9x1xf32> to vector<9x16xf32>
    %1184 = arith.subf %1171, %1183 : vector<9x16xf32>
    %cst_459 = arith.constant dense<0xFF800000> : vector<9xf32>
    %1185 = vector.multi_reduction <maximumf>, %1171, %cst_459 [1] : vector<9x16xf32> to vector<9xf32>
    %1186 = vector.shape_cast %1185 : vector<9xf32> to vector<9x1xf32>
    %1187 = vector.broadcast %1186 : vector<9x1xf32> to vector<9x16xf32>
    %1188 = arith.subf %1184, %1187 : vector<9x16xf32>
    %1189 = math.exp %1188 : vector<9x16xf32>
    %cst_460 = arith.constant 9.99999974E-5 : f32
    %1190 = vector.broadcast %cst_460 : f32 to vector<9x16xf32>
    %1191 = arith.addf %1189, %1190 : vector<9x16xf32>
    %cst_461 = arith.constant 2.500000e-01 : f32
    %1192 = vector.broadcast %cst_461 : f32 to vector<9x16xf32>
    %1193 = arith.mulf %1192, %1191 : vector<9x16xf32>
    %1194 = vector.broadcast %1182 : vector<9x1xf32> to vector<9x16xf32>
    %1195 = arith.subf %1172, %1194 : vector<9x16xf32>
    %1196 = vector.shape_cast %1172 : vector<9x16xf32> to vector<1x9x16xf32>
    %cst_462 = arith.constant dense<0xFF800000> : vector<1xf32>
    %1197 = vector.multi_reduction <maximumf>, %1196, %cst_462 [1, 2] : vector<1x9x16xf32> to vector<1xf32>
    %1198 = vector.shape_cast %1197 : vector<1xf32> to vector<1x1x1xf32>
    %1199 = vector.extract %1198[0, 0, 0] : f32 from vector<1x1x1xf32>
    %1200 = vector.broadcast %1199 : f32 to vector<1x1xf32>
    %1201 = vector.broadcast %1200 : vector<1x1xf32> to vector<9x16xf32>
    %1202 = arith.subf %1195, %1201 : vector<9x16xf32>
    %1203 = math.exp %1202 : vector<9x16xf32>
    %cst_463 = arith.constant 9.99999974E-5 : f32
    %1204 = vector.broadcast %cst_463 : f32 to vector<9x16xf32>
    %1205 = arith.addf %1203, %1204 : vector<9x16xf32>
    %cst_464 = arith.constant 2.500000e-01 : f32
    %1206 = vector.broadcast %cst_464 : f32 to vector<9x16xf32>
    %1207 = arith.mulf %1206, %1205 : vector<9x16xf32>
    %1208 = tpu.transpose %1207, [1, 0] : vector<9x16xf32> -> vector<16x9xf32>
    %cst_465 = arith.constant dense<0.000000e+00> : vector<16x16xf32>
    %1209 = tpu.matmul %1208, %1170, %cst_465 {dimension_numbers = #tpu.dot_dimension_numbers<[1], [0], [0], [1], [0, 0, 1, 1], [], []>} : vector<16x9xf32>, vector<9x16xf32>, vector<16x16xf32> -> vector<16x16xf32>
    %cst_466 = arith.constant dense<0.000000e+00> : vector<16xf32>
    %1210 = vector.multi_reduction <add>, %1207, %cst_466 [0] : vector<9x16xf32> to vector<16xf32>
    %1211 = vector.shape_cast %1210 : vector<16xf32> to vector<1x16xf32>
    %cst_467 = arith.constant dense<0.000000e+00> : vector<9x16xf32>
    %1212 = tpu.matmul %1193, %1209, %cst_467 {dimension_numbers = #tpu.dot_dimension_numbers<[1], [0], [0], [1], [0, 0, 1, 1], [], []>} : vector<9x16xf32>, vector<16x16xf32>, vector<9x16xf32> -> vector<9x16xf32>
    %1213 = vector.broadcast %1211 : vector<1x16xf32> to vector<9x16xf32>
    %1214 = arith.mulf %1193, %1213 : vector<9x16xf32>
    %cst_468 = arith.constant dense<0.000000e+00> : vector<9xf32>
    %1215 = vector.multi_reduction <add>, %1214, %cst_468 [1] : vector<9x16xf32> to vector<9xf32>
    %1216 = vector.shape_cast %1215 : vector<9xf32> to vector<9x1xf32>
    %1217 = vector.broadcast %1216 : vector<9x1xf32> to vector<9x16xf32>
    %1218 = arith.divf %1212, %1217 : vector<9x16xf32>
    %1219 = vector.extract_strided_slice %10 {offsets = [0, 0], sizes = [16, 32], strides = [1, 1]} : vector<32x32xf32> to vector<16x32xf32>
    %cst_469 = arith.constant dense<0.000000e+00> : vector<9x32xf32>
    %1220 = tpu.matmul %1218, %1219, %cst_469 {dimension_numbers = #tpu.dot_dimension_numbers<[1], [0], [0], [1], [0, 0, 1, 1], [], []>} : vector<9x16xf32>, vector<16x32xf32>, vector<9x32xf32> -> vector<9x32xf32>
    %1221 = vector.extract_strided_slice %1160 {offsets = [0, 16], sizes = [9, 16], strides = [1, 1]} : vector<9x32xf32> to vector<9x16xf32>
    %cst_470 = arith.constant 5.000000e-01 : f32
    %1222 = vector.broadcast %cst_470 : f32 to vector<9x16xf32>
    %1223 = arith.mulf %1221, %1222 : vector<9x16xf32>
    %1224 = vector.extract_strided_slice %1161 {offsets = [0, 16], sizes = [9, 16], strides = [1, 1]} : vector<9x32xf32> to vector<9x16xf32>
    %cst_471 = arith.constant 5.000000e-01 : f32
    %1225 = vector.broadcast %cst_471 : f32 to vector<9x16xf32>
    %1226 = arith.mulf %1224, %1225 : vector<9x16xf32>
    %1227 = vector.extract_strided_slice %1162 {offsets = [0, 16], sizes = [9, 16], strides = [1, 1]} : vector<9x32xf32> to vector<9x16xf32>
    %cst_472 = arith.constant dense<0.000000e+00> : vector<9x16xf32>
    %1228 = tpu.matmul %1223, %1163, %cst_472 {dimension_numbers = #tpu.dot_dimension_numbers<[1], [0], [0], [1], [0, 0, 1, 1], [], []>} : vector<9x16xf32>, vector<16x16xf32>, vector<9x16xf32> -> vector<9x16xf32>
    %cst_473 = arith.constant dense<0.000000e+00> : vector<9x16xf32>
    %1229 = tpu.matmul %1226, %1163, %cst_473 {dimension_numbers = #tpu.dot_dimension_numbers<[1], [0], [0], [1], [0, 0, 1, 1], [], []>} : vector<9x16xf32>, vector<16x16xf32>, vector<9x16xf32> -> vector<9x16xf32>
    %1230 = arith.mulf %1223, %1223 : vector<9x16xf32>
    %cst_474 = arith.constant dense<0.000000e+00> : vector<9xf32>
    %1231 = vector.multi_reduction <add>, %1230, %cst_474 [1] : vector<9x16xf32> to vector<9xf32>
    %1232 = vector.shape_cast %1231 : vector<9xf32> to vector<9x1xf32>
    %cst_475 = arith.constant 5.000000e-01 : f32
    %1233 = vector.broadcast %cst_475 : f32 to vector<9x1xf32>
    %1234 = arith.mulf %1233, %1232 : vector<9x1xf32>
    %1235 = arith.mulf %1226, %1226 : vector<9x16xf32>
    %cst_476 = arith.constant dense<0.000000e+00> : vector<9xf32>
    %1236 = vector.multi_reduction <add>, %1235, %cst_476 [1] : vector<9x16xf32> to vector<9xf32>
    %1237 = vector.shape_cast %1236 : vector<9xf32> to vector<9x1xf32>
    %cst_477 = arith.constant 5.000000e-01 : f32
    %1238 = vector.broadcast %cst_477 : f32 to vector<9x1xf32>
    %1239 = arith.mulf %1238, %1237 : vector<9x1xf32>
    %1240 = vector.broadcast %1234 : vector<9x1xf32> to vector<9x16xf32>
    %1241 = arith.subf %1228, %1240 : vector<9x16xf32>
    %cst_478 = arith.constant dense<0xFF800000> : vector<9xf32>
    %1242 = vector.multi_reduction <maximumf>, %1228, %cst_478 [1] : vector<9x16xf32> to vector<9xf32>
    %1243 = vector.shape_cast %1242 : vector<9xf32> to vector<9x1xf32>
    %1244 = vector.broadcast %1243 : vector<9x1xf32> to vector<9x16xf32>
    %1245 = arith.subf %1241, %1244 : vector<9x16xf32>
    %1246 = math.exp %1245 : vector<9x16xf32>
    %cst_479 = arith.constant 9.99999974E-5 : f32
    %1247 = vector.broadcast %cst_479 : f32 to vector<9x16xf32>
    %1248 = arith.addf %1246, %1247 : vector<9x16xf32>
    %cst_480 = arith.constant 2.500000e-01 : f32
    %1249 = vector.broadcast %cst_480 : f32 to vector<9x16xf32>
    %1250 = arith.mulf %1249, %1248 : vector<9x16xf32>
    %1251 = vector.broadcast %1239 : vector<9x1xf32> to vector<9x16xf32>
    %1252 = arith.subf %1229, %1251 : vector<9x16xf32>
    %1253 = vector.shape_cast %1229 : vector<9x16xf32> to vector<1x9x16xf32>
    %cst_481 = arith.constant dense<0xFF800000> : vector<1xf32>
    %1254 = vector.multi_reduction <maximumf>, %1253, %cst_481 [1, 2] : vector<1x9x16xf32> to vector<1xf32>
    %1255 = vector.shape_cast %1254 : vector<1xf32> to vector<1x1x1xf32>
    %1256 = vector.extract %1255[0, 0, 0] : f32 from vector<1x1x1xf32>
    %1257 = vector.broadcast %1256 : f32 to vector<1x1xf32>
    %1258 = vector.broadcast %1257 : vector<1x1xf32> to vector<9x16xf32>
    %1259 = arith.subf %1252, %1258 : vector<9x16xf32>
    %1260 = math.exp %1259 : vector<9x16xf32>
    %cst_482 = arith.constant 9.99999974E-5 : f32
    %1261 = vector.broadcast %cst_482 : f32 to vector<9x16xf32>
    %1262 = arith.addf %1260, %1261 : vector<9x16xf32>
    %cst_483 = arith.constant 2.500000e-01 : f32
    %1263 = vector.broadcast %cst_483 : f32 to vector<9x16xf32>
    %1264 = arith.mulf %1263, %1262 : vector<9x16xf32>
    %1265 = tpu.transpose %1264, [1, 0] : vector<9x16xf32> -> vector<16x9xf32>
    %cst_484 = arith.constant dense<0.000000e+00> : vector<16x16xf32>
    %1266 = tpu.matmul %1265, %1227, %cst_484 {dimension_numbers = #tpu.dot_dimension_numbers<[1], [0], [0], [1], [0, 0, 1, 1], [], []>} : vector<16x9xf32>, vector<9x16xf32>, vector<16x16xf32> -> vector<16x16xf32>
    %cst_485 = arith.constant dense<0.000000e+00> : vector<16xf32>
    %1267 = vector.multi_reduction <add>, %1264, %cst_485 [0] : vector<9x16xf32> to vector<16xf32>
    %1268 = vector.shape_cast %1267 : vector<16xf32> to vector<1x16xf32>
    %cst_486 = arith.constant dense<0.000000e+00> : vector<9x16xf32>
    %1269 = tpu.matmul %1250, %1266, %cst_486 {dimension_numbers = #tpu.dot_dimension_numbers<[1], [0], [0], [1], [0, 0, 1, 1], [], []>} : vector<9x16xf32>, vector<16x16xf32>, vector<9x16xf32> -> vector<9x16xf32>
    %1270 = vector.broadcast %1268 : vector<1x16xf32> to vector<9x16xf32>
    %1271 = arith.mulf %1250, %1270 : vector<9x16xf32>
    %cst_487 = arith.constant dense<0.000000e+00> : vector<9xf32>
    %1272 = vector.multi_reduction <add>, %1271, %cst_487 [1] : vector<9x16xf32> to vector<9xf32>
    %1273 = vector.shape_cast %1272 : vector<9xf32> to vector<9x1xf32>
    %1274 = vector.broadcast %1273 : vector<9x1xf32> to vector<9x16xf32>
    %1275 = arith.divf %1269, %1274 : vector<9x16xf32>
    %1276 = vector.extract_strided_slice %10 {offsets = [16, 0], sizes = [16, 32], strides = [1, 1]} : vector<32x32xf32> to vector<16x32xf32>
    %cst_488 = arith.constant dense<0.000000e+00> : vector<9x32xf32>
    %1277 = tpu.matmul %1275, %1276, %cst_488 {dimension_numbers = #tpu.dot_dimension_numbers<[1], [0], [0], [1], [0, 0, 1, 1], [], []>} : vector<9x16xf32>, vector<16x32xf32>, vector<9x32xf32> -> vector<9x32xf32>
    %1278 = arith.addf %1220, %1277 : vector<9x32xf32>
    %1279 = arith.addf %1139, %1278 : vector<9x32xf32>
    %1280 = vector.broadcast %9 : vector<1x32xf32> to vector<9x32xf32>
    %1281 = arith.addf %1279, %1280 : vector<9x32xf32>
    %cst_489 = arith.constant dense<0.000000e+00> : vector<9xf32>
    %1282 = vector.multi_reduction <add>, %1281, %cst_489 [1] : vector<9x32xf32> to vector<9xf32>
    %1283 = vector.shape_cast %1282 : vector<9xf32> to vector<9x1xf32>
    %cst_490 = arith.constant 3.200000e+01 : f32
    %1284 = vector.broadcast %cst_490 : f32 to vector<9x1xf32>
    %1285 = arith.divf %1283, %1284 : vector<9x1xf32>
    %1286 = vector.broadcast %1285 : vector<9x1xf32> to vector<9x32xf32>
    %1287 = arith.subf %1281, %1286 : vector<9x32xf32>
    %1288 = arith.mulf %1287, %1287 : vector<9x32xf32>
    %cst_491 = arith.constant dense<0.000000e+00> : vector<9xf32>
    %1289 = vector.multi_reduction <add>, %1288, %cst_491 [1] : vector<9x32xf32> to vector<9xf32>
    %1290 = vector.shape_cast %1289 : vector<9xf32> to vector<9x1xf32>
    %cst_492 = arith.constant 3.200000e+01 : f32
    %1291 = vector.broadcast %cst_492 : f32 to vector<9x1xf32>
    %1292 = arith.divf %1290, %1291 : vector<9x1xf32>
    %cst_493 = arith.constant 9.99999974E-6 : f32
    %1293 = vector.broadcast %cst_493 : f32 to vector<9x1xf32>
    %1294 = arith.addf %1292, %1293 : vector<9x1xf32>
    %1295 = math.rsqrt %1294 : vector<9x1xf32>
    %1296 = vector.broadcast %1295 : vector<9x1xf32> to vector<9x32xf32>
    %1297 = arith.mulf %1287, %1296 : vector<9x32xf32>
    %1298 = vector.broadcast %8 : vector<1x32xf32> to vector<9x32xf32>
    %1299 = arith.mulf %1297, %1298 : vector<9x32xf32>
    %1300 = vector.broadcast %7 : vector<1x32xf32> to vector<9x32xf32>
    %1301 = arith.addf %1299, %1300 : vector<9x32xf32>
    %cst_494 = arith.constant dense<0.000000e+00> : vector<9x128xf32>
    %1302 = tpu.matmul %1301, %2, %cst_494 {dimension_numbers = #tpu.dot_dimension_numbers<[1], [0], [0], [1], [0, 0, 1, 1], [], []>} : vector<9x32xf32>, vector<32x128xf32>, vector<9x128xf32> -> vector<9x128xf32>
    %1303 = vector.broadcast %1 : vector<1x128xf32> to vector<9x128xf32>
    %1304 = arith.addf %1302, %1303 : vector<9x128xf32>
    %1305 = arith.mulf %1304, %1304 : vector<9x128xf32>
    %1306 = arith.mulf %1304, %1305 : vector<9x128xf32>
    %cst_495 = arith.constant 4.471500e-02 : f32
    %1307 = vector.broadcast %cst_495 : f32 to vector<9x128xf32>
    %1308 = arith.mulf %1307, %1306 : vector<9x128xf32>
    %1309 = arith.addf %1304, %1308 : vector<9x128xf32>
    %cst_496 = arith.constant 0.797884583 : f32
    %1310 = vector.broadcast %cst_496 : f32 to vector<9x128xf32>
    %1311 = arith.mulf %1310, %1309 : vector<9x128xf32>
    %1312 = math.tanh %1311 : vector<9x128xf32>
    %cst_497 = arith.constant 1.000000e+00 : f32
    %1313 = vector.broadcast %cst_497 : f32 to vector<9x128xf32>
    %1314 = arith.addf %1313, %1312 : vector<9x128xf32>
    %cst_498 = arith.constant 5.000000e-01 : f32
    %1315 = vector.broadcast %cst_498 : f32 to vector<9x128xf32>
    %1316 = arith.mulf %1315, %1314 : vector<9x128xf32>
    %1317 = arith.mulf %1304, %1316 : vector<9x128xf32>
    %cst_499 = arith.constant dense<0.000000e+00> : vector<9x32xf32>
    %1318 = tpu.matmul %1317, %4, %cst_499 {dimension_numbers = #tpu.dot_dimension_numbers<[1], [0], [0], [1], [0, 0, 1, 1], [], []>} : vector<9x128xf32>, vector<128x32xf32>, vector<9x32xf32> -> vector<9x32xf32>
    %1319 = vector.broadcast %3 : vector<1x32xf32> to vector<9x32xf32>
    %1320 = arith.addf %1318, %1319 : vector<9x32xf32>
    %1321 = arith.addf %1281, %1320 : vector<9x32xf32>
    %cst_500 = arith.constant dense<0.000000e+00> : vector<9xf32>
    %1322 = vector.multi_reduction <add>, %1321, %cst_500 [1] : vector<9x32xf32> to vector<9xf32>
    %1323 = vector.shape_cast %1322 : vector<9xf32> to vector<9x1xf32>
    %cst_501 = arith.constant 3.200000e+01 : f32
    %1324 = vector.broadcast %cst_501 : f32 to vector<9x1xf32>
    %1325 = arith.divf %1323, %1324 : vector<9x1xf32>
    %1326 = vector.broadcast %1325 : vector<9x1xf32> to vector<9x32xf32>
    %1327 = arith.subf %1321, %1326 : vector<9x32xf32>
    %1328 = arith.mulf %1327, %1327 : vector<9x32xf32>
    %cst_502 = arith.constant dense<0.000000e+00> : vector<9xf32>
    %1329 = vector.multi_reduction <add>, %1328, %cst_502 [1] : vector<9x32xf32> to vector<9xf32>
    %1330 = vector.shape_cast %1329 : vector<9xf32> to vector<9x1xf32>
    %cst_503 = arith.constant 3.200000e+01 : f32
    %1331 = vector.broadcast %cst_503 : f32 to vector<9x1xf32>
    %1332 = arith.divf %1330, %1331 : vector<9x1xf32>
    %cst_504 = arith.constant 9.99999974E-6 : f32
    %1333 = vector.broadcast %cst_504 : f32 to vector<9x1xf32>
    %1334 = arith.addf %1332, %1333 : vector<9x1xf32>
    %1335 = math.rsqrt %1334 : vector<9x1xf32>
    %1336 = vector.broadcast %1335 : vector<9x1xf32> to vector<9x32xf32>
    %1337 = arith.mulf %1327, %1336 : vector<9x32xf32>
    %1338 = vector.broadcast %20 : vector<1x32xf32> to vector<9x32xf32>
    %1339 = arith.mulf %1337, %1338 : vector<9x32xf32>
    %1340 = vector.broadcast %19 : vector<1x32xf32> to vector<9x32xf32>
    %1341 = arith.addf %1339, %1340 : vector<9x32xf32>
    %cst_505 = arith.constant dense<0.000000e+00> : vector<9x32xf32>
    %1342 = tpu.matmul %1341, %27, %cst_505 {dimension_numbers = #tpu.dot_dimension_numbers<[1], [0], [0], [1], [0, 0, 1, 1], [], []>} : vector<9x32xf32>, vector<32x32xf32>, vector<9x32xf32> -> vector<9x32xf32>
    %cst_506 = arith.constant dense<0.000000e+00> : vector<9x32xf32>
    %1343 = tpu.matmul %1341, %26, %cst_506 {dimension_numbers = #tpu.dot_dimension_numbers<[1], [0], [0], [1], [0, 0, 1, 1], [], []>} : vector<9x32xf32>, vector<32x32xf32>, vector<9x32xf32> -> vector<9x32xf32>
    %cst_507 = arith.constant dense<0.000000e+00> : vector<9x32xf32>
    %1344 = tpu.matmul %1341, %28, %cst_507 {dimension_numbers = #tpu.dot_dimension_numbers<[1], [0], [0], [1], [0, 0, 1, 1], [], []>} : vector<9x32xf32>, vector<32x32xf32>, vector<9x32xf32> -> vector<9x32xf32>
    %1345 = tpu.transpose %25, [1, 0] : vector<16x16xf32> -> vector<16x16xf32>
    %1346 = vector.extract_strided_slice %1342 {offsets = [0, 0], sizes = [9, 16], strides = [1, 1]} : vector<9x32xf32> to vector<9x16xf32>
    %cst_508 = arith.constant 5.000000e-01 : f32
    %1347 = vector.broadcast %cst_508 : f32 to vector<9x16xf32>
    %1348 = arith.mulf %1346, %1347 : vector<9x16xf32>
    %1349 = vector.extract_strided_slice %1343 {offsets = [0, 0], sizes = [9, 16], strides = [1, 1]} : vector<9x32xf32> to vector<9x16xf32>
    %cst_509 = arith.constant 5.000000e-01 : f32
    %1350 = vector.broadcast %cst_509 : f32 to vector<9x16xf32>
    %1351 = arith.mulf %1349, %1350 : vector<9x16xf32>
    %1352 = vector.extract_strided_slice %1344 {offsets = [0, 0], sizes = [9, 16], strides = [1, 1]} : vector<9x32xf32> to vector<9x16xf32>
    %cst_510 = arith.constant dense<0.000000e+00> : vector<9x16xf32>
    %1353 = tpu.matmul %1348, %1345, %cst_510 {dimension_numbers = #tpu.dot_dimension_numbers<[1], [0], [0], [1], [0, 0, 1, 1], [], []>} : vector<9x16xf32>, vector<16x16xf32>, vector<9x16xf32> -> vector<9x16xf32>
    %cst_511 = arith.constant dense<0.000000e+00> : vector<9x16xf32>
    %1354 = tpu.matmul %1351, %1345, %cst_511 {dimension_numbers = #tpu.dot_dimension_numbers<[1], [0], [0], [1], [0, 0, 1, 1], [], []>} : vector<9x16xf32>, vector<16x16xf32>, vector<9x16xf32> -> vector<9x16xf32>
    %1355 = arith.mulf %1348, %1348 : vector<9x16xf32>
    %cst_512 = arith.constant dense<0.000000e+00> : vector<9xf32>
    %1356 = vector.multi_reduction <add>, %1355, %cst_512 [1] : vector<9x16xf32> to vector<9xf32>
    %1357 = vector.shape_cast %1356 : vector<9xf32> to vector<9x1xf32>
    %cst_513 = arith.constant 5.000000e-01 : f32
    %1358 = vector.broadcast %cst_513 : f32 to vector<9x1xf32>
    %1359 = arith.mulf %1358, %1357 : vector<9x1xf32>
    %1360 = arith.mulf %1351, %1351 : vector<9x16xf32>
    %cst_514 = arith.constant dense<0.000000e+00> : vector<9xf32>
    %1361 = vector.multi_reduction <add>, %1360, %cst_514 [1] : vector<9x16xf32> to vector<9xf32>
    %1362 = vector.shape_cast %1361 : vector<9xf32> to vector<9x1xf32>
    %cst_515 = arith.constant 5.000000e-01 : f32
    %1363 = vector.broadcast %cst_515 : f32 to vector<9x1xf32>
    %1364 = arith.mulf %1363, %1362 : vector<9x1xf32>
    %1365 = vector.broadcast %1359 : vector<9x1xf32> to vector<9x16xf32>
    %1366 = arith.subf %1353, %1365 : vector<9x16xf32>
    %cst_516 = arith.constant dense<0xFF800000> : vector<9xf32>
    %1367 = vector.multi_reduction <maximumf>, %1353, %cst_516 [1] : vector<9x16xf32> to vector<9xf32>
    %1368 = vector.shape_cast %1367 : vector<9xf32> to vector<9x1xf32>
    %1369 = vector.broadcast %1368 : vector<9x1xf32> to vector<9x16xf32>
    %1370 = arith.subf %1366, %1369 : vector<9x16xf32>
    %1371 = math.exp %1370 : vector<9x16xf32>
    %cst_517 = arith.constant 9.99999974E-5 : f32
    %1372 = vector.broadcast %cst_517 : f32 to vector<9x16xf32>
    %1373 = arith.addf %1371, %1372 : vector<9x16xf32>
    %cst_518 = arith.constant 2.500000e-01 : f32
    %1374 = vector.broadcast %cst_518 : f32 to vector<9x16xf32>
    %1375 = arith.mulf %1374, %1373 : vector<9x16xf32>
    %1376 = vector.broadcast %1364 : vector<9x1xf32> to vector<9x16xf32>
    %1377 = arith.subf %1354, %1376 : vector<9x16xf32>
    %1378 = vector.shape_cast %1354 : vector<9x16xf32> to vector<1x9x16xf32>
    %cst_519 = arith.constant dense<0xFF800000> : vector<1xf32>
    %1379 = vector.multi_reduction <maximumf>, %1378, %cst_519 [1, 2] : vector<1x9x16xf32> to vector<1xf32>
    %1380 = vector.shape_cast %1379 : vector<1xf32> to vector<1x1x1xf32>
    %1381 = vector.extract %1380[0, 0, 0] : f32 from vector<1x1x1xf32>
    %1382 = vector.broadcast %1381 : f32 to vector<1x1xf32>
    %1383 = vector.broadcast %1382 : vector<1x1xf32> to vector<9x16xf32>
    %1384 = arith.subf %1377, %1383 : vector<9x16xf32>
    %1385 = math.exp %1384 : vector<9x16xf32>
    %cst_520 = arith.constant 9.99999974E-5 : f32
    %1386 = vector.broadcast %cst_520 : f32 to vector<9x16xf32>
    %1387 = arith.addf %1385, %1386 : vector<9x16xf32>
    %cst_521 = arith.constant 2.500000e-01 : f32
    %1388 = vector.broadcast %cst_521 : f32 to vector<9x16xf32>
    %1389 = arith.mulf %1388, %1387 : vector<9x16xf32>
    %1390 = tpu.transpose %1389, [1, 0] : vector<9x16xf32> -> vector<16x9xf32>
    %cst_522 = arith.constant dense<0.000000e+00> : vector<16x16xf32>
    %1391 = tpu.matmul %1390, %1352, %cst_522 {dimension_numbers = #tpu.dot_dimension_numbers<[1], [0], [0], [1], [0, 0, 1, 1], [], []>} : vector<16x9xf32>, vector<9x16xf32>, vector<16x16xf32> -> vector<16x16xf32>
    %cst_523 = arith.constant dense<0.000000e+00> : vector<16xf32>
    %1392 = vector.multi_reduction <add>, %1389, %cst_523 [0] : vector<9x16xf32> to vector<16xf32>
    %1393 = vector.shape_cast %1392 : vector<16xf32> to vector<1x16xf32>
    %cst_524 = arith.constant dense<0.000000e+00> : vector<9x16xf32>
    %1394 = tpu.matmul %1375, %1391, %cst_524 {dimension_numbers = #tpu.dot_dimension_numbers<[1], [0], [0], [1], [0, 0, 1, 1], [], []>} : vector<9x16xf32>, vector<16x16xf32>, vector<9x16xf32> -> vector<9x16xf32>
    %1395 = vector.broadcast %1393 : vector<1x16xf32> to vector<9x16xf32>
    %1396 = arith.mulf %1375, %1395 : vector<9x16xf32>
    %cst_525 = arith.constant dense<0.000000e+00> : vector<9xf32>
    %1397 = vector.multi_reduction <add>, %1396, %cst_525 [1] : vector<9x16xf32> to vector<9xf32>
    %1398 = vector.shape_cast %1397 : vector<9xf32> to vector<9x1xf32>
    %1399 = vector.broadcast %1398 : vector<9x1xf32> to vector<9x16xf32>
    %1400 = arith.divf %1394, %1399 : vector<9x16xf32>
    %1401 = vector.extract_strided_slice %24 {offsets = [0, 0], sizes = [16, 32], strides = [1, 1]} : vector<32x32xf32> to vector<16x32xf32>
    %cst_526 = arith.constant dense<0.000000e+00> : vector<9x32xf32>
    %1402 = tpu.matmul %1400, %1401, %cst_526 {dimension_numbers = #tpu.dot_dimension_numbers<[1], [0], [0], [1], [0, 0, 1, 1], [], []>} : vector<9x16xf32>, vector<16x32xf32>, vector<9x32xf32> -> vector<9x32xf32>
    %1403 = vector.extract_strided_slice %1342 {offsets = [0, 16], sizes = [9, 16], strides = [1, 1]} : vector<9x32xf32> to vector<9x16xf32>
    %cst_527 = arith.constant 5.000000e-01 : f32
    %1404 = vector.broadcast %cst_527 : f32 to vector<9x16xf32>
    %1405 = arith.mulf %1403, %1404 : vector<9x16xf32>
    %1406 = vector.extract_strided_slice %1343 {offsets = [0, 16], sizes = [9, 16], strides = [1, 1]} : vector<9x32xf32> to vector<9x16xf32>
    %cst_528 = arith.constant 5.000000e-01 : f32
    %1407 = vector.broadcast %cst_528 : f32 to vector<9x16xf32>
    %1408 = arith.mulf %1406, %1407 : vector<9x16xf32>
    %1409 = vector.extract_strided_slice %1344 {offsets = [0, 16], sizes = [9, 16], strides = [1, 1]} : vector<9x32xf32> to vector<9x16xf32>
    %cst_529 = arith.constant dense<0.000000e+00> : vector<9x16xf32>
    %1410 = tpu.matmul %1405, %1345, %cst_529 {dimension_numbers = #tpu.dot_dimension_numbers<[1], [0], [0], [1], [0, 0, 1, 1], [], []>} : vector<9x16xf32>, vector<16x16xf32>, vector<9x16xf32> -> vector<9x16xf32>
    %cst_530 = arith.constant dense<0.000000e+00> : vector<9x16xf32>
    %1411 = tpu.matmul %1408, %1345, %cst_530 {dimension_numbers = #tpu.dot_dimension_numbers<[1], [0], [0], [1], [0, 0, 1, 1], [], []>} : vector<9x16xf32>, vector<16x16xf32>, vector<9x16xf32> -> vector<9x16xf32>
    %1412 = arith.mulf %1405, %1405 : vector<9x16xf32>
    %cst_531 = arith.constant dense<0.000000e+00> : vector<9xf32>
    %1413 = vector.multi_reduction <add>, %1412, %cst_531 [1] : vector<9x16xf32> to vector<9xf32>
    %1414 = vector.shape_cast %1413 : vector<9xf32> to vector<9x1xf32>
    %cst_532 = arith.constant 5.000000e-01 : f32
    %1415 = vector.broadcast %cst_532 : f32 to vector<9x1xf32>
    %1416 = arith.mulf %1415, %1414 : vector<9x1xf32>
    %1417 = arith.mulf %1408, %1408 : vector<9x16xf32>
    %cst_533 = arith.constant dense<0.000000e+00> : vector<9xf32>
    %1418 = vector.multi_reduction <add>, %1417, %cst_533 [1] : vector<9x16xf32> to vector<9xf32>
    %1419 = vector.shape_cast %1418 : vector<9xf32> to vector<9x1xf32>
    %cst_534 = arith.constant 5.000000e-01 : f32
    %1420 = vector.broadcast %cst_534 : f32 to vector<9x1xf32>
    %1421 = arith.mulf %1420, %1419 : vector<9x1xf32>
    %1422 = vector.broadcast %1416 : vector<9x1xf32> to vector<9x16xf32>
    %1423 = arith.subf %1410, %1422 : vector<9x16xf32>
    %cst_535 = arith.constant dense<0xFF800000> : vector<9xf32>
    %1424 = vector.multi_reduction <maximumf>, %1410, %cst_535 [1] : vector<9x16xf32> to vector<9xf32>
    %1425 = vector.shape_cast %1424 : vector<9xf32> to vector<9x1xf32>
    %1426 = vector.broadcast %1425 : vector<9x1xf32> to vector<9x16xf32>
    %1427 = arith.subf %1423, %1426 : vector<9x16xf32>
    %1428 = math.exp %1427 : vector<9x16xf32>
    %cst_536 = arith.constant 9.99999974E-5 : f32
    %1429 = vector.broadcast %cst_536 : f32 to vector<9x16xf32>
    %1430 = arith.addf %1428, %1429 : vector<9x16xf32>
    %cst_537 = arith.constant 2.500000e-01 : f32
    %1431 = vector.broadcast %cst_537 : f32 to vector<9x16xf32>
    %1432 = arith.mulf %1431, %1430 : vector<9x16xf32>
    %1433 = vector.broadcast %1421 : vector<9x1xf32> to vector<9x16xf32>
    %1434 = arith.subf %1411, %1433 : vector<9x16xf32>
    %1435 = vector.shape_cast %1411 : vector<9x16xf32> to vector<1x9x16xf32>
    %cst_538 = arith.constant dense<0xFF800000> : vector<1xf32>
    %1436 = vector.multi_reduction <maximumf>, %1435, %cst_538 [1, 2] : vector<1x9x16xf32> to vector<1xf32>
    %1437 = vector.shape_cast %1436 : vector<1xf32> to vector<1x1x1xf32>
    %1438 = vector.extract %1437[0, 0, 0] : f32 from vector<1x1x1xf32>
    %1439 = vector.broadcast %1438 : f32 to vector<1x1xf32>
    %1440 = vector.broadcast %1439 : vector<1x1xf32> to vector<9x16xf32>
    %1441 = arith.subf %1434, %1440 : vector<9x16xf32>
    %1442 = math.exp %1441 : vector<9x16xf32>
    %cst_539 = arith.constant 9.99999974E-5 : f32
    %1443 = vector.broadcast %cst_539 : f32 to vector<9x16xf32>
    %1444 = arith.addf %1442, %1443 : vector<9x16xf32>
    %cst_540 = arith.constant 2.500000e-01 : f32
    %1445 = vector.broadcast %cst_540 : f32 to vector<9x16xf32>
    %1446 = arith.mulf %1445, %1444 : vector<9x16xf32>
    %1447 = tpu.transpose %1446, [1, 0] : vector<9x16xf32> -> vector<16x9xf32>
    %cst_541 = arith.constant dense<0.000000e+00> : vector<16x16xf32>
    %1448 = tpu.matmul %1447, %1409, %cst_541 {dimension_numbers = #tpu.dot_dimension_numbers<[1], [0], [0], [1], [0, 0, 1, 1], [], []>} : vector<16x9xf32>, vector<9x16xf32>, vector<16x16xf32> -> vector<16x16xf32>
    %cst_542 = arith.constant dense<0.000000e+00> : vector<16xf32>
    %1449 = vector.multi_reduction <add>, %1446, %cst_542 [0] : vector<9x16xf32> to vector<16xf32>
    %1450 = vector.shape_cast %1449 : vector<16xf32> to vector<1x16xf32>
    %cst_543 = arith.constant dense<0.000000e+00> : vector<9x16xf32>
    %1451 = tpu.matmul %1432, %1448, %cst_543 {dimension_numbers = #tpu.dot_dimension_numbers<[1], [0], [0], [1], [0, 0, 1, 1], [], []>} : vector<9x16xf32>, vector<16x16xf32>, vector<9x16xf32> -> vector<9x16xf32>
    %1452 = vector.broadcast %1450 : vector<1x16xf32> to vector<9x16xf32>
    %1453 = arith.mulf %1432, %1452 : vector<9x16xf32>
    %cst_544 = arith.constant dense<0.000000e+00> : vector<9xf32>
    %1454 = vector.multi_reduction <add>, %1453, %cst_544 [1] : vector<9x16xf32> to vector<9xf32>
    %1455 = vector.shape_cast %1454 : vector<9xf32> to vector<9x1xf32>
    %1456 = vector.broadcast %1455 : vector<9x1xf32> to vector<9x16xf32>
    %1457 = arith.divf %1451, %1456 : vector<9x16xf32>
    %1458 = vector.extract_strided_slice %24 {offsets = [16, 0], sizes = [16, 32], strides = [1, 1]} : vector<32x32xf32> to vector<16x32xf32>
    %cst_545 = arith.constant dense<0.000000e+00> : vector<9x32xf32>
    %1459 = tpu.matmul %1457, %1458, %cst_545 {dimension_numbers = #tpu.dot_dimension_numbers<[1], [0], [0], [1], [0, 0, 1, 1], [], []>} : vector<9x16xf32>, vector<16x32xf32>, vector<9x32xf32> -> vector<9x32xf32>
    %1460 = arith.addf %1402, %1459 : vector<9x32xf32>
    %1461 = arith.addf %1321, %1460 : vector<9x32xf32>
    %1462 = vector.broadcast %23 : vector<1x32xf32> to vector<9x32xf32>
    %1463 = arith.addf %1461, %1462 : vector<9x32xf32>
    %cst_546 = arith.constant dense<0.000000e+00> : vector<9xf32>
    %1464 = vector.multi_reduction <add>, %1463, %cst_546 [1] : vector<9x32xf32> to vector<9xf32>
    %1465 = vector.shape_cast %1464 : vector<9xf32> to vector<9x1xf32>
    %cst_547 = arith.constant 3.200000e+01 : f32
    %1466 = vector.broadcast %cst_547 : f32 to vector<9x1xf32>
    %1467 = arith.divf %1465, %1466 : vector<9x1xf32>
    %1468 = vector.broadcast %1467 : vector<9x1xf32> to vector<9x32xf32>
    %1469 = arith.subf %1463, %1468 : vector<9x32xf32>
    %1470 = arith.mulf %1469, %1469 : vector<9x32xf32>
    %cst_548 = arith.constant dense<0.000000e+00> : vector<9xf32>
    %1471 = vector.multi_reduction <add>, %1470, %cst_548 [1] : vector<9x32xf32> to vector<9xf32>
    %1472 = vector.shape_cast %1471 : vector<9xf32> to vector<9x1xf32>
    %cst_549 = arith.constant 3.200000e+01 : f32
    %1473 = vector.broadcast %cst_549 : f32 to vector<9x1xf32>
    %1474 = arith.divf %1472, %1473 : vector<9x1xf32>
    %cst_550 = arith.constant 9.99999974E-6 : f32
    %1475 = vector.broadcast %cst_550 : f32 to vector<9x1xf32>
    %1476 = arith.addf %1474, %1475 : vector<9x1xf32>
    %1477 = math.rsqrt %1476 : vector<9x1xf32>
    %1478 = vector.broadcast %1477 : vector<9x1xf32> to vector<9x32xf32>
    %1479 = arith.mulf %1469, %1478 : vector<9x32xf32>
    %1480 = vector.broadcast %22 : vector<1x32xf32> to vector<9x32xf32>
    %1481 = arith.mulf %1479, %1480 : vector<9x32xf32>
    %1482 = vector.broadcast %21 : vector<1x32xf32> to vector<9x32xf32>
    %1483 = arith.addf %1481, %1482 : vector<9x32xf32>
    %cst_551 = arith.constant dense<0.000000e+00> : vector<9x128xf32>
    %1484 = tpu.matmul %1483, %16, %cst_551 {dimension_numbers = #tpu.dot_dimension_numbers<[1], [0], [0], [1], [0, 0, 1, 1], [], []>} : vector<9x32xf32>, vector<32x128xf32>, vector<9x128xf32> -> vector<9x128xf32>
    %1485 = vector.broadcast %15 : vector<1x128xf32> to vector<9x128xf32>
    %1486 = arith.addf %1484, %1485 : vector<9x128xf32>
    %1487 = arith.mulf %1486, %1486 : vector<9x128xf32>
    %1488 = arith.mulf %1486, %1487 : vector<9x128xf32>
    %cst_552 = arith.constant 4.471500e-02 : f32
    %1489 = vector.broadcast %cst_552 : f32 to vector<9x128xf32>
    %1490 = arith.mulf %1489, %1488 : vector<9x128xf32>
    %1491 = arith.addf %1486, %1490 : vector<9x128xf32>
    %cst_553 = arith.constant 0.797884583 : f32
    %1492 = vector.broadcast %cst_553 : f32 to vector<9x128xf32>
    %1493 = arith.mulf %1492, %1491 : vector<9x128xf32>
    %1494 = math.tanh %1493 : vector<9x128xf32>
    %cst_554 = arith.constant 1.000000e+00 : f32
    %1495 = vector.broadcast %cst_554 : f32 to vector<9x128xf32>
    %1496 = arith.addf %1495, %1494 : vector<9x128xf32>
    %cst_555 = arith.constant 5.000000e-01 : f32
    %1497 = vector.broadcast %cst_555 : f32 to vector<9x128xf32>
    %1498 = arith.mulf %1497, %1496 : vector<9x128xf32>
    %1499 = arith.mulf %1486, %1498 : vector<9x128xf32>
    %cst_556 = arith.constant dense<0.000000e+00> : vector<9x32xf32>
    %1500 = tpu.matmul %1499, %18, %cst_556 {dimension_numbers = #tpu.dot_dimension_numbers<[1], [0], [0], [1], [0, 0, 1, 1], [], []>} : vector<9x128xf32>, vector<128x32xf32>, vector<9x32xf32> -> vector<9x32xf32>
    %1501 = vector.broadcast %17 : vector<1x32xf32> to vector<9x32xf32>
    %1502 = arith.addf %1500, %1501 : vector<9x32xf32>
    %1503 = arith.addf %1463, %1502 : vector<9x32xf32>
    %cst_557 = arith.constant dense<0.000000e+00> : vector<9xf32>
    %1504 = vector.multi_reduction <add>, %1503, %cst_557 [1] : vector<9x32xf32> to vector<9xf32>
    %1505 = vector.shape_cast %1504 : vector<9xf32> to vector<9x1xf32>
    %cst_558 = arith.constant 3.200000e+01 : f32
    %1506 = vector.broadcast %cst_558 : f32 to vector<9x1xf32>
    %1507 = arith.divf %1505, %1506 : vector<9x1xf32>
    %1508 = vector.broadcast %1507 : vector<9x1xf32> to vector<9x32xf32>
    %1509 = arith.subf %1503, %1508 : vector<9x32xf32>
    %1510 = arith.mulf %1509, %1509 : vector<9x32xf32>
    %cst_559 = arith.constant dense<0.000000e+00> : vector<9xf32>
    %1511 = vector.multi_reduction <add>, %1510, %cst_559 [1] : vector<9x32xf32> to vector<9xf32>
    %1512 = vector.shape_cast %1511 : vector<9xf32> to vector<9x1xf32>
    %cst_560 = arith.constant 3.200000e+01 : f32
    %1513 = vector.broadcast %cst_560 : f32 to vector<9x1xf32>
    %1514 = arith.divf %1512, %1513 : vector<9x1xf32>
    %cst_561 = arith.constant 9.99999974E-6 : f32
    %1515 = vector.broadcast %cst_561 : f32 to vector<9x1xf32>
    %1516 = arith.addf %1514, %1515 : vector<9x1xf32>
    %1517 = math.rsqrt %1516 : vector<9x1xf32>
    %1518 = vector.broadcast %1517 : vector<9x1xf32> to vector<9x32xf32>
    %1519 = arith.mulf %1509, %1518 : vector<9x32xf32>
    %1520 = vector.broadcast %30 : vector<1x32xf32> to vector<9x32xf32>
    %1521 = arith.mulf %1519, %1520 : vector<9x32xf32>
    %1522 = vector.broadcast %29 : vector<1x32xf32> to vector<9x32xf32>
    %1523 = arith.addf %1521, %1522 : vector<9x32xf32>
    %1524 = vector.extract_strided_slice %1523 {offsets = [0, 0], sizes = [1, 32], strides = [1, 1]} : vector<9x32xf32> to vector<1x32xf32>
    %1525 = arith.mulf %1524, %1524 : vector<1x32xf32>
    %cst_562 = arith.constant dense<0.000000e+00> : vector<1xf32>
    %1526 = vector.multi_reduction <add>, %1525, %cst_562 [1] : vector<1x32xf32> to vector<1xf32>
    %1527 = vector.shape_cast %1526 : vector<1xf32> to vector<1x1xf32>
    %1528 = math.rsqrt %1527 : vector<1x1xf32>
    %1529 = vector.broadcast %1528 : vector<1x1xf32> to vector<1x32xf32>
    %1530 = arith.mulf %1524, %1529 : vector<1x32xf32>
    %1531 = tpu.concatenate %405, %745 in 0 : vector<1x32xf32>, vector<1x32xf32> -> vector<2x32xf32>
    %1532 = tpu.concatenate %1138, %1530 in 0 : vector<1x32xf32>, vector<1x32xf32> -> vector<2x32xf32>
    %1533 = tpu.transpose %1532, [1, 0] : vector<2x32xf32> -> vector<32x2xf32>
    %cst_563 = arith.constant dense<0.000000e+00> : vector<2x2xf32>
    %1534 = tpu.matmul %1531, %1533, %cst_563 {dimension_numbers = #tpu.dot_dimension_numbers<[1], [0], [0], [1], [0, 0, 1, 1], [], []>} : vector<2x32xf32>, vector<32x2xf32>, vector<2x2xf32> -> vector<2x2xf32>
    %cst_564 = arith.constant 14.2857141 : f32
    %1535 = vector.broadcast %cst_564 : f32 to vector<2x2xf32>
    %1536 = arith.mulf %1535, %1534 : vector<2x2xf32>
    %c0_565 = arith.constant 0 : index
    %c0_566 = arith.constant 0 : index
    %1537 = vector.load %arg64[%c0_565, %c0_566] : memref<2x2xf32, #tpu.memory_space<vmem>>, vector<2x2xf32>
    tpu.vector_store %arg64[%c0_565, %c0_566], %1536 {strides = array<i32>} : memref<2x2xf32, #tpu.memory_space<vmem>>, vector<2x2xf32>,
    return
  }
}

</mosaic_0001>

<bundles_post_ra>
// kernel: forward.1
= control target key start
LH: loop header
LB: loop body
LE: loop exit
PB: predicated region body
PF: predicated region fallthrough
CT: control target
= control target key end

     0   :  { %s16064_s6 = smov 1   ;;  %s16065_s10 = smov 2   ;;  %s18363_s0 = inlined_call_operand.smem [shape: u32[65], index: -1, kind: input, shape index: {}] }
   0x1   :  { %s16174_s5 = sld [smem:[%s18363_s0]]   ;;  %s16066_s14 = smov 3  }
   0x2   :  { %s16179_s9 = sld [smem:[%s18363_s0 + %s16064_s6]]   ;;  %s16067_s18 = smov 4  }
   0x3   :  { %s16184_s13 = sld [smem:[%s18363_s0 + %s16065_s10]]   ;;  %s16068_s22 = smov 5  }
   0x4   :  { %s16189_s17 = sld [smem:[%s18363_s0 + %s16066_s14]]   ;;  %s16069_s26 = smov 6  }
   0x5   :  { %s16194_s21 = sld [smem:[%s18363_s0 + %s16067_s18]]   ;;  %s16070_s30 = smov 7  }
   0x6   :  { %s16199_s25 = sld [smem:[%s18363_s0 + %s16068_s22]]   ;;  %s16071_s4 = smov 8  }
   0x7   :  { %18419 = sst [smem:[#allocation51_spill]] %s16174_s5  ;;  %s16072_s10 = smov 9  }
   0x8   :  { %18420 = sst [smem:[#allocation52_spill]] %s16179_s9  ;;  %s16073_s15 = smov 10  }
   0x9   :  { %18421 = sst [smem:[#allocation53_spill]] %s16184_s13  ;;  %s16074_s20 = smov 11  }
   0xa   :  { %18422 = sst [smem:[#allocation54_spill]] %s16189_s17  ;;  %s16076_s1 = smov 13  }
   0xb   :  { %18423 = sst [smem:[#allocation55_spill]] %s16194_s21  ;;  %s16077_s7 = smov 14  }
   0xc   :  { %18424 = sst [smem:[#allocation56_spill]] %s16199_s25  ;;  %s16079_s22 = smov 16  }
   0xd   :  { %s16204_s29 = sld [smem:[%s18363_s0 + %s16069_s26]]   ;;  %s16075_s26 = smov 12  }
   0xe   :  { %s16209_s3 = sld [smem:[%s18363_s0 + %s16070_s30]]   ;;  %s16080_s28 = smov 17  }
   0xf   :  { %s16214_s8 = sld [smem:[%s18363_s0 + %s16071_s4]]  }
  0x10   :  { %s16219_s14 = sld [smem:[%s18363_s0 + %s16072_s10]]  }
  0x11   :  { %s16224_s19 = sld [smem:[%s18363_s0 + %s16073_s15]]   ;;  %s16078_s15 = smov 15  }
  0x12   :  { %s16229_s24 = sld [smem:[%s18363_s0 + %s16074_s20]]  }
  0x13   :  { %18425 = sst [smem:[#allocation57_spill]] %s16204_s29 }
  0x14   :  { %18426 = sst [smem:[#allocation58_spill]] %s16209_s3 }
  0x15   :  { %18427 = sst [smem:[#allocation59_spill]] %s16214_s8 }
  0x16   :  { %18428 = sst [smem:[#allocation60_spill]] %s16219_s14 }
  0x17   :  { %18429 = sst [smem:[#allocation61_spill]] %s16224_s19 }
  0x18   :  { %18430 = sst [smem:[#allocation62_spill]] %s16229_s24 }
  0x19   :  { %s16234_s30 = sld [smem:[%s18363_s0 + %s16075_s26]]  }
  0x1a   :  { %s16239_s6 = sld [smem:[%s18363_s0 + %s16076_s1]]  }
  0x1b   :  { %s16244_s12 = sld [smem:[%s18363_s0 + %s16077_s7]]   ;;  %s16081_s7 = smov 18  }
  0x1c   :  { %s16249_s20 = sld [smem:[%s18363_s0 + %s16078_s15]]   ;;  %s16082_s15 = smov 19  }
  0x1d   :  { %s16254_s27 = sld [smem:[%s18363_s0 + %s16079_s22]]   ;;  %s16083_s22 = smov 20  }
  0x1e   :  { %s16259_s4 = sld [smem:[%s18363_s0 + %s16080_s28]]   ;;  %s16084_s28 = smov 21  }
  0x1f   :  { %18431 = sst [smem:[#allocation63_spill]] %s16234_s30 }
  0x20   :  { %18432 = sst [smem:[#allocation64_spill]] %s16239_s6 }
  0x21   :  { %18433 = sst [smem:[#allocation65_spill]] %s16244_s12 }
  0x22   :  { %18434 = sst [smem:[#allocation66_spill]] %s16249_s20 }
  0x23   :  { %18435 = sst [smem:[#allocation67_spill]] %s16254_s27 }
  0x24   :  { %18436 = sst [smem:[#allocation68_spill]] %s16259_s4 }
  0x25   :  { %s16264_s25 = sld [smem:[%s18363_s0 + %s16081_s7]]   ;;  %s16085_s7 = smov 22  }
  0x26   :  { %s16269_s17 = sld [smem:[%s18363_s0 + %s16082_s15]]   ;;  %s16086_s15 = smov 23  }
  0x27   :  { %s16274_s29 = sld [smem:[%s18363_s0 + %s16083_s22]]   ;;  %s16087_s22 = smov 24  }
  0x28   :  { %s16279_s4 = sld [smem:[%s18363_s0 + %s16084_s28]]   ;;  %s16088_s28 = smov 25  }
  0x2b   :  { %18437 = sst [smem:[#allocation69_spill]] %s16264_s25 }
  0x2c   :  { %18438 = sst [smem:[#allocation70_spill]] %s16269_s17 }
  0x2d   :  { %18439 = sst [smem:[#allocation71_spill]] %s16274_s29 }
  0x2e   :  { %18440 = sst [smem:[#allocation72_spill]] %s16279_s4 }
  0x2f   :  { %s16284_s25 = sld [smem:[%s18363_s0 + %s16085_s7]]   ;;  %s16089_s7 = smov 26  }
  0x30   :  { %s16289_s17 = sld [smem:[%s18363_s0 + %s16086_s15]]   ;;  %s16090_s15 = smov 27  }
  0x31   :  { %s16294_s29 = sld [smem:[%s18363_s0 + %s16087_s22]]   ;;  %s16091_s22 = smov 28  }
  0x32   :  { %s16299_s4 = sld [smem:[%s18363_s0 + %s16088_s28]]   ;;  %s16092_s28 = smov 29  }
  0x35   :  { %18441 = sst [smem:[#allocation73_spill]] %s16284_s25 }
  0x36   :  { %18442 = sst [smem:[#allocation74_spill]] %s16289_s17 }
  0x37   :  { %18443 = sst [smem:[#allocation75_spill]] %s16294_s29 }
  0x38   :  { %18444 = sst [smem:[#allocation76_spill]] %s16299_s4 }
  0x39   :  { %s16304_s25 = sld [smem:[%s18363_s0 + %s16089_s7]]   ;;  %s16093_s7 = smov 30  }
  0x3a   :  { %s16309_s17 = sld [smem:[%s18363_s0 + %s16090_s15]]   ;;  %s16094_s15 = smov 31  }
  0x3b   :  { %s16314_s29 = sld [smem:[%s18363_s0 + %s16091_s22]]   ;;  %s16095_s22 = smov 32  }
  0x3c   :  { %s16319_s4 = sld [smem:[%s18363_s0 + %s16092_s28]]   ;;  %s16096_s28 = smov 33  }
  0x3f   :  { %18445 = sst [smem:[#allocation77_spill]] %s16304_s25 }
  0x40   :  { %18446 = sst [smem:[#allocation78_spill]] %s16309_s17 }
  0x41   :  { %18447 = sst [smem:[#allocation79_spill]] %s16314_s29 }
  0x42   :  { %18448 = sst [smem:[#allocation80_spill]] %s16319_s4 }
  0x43   :  { %s16324_s25 = sld [smem:[%s18363_s0 + %s16093_s7]]   ;;  %s16097_s7 = smov 34  }
  0x44   :  { %s16329_s17 = sld [smem:[%s18363_s0 + %s16094_s15]]   ;;  %s16098_s15 = smov 35  }
  0x45   :  { %s16334_s29 = sld [smem:[%s18363_s0 + %s16095_s22]]   ;;  %s16099_s22 = smov 36  }
  0x46   :  { %s16339_s4 = sld [smem:[%s18363_s0 + %s16096_s28]]   ;;  %s16100_s28 = smov 37  }
  0x47   :  { %s16349_s14 = sld [smem:[%s18363_s0 + %s16098_s15]]   ;;  %s16102_s15 = smov 39  }
  0x48   :  { %s16354_s19 = sld [smem:[%s18363_s0 + %s16099_s22]]   ;;  %s16103_s22 = smov 40  }
  0x49   :  { %18449 = sst [smem:[#allocation81_spill]] %s16324_s25 }
  0x4a   :  { %s16344_s25 = sld [smem:[%s18363_s0 + %s16097_s7]]   ;;  %s16101_s7 = smov 38  }
  0x4b   :  { %s16359_s21 = sld [smem:[%s18363_s0 + %s16100_s28]]   ;;  %s16104_s28 = smov 41  }
  0x4c   :  { %s16364_s24 = sld [smem:[%s18363_s0 + %s16101_s7]]   ;;  %s16105_s7 = smov 42  }
  0x4d   :  { %18451 = sst [smem:[#allocation83_spill]] %s16349_s14 }
  0x4e   :  { %s16369_s30 = sld [smem:[%s18363_s0 + %s16102_s15]]   ;;  %s16106_s15 = smov 43  }
  0x4f   :  { %s16374_s6 = sld [smem:[%s18363_s0 + %s16103_s22]]   ;;  %s16107_s22 = smov 44  }
  0x50   :  { %18450 = sst [smem:[#allocation82_spill]] %s16344_s25 }
  0x51   :  { %18452 = sst [smem:[#allocation84_spill]] %s16359_s21 }
  0x52   :  { %s16379_s27 = sld [smem:[%s18363_s0 + %s16104_s28]]   ;;  %s16108_s28 = smov 45  }
  0x53   :  { %s16384_s12 = sld [smem:[%s18363_s0 + %s16105_s7]]   ;;  %s16109_s7 = smov 46  }
  0x54   :  { %18453 = sst [smem:[#allocation85_spill]] %s16369_s30 }
  0x55   :  { %s16389_s3 = sld [smem:[%s18363_s0 + %s16106_s15]]   ;;  %s16110_s15 = smov 47  }
  0x56   :  { %s16394_s8 = sld [smem:[%s18363_s0 + %s16107_s22]]   ;;  %s16111_s22 = smov 48  }
  0x57   :  { %s16399_s20 = sld [smem:[%s18363_s0 + %s16108_s28]]   ;;  %s16112_s28 = smov 49  }
  0x58   :  { %s16404_s9 = sld [smem:[%s18363_s0 + %s16109_s7]]   ;;  %s16113_s7 = smov 50  }
  0x59   :  { %s16409_s30 = sld [smem:[%s18363_s0 + %s16110_s15]]   ;;  %s16114_s15 = smov 51  }
  0x5a   :  { %s16414_s21 = sld [smem:[%s18363_s0 + %s16111_s22]]   ;;  %s16115_s22 = smov 52  }
  0x5b   :  { %18454 = sst [smem:[#allocation86_spill]] %s16389_s3 }
  0x5c   :  { %s16424_s14 = sld [smem:[%s18363_s0 + %s16113_s7]]   ;;  %s16117_s7 = smov 54  }
  0x5d   :  { %18455 = sst [smem:[#allocation87_spill]] %s16399_s20 }
  0x5e   :  { %18456 = sst [smem:[#allocation88_spill]] %s16404_s9 }
  0x5f   :  { %18457 = sst [smem:[#allocation89_spill]] %s16409_s30 }
  0x60   :  { %s16419_s20 = sld [smem:[%s18363_s0 + %s16112_s28]]   ;;  %s16116_s28 = smov 53  }
  0x61   :  { %s16429_s30 = sld [smem:[%s18363_s0 + %s16114_s15]]   ;;  %s16118_s15 = smov 55  }
  0x62   :  { %18459 = sst [smem:[#allocation91_spill]] %s16424_s14 }
  0x63   :  { %s16434_s13 = sld [smem:[%s18363_s0 + %s16115_s22]]   ;;  %s16119_s22 = smov 56  }
  0x64   :  { %s16444_s5 = sld [smem:[%s18363_s0 + %s16117_s7]]   ;;  %s16121_s7 = smov 58  }
  0x65   :  { %s16454_s25 = sld [smem:[%s18363_s0 + %s16119_s22]]   ;;  %s16123_s22 = smov 60  }
  0x66   :  { %18458 = sst [smem:[#allocation90_spill]] %s16419_s20 }
  0x67   :  { %18460 = sst [smem:[#allocation92_spill]] %s16429_s30 }
  0x68   :  { %s16439_s20 = sld [smem:[%s18363_s0 + %s16116_s28]]   ;;  %s16120_s28 = smov 57  }
  0x69   :  { %s16449_s30 = sld [smem:[%s18363_s0 + %s16118_s15]]   ;;  %s16122_s15 = smov 59  }
  0x6a   :  { %s16464_s14 = sld [smem:[%s18363_s0 + %s16121_s7]]   ;;  %s16125_s7 = smov 62  }
  0x6b   :  { %s16474_s9 = sld [smem:[%s18363_s0 + %s16123_s22]]   ;;  %s16127_s22 = smov 64  }
  0x6c   :  { %s16494_s3 = sld [smem:[%s18363_s0 + %s16127_s22]]  }
  0x6e   :  { %18461 = sst [smem:[#allocation93_spill]] %s16439_s20 }
  0x6f   :  { %18462 = sst [smem:[#allocation94_spill]] %s16449_s30 }
  0x70   :  { %s16459_s20 = sld [smem:[%s18363_s0 + %s16120_s28]]   ;;  %s16124_s28 = smov 61  }
  0x71   :  { %18464 = sst [smem:[#allocation96_spill]] %s16464_s14 }
  0x72   :  { %s16469_s30 = sld [smem:[%s18363_s0 + %s16122_s15]]   ;;  %s16126_s15 = smov 63  }
  0x73   :  { %s16484_s14 = sld [smem:[%s18363_s0 + %s16125_s7]]  }
  0x76   :  { %18463 = sst [smem:[#allocation95_spill]] %s16459_s20 }
  0x77   :  { %s16479_s20 = sld [smem:[%s18363_s0 + %s16124_s28]]  }
  0x78   :  { %18465 = sst [smem:[#allocation97_spill]] %s16469_s30 }
  0x79   :  { %s16489_s30 = sld [smem:[%s18363_s0 + %s16126_s15]]  }
  0x7a   :  { %134 = vsyncpa [#allocation3], 0 }
  0x7b   :  { %135 = vsyncpa [#allocation6], 0 }
  0x7c   :  { %136 = vsyncpa [#allocation9], 0 }
  0x7d   :  { %137 = vsyncpa [#allocation12], 0 }
  0x7e   :  { %138 = vsyncpa [#allocation15], 0 }
  0x7f   :  { %139 = vsyncpa [#allocation18], 0 }
  0x80   :  { %140 = vsyncpa [#allocation21], 0 }
  0x81   :  { %141 = vsyncpa [#allocation24], 0 }
  0x82   :  { %142 = vsyncpa [#allocation27], 0 }
  0x83   :  { %143 = vsyncpa [#allocation30], 0 }
  0x84   :  { %144 = vsyncpa [#allocation33], 0 }
  0x85   :  { %145 = vsyncpa [#allocation36], 0 }
  0x86   :  { %146 = vsyncpa [#allocation4], 0  ;;  %s16128_s28 = smov [#allocation5]   ;;  %s16129_s0 = smov [#allocation8]  }
  0x87   :  { %s225_s1 = sshll.u32 %s16128_s28, 4  ;;  %s249_s2 = sshll.u32 %s16129_s0, 4  ;;  %s226_s1 = int_to_ptr.vmem [resolvable:$true] %s225_s1  ;;  %s250_s2 = int_to_ptr.vmem [resolvable:$true] %s249_s2 }
  0x88   :  { %s15532_s7 = scalar_lea.hbm %s16334_s29, 16 }
  0x89   :  { %p15533_p0 = scmp.ne.s32.totalorder %s16334_s29, %s15532_s7  ;;  %p15536_p1 = scmp.lt.u32.totalorder %s15532_s7, %s16334_s29 }
  0x8b   :  { %p15538_p2 = pnand %p15536_p1, %p15533_p0 }
  0x8d   :  { %15541 = shalt.err (!%p15538_p2)
}
  0x8e   :  { %s15542_s10 = scalar_lea.vmem %s226_s1, 16  ;;  %s15546_s11 = scalar_lea.vmem %s226_s1, 32 }
  0x8f   :  { %p15543_p3 = scmp.ne.s32.totalorder %s226_s1, %s15542_s10  ;;  %p15547_p4 = scmp.lt.s32.totalorder %s226_s1, %s226_s1 }
  0x90   :  { %p15548_p5 = scmp.lt.s32.totalorder %s15546_s11, %s15542_s10 }
  0x92   :  { %p15549_p6 = por %p15548_p5, %p15547_p4 }
  0x94   :  { %p15550_p7 = pnand %p15549_p6, %p15543_p3 }
  0x96   :  { %15553 = shalt.err (!%p15550_p7)
}
  0x97   :  { %228 = dma.hbm_to_vmem [thread:$0]  %s16334_s29, 16, %s226_s1, [#allocation6]  }
  0x98   :  { %s15554_s15 = scalar_lea.hbm %s16354_s19, 16 }
  0x99   :  { %p15555_p8 = scmp.ne.s32.totalorder %s16354_s19, %s15554_s15  ;;  %p15558_p9 = scmp.lt.u32.totalorder %s15554_s15, %s16354_s19 }
  0x9b   :  { %p15560_p10 = pnand %p15558_p9, %p15555_p8 }
  0x9d   :  { %15563 = shalt.err (!%p15560_p10)
}
  0x9e   :  { %s15564_s16 = scalar_lea.vmem %s250_s2, 16  ;;  %s15568_s18 = scalar_lea.vmem %s250_s2, 32 }
  0x9f   :  { %p15565_p11 = scmp.ne.s32.totalorder %s250_s2, %s15564_s16  ;;  %p15569_p12 = scmp.lt.s32.totalorder %s250_s2, %s250_s2 }
  0xa0   :  { %p15570_p13 = scmp.lt.s32.totalorder %s15568_s18, %s15564_s16 }
  0xa2   :  { %p15571_p0 = por %p15570_p13, %p15569_p12 }
  0xa4   :  { %p15572_p1 = pnand %p15571_p0, %p15565_p11 }
  0xa6   :  { %15575 = shalt.err (!%p15572_p1)
}
  0xa7   :  { %252 = dma.hbm_to_vmem [thread:$0]  %s16354_s19, 16, %s250_s2, [#allocation9]  }
  0xa8   :  { %s16130_s22 = smov [#allocation11]   ;;  %s16131_s23 = smov [#allocation14]  }
  0xa9   :  { %s273_s29 = sshll.u32 %s16130_s22, 4  ;;  %s293_s26 = sshll.u32 %s16131_s23, 4  ;;  %s274_s29 = int_to_ptr.vmem [resolvable:$true] %s273_s29  ;;  %s294_s26 = int_to_ptr.vmem [resolvable:$true] %s293_s26 }
  0xaa   :  { %s15576_s28 = scalar_lea.hbm %s16374_s6, 16 }
  0xab   :  { %p15577_p2 = scmp.ne.s32.totalorder %s16374_s6, %s15576_s28  ;;  %p15580_p3 = scmp.lt.u32.totalorder %s15576_s28, %s16374_s6 }
  0xad   :  { %p15582_p4 = pnand %p15580_p3, %p15577_p2 }
  0xaf   :  { %15585 = shalt.err (!%p15582_p4)
}
  0xb0   :  { %s15586_s1 = scalar_lea.vmem %s274_s29, 16  ;;  %s15590_s0 = scalar_lea.vmem %s274_s29, 32 }
  0xb1   :  { %p15587_p5 = scmp.ne.s32.totalorder %s274_s29, %s15586_s1  ;;  %p15591_p6 = scmp.lt.s32.totalorder %s274_s29, %s274_s29 }
  0xb2   :  { %p15592_p7 = scmp.lt.s32.totalorder %s15590_s0, %s15586_s1 }
  0xb4   :  { %p15593_p8 = por %p15592_p7, %p15591_p6 }
  0xb6   :  { %p15594_p9 = pnand %p15593_p8, %p15587_p5 }
  0xb8   :  { %15597 = shalt.err (!%p15594_p9)
}
  0xb9   :  { %276 = dma.hbm_to_vmem [thread:$0]  %s16374_s6, 16, %s274_s29, [#allocation12]  }
  0xba   :  { %s15598_s19 = scalar_lea.hbm %s16384_s12, 16 }
  0xbb   :  { %p15599_p10 = scmp.ne.s32.totalorder %s16384_s12, %s15598_s19  ;;  %p15602_p11 = scmp.lt.u32.totalorder %s15598_s19, %s16384_s12 }
  0xbd   :  { %p15604_p12 = pnand %p15602_p11, %p15599_p10 }
  0xbf   :  { %15607 = shalt.err (!%p15604_p12)
}
  0xc0   :  { %s15608_s2 = scalar_lea.vmem %s294_s26, 16  ;;  %s15612_s7 = scalar_lea.vmem %s294_s26, 32 }
  0xc1   :  { %p15609_p13 = scmp.ne.s32.totalorder %s294_s26, %s15608_s2  ;;  %p15613_p0 = scmp.lt.s32.totalorder %s294_s26, %s294_s26 }
  0xc2   :  { %p15614_p1 = scmp.lt.s32.totalorder %s15612_s7, %s15608_s2 }
  0xc4   :  { %p15615_p2 = por %p15614_p1, %p15613_p0 }
  0xc6   :  { %p15616_p3 = pnand %p15615_p2, %p15609_p13 }
  0xc8   :  { %15619 = shalt.err (!%p15616_p3)
}
  0xc9   :  { %296 = dma.hbm_to_vmem [thread:$0]  %s16384_s12, 16, %s294_s26, [#allocation15]  }
  0xca   :  { %s16132_s10 = smov [#allocation17]   ;;  %s16133_s11 = smov [#allocation20]  }
  0xcb   :  { %s313_s6 = sshll.u32 %s16132_s10, 4  ;;  %s337_s15 = sshll.u32 %s16133_s11, 4  ;;  %s314_s6 = int_to_ptr.vmem [resolvable:$true] %s313_s6  ;;  %s338_s15 = int_to_ptr.vmem [resolvable:$true] %s337_s15 }
  0xcc   :  { %s15620_s16 = scalar_lea.hbm %s16394_s8, 16 }
  0xcd   :  { %p15621_p4 = scmp.ne.s32.totalorder %s16394_s8, %s15620_s16  ;;  %p15624_p5 = scmp.lt.u32.totalorder %s15620_s16, %s16394_s8 }
  0xcf   :  { %p15626_p6 = pnand %p15624_p5, %p15621_p4 }
  0xd1   :  { %15629 = shalt.err (!%p15626_p6)
}
  0xd2   :  { %s15630_s18 = scalar_lea.vmem %s314_s6, 16  ;;  %s15634_s22 = scalar_lea.vmem %s314_s6, 32 }
  0xd3   :  { %p15631_p7 = scmp.ne.s32.totalorder %s314_s6, %s15630_s18  ;;  %p15635_p8 = scmp.lt.s32.totalorder %s314_s6, %s314_s6 }
  0xd4   :  { %p15636_p9 = scmp.lt.s32.totalorder %s15634_s22, %s15630_s18 }
  0xd6   :  { %p15637_p10 = por %p15636_p9, %p15635_p8 }
  0xd8   :  { %p15638_p11 = pnand %p15637_p10, %p15631_p7 }
  0xda   :  { %15641 = shalt.err (!%p15638_p11)
}
  0xdb   :  { %316 = dma.hbm_to_vmem [thread:$0]  %s16394_s8, 16, %s314_s6, [#allocation18]  }
  0xdc   :  { %s15642_s12 = scalar_lea.hbm %s16414_s21, 16 }
  0xdd   :  { %p15643_p12 = scmp.ne.s32.totalorder %s16414_s21, %s15642_s12  ;;  %p15646_p13 = scmp.lt.u32.totalorder %s15642_s12, %s16414_s21 }
  0xdf   :  { %p15648_p0 = pnand %p15646_p13, %p15643_p12 }
  0xe1   :  { %15651 = shalt.err (!%p15648_p0)
}
  0xe2   :  { %s15652_s29 = scalar_lea.vmem %s338_s15, 16  ;;  %s15656_s23 = scalar_lea.vmem %s338_s15, 32 }
  0xe3   :  { %p15653_p1 = scmp.ne.s32.totalorder %s338_s15, %s15652_s29  ;;  %p15657_p2 = scmp.lt.s32.totalorder %s338_s15, %s338_s15 }
  0xe4   :  { %p15658_p3 = scmp.lt.s32.totalorder %s15656_s23, %s15652_s29 }
  0xe6   :  { %p15659_p4 = por %p15658_p3, %p15657_p2 }
  0xe8   :  { %p15660_p5 = pnand %p15659_p4, %p15653_p1 }
  0xea   :  { %15663 = shalt.err (!%p15660_p5)
}
  0xeb   :  { %340 = dma.hbm_to_vmem [thread:$0]  %s16414_s21, 16, %s338_s15, [#allocation21]  }
  0xec   :  { %s16134_s26 = smov [#allocation23]   ;;  %s16135_s28 = smov [#allocation26]  }
  0xed   :  { %s361_s8 = sshll.u32 %s16134_s26, 4  ;;  %s381_s1 = sshll.u32 %s16135_s28, 4  ;;  %s362_s8 = int_to_ptr.vmem [resolvable:$true] %s361_s8  ;;  %s382_s1 = int_to_ptr.vmem [resolvable:$true] %s381_s1 }
  0xee   :  { %s15664_s0 = scalar_lea.hbm %s16434_s13, 16 }
  0xef   :  { %p15665_p6 = scmp.ne.s32.totalorder %s16434_s13, %s15664_s0  ;;  %p15668_p7 = scmp.lt.u32.totalorder %s15664_s0, %s16434_s13 }
  0xf1   :  { %p15670_p8 = pnand %p15668_p7, %p15665_p6 }
  0xf3   :  { %15673 = shalt.err (!%p15670_p8)
}
  0xf4   :  { %s15674_s19 = scalar_lea.vmem %s362_s8, 16  ;;  %s15678_s2 = scalar_lea.vmem %s362_s8, 32 }
  0xf5   :  { %p15675_p9 = scmp.ne.s32.totalorder %s362_s8, %s15674_s19  ;;  %p15679_p10 = scmp.lt.s32.totalorder %s362_s8, %s362_s8 }
  0xf6   :  { %p15680_p11 = scmp.lt.s32.totalorder %s15678_s2, %s15674_s19 }
  0xf8   :  { %p15681_p12 = por %p15680_p11, %p15679_p10 }
  0xfa   :  { %p15682_p13 = pnand %p15681_p12, %p15675_p9 }
  0xfc   :  { %15685 = shalt.err (!%p15682_p13)
}
  0xfd   :  { %364 = dma.hbm_to_vmem [thread:$0]  %s16434_s13, 16, %s362_s8, [#allocation24]  }
  0xfe   :  { %s15686_s21 = scalar_lea.hbm %s16444_s5, 16 }
  0xff   :  { %p15687_p0 = scmp.ne.s32.totalorder %s16444_s5, %s15686_s21  ;;  %p15690_p1 = scmp.lt.u32.totalorder %s15686_s21, %s16444_s5 }
 0x101   :  { %p15692_p2 = pnand %p15690_p1, %p15687_p0 }
 0x103   :  { %15695 = shalt.err (!%p15692_p2)
}
 0x104   :  { %s15696_s7 = scalar_lea.vmem %s382_s1, 16  ;;  %s15700_s10 = scalar_lea.vmem %s382_s1, 32 }
 0x105   :  { %p15697_p3 = scmp.ne.s32.totalorder %s382_s1, %s15696_s7  ;;  %p15701_p4 = scmp.lt.s32.totalorder %s382_s1, %s382_s1 }
 0x106   :  { %p15702_p5 = scmp.lt.s32.totalorder %s15700_s10, %s15696_s7 }
 0x108   :  { %p15703_p6 = por %p15702_p5, %p15701_p4 }
 0x10a   :  { %p15704_p7 = pnand %p15703_p6, %p15697_p3 }
 0x10c   :  { %15707 = shalt.err (!%p15704_p7)
}
 0x10d   :  { %384 = dma.hbm_to_vmem [thread:$0]  %s16444_s5, 16, %s382_s1, [#allocation27]  }
 0x10e   :  { %s16136_s6 = smov [#allocation29]   ;;  %s16137_s11 = smov [#allocation32]  }
 0x10f   :  { %s401_s13 = sshll.u32 %s16136_s6, 4  ;;  %s425_s15 = sshll.u32 %s16137_s11, 4  ;;  %s402_s13 = int_to_ptr.vmem [resolvable:$true] %s401_s13  ;;  %s426_s15 = int_to_ptr.vmem [resolvable:$true] %s425_s15 }
 0x110   :  { %s15708_s16 = scalar_lea.hbm %s16454_s25, 16 }
 0x111   :  { %p15709_p8 = scmp.ne.s32.totalorder %s16454_s25, %s15708_s16  ;;  %p15712_p9 = scmp.lt.u32.totalorder %s15708_s16, %s16454_s25 }
 0x113   :  { %p15714_p10 = pnand %p15712_p9, %p15709_p8 }
 0x115   :  { %15717 = shalt.err (!%p15714_p10)
}
 0x116   :  { %s15718_s18 = scalar_lea.vmem %s402_s13, 16  ;;  %s15722_s22 = scalar_lea.vmem %s402_s13, 32 }
 0x117   :  { %p15719_p11 = scmp.ne.s32.totalorder %s402_s13, %s15718_s18  ;;  %p15723_p12 = scmp.lt.s32.totalorder %s402_s13, %s402_s13 }
 0x118   :  { %p15724_p13 = scmp.lt.s32.totalorder %s15722_s22, %s15718_s18 }
 0x11a   :  { %p15725_p0 = por %p15724_p13, %p15723_p12 }
 0x11c   :  { %p15726_p1 = pnand %p15725_p0, %p15719_p11 }
 0x11e   :  { %15729 = shalt.err (!%p15726_p1)
}
 0x11f   :  { %404 = dma.hbm_to_vmem [thread:$0]  %s16454_s25, 16, %s402_s13, [#allocation30]  }
 0x120   :  { %s15730_s5 = scalar_lea.hbm %s16474_s9, 16 }
 0x121   :  { %p15731_p2 = scmp.ne.s32.totalorder %s16474_s9, %s15730_s5  ;;  %p15734_p3 = scmp.lt.u32.totalorder %s15730_s5, %s16474_s9 }
 0x123   :  { %p15736_p4 = pnand %p15734_p3, %p15731_p2 }
 0x125   :  { %15739 = shalt.err (!%p15736_p4)
}
 0x126   :  { %s15740_s12 = scalar_lea.vmem %s426_s15, 16  ;;  %s15744_s29 = scalar_lea.vmem %s426_s15, 32 }
 0x127   :  { %p15741_p5 = scmp.ne.s32.totalorder %s426_s15, %s15740_s12  ;;  %p15745_p6 = scmp.lt.s32.totalorder %s426_s15, %s426_s15 }
 0x128   :  { %p15746_p7 = scmp.lt.s32.totalorder %s15744_s29, %s15740_s12 }
 0x12a   :  { %p15747_p8 = por %p15746_p7, %p15745_p6 }
 0x12c   :  { %p15748_p9 = pnand %p15747_p8, %p15741_p5 }
 0x12e   :  { %15751 = shalt.err (!%p15748_p9)
}
 0x12f   :  { %428 = dma.hbm_to_vmem [thread:$0]  %s16474_s9, 16, %s426_s15, [#allocation33]  }
 0x130   :  { %s16138_s23 = smov [#allocation2]   ;;  %s16139_s26 = smov [#allocation7]  }
 0x131   :  { %s215_s25 = sshll.u32 %s16138_s23, 4  ;;  %s235_s8 = sshll.u32 %s16139_s26, 4  ;;  %s216_s25 = int_to_ptr.vmem [resolvable:$true] %s215_s25  ;;  %s236_s8 = int_to_ptr.vmem [resolvable:$true] %s235_s8 }
 0x132   :  { %s15752_s28 = scalar_lea.hbm %s16329_s17, 16 }
 0x133   :  { %p15753_p10 = scmp.ne.s32.totalorder %s16329_s17, %s15752_s28  ;;  %p15756_p11 = scmp.lt.u32.totalorder %s15752_s28, %s16329_s17 }
 0x135   :  { %p15758_p12 = pnand %p15756_p11, %p15753_p10 }
 0x137   :  { %15761 = shalt.err (!%p15758_p12)
}
 0x138   :  { %s15762_s1 = scalar_lea.vmem %s216_s25, 16  ;;  %s15766_s0 = scalar_lea.vmem %s216_s25, 32 }
 0x139   :  { %p15763_p13 = scmp.ne.s32.totalorder %s216_s25, %s15762_s1  ;;  %p15767_p0 = scmp.lt.s32.totalorder %s216_s25, %s216_s25 }
 0x13a   :  { %p15768_p1 = scmp.lt.s32.totalorder %s15766_s0, %s15762_s1 }
 0x13c   :  { %p15769_p2 = por %p15768_p1, %p15767_p0 }
 0x13e   :  { %p15770_p3 = pnand %p15769_p2, %p15763_p13 }
 0x140   :  { %15773 = shalt.err (!%p15770_p3)
}
 0x141   :  { %218 = dma.hbm_to_vmem [thread:$0]  %s16329_s17, 16, %s216_s25, [#allocation3]  }
 0x142   :  { %s15774_s9 = scalar_lea.hbm %s16339_s4, 16 }
 0x143   :  { %p15775_p4 = scmp.ne.s32.totalorder %s16339_s4, %s15774_s9  ;;  %p15778_p5 = scmp.lt.u32.totalorder %s15774_s9, %s16339_s4 }
 0x145   :  { %p15780_p6 = pnand %p15778_p5, %p15775_p4 }
 0x147   :  { %15783 = shalt.err (!%p15780_p6)
}
 0x148   :  { %s15784_s19 = scalar_lea.vmem %s236_s8, 16  ;;  %s15788_s2 = scalar_lea.vmem %s236_s8, 32 }
 0x149   :  { %p15785_p7 = scmp.ne.s32.totalorder %s236_s8, %s15784_s19  ;;  %p15789_p8 = scmp.lt.s32.totalorder %s236_s8, %s236_s8 }
 0x14a   :  { %p15790_p9 = scmp.lt.s32.totalorder %s15788_s2, %s15784_s19 }
 0x14c   :  { %p15791_p10 = por %p15790_p9, %p15789_p8 }
 0x14e   :  { %p15792_p11 = pnand %p15791_p10, %p15785_p7 }
 0x150   :  { %15795 = shalt.err (!%p15792_p11)
}
 0x151   :  { %238 = dma.hbm_to_vmem [thread:$0]  %s16339_s4, 16, %s236_s8, [#allocation6]  }
 0x152   :  { %s16140_s21 = smov [#allocation10]   ;;  %s16141_s7 = smov [#allocation13]  }
 0x153   :  { %s261_s17 = sshll.u32 %s16140_s21, 4  ;;  %s283_s10 = sshll.u32 %s16141_s7, 4  ;;  %s262_s17 = int_to_ptr.vmem [resolvable:$true] %s261_s17  ;;  %s284_s10 = int_to_ptr.vmem [resolvable:$true] %s283_s10 }
 0x154   :  { %s15796_s6 = scalar_lea.hbm %s16364_s24, 16 }
 0x155   :  { %p15797_p12 = scmp.ne.s32.totalorder %s16364_s24, %s15796_s6  ;;  %p15800_p13 = scmp.lt.u32.totalorder %s15796_s6, %s16364_s24 }
 0x157   :  { %p15802_p0 = pnand %p15800_p13, %p15797_p12 }
 0x159   :  { %15805 = shalt.err (!%p15802_p0)
}
 0x15a   :  { %s15806_s13 = scalar_lea.vmem %s262_s17, 16  ;;  %s15810_s11 = scalar_lea.vmem %s262_s17, 32 }
 0x15b   :  { %p15807_p1 = scmp.ne.s32.totalorder %s262_s17, %s15806_s13  ;;  %p15811_p2 = scmp.lt.s32.totalorder %s262_s17, %s262_s17 }
 0x15c   :  { %p15812_p3 = scmp.lt.s32.totalorder %s15810_s11, %s15806_s13 }
 0x15e   :  { %p15813_p4 = por %p15812_p3, %p15811_p2 }
 0x160   :  { %p15814_p5 = pnand %p15813_p4, %p15807_p1 }
 0x162   :  { %15817 = shalt.err (!%p15814_p5)
}
 0x163   :  { %264 = dma.hbm_to_vmem [thread:$0]  %s16364_s24, 16, %s262_s17, [#allocation9]  }
 0x164   :  { %s15818_s4 = scalar_lea.hbm %s16379_s27, 16 }
 0x165   :  { %p15819_p6 = scmp.ne.s32.totalorder %s16379_s27, %s15818_s4  ;;  %p15822_p7 = scmp.lt.u32.totalorder %s15818_s4, %s16379_s27 }
 0x167   :  { %p15824_p8 = pnand %p15822_p7, %p15819_p6 }
 0x169   :  { %15827 = shalt.err (!%p15824_p8)
}
 0x16a   :  { %s15828_s15 = scalar_lea.vmem %s284_s10, 16  ;;  %s15832_s16 = scalar_lea.vmem %s284_s10, 32 }
 0x16b   :  { %p15829_p9 = scmp.ne.s32.totalorder %s284_s10, %s15828_s15  ;;  %p15833_p10 = scmp.lt.s32.totalorder %s284_s10, %s284_s10 }
 0x16c   :  { %p15834_p11 = scmp.lt.s32.totalorder %s15832_s16, %s15828_s15 }
 0x16e   :  { %p15835_p12 = por %p15834_p11, %p15833_p10 }
 0x170   :  { %p15836_p13 = pnand %p15835_p12, %p15829_p9 }
 0x172   :  { %15839 = shalt.err (!%p15836_p13)
}
 0x173   :  { %s18466_s18 = sld [smem:[#allocation86_spill]]  ;;  %s16142_s22 = smov [#allocation16]  }
 0x174   :  { %286 = dma.hbm_to_vmem [thread:$0]  %s16379_s27, 16, %s284_s10, [#allocation12]  }
 0x175   :  { %s303_s24 = sshll.u32 %s16142_s22, 4  ;;  %s16143_s5 = smov [#allocation19]   ;;  %s304_s24 = int_to_ptr.vmem [resolvable:$true] %s303_s24 }
 0x176   :  { %s325_s12 = sshll.u32 %s16143_s5, 4  ;;  %s326_s12 = int_to_ptr.vmem [resolvable:$true] %s325_s12 }
 0x179   :  { %s15840_s29 = scalar_lea.hbm %s18466_s18, 16 }
 0x17a   :  { %p15841_p0 = scmp.ne.s32.totalorder %s18466_s18, %s15840_s29  ;;  %p15844_p1 = scmp.lt.u32.totalorder %s15840_s29, %s18466_s18 }
 0x17c   :  { %p15846_p2 = pnand %p15844_p1, %p15841_p0 }
 0x17e   :  { %15849 = shalt.err (!%p15846_p2)
}
 0x17f   :  { %s15850_s23 = scalar_lea.vmem %s304_s24, 16  ;;  %s15854_s25 = scalar_lea.vmem %s304_s24, 32 }
 0x180   :  { %p15851_p3 = scmp.ne.s32.totalorder %s304_s24, %s15850_s23  ;;  %p15855_p4 = scmp.lt.s32.totalorder %s304_s24, %s304_s24 }
 0x181   :  { %p15856_p5 = scmp.lt.s32.totalorder %s15854_s25, %s15850_s23 }
 0x183   :  { %p15857_p6 = por %p15856_p5, %p15855_p4 }
 0x185   :  { %p15858_p7 = pnand %p15857_p6, %p15851_p3 }
 0x187   :  { %15861 = shalt.err (!%p15858_p7)
}
 0x188   :  { %s18467_s27 = sld [smem:[#allocation88_spill]] }
 0x189   :  { %306 = dma.hbm_to_vmem [thread:$0]  %s18466_s18, 16, %s304_s24, [#allocation15]  }
 0x18e   :  { %s15862_s26 = scalar_lea.hbm %s18467_s27, 16 }
 0x18f   :  { %p15863_p8 = scmp.ne.s32.totalorder %s18467_s27, %s15862_s26  ;;  %p15866_p9 = scmp.lt.u32.totalorder %s15862_s26, %s18467_s27 }
 0x191   :  { %p15868_p10 = pnand %p15866_p9, %p15863_p8 }
 0x193   :  { %15871 = shalt.err (!%p15868_p10)
}
 0x194   :  { %s15872_s8 = scalar_lea.vmem %s326_s12, 16  ;;  %s15876_s28 = scalar_lea.vmem %s326_s12, 32 }
 0x195   :  { %p15873_p11 = scmp.ne.s32.totalorder %s326_s12, %s15872_s8  ;;  %p15877_p12 = scmp.lt.s32.totalorder %s326_s12, %s326_s12 }
 0x196   :  { %p15878_p13 = scmp.lt.s32.totalorder %s15876_s28, %s15872_s8 }
 0x198   :  { %p15879_p0 = por %p15878_p13, %p15877_p12 }
 0x19a   :  { %p15880_p1 = pnand %p15879_p0, %p15873_p11 }
 0x19c   :  { %15883 = shalt.err (!%p15880_p1)
}
 0x19d   :  { %s18468_s1 = sld [smem:[#allocation91_spill]]  ;;  %s16144_s0 = smov [#allocation22]  }
 0x19e   :  { %328 = dma.hbm_to_vmem [thread:$0]  %s18467_s27, 16, %s326_s12, [#allocation18]  }
 0x19f   :  { %s349_s9 = sshll.u32 %s16144_s0, 4  ;;  %s16145_s19 = smov [#allocation25]   ;;  %s350_s9 = int_to_ptr.vmem [resolvable:$true] %s349_s9 }
 0x1a0   :  { %s371_s2 = sshll.u32 %s16145_s19, 4  ;;  %s372_s2 = int_to_ptr.vmem [resolvable:$true] %s371_s2 }
 0x1a3   :  { %s15884_s21 = scalar_lea.hbm %s18468_s1, 16 }
 0x1a4   :  { %p15885_p2 = scmp.ne.s32.totalorder %s18468_s1, %s15884_s21  ;;  %p15888_p3 = scmp.lt.u32.totalorder %s15884_s21, %s18468_s1 }
 0x1a6   :  { %p15890_p4 = pnand %p15888_p3, %p15885_p2 }
 0x1a8   :  { %15893 = shalt.err (!%p15890_p4)
}
 0x1a9   :  { %s15894_s17 = scalar_lea.vmem %s350_s9, 16  ;;  %s15898_s7 = scalar_lea.vmem %s350_s9, 32 }
 0x1aa   :  { %p15895_p5 = scmp.ne.s32.totalorder %s350_s9, %s15894_s17  ;;  %p15899_p6 = scmp.lt.s32.totalorder %s350_s9, %s350_s9 }
 0x1ab   :  { %p15900_p7 = scmp.lt.s32.totalorder %s15898_s7, %s15894_s17 }
 0x1ad   :  { %p15901_p8 = por %p15900_p7, %p15899_p6 }
 0x1af   :  { %p15902_p9 = pnand %p15901_p8, %p15895_p5 }
 0x1b1   :  { %15905 = shalt.err (!%p15902_p9)
}
 0x1b2   :  { %s18469_s10 = sld [smem:[#allocation93_spill]] }
 0x1b3   :  { %352 = dma.hbm_to_vmem [thread:$0]  %s18468_s1, 16, %s350_s9, [#allocation21]  }
 0x1b8   :  { %s15906_s6 = scalar_lea.hbm %s18469_s10, 16 }
 0x1b9   :  { %p15907_p10 = scmp.ne.s32.totalorder %s18469_s10, %s15906_s6  ;;  %p15910_p11 = scmp.lt.u32.totalorder %s15906_s6, %s18469_s10 }
 0x1bb   :  { %p15912_p12 = pnand %p15910_p11, %p15907_p10 }
 0x1bd   :  { %15915 = shalt.err (!%p15912_p12)
}
 0x1be   :  { %s15916_s13 = scalar_lea.vmem %s372_s2, 16  ;;  %s15920_s11 = scalar_lea.vmem %s372_s2, 32 }
 0x1bf   :  { %p15917_p13 = scmp.ne.s32.totalorder %s372_s2, %s15916_s13  ;;  %p15921_p0 = scmp.lt.s32.totalorder %s372_s2, %s372_s2 }
 0x1c0   :  { %p15922_p1 = scmp.lt.s32.totalorder %s15920_s11, %s15916_s13 }
 0x1c2   :  { %p15923_p2 = por %p15922_p1, %p15921_p0 }
 0x1c4   :  { %p15924_p3 = pnand %p15923_p2, %p15917_p13 }
 0x1c6   :  { %15927 = shalt.err (!%p15924_p3)
}
 0x1c7   :  { %s18470_s4 = sld [smem:[#allocation94_spill]]  ;;  %s16146_s15 = smov [#allocation28]  }
 0x1c8   :  { %374 = dma.hbm_to_vmem [thread:$0]  %s18469_s10, 16, %s372_s2, [#allocation24]  }
 0x1c9   :  { %s391_s16 = sshll.u32 %s16146_s15, 4  ;;  %s16147_s18 = smov [#allocation31]   ;;  %s392_s16 = int_to_ptr.vmem [resolvable:$true] %s391_s16 }
 0x1ca   :  { %s413_s22 = sshll.u32 %s16147_s18, 4  ;;  %s414_s22 = int_to_ptr.vmem [resolvable:$true] %s413_s22 }
 0x1cd   :  { %s15928_s24 = scalar_lea.hbm %s18470_s4, 16 }
 0x1ce   :  { %p15929_p4 = scmp.ne.s32.totalorder %s18470_s4, %s15928_s24  ;;  %p15932_p5 = scmp.lt.u32.totalorder %s15928_s24, %s18470_s4 }
 0x1d0   :  { %p15934_p6 = pnand %p15932_p5, %p15929_p4 }
 0x1d2   :  { %15937 = shalt.err (!%p15934_p6)
}
 0x1d3   :  { %s15938_s5 = scalar_lea.vmem %s392_s16, 16  ;;  %s15942_s12 = scalar_lea.vmem %s392_s16, 32 }
 0x1d4   :  { %p15939_p7 = scmp.ne.s32.totalorder %s392_s16, %s15938_s5  ;;  %p15943_p8 = scmp.lt.s32.totalorder %s392_s16, %s392_s16 }
 0x1d5   :  { %p15944_p9 = scmp.lt.s32.totalorder %s15942_s12, %s15938_s5 }
 0x1d7   :  { %p15945_p10 = por %p15944_p9, %p15943_p8 }
 0x1d9   :  { %p15946_p11 = pnand %p15945_p10, %p15939_p7 }
 0x1db   :  { %15949 = shalt.err (!%p15946_p11)
}
 0x1dc   :  { %s18471_s29 = sld [smem:[#allocation96_spill]] }
 0x1dd   :  { %394 = dma.hbm_to_vmem [thread:$0]  %s18470_s4, 16, %s392_s16, [#allocation27]  }
 0x1e2   :  { %s15950_s23 = scalar_lea.hbm %s18471_s29, 16 }
 0x1e3   :  { %p15951_p12 = scmp.ne.s32.totalorder %s18471_s29, %s15950_s23  ;;  %p15954_p13 = scmp.lt.u32.totalorder %s15950_s23, %s18471_s29 }
 0x1e5   :  { %p15956_p0 = pnand %p15954_p13, %p15951_p12 }
 0x1e7   :  { %15959 = shalt.err (!%p15956_p0)
}
 0x1e8   :  { %s15960_s25 = scalar_lea.vmem %s414_s22, 16  ;;  %s15964_s27 = scalar_lea.vmem %s414_s22, 32 }
 0x1e9   :  { %p15961_p1 = scmp.ne.s32.totalorder %s414_s22, %s15960_s25  ;;  %p15965_p2 = scmp.lt.s32.totalorder %s414_s22, %s414_s22 }
 0x1ea   :  { %p15966_p3 = scmp.lt.s32.totalorder %s15964_s27, %s15960_s25 }
 0x1ec   :  { %p15967_p4 = por %p15966_p3, %p15965_p2 }
 0x1ee   :  { %p15968_p5 = pnand %p15967_p4, %p15961_p1 }
 0x1f0   :  { %15971 = shalt.err (!%p15968_p5)
}
 0x1f1   :  { %416 = dma.hbm_to_vmem [thread:$0]  %s18471_s29, 16, %s414_s22, [#allocation30]  }
 0x1f2   :  { %s16148_s26 = smov [#allocation34]   ;;  %s16149_s28 = smov [#allocation35]  }
 0x1f3   :  { %s435_s8 = sshll.u32 %s16148_s26, 4  ;;  %s445_s1 = sshll.u32 %s16149_s28, 4  ;;  %s436_s8 = int_to_ptr.vmem [resolvable:$true] %s435_s8  ;;  %s446_s1 = int_to_ptr.vmem [resolvable:$true] %s445_s1 }
 0x1f4   :  { %s15972_s0 = scalar_lea.hbm %s16479_s20, 16 }
 0x1f5   :  { %p15973_p6 = scmp.ne.s32.totalorder %s16479_s20, %s15972_s0  ;;  %p15976_p7 = scmp.lt.u32.totalorder %s15972_s0, %s16479_s20 }
 0x1f7   :  { %p15978_p8 = pnand %p15976_p7, %p15973_p6 }
 0x1f9   :  { %15981 = shalt.err (!%p15978_p8)
}
 0x1fa   :  { %s15982_s9 = scalar_lea.vmem %s436_s8, 16  ;;  %s15986_s19 = scalar_lea.vmem %s436_s8, 32 }
 0x1fb   :  { %p15983_p9 = scmp.ne.s32.totalorder %s436_s8, %s15982_s9  ;;  %p15987_p10 = scmp.lt.s32.totalorder %s436_s8, %s436_s8 }
 0x1fc   :  { %p15988_p11 = scmp.lt.s32.totalorder %s15986_s19, %s15982_s9 }
 0x1fe   :  { %p15989_p12 = por %p15988_p11, %p15987_p10 }
 0x200   :  { %p15990_p13 = pnand %p15989_p12, %p15983_p9 }
 0x202   :  { %15993 = shalt.err (!%p15990_p13)
}
 0x203   :  { %438 = dma.hbm_to_vmem [thread:$0]  %s16479_s20, 16, %s436_s8, [#allocation33]  }
 0x204   :  { %s15994_s2 = scalar_lea.hbm %s16484_s14, 16 }
 0x205   :  { %p15995_p0 = scmp.ne.s32.totalorder %s16484_s14, %s15994_s2  ;;  %p15998_p1 = scmp.lt.u32.totalorder %s15994_s2, %s16484_s14 }
 0x207   :  { %p16000_p2 = pnand %p15998_p1, %p15995_p0 }
 0x209   :  { %16003 = shalt.err (!%p16000_p2)
}
 0x20a   :  { %s16004_s21 = scalar_lea.vmem %s446_s1, 16  ;;  %s16008_s17 = scalar_lea.vmem %s446_s1, 32 }
 0x20b   :  { %p16005_p3 = scmp.ne.s32.totalorder %s446_s1, %s16004_s21  ;;  %p16009_p4 = scmp.lt.s32.totalorder %s446_s1, %s446_s1 }
 0x20c   :  { %p16010_p5 = scmp.lt.s32.totalorder %s16008_s17, %s16004_s21 }
 0x20e   :  { %p16011_p6 = por %p16010_p5, %p16009_p4 }
 0x210   :  { %p16012_p7 = pnand %p16011_p6, %p16005_p3 }
 0x212   :  { %16015 = shalt.err (!%p16012_p7)
}
 0x213   :  { %448 = dma.hbm_to_vmem [thread:$0]  %s16484_s14, 16, %s446_s1, [#allocation36]  }
 0x214   :  { %16038 = dma.done.wait [#allocation3], 16  }
 0x215   :  { %16039 = vsyncadd [#allocation3], 4294967280 }
 0x216   :  { %16040 = dma.done.wait [#allocation6], 32  }
 0x217   :  { %16041 = vsyncadd [#allocation6], 4294967264 }
 0x218   :  { %16042 = dma.done.wait [#allocation9], 32  }
 0x219   :  { %16043 = vsyncadd [#allocation9], 4294967264 }
 0x21a   :  { %16044 = dma.done.wait [#allocation12], 32  }
 0x21b   :  { %16045 = vsyncadd [#allocation12], 4294967264 }
 0x21c   :  { %16046 = dma.done.wait [#allocation15], 32  }
 0x21d   :  { %16047 = vsyncadd [#allocation15], 4294967264 }
 0x21e   :  { %16048 = dma.done.wait [#allocation18], 32  }
 0x21f   :  { %16049 = vsyncadd [#allocation18], 4294967264 }
 0x220   :  { %16050 = dma.done.wait [#allocation21], 32  }
 0x221   :  { %16051 = vsyncadd [#allocation21], 4294967264 }
 0x222   :  { %16052 = dma.done.wait [#allocation24], 32  }
 0x223   :  { %16053 = vsyncadd [#allocation24], 4294967264 }
 0x224   :  { %16054 = dma.done.wait [#allocation27], 32  }
 0x225   :  { %16055 = vsyncadd [#allocation27], 4294967264 }
 0x226   :  { %16056 = dma.done.wait [#allocation30], 32  }
 0x227   :  { %16057 = vsyncadd [#allocation30], 4294967264 }
 0x228   :  { %16058 = dma.done.wait [#allocation33], 32  }
 0x229   :  { %16059 = vsyncadd [#allocation33], 4294967264 }
 0x22a   :  { %16060 = dma.done.wait [#allocation36], 16  }
 0x22b   :  { %16061 = vsyncadd [#allocation36], 4294967280  ;;  %s18472_s14 = sld [smem:[#allocation82_spill]]  ;;  %v16150_v0 = vmov 0.0|0.0   ;;  %s18473_s20 = sld [smem:[#allocation51_spill]]  ;;  %vm723_vm0 = vcmask 523264  }
 0x22c   :  { %14446 = vmatprep.subr.bf16.mxu0 %v16150_v0  ;;  %14482 = vmatprep.subr.bf16.mxu1 %v16150_v0  ;;  %s18474_s7 = sld [smem:[#allocation53_spill]]  ;;  %s18475_s10 = sld [smem:[#allocation83_spill]]  ;;  %v12531_v39 = vld [vmem:[#allocation7] ss:$0 sm:$0xff]  ;;  %vm800_vm1 = vcmask 1040384   ;;  %vm803_vm2 = vcmask 258048  }
 0x22d   :  { %s18476_s6 = sld [smem:[#allocation89_spill]]  ;;  %vm16151_vm3 = vmmov 0   ;;  %v18408_v62 = vmov 0.0   ;;  %vm838_vm4 = vcmask 261120   ;;  %s16153_s13 = smov 64   ;;  %vm915_vm5 = vcmask 64512  }
 0x22e   :  { %13363 = vmatprep.mubr.msk.f32.mxu1 %vm16151_vm3, %v18408_v62  ;;  %s16154_s11 = smov 96   ;;  %s16155_s4 = smov 88   ;;  %vm1009_vm6 = vcmask 1044480   ;;  %vm991_vm7 = vcmask 36864   ;;  %vm1005_vm8 = vcmask 39936   ;;  %vm3445_vm9 = vcmask 253952  }
 0x22f   :  { %s16156_s15 = smov 120   ;;  %s16157_s16 = smov 56   ;;  %vm6269_vm10 = vcmask 130048   ;;  %vm16164_vm12 = vmmov 1   ;;  %vm6443_vm14 = vcmask 122880   ;;  %vm6534_vm15 = vcmask 72704  }
 0x230   :  { %s16158_s18 = smov 80   ;;  %s16159_s22 = smov 112   ;;  %vm17374_vm11 = vmpackc.low %vm6269_vm10, %vm6269_vm10 }
 0x231   :  { %v611_v1 = vld [vmem:[%s18472_s14] sm:$0xff]  ;;  %v612_v2 = vld [vmem:[%s18472_s14 + $0x8] sm:$0xff]  ;;  %v613_v3 = vld [vmem:[%s18472_s14 + $0x10] sm:$0xff]  ;;  %s18477_s24 = sld [smem:[#allocation87_spill]]  ;;  %s16160_s5 = smov 48  }
 0x232   :  { %v14447_v4 = vpack.c.bf16 %v612_v2, %v611_v1  ;;  %v614_v5 = vld [vmem:[%s18472_s14 + $0x18] sm:$0xff]  ;;  %v615_v7 = vld [vmem:[%s18472_s14 + $0x20] sm:$0xff]  ;;  %v616_v8 = vld [vmem:[%s18472_s14 + $0x28] sm:$0xff]  ;;  %s16161_s12 = smov 72   ;;  %s16162_s29 = smov 104  }
 0x233   :  { %v14450_v6 = vpack.c.bf16 %v614_v5, %v613_v3  ;;  %v14453_v9 = vpack.c.bf16 %v616_v8, %v615_v7  ;;  %v617_v10 = vld [vmem:[%s18472_s14 + $0x30] sm:$0xff]  ;;  %v618_v11 = vld [vmem:[%s18472_s14 + $0x38] sm:$0xff]  ;;  %v716_v12 = vld [vmem:[%s18473_s20 + $0x8] sm:$0xff]  ;;  %s16163_s23 = smov 40   ;;  %s18478_s25 = sld [smem:[#allocation84_spill]] }
 0x234   :  { %14448 = vmatpush1.bf16.msra.mxu0 %v14447_v4  ;;  %12532 = vmatprep.mubr.msk.f32.mxu0 %vm723_vm0, %v716_v12  ;;  %v14456_v13 = vpack.c.bf16 %v618_v11, %v617_v10  ;;  %v619_v14 = vld [vmem:[%s18472_s14 + $0x40] sm:$0xff]  ;;  %v620_v15 = vld [vmem:[%s18472_s14 + $0x48] sm:$0xff]  ;;  %v621_v17 = vld [vmem:[%s18472_s14 + $0x50] sm:$0xff]  ;;  %s18479_s27 = sld [smem:[#allocation85_spill]]  ;;  %s18480_s26 = sld [smem:[#allocation97_spill]]  ;;  %vm9210_vm0 = vcmask 261121  }
 0x235   :  { %14449 = vmatprep.subr.bf16.mxu0 %v16150_v0  ;;  %v14459_v16 = vpack.c.bf16 %v620_v15, %v619_v14  ;;  %v622_v18 = vld [vmem:[%s18472_s14 + $0x58] sm:$0xff]  ;;  %v623_v20 = vld [vmem:[%s18472_s14 + $0x60] sm:$0xff]  ;;  %v624_v21 = vld [vmem:[%s18472_s14 + $0x68] sm:$0xff]  ;;  %s18481_s8 = sld [smem:[#allocation95_spill]]  ;;  %s18482_s28 = sld [smem:[#allocation90_spill]] }
 0x236   :  { %v14462_v19 = vpack.c.bf16 %v622_v18, %v621_v17  ;;  %v14465_v22 = vpack.c.bf16 %v624_v21, %v623_v20  ;;  %v625_v23 = vld [vmem:[%s18472_s14 + $0x70] sm:$0xff]  ;;  %v626_v24 = vld [vmem:[%s18472_s14 + $0x78] sm:$0xff]  ;;  %v627_v26 = vld [vmem:[%s18472_s14 + $0x80] sm:$0xff]  ;;  %s18483_s1 = sld [smem:[#allocation92_spill]]  ;;  %s18486_s0 = sld [smem:[#allocation66_spill]] }
 0x237   :  { %v14468_v25 = vpack.c.bf16 %v626_v24, %v625_v23  ;;  %v628_v27 = vld [vmem:[%s18472_s14 + $0x88] sm:$0xff]  ;;  %v629_v29 = vld [vmem:[%s18472_s14 + $0x90] sm:$0xff]  ;;  %v630_v30 = vld [vmem:[%s18472_s14 + $0x98] sm:$0xff]  ;;  %s18487_s9 = sld [smem:[#allocation59_spill]]  ;;  %s18488_s19 = sld [smem:[#allocation58_spill]] }
 0x238   :  { %14451 = vmatpush1.bf16.msra.mxu0 %v14450_v6  ;;  %v14471_v28 = vpack.c.bf16 %v628_v27, %v627_v26  ;;  %v14474_v31 = vpack.c.bf16 %v630_v30, %v629_v29  ;;  %v631_v32 = vld [vmem:[%s18472_s14 + $0xa0] sm:$0xff]  ;;  %v632_v33 = vld [vmem:[%s18472_s14 + $0xa8] sm:$0xff]  ;;  %v633_v35 = vld [vmem:[%s18472_s14 + $0xb0] sm:$0xff]  ;;  %s18489_s2 = sld [smem:[#allocation65_spill]]  ;;  %s18490_s21 = sld [smem:[#allocation67_spill]] }
 0x239   :  { %14452 = vmatprep.subr.bf16.mxu0 %v16150_v0  ;;  %v14477_v34 = vpack.c.bf16 %v632_v33, %v631_v32  ;;  %v634_v36 = vld [vmem:[%s18472_s14 + $0xb8] sm:$0xff]  ;;  %v715_v38 = vld [vmem:[%s18473_s20] sm:$0xff]  ;;  %v669_v58 = vld [vmem:[%s18476_s6 + $0x8] sm:$0xff]  ;;  %s18491_s17 = sld [smem:[#allocation64_spill]] }
 0x23a   :  { %v14480_v37 = vpack.c.bf16 %v634_v36, %v633_v35  ;;  %v517_v43 = vld [vmem:[%s18474_s7] sm:$0x1]  ;;  %v670_v59 = vld [vmem:[%s18476_s6 + $0x10] sm:$0xff]  ;;  %v671_v61 = vld [vmem:[%s18476_s6 + $0x18] sm:$0xff]  ;;  %s18497_s7 = sld [smem:[#allocation63_spill]] }
 0x23b   :  { %v635_v46 = vld [vmem:[%s18475_s10] sm:$0x1f]  ;;  %v16647_v63 = vpack.c.bf16 %v671_v61, %v670_v59  ;;  %v12533_v5 = vld [vmem:[#allocation13] ss:$0 sm:$0xff]  ;;  %v12534_v7 = vld [vmem:[#allocation11] ss:$0 sm:$0xff] }
 0x23c   :  { %14454 = vmatpush1.bf16.msra.mxu0 %v14453_v9  ;;  %v668_v57 = vld [vmem:[%s18476_s6] sm:$0xff]  ;;  %v12535_v10 = vld [vmem:[#allocation19] ss:$0 sm:$0xff]  ;;  %vm17412_vm13 = vmpackc.low %vm800_vm1, %vm16164_vm12  ;;  %s18498_s10 = sld [smem:[#allocation62_spill]]  ;;  %s18499_s6 = sld [smem:[#allocation55_spill]] }
 0x23d   :  { %14455 = vmatprep.subr.bf16.mxu0 %v16150_v0  ;;  %v16639_v60 = vpack.c.bf16 %v669_v58, %v668_v57 }
 0x23f   :  { %14484 = vmatpush3.bf16.msra.mxu1 %v16639_v60 }
 0x240   :  { %14457 = vmatpush1.bf16.msra.mxu0 %v14456_v13  ;;  %14485 = vmatprep.subr.bf16.mxu1 %v16150_v0 }
 0x241   :  { %14458 = vmatprep.subr.bf16.mxu0 %v16150_v0 }
 0x243   :  { %14487 = vmatpush3.bf16.msra.mxu1 %v16647_v63 }
 0x244   :  { %14460 = vmatpush1.bf16.msra.mxu0 %v14459_v16  ;;  %13366 = vmatprep.subr.mxu1 %v18408_v62 }
 0x245   :  { %14461 = vmatprep.subr.bf16.mxu0 %v16150_v0 }
 0x248   :  { %14463 = vmatpush1.bf16.msra.mxu0 %v14462_v19 }
 0x249   :  { %14464 = vmatprep.subr.bf16.mxu0 %v16150_v0 }
 0x24c   :  { %14466 = vmatpush1.bf16.msra.mxu0 %v14465_v22 }
 0x24d   :  { %14467 = vmatprep.subr.bf16.mxu0 %v16150_v0 }
 0x250   :  { %14469 = vmatpush1.bf16.msra.mxu0 %v14468_v25 }
 0x251   :  { %14470 = vmatprep.subr.bf16.mxu0 %v16150_v0 }
 0x254   :  { %14472 = vmatpush1.bf16.msra.mxu0 %v14471_v28 }
 0x255   :  { %14473 = vmatprep.subr.bf16.mxu0 %v16150_v0 }
 0x258   :  { %14475 = vmatpush1.bf16.msra.mxu0 %v14474_v31 }
 0x259   :  { %14476 = vmatprep.subr.bf16.mxu0 %v16150_v0 }
 0x25c   :  { %14478 = vmatpush1.bf16.msra.mxu0 %v14477_v34 }
 0x25d   :  { %14479 = vmatprep.subr.bf16.mxu0 %v16150_v0 }
 0x260   :  { %14481 = vmatpush1.bf16.msra.mxu0 %v14480_v37 }
 0x261   :  { %14518 = vmatprep.subr.bf16.mxu0 %v16150_v0 }
 0x263   :  { %792 = vmatmul.mubr.f32.vlgmr.msra.gmra.mrb[0].mxu0 %v715_v38 }
 0x264   :  { %13480 = vmatprep.mubr.msk.f32.mxu0 %vm16151_vm3, %v18408_v62 }
 0x336   :  { %v793_v40 = vpop.f32.mrb[0].mxu0 }
 0x337   :  { %v794_v41 = vadd.f32 %v12531_v39, %v793_v40  ;;  %v795_v42 = vpop.f32.mrb[1].mxu0 }
 0x339   :  { %v798_v44 = vrot.slane %v794_v41, 7  ;;  %v3452_v45 = vrot.slane %v794_v41, 3 }
 0x33b   :  { %v801_v47 = vsel %vm800_vm1, %v517_v43, %v798_v44  ;;  %v3454_v48 = vsel %vm800_vm1, %v517_v43, %v3452_v45  ;;  %v664_v45 = vld [vmem:[%s18477_s24 + $0x8] sm:$0xff] }
 0x33c   :  { %v16628_v49 = vadd.f32 %v801_v47, %v635_v46  ;;  %v16630_v50 = vadd.f32 %v3454_v48, %v635_v46  ;;  %v663_v46 = vld [vmem:[%s18477_s24] sm:$0xff] }
 0x33e   :  { %v804_v51 = vsel %vm803_vm2, %v16628_v49, 0.0 }
 0x33f   :  { %805 = vadd.xlane.f32.xlu0 %v804_v51 }
 0x3cc   :  { %v806_v52 = vpop.xlane.xlu0 %805 }
 0x3cd   :  { %v808_v53 = vmul.f32 0.03125, %v806_v52 }
 0x3cf   :  { %v809_v54 = vsub.f32 %v16628_v49, %v808_v53 }
 0x3d1   :  { %v810_v55 = vmul.f32 %v809_v54, %v809_v54 }
 0x3d3   :  { %v811_v56 = vsel %vm803_vm2, %v810_v55, 0.0 }
 0x3d4   :  { %812 = vadd.xlane.f32.xlu0 %v811_v56 }
 0x461   :  { %v813_v1 = vpop.xlane.xlu0 %812 }
 0x462   :  { %v814_v2 = vmul.f32 0.03125, %v813_v1 }
 0x464   :  { %v815_v3 = vadd.f32 1e-05, %v814_v2 }
 0x466   :  { %15248 = vrsqrt.f32 %v815_v3 }
 0x470   :  { %v15249_v4 = vpop.eup %15248 }
 0x471   :  { %v817_v6 = vmul.f32 %v15249_v4, %v809_v54 }
 0x473   :  { %v824_v8 = vmul.f32 %v12533_v5, %v817_v6 }
 0x475   :  { %v831_v9 = vadd.f32 %v12534_v7, %v824_v8 }
 0x477   :  { %13364 = vmatmul.mubr.msk.f32.vlgmr.msra.gmra.mrb[0].mxu1 %vm838_vm4, %v831_v9 }
 0x478   :  { %13368 = vmatprep.mubr.msk.f32.mxu1 %vm16151_vm3, %v18408_v62 }
 0x54a   :  { %v908_v11 = vpop.f32.mrb[0].mxu1 }
 0x54b   :  { %v16655_v12 = vadd.f32 %v12535_v10, %v908_v11  ;;  %v13365_v13 = vpop.f32.mrb[1].mxu1  ;;  %v665_v11 = vld [vmem:[%s18477_s24 + $0x10] sm:$0xff] }
 0x54d   :  { %1003 = vrot.lane.b32.xlu0 %v16655_v12, %s16153_s13  ;;  %913 = vrot.lane.b32.xlu1 %v16655_v12, %s16154_s11 }
 0x551   :  { %1084 = vrot.lane.b32.xlu0 %v16655_v12, %s16155_s4 }
 0x5bf   :  { %v914_v14 = vpop.permute.xlu1 %913  ;;  %v1004_v15 = vpop.permute.xlu0 %1003 }
 0x5c0   :  { %13367 = vmatpush3.xpose.msk.msra.mxu1 %vm915_vm5, %v914_v14 }
 0x5c1   :  { %13371 = vmatprep.subr.mxu1 %v18408_v62 }
 0x5c3   :  { %13369 = vmatmul.mubr.msk.f32.vlgmr.msra.gmra.mrb[2].mxu1 %vm915_vm5, %v16655_v12  ;;  %v1085_v25 = vpop.permute.xlu0 %1084 }
 0x5c4   :  { %13372 = vmatpush3.msk.msra.mxu1 %vm1009_vm6, %v1004_v15  ;;  %13373 = vmatprep.mubr.msk.f32.mxu1 %vm16151_vm3, %v18408_v62 }
 0x5c5   :  { %13376 = vmatprep.subr.mxu1 %v18408_v62 }
 0x696   :  { %v986_v16 = vpop.f32.mrb[2].mxu1 }
 0x697   :  { %v990_v17 = vmul.f32 0.35355338, %v986_v16  ;;  %v13370_v18 = vpop.f32.mrb[3].mxu1 }
 0x699   :  { %v992_v19 = vsel %vm991_vm7, %v990_v17, -inf }
 0x69a   :  { %993 = vmax.xlane.f32.xlu1 %v992_v19 }
 0x727   :  { %v994_v20 = vpop.xlane.xlu1 %993 }
 0x728   :  { %v995_v21 = vsub.f32 %v990_v17, %v994_v20 }
 0x72a   :  { %v996_v22 = vmul.f32 1.442695, %v995_v21 }
 0x72c   :  { %15250 = vpow2.f32 %v996_v22 }
 0x736   :  { %v15251_v23 = vpop.eup %15250 }
 0x737   :  { %v998_v24 = vsel %vm991_vm7, %v15251_v23, 0.0 }
 0x738   :  { %999 = vadd.xlane.f32.xlu0 %v998_v24 }
 0x74e   :  { %1082 = vrot.lane.b32.xlu0 %v16655_v12, %s16156_s15 }
 0x7c5   :  { %v1000_v26 = vpop.xlane.xlu0 %999 }
 0x7c6   :  { %15252 = vrcp.f32 %v1000_v26 }
 0x7c9   :  { %v1083_v29 = vpop.permute.xlu0 %1082 }
 0x7d0   :  { %v15253_v27 = vpop.eup %15252 }
 0x7d1   :  { %v1002_v28 = vmul.f32 %v15253_v27, %v15251_v23 }
 0x7d3   :  { %13374 = vmatmul.mubr.msk.f32.vlgmr.msra.gmra.mrb[4].mxu1 %vm1005_vm8, %v1002_v28 }
 0x7d4   :  { %13377 = vmatpush3.xpose.msk.msra.mxu1 %vm915_vm5, %v1085_v25  ;;  %13378 = vmatprep.mubr.msk.f32.mxu1 %vm16151_vm3, %v18408_v62 }
 0x7d5   :  { %13381 = vmatprep.subr.mxu1 %v18408_v62 }
 0x7d7   :  { %13379 = vmatmul.mubr.msk.f32.vlgmr.msra.gmra.mrb[6].mxu1 %vm915_vm5, %v1083_v29 }
 0x7d8   :  { %13383 = vmatprep.mubr.msk.f32.mxu1 %vm16151_vm3, %v18408_v62 }
 0x8a6   :  { %v1078_v30 = vpop.f32.mrb[4].mxu1 }
 0x8a7   :  { %v13375_v31 = vpop.f32.mrb[5].mxu1 }
 0x8aa   :  { %v1156_v32 = vpop.f32.mrb[6].mxu1 }
 0x8ab   :  { %v1160_v33 = vmul.f32 0.35355338, %v1156_v32  ;;  %v13380_v34 = vpop.f32.mrb[7].mxu1 }
 0x8ad   :  { %v1161_v35 = vsel %vm991_vm7, %v1160_v33, -inf }
 0x8ae   :  { %1162 = vmax.xlane.f32.xlu1 %v1161_v35 }
 0x8bf   :  { %1172 = vrot.lane.b32.xlu1 %v16655_v12, %s16157_s16 }
 0x8c3   :  { %1397 = vrot.lane.b32.xlu1 %v16655_v12, %s16158_s18 }
 0x8c7   :  { %1395 = vrot.lane.b32.xlu1 %v16655_v12, %s16159_s22 }
 0x93b   :  { %v1163_v36 = vpop.xlane.xlu1 %1162 }
 0x93c   :  { %v1164_v37 = vsub.f32 %v1160_v33, %v1163_v36  ;;  %v666_v33 = vld [vmem:[%s18477_s24 + $0x18] sm:$0xff] }
 0x93e   :  { %v1165_v38 = vmul.f32 1.442695, %v1164_v37 }
 0x93f   :  { %v1173_v39 = vpop.permute.xlu1 %1172 }
 0x940   :  { %15254 = vpow2.f32 %v1165_v38  ;;  %13382 = vmatpush3.msk.msra.mxu1 %vm1009_vm6, %v1173_v39  ;;  %v12557_v38 = vld [vmem:[#allocation17] ss:$0 sm:$0xff] }
 0x941   :  { %13386 = vmatprep.subr.mxu1 %v18408_v62 }
 0x943   :  { %v1398_v51 = vpop.permute.xlu1 %1397 }
 0x947   :  { %v1396_v52 = vpop.permute.xlu1 %1395 }
 0x94a   :  { %v15255_v40 = vpop.eup %15254 }
 0x94b   :  { %v1167_v41 = vsel %vm991_vm7, %v15255_v40, 0.0 }
 0x94c   :  { %1168 = vadd.xlane.f32.xlu0 %v1167_v41 }
 0x9d9   :  { %v1169_v42 = vpop.xlane.xlu0 %1168 }
 0x9da   :  { %15256 = vrcp.f32 %v1169_v42 }
 0x9e4   :  { %v15257_v43 = vpop.eup %15256 }
 0x9e5   :  { %v1171_v44 = vmul.f32 %v15257_v43, %v15255_v40 }
 0x9e7   :  { %13384 = vmatmul.mubr.msk.f32.vlgmr.msra.gmra.mrb[8].mxu1 %vm1005_vm8, %v1171_v44 }
 0x9e8   :  { %13387 = vmatpush3.msra.mxu1 %v664_v45  ;;  %13388 = vmatprep.mubr.msk.f32.mxu1 %vm16151_vm3, %v18408_v62 }
 0x9e9   :  { %13391 = vmatprep.subr.mxu1 %v18408_v62 }
 0xaba   :  { %v1245_v47 = vpop.f32.mrb[8].mxu1 }
 0xabb   :  { %v13385_v48 = vpop.f32.mrb[9].mxu1  ;;  %13389 = vmatmul.mubr.msk.f32.vlgmr.msra.gmra.mrb[10].mxu1 %vm915_vm5, %v1245_v47  ;;  %v637_v47 = vld [vmem:[%s18478_s25] sm:$0xff] }
 0xabc   :  { %13392 = vmatpush3.msra.mxu1 %v663_v46  ;;  %13393 = vmatprep.mubr.msk.f32.mxu1 %vm16151_vm3, %v18408_v62  ;;  %v638_v48 = vld [vmem:[%s18478_s25 + $0x8] sm:$0xff] }
 0xabd   :  { %13396 = vmatprep.subr.mxu1 %v18408_v62 }
 0xabf   :  { %13394 = vmatmul.mubr.msk.f32.vlgmr.msra.gmra.mrb[12].mxu1 %vm915_vm5, %v1078_v30 }
 0xac0   :  { %13398 = vmatprep.mubr.msk.f32.mxu1 %vm16151_vm3, %v18408_v62 }
 0xac3   :  { %13397 = vmatpush3.xpose.msk.msra.mxu1 %vm915_vm5, %v1398_v51  ;;  %v16757_v51 = vpack.c.bf16 %v638_v48, %v637_v47 }
 0xac4   :  { %13401 = vmatprep.subr.mxu1 %v18408_v62 }
 0xac6   :  { %13399 = vmatmul.mubr.msk.f32.vlgmr.msra.gmra.mrb[14].mxu1 %vm915_vm5, %v1396_v52  ;;  %v640_v52 = vld [vmem:[%s18478_s25 + $0x18] sm:$0xff] }
 0xac7   :  { %13403 = vmatprep.mubr.msk.f32.mxu1 %vm16151_vm3, %v18408_v62 }
 0xb8e   :  { %v1318_v53 = vpop.f32.mrb[10].mxu1 }
 0xb8f   :  { %v13390_v54 = vpop.f32.mrb[11].mxu1 }
 0xb92   :  { %v1391_v55 = vpop.f32.mrb[12].mxu1 }
 0xb93   :  { %v1392_v56 = vadd.f32 %v1391_v55, %v1318_v53  ;;  %v13395_v57 = vpop.f32.mrb[13].mxu1 }
 0xb99   :  { %v1469_v58 = vpop.f32.mrb[14].mxu1 }
 0xb9a   :  { %v1473_v59 = vmul.f32 0.35355338, %v1469_v58  ;;  %v13400_v61 = vpop.f32.mrb[15].mxu1  ;;  %v12558_v58 = vld [vmem:[#allocation16] ss:$0 sm:$0xff] }
 0xb9b   :  { %v642_v61 = vld [vmem:[%s18479_s27] sm:$0xff] }
 0xb9c   :  { %v1474_v1 = vsel %vm991_vm7, %v1473_v59, -inf }
 0xb9d   :  { %1475 = vmax.xlane.f32.xlu1 %v1474_v1  ;;  %v643_v1 = vld [vmem:[%s18479_s27 + $0x8] sm:$0xff] }
 0xc2a   :  { %v1476_v2 = vpop.xlane.xlu1 %1475 }
 0xc2b   :  { %v1477_v3 = vsub.f32 %v1473_v59, %v1476_v2  ;;  %v12559_v2 = vld [vmem:[#allocation14] ss:$0 sm:$0xff] }
 0xc2d   :  { %v1478_v4 = vmul.f32 1.442695, %v1477_v3 }
 0xc2f   :  { %15258 = vpow2.f32 %v1478_v4  ;;  %v16769_v4 = vpack.c.bf16 %v643_v1, %v642_v61 }
 0xc39   :  { %v15259_v5 = vpop.eup %15258 }
 0xc3a   :  { %v1480_v6 = vsel %vm991_vm7, %v15259_v5, 0.0 }
 0xc3b   :  { %1481 = vadd.xlane.f32.xlu0 %v1480_v6  ;;  %v644_v6 = vld [vmem:[%s18479_s27 + $0x10] sm:$0xff] }
 0xc51   :  { %1485 = vrot.lane.b32.xlu0 %v16655_v12, %s16160_s5 }
 0xc55   :  { %1638 = vrot.lane.b32.xlu0 %v16655_v12, %s16161_s12 }
 0xc59   :  { %1636 = vrot.lane.b32.xlu0 %v16655_v12, %s16162_s29 }
 0xcc8   :  { %v1482_v7 = vpop.xlane.xlu0 %1481 }
 0xcc9   :  { %15260 = vrcp.f32 %v1482_v7  ;;  %v645_v7 = vld [vmem:[%s18479_s27 + $0x18] sm:$0xff] }
 0xccc   :  { %v1486_v8 = vpop.permute.xlu0 %1485 }
 0xccd   :  { %13402 = vmatpush3.msk.msra.mxu1 %vm1009_vm6, %v1486_v8  ;;  %v16778_v8 = vpack.c.bf16 %v645_v7, %v644_v6  ;;  %v12564_v7 = vld [vmem:[#allocation23] ss:$0 sm:$0xff] }
 0xcce   :  { %13406 = vmatprep.subr.mxu1 %v18408_v62 }
 0xcd0   :  { %v1639_v13 = vpop.permute.xlu0 %1638 }
 0xcd3   :  { %v15261_v9 = vpop.eup %15260 }
 0xcd4   :  { %v1484_v10 = vmul.f32 %v15261_v9, %v15259_v5  ;;  %v1637_v16 = vpop.permute.xlu0 %1636  ;;  %v646_v9 = vld [vmem:[%s18479_s27 + $0x20] sm:$0xff] }
 0xcd6   :  { %13404 = vmatmul.mubr.msk.f32.vlgmr.msra.gmra.mrb[16].mxu1 %vm1005_vm8, %v1484_v10  ;;  %v647_v10 = vld [vmem:[%s18479_s27 + $0x28] sm:$0xff] }
 0xcd7   :  { %13407 = vmatpush3.msra.mxu1 %v665_v11  ;;  %13408 = vmatprep.mubr.msk.f32.mxu1 %vm16151_vm3, %v18408_v62  ;;  %v16784_v11 = vpack.c.bf16 %v647_v10, %v646_v9 }
 0xcd8   :  { %13411 = vmatprep.subr.mxu1 %v18408_v62 }
 0xda9   :  { %v1558_v14 = vpop.f32.mrb[16].mxu1 }
 0xdaa   :  { %v13405_v15 = vpop.f32.mrb[17].mxu1  ;;  %13409 = vmatmul.mubr.msk.f32.vlgmr.msra.gmra.mrb[18].mxu1 %vm915_vm5, %v1558_v14  ;;  %v649_v14 = vld [vmem:[%s18479_s27 + $0x38] sm:$0xff] }
 0xdab   :  { %13412 = vmatpush3.xpose.msk.msra.mxu1 %vm915_vm5, %v1639_v13  ;;  %13413 = vmatprep.mubr.msk.f32.mxu1 %vm16151_vm3, %v18408_v62  ;;  %v648_v13 = vld [vmem:[%s18479_s27 + $0x30] sm:$0xff] }
 0xdac   :  { %13416 = vmatprep.subr.mxu1 %v18408_v62  ;;  %v16790_v15 = vpack.c.bf16 %v649_v14, %v648_v13  ;;  %v12565_v13 = vld [vmem:[#allocation31] ss:$0 sm:$0xff] }
 0xdae   :  { %13414 = vmatmul.mubr.msk.f32.vlgmr.msra.gmra.mrb[20].mxu1 %vm915_vm5, %v1637_v16  ;;  %v650_v16 = vld [vmem:[%s18479_s27 + $0x40] sm:$0xff] }
 0xdaf   :  { %13418 = vmatprep.mubr.msk.f32.mxu1 %vm16151_vm3, %v18408_v62 }
 0xe7d   :  { %v1631_v17 = vpop.f32.mrb[18].mxu1 }
 0xe7e   :  { %v1635_v18 = vadd.f32 %v1631_v17, %v1392_v56  ;;  %v13410_v19 = vpop.f32.mrb[19].mxu1  ;;  %v651_v17 = vld [vmem:[%s18479_s27 + $0x48] sm:$0xff] }
 0xe7f   :  { %v16797_v19 = vpack.c.bf16 %v651_v17, %v650_v16 }
 0xe81   :  { %v1710_v20 = vpop.f32.mrb[20].mxu1 }
 0xe82   :  { %v1714_v21 = vmul.f32 0.35355338, %v1710_v20  ;;  %v13415_v22 = vpop.f32.mrb[21].mxu1  ;;  %v653_v20 = vld [vmem:[%s18479_s27 + $0x58] sm:$0xff] }
 0xe83   :  { %v654_v22 = vld [vmem:[%s18479_s27 + $0x60] sm:$0xff] }
 0xe84   :  { %v1715_v23 = vsel %vm991_vm7, %v1714_v21, -inf }
 0xe85   :  { %1716 = vmax.xlane.f32.xlu1 %v1715_v23  ;;  %v655_v23 = vld [vmem:[%s18479_s27 + $0x68] sm:$0xff] }
 0xe96   :  { %1726 = vrot.lane.b32.xlu1 %v16655_v12, %s16163_s23 }
 0xf12   :  { %v1717_v24 = vpop.xlane.xlu1 %1716 }
 0xf13   :  { %v1718_v25 = vsub.f32 %v1714_v21, %v1717_v24  ;;  %v16807_v24 = vpack.c.bf16 %v655_v23, %v654_v22 }
 0xf15   :  { %v1719_v26 = vmul.f32 1.442695, %v1718_v25  ;;  %v656_v25 = vld [vmem:[%s18479_s27 + $0x70] sm:$0xff] }
 0xf16   :  { %v1727_v27 = vpop.permute.xlu1 %1726 }
 0xf17   :  { %15262 = vpow2.f32 %v1719_v26  ;;  %13417 = vmatpush3.msk.msra.mxu1 %vm1009_vm6, %v1727_v27  ;;  %v657_v26 = vld [vmem:[%s18479_s27 + $0x78] sm:$0xff] }
 0xf18   :  { %13421 = vmatprep.subr.mxu1 %v18408_v62  ;;  %v16813_v27 = vpack.c.bf16 %v657_v26, %v656_v25 }
 0xf21   :  { %v15263_v28 = vpop.eup %15262 }
 0xf22   :  { %v1721_v29 = vsel %vm991_vm7, %v15263_v28, 0.0 }
 0xf23   :  { %1722 = vadd.xlane.f32.xlu0 %v1721_v29 }
 0xfb0   :  { %v1723_v30 = vpop.xlane.xlu0 %1722 }
 0xfb1   :  { %15264 = vrcp.f32 %v1723_v30 }
 0xfbb   :  { %v15265_v31 = vpop.eup %15264 }
 0xfbc   :  { %v1725_v32 = vmul.f32 %v15265_v31, %v15263_v28  ;;  %v12560_v28 = vld [vmem:[#allocation8] ss:$0 sm:$0xff] }
 0xfbe   :  { %13419 = vmatmul.mubr.msk.f32.vlgmr.msra.gmra.mrb[22].mxu1 %vm1005_vm8, %v1725_v32 }
 0xfbf   :  { %13422 = vmatpush3.msra.mxu1 %v666_v33  ;;  %13423 = vmatprep.mubr.msk.f32.mxu1 %vm16151_vm3, %v18408_v62 }
 0xfc0   :  { %14488 = vmatprep.subr.bf16.mxu1 %v16150_v0 }
0x1091   :  { %v1799_v12 = vpop.f32.mrb[22].mxu1 }
0x1092   :  { %v13420_v34 = vpop.f32.mrb[23].mxu1  ;;  %13424 = vmatmul.mubr.msk.f32.vlgmr.msra.gmra.mrb[24].mxu1 %vm915_vm5, %v1799_v12 }
0x1093   :  { %13434 = vmatprep.mubr.msk.f32.mxu1 %vm16151_vm3, %v18408_v62  ;;  %14490 = vmatpush3.bf16.msra.mxu1 %v16757_v51 }
0x1094   :  { %14491 = vmatprep.subr.bf16.mxu1 %v16150_v0 }
0x1165   :  { %v1872_v35 = vpop.f32.mrb[24].mxu1 }
0x1166   :  { %v1876_v36 = vadd.f32 %v1872_v35, %v1635_v18  ;;  %v13425_v37 = vpop.f32.mrb[25].mxu1  ;;  %v652_v18 = vld [vmem:[%s18479_s27 + $0x50] sm:$0xff] }
0x1167   :  { %v16801_v21 = vpack.c.bf16 %v653_v20, %v652_v18 }
0x1168   :  { %v1877_v39 = vadd.f32 %v1876_v36, %v16628_v49  ;;  %v639_v49 = vld [vmem:[%s18478_s25 + $0x10] sm:$0xff] }
0x1169   :  { %v16763_v53 = vpack.c.bf16 %v640_v52, %v639_v49 }
0x116a   :  { %v16749_v40 = vadd.f32 %v12557_v38, %v1877_v39 }
0x116b   :  { %14493 = vmatpush3.bf16.msra.mxu1 %v16763_v53 }
0x116c   :  { %v1885_v41 = vsel %vm803_vm2, %v16749_v40, 0.0  ;;  %14494 = vmatprep.subr.bf16.mxu1 %v16150_v0 }
0x116d   :  { %1886 = vadd.xlane.f32.xlu1 %v1885_v41  ;;  %v12562_v41 = vld [vmem:[#allocation10] ss:$0 sm:$0xff] }
0x11fa   :  { %v1887_v42 = vpop.xlane.xlu1 %1886 }
0x11fb   :  { %v1888_v43 = vmul.f32 0.03125, %v1887_v42 }
0x11fd   :  { %v1889_v44 = vsub.f32 %v16749_v40, %v1888_v43 }
0x11ff   :  { %v1890_v45 = vmul.f32 %v1889_v44, %v1889_v44 }
0x1201   :  { %v1891_v46 = vsel %vm803_vm2, %v1890_v45, 0.0 }
0x1202   :  { %1892 = vadd.xlane.f32.xlu0 %v1891_v46 }
0x128f   :  { %v1893_v54 = vpop.xlane.xlu0 %1892 }
0x1290   :  { %v1894_v55 = vmul.f32 0.03125, %v1893_v54 }
0x1292   :  { %v1895_v56 = vadd.f32 1e-05, %v1894_v55  ;;  %v704_v55 = vld [vmem:[%s18480_s26] sm:$0xff] }
0x1294   :  { %15266 = vrsqrt.f32 %v1895_v56  ;;  %v705_v56 = vld [vmem:[%s18480_s26 + $0x8] sm:$0xff] }
0x129e   :  { %v15267_v57 = vpop.eup %15266 }
0x129f   :  { %v1897_v59 = vmul.f32 %v15267_v57, %v1889_v44  ;;  %v16829_v57 = vpack.c.bf16 %v705_v56, %v704_v55 }
0x12a1   :  { %v1904_v3 = vmul.f32 %v12558_v58, %v1897_v59  ;;  %14520 = vmatpush3.bf16.msra.mxu0 %v16829_v57  ;;  %v707_v58 = vld [vmem:[%s18480_s26 + $0x18] sm:$0xff] }
0x12a2   :  { %14521 = vmatprep.subr.bf16.mxu0 %v16150_v0 }
0x12a3   :  { %v1911_v5 = vadd.f32 %v12559_v2, %v1904_v3 }
0x12a5   :  { %13435 = vmatmul.mubr.msk.f32.vlgmr.msra.gmra.mrb[26].mxu1 %vm838_vm4, %v1911_v5  ;;  %v12563_v5 = vld [vmem:[#allocation25] ss:$0 sm:$0xff] }
0x12a6   :  { %14496 = vmatpush3.bf16.msra.mxu1 %v16769_v4  ;;  %13469 = vmatprep.mubr.msk.f32.mxu1 %vm16151_vm3, %v18408_v62 }
0x12a7   :  { %14497 = vmatprep.subr.bf16.mxu1 %v16150_v0 }
0x12aa   :  { %14499 = vmatpush3.bf16.msra.mxu1 %v16778_v8 }
0x12ab   :  { %14500 = vmatprep.subr.bf16.mxu1 %v16150_v0 }
0x12ae   :  { %14502 = vmatpush3.bf16.msra.mxu1 %v16784_v11 }
0x12af   :  { %14503 = vmatprep.subr.bf16.mxu1 %v16150_v0 }
0x12b2   :  { %14505 = vmatpush3.bf16.msra.mxu1 %v16790_v15 }
0x12b3   :  { %14506 = vmatprep.subr.bf16.mxu1 %v16150_v0 }
0x12b6   :  { %14508 = vmatpush3.bf16.msra.mxu1 %v16797_v19 }
0x12b7   :  { %14509 = vmatprep.subr.bf16.mxu1 %v16150_v0 }
0x12ba   :  { %14511 = vmatpush3.bf16.msra.mxu1 %v16801_v21 }
0x12bb   :  { %14512 = vmatprep.subr.bf16.mxu1 %v16150_v0 }
0x12be   :  { %14514 = vmatpush3.bf16.msra.mxu1 %v16807_v24 }
0x12bf   :  { %14515 = vmatprep.subr.bf16.mxu1 %v16150_v0 }
0x12c2   :  { %14517 = vmatpush3.bf16.msra.mxu1 %v16813_v27 }
0x12c3   :  { %13508 = vmatprep.subr.mxu1 %v18408_v62 }
0x1378   :  { %v1987_v29 = vpop.f32.mrb[26].mxu1 }
0x1379   :  { %v1988_v30 = vadd.f32 %v12560_v28, %v1987_v29  ;;  %v13436_v31 = vpop.f32.mrb[27].mxu1 }
0x137b   :  { %v1991_v32 = vmul.f32 %v1988_v30, %v1988_v30 }
0x137d   :  { %v1992_v33 = vmul.f32 %v1991_v32, %v1988_v30 }
0x137f   :  { %v1993_v12 = vmul.f32 0.044715, %v1992_v33 }
0x1381   :  { %v1994_v34 = vadd.f32 %v1993_v12, %v1988_v30 }
0x1383   :  { %v1995_v35 = vmul.f32 0.7978846, %v1994_v34 }
0x1385   :  { %15268 = vtanh.f32 %v1995_v35 }
0x138f   :  { %v15269_v36 = vpop.eup %15268 }
0x1390   :  { %v1997_v37 = vadd.f32 1.0, %v15269_v36 }
0x1392   :  { %v1998_v38 = vmul.f32 0.5, %v1997_v37  ;;  %v16871_v37 = vld [vmem:[%s18481_s8] sm:$0xff] }
0x1394   :  { %v1999_v39 = vmul.f32 %v1998_v38, %v1988_v30 }
0x1396   :  { %13470 = vmatmul.mubr.f32.vlgmr.msra.gmra.mrb[28].mxu1 %v1999_v39 }
0x1397   :  { %13510 = vmatprep.mubr.msk.f32.mxu1 %vm16151_vm3, %v18408_v62  ;;  %13509 = vmatpush3.msra.mxu1 %v16871_v37 }
0x1398   :  { %13518 = vmatprep.subr.mxu1 %v18408_v62 }
0x1469   :  { %v2072_v42 = vpop.f32.mrb[28].mxu1 }
0x146a   :  { %v2073_v43 = vadd.f32 %v12562_v41, %v2072_v42  ;;  %v13471_v44 = vpop.f32.mrb[29].mxu1 }
0x146c   :  { %v16821_v45 = vadd.f32 %v2073_v43, %v16749_v40  ;;  %v706_v40 = vld [vmem:[%s18480_s26 + $0x10] sm:$0xff]  ;;  %s18511_s26 = sld [smem:[#allocation77_spill]] }
0x146d   :  { %v16835_v59 = vpack.c.bf16 %v707_v58, %v706_v40 }
0x146e   :  { %v2077_v46 = vsel %vm803_vm2, %v16821_v45, 0.0 }
0x146f   :  { %2078 = vadd.xlane.f32.xlu0 %v2077_v46  ;;  %14523 = vmatpush3.bf16.msra.mxu0 %v16835_v59 }
0x1470   :  { %13483 = vmatprep.subr.mxu0 %v18408_v62 }
0x14fc   :  { %v2079_v47 = vpop.xlane.xlu0 %2078 }
0x14fd   :  { %v2080_v48 = vmul.f32 0.03125, %v2079_v47 }
0x14ff   :  { %v2081_v49 = vsub.f32 %v16821_v45, %v2080_v48 }
0x1501   :  { %v2082_v52 = vmul.f32 %v2081_v49, %v2081_v49 }
0x1503   :  { %v2083_v54 = vsel %vm803_vm2, %v2082_v52, 0.0 }
0x1504   :  { %2084 = vadd.xlane.f32.xlu0 %v2083_v54 }
0x1591   :  { %v2085_v61 = vpop.xlane.xlu0 %2084 }
0x1592   :  { %v2086_v1 = vmul.f32 0.03125, %v2085_v61 }
0x1594   :  { %v2087_v2 = vadd.f32 1e-05, %v2086_v1  ;;  %v700_v1 = vld [vmem:[%s18481_s8 + $0x8] sm:$0xff] }
0x1596   :  { %15270 = vrsqrt.f32 %v2087_v2 }
0x15a0   :  { %v15271_v3 = vpop.eup %15270 }
0x15a1   :  { %v2089_v6 = vmul.f32 %v15271_v3, %v2081_v49 }
0x15a3   :  { %v2096_v9 = vmul.f32 %v12563_v5, %v2089_v6 }
0x15a5   :  { %v2103_v10 = vadd.f32 %v12564_v7, %v2096_v9 }
0x15a7   :  { %13481 = vmatmul.mubr.msk.f32.vlgmr.msra.gmra.mrb[2].mxu0 %vm838_vm4, %v2103_v10 }
0x15a8   :  { %13485 = vmatprep.mubr.msk.f32.mxu0 %vm16151_vm3, %v18408_v62 }
0x167a   :  { %v2179_v14 = vpop.f32.mrb[2].mxu0 }
0x167b   :  { %v16842_v16 = vadd.f32 %v12565_v13, %v2179_v14  ;;  %v13482_v17 = vpop.f32.mrb[3].mxu0 }
0x167d   :  { %2184 = vrot.lane.b32.xlu0 %v16842_v16, %s16154_s11 }
0x1681   :  { %2351 = vrot.lane.b32.xlu0 %v16842_v16, %s16155_s4 }
0x1685   :  { %2349 = vrot.lane.b32.xlu0 %v16842_v16, %s16156_s15 }
0x16ef   :  { %v2185_v18 = vpop.permute.xlu0 %2184 }
0x16f0   :  { %13484 = vmatpush3.xpose.msk.msra.mxu0 %vm915_vm5, %v2185_v18 }
0x16f1   :  { %13488 = vmatprep.subr.mxu0 %v18408_v62 }
0x16f3   :  { %13486 = vmatmul.mubr.msk.f32.vlgmr.msra.gmra.mrb[4].mxu0 %vm915_vm5, %v16842_v16  ;;  %v2352_v34 = vpop.permute.xlu0 %2351 }
0x16f4   :  { %13490 = vmatprep.mubr.msk.f32.mxu0 %vm16151_vm3, %v18408_v62 }
0x16f7   :  { %v2350_v36 = vpop.permute.xlu0 %2349 }
0x17c6   :  { %v2256_v20 = vpop.f32.mrb[4].mxu0 }
0x17c7   :  { %v2260_v22 = vmul.f32 0.35355338, %v2256_v20  ;;  %v13487_v23 = vpop.f32.mrb[5].mxu0 }
0x17c9   :  { %v2261_v25 = vsel %vm991_vm7, %v2260_v22, -inf }
0x17ca   :  { %2262 = vmax.xlane.f32.xlu1 %v2261_v25 }
0x1857   :  { %v2263_v26 = vpop.xlane.xlu1 %2262 }
0x1858   :  { %v2264_v28 = vsub.f32 %v2260_v22, %v2263_v26 }
0x185a   :  { %v2265_v29 = vmul.f32 1.442695, %v2264_v28 }
0x185c   :  { %15272 = vpow2.f32 %v2265_v29 }
0x1866   :  { %v15273_v30 = vpop.eup %15272 }
0x1867   :  { %v2267_v31 = vsel %vm991_vm7, %v15273_v30, 0.0 }
0x1868   :  { %2268 = vadd.xlane.f32.xlu1 %v2267_v31 }
0x1879   :  { %2272 = vrot.lane.b32.xlu1 %v16842_v16, %s16153_s13 }
0x18f5   :  { %v2269_v32 = vpop.xlane.xlu1 %2268 }
0x18f6   :  { %15274 = vrcp.f32 %v2269_v32 }
0x18f9   :  { %v2273_v33 = vpop.permute.xlu1 %2272 }
0x18fa   :  { %13489 = vmatpush3.msk.msra.mxu0 %vm1009_vm6, %v2273_v33 }
0x18fb   :  { %13493 = vmatprep.subr.mxu0 %v18408_v62 }
0x1900   :  { %v15275_v12 = vpop.eup %15274 }
0x1901   :  { %v2271_v35 = vmul.f32 %v15275_v12, %v15273_v30  ;;  %v16920_v12 = vld [vmem:[%s18481_s8 + $0x10] sm:$0xff] }
0x1903   :  { %13491 = vmatmul.mubr.msk.f32.vlgmr.msra.gmra.mrb[6].mxu0 %vm1005_vm8, %v2271_v35 }
0x1904   :  { %13494 = vmatpush3.xpose.msk.msra.mxu0 %vm915_vm5, %v2352_v34  ;;  %13495 = vmatprep.mubr.msk.f32.mxu0 %vm16151_vm3, %v18408_v62 }
0x1905   :  { %13498 = vmatprep.subr.mxu0 %v18408_v62 }
0x1907   :  { %13496 = vmatmul.mubr.msk.f32.vlgmr.msra.gmra.mrb[8].mxu0 %vm915_vm5, %v2350_v36 }
0x1908   :  { %13500 = vmatprep.mubr.msk.f32.mxu0 %vm16151_vm3, %v18408_v62 }
0x19d6   :  { %v2345_v38 = vpop.f32.mrb[6].mxu0 }
0x19d7   :  { %v13492_v39 = vpop.f32.mrb[7].mxu0  ;;  %13511 = vmatmul.mubr.msk.f32.vlgmr.msra.gmra.mrb[30].mxu1 %vm915_vm5, %v2345_v38 }
0x19d8   :  { %13520 = vmatprep.mubr.msk.f32.mxu1 %vm16151_vm3, %v18408_v62 }
0x19da   :  { %v2423_v41 = vpop.f32.mrb[8].mxu0 }
0x19db   :  { %v2427_v42 = vmul.f32 0.35355338, %v2423_v41  ;;  %v13497_v43 = vpop.f32.mrb[9].mxu0 }
0x19dd   :  { %v2428_v44 = vsel %vm991_vm7, %v2427_v42, -inf }
0x19de   :  { %2429 = vmax.xlane.f32.xlu0 %v2428_v44 }
0x19f4   :  { %2439 = vrot.lane.b32.xlu0 %v16842_v16, %s16157_s16 }
0x19f8   :  { %2662 = vrot.lane.b32.xlu0 %v16842_v16, %s16159_s22 }
0x1a6b   :  { %v2430_v46 = vpop.xlane.xlu0 %2429 }
0x1a6c   :  { %v2431_v47 = vsub.f32 %v2427_v42, %v2430_v46 }
0x1a6e   :  { %v2432_v48 = vmul.f32 1.442695, %v2431_v47 }
0x1a6f   :  { %v2440_v49 = vpop.permute.xlu0 %2439 }
0x1a70   :  { %15276 = vpow2.f32 %v2432_v48  ;;  %13499 = vmatpush3.msk.msra.mxu0 %vm1009_vm6, %v2440_v49  ;;  %v702_v48 = vld [vmem:[%s18481_s8 + $0x18] sm:$0xff] }
0x1a71   :  { %13503 = vmatprep.subr.mxu0 %v18408_v62 }
0x1a73   :  { %v2663_v6 = vpop.permute.xlu0 %2662 }
0x1a7a   :  { %v15277_v52 = vpop.eup %15276 }
0x1a7b   :  { %v2434_v54 = vsel %vm991_vm7, %v15277_v52, 0.0 }
0x1a7c   :  { %2435 = vadd.xlane.f32.xlu1 %v2434_v54 }
0x1a8d   :  { %2664 = vrot.lane.b32.xlu1 %v16842_v16, %s16158_s18 }
0x1aaa   :  { %v2658_v55 = vpop.f32.mrb[30].mxu1 }
0x1aab   :  { %v13512_v56 = vpop.f32.mrb[31].mxu1 }
0x1b09   :  { %v2436_v40 = vpop.xlane.xlu1 %2435 }
0x1b0a   :  { %15278 = vrcp.f32 %v2436_v40 }
0x1b0d   :  { %v2665_v3 = vpop.permute.xlu1 %2664 }
0x1b14   :  { %v15279_v58 = vpop.eup %15278 }
0x1b15   :  { %v2438_v61 = vmul.f32 %v15279_v58, %v15277_v52 }
0x1b17   :  { %13501 = vmatmul.mubr.msk.f32.vlgmr.msra.gmra.mrb[10].mxu0 %vm1005_vm8, %v2438_v61 }
0x1b18   :  { %13504 = vmatpush3.msra.mxu0 %v700_v1  ;;  %13505 = vmatprep.mubr.msk.f32.mxu0 %vm16151_vm3, %v18408_v62 }
0x1b19   :  { %13513 = vmatprep.subr.mxu0 %v18408_v62 }
0x1bea   :  { %v2512_v2 = vpop.f32.mrb[10].mxu0 }
0x1beb   :  { %v13502_v5 = vpop.f32.mrb[11].mxu0  ;;  %13506 = vmatmul.mubr.msk.f32.vlgmr.msra.gmra.mrb[12].mxu0 %vm915_vm5, %v2512_v2 }
0x1bec   :  { %13514 = vmatpush3.xpose.msk.msra.mxu0 %vm915_vm5, %v2665_v3  ;;  %13515 = vmatprep.mubr.msk.f32.mxu0 %vm16151_vm3, %v18408_v62  ;;  %v12587_v5 = vld [vmem:[#allocation29] ss:$0 sm:$0xff] }
0x1bed   :  { %13523 = vmatprep.subr.mxu0 %v18408_v62 }
0x1bef   :  { %13516 = vmatmul.mubr.msk.f32.vlgmr.msra.gmra.mrb[14].mxu0 %vm915_vm5, %v2663_v6 }
0x1bf0   :  { %13525 = vmatprep.mubr.msk.f32.mxu0 %vm16151_vm3, %v18408_v62  ;;  %13524 = vmatpush3.msra.mxu0 %v16920_v12 }
0x1bf1   :  { %13533 = vmatprep.subr.mxu0 %v18408_v62 }
0x1cbe   :  { %v2585_v7 = vpop.f32.mrb[12].mxu0 }
0x1cbf   :  { %v2659_v9 = vadd.f32 %v2658_v55, %v2585_v7  ;;  %v13507_v10 = vpop.f32.mrb[13].mxu0 }
0x1cc2   :  { %v2736_v13 = vpop.f32.mrb[14].mxu0 }
0x1cc3   :  { %v2740_v14 = vmul.f32 0.35355338, %v2736_v13  ;;  %v13517_v17 = vpop.f32.mrb[15].mxu0 }
0x1cc5   :  { %v2741_v18 = vsel %vm991_vm7, %v2740_v14, -inf }
0x1cc6   :  { %2742 = vmax.xlane.f32.xlu0 %v2741_v18 }
0x1cdc   :  { %2752 = vrot.lane.b32.xlu0 %v16842_v16, %s16160_s5 }
0x1ce0   :  { %2903 = vrot.lane.b32.xlu0 %v16842_v16, %s16162_s29 }
0x1d53   :  { %v2743_v20 = vpop.xlane.xlu0 %2742 }
0x1d54   :  { %v2744_v22 = vsub.f32 %v2740_v14, %v2743_v20  ;;  %v673_v20 = vld [vmem:[%s18482_s28] sm:$0xff] }
0x1d56   :  { %v2745_v23 = vmul.f32 1.442695, %v2744_v22  ;;  %v674_v22 = vld [vmem:[%s18482_s28 + $0x8] sm:$0xff] }
0x1d57   :  { %v2753_v25 = vpop.permute.xlu0 %2752 }
0x1d58   :  { %15280 = vpow2.f32 %v2745_v23  ;;  %13519 = vmatpush3.msk.msra.mxu1 %vm1009_vm6, %v2753_v25  ;;  %v16950_v23 = vpack.c.bf16 %v674_v22, %v673_v20  ;;  %v676_v25 = vld [vmem:[%s18482_s28 + $0x18] sm:$0xff] }
0x1d59   :  { %13528 = vmatprep.subr.mxu1 %v18408_v62 }
0x1d5b   :  { %v2904_v33 = vpop.permute.xlu0 %2903 }
0x1d62   :  { %v15281_v26 = vpop.eup %15280 }
0x1d63   :  { %v2747_v28 = vsel %vm991_vm7, %v15281_v26, 0.0 }
0x1d64   :  { %2748 = vadd.xlane.f32.xlu1 %v2747_v28  ;;  %v678_v28 = vld [vmem:[%s18483_s1] sm:$0xff] }
0x1d75   :  { %2905 = vrot.lane.b32.xlu1 %v16842_v16, %s16161_s12 }
0x1df1   :  { %v2749_v29 = vpop.xlane.xlu1 %2748 }
0x1df2   :  { %15282 = vrcp.f32 %v2749_v29  ;;  %v679_v29 = vld [vmem:[%s18483_s1 + $0x8] sm:$0xff] }
0x1df5   :  { %v2906_v32 = vpop.permute.xlu1 %2905 }
0x1dfc   :  { %v15283_v30 = vpop.eup %15282 }
0x1dfd   :  { %v2751_v31 = vmul.f32 %v15283_v30, %v15281_v26  ;;  %v16962_v30 = vpack.c.bf16 %v679_v29, %v678_v28 }
0x1dff   :  { %13521 = vmatmul.mubr.msk.f32.vlgmr.msra.gmra.mrb[32].mxu1 %vm1005_vm8, %v2751_v31 }
0x1e00   :  { %13529 = vmatpush3.xpose.msk.msra.mxu1 %vm915_vm5, %v2906_v32  ;;  %13530 = vmatprep.mubr.msk.f32.mxu1 %vm16151_vm3, %v18408_v62 }
0x1e01   :  { %13538 = vmatprep.subr.mxu1 %v18408_v62 }
0x1e03   :  { %13531 = vmatmul.mubr.msk.f32.vlgmr.msra.gmra.mrb[34].mxu1 %vm915_vm5, %v2904_v33 }
0x1e04   :  { %13540 = vmatprep.mubr.msk.f32.mxu1 %vm16151_vm3, %v18408_v62  ;;  %13539 = vmatpush3.msra.mxu1 %v702_v48 }
0x1e05   :  { %14530 = vmatprep.subr.bf16.mxu1 %v16150_v0 }
0x1ed2   :  { %v2825_v34 = vpop.f32.mrb[32].mxu1 }
0x1ed3   :  { %v13522_v35 = vpop.f32.mrb[33].mxu1  ;;  %13526 = vmatmul.mubr.msk.f32.vlgmr.msra.gmra.mrb[16].mxu0 %vm915_vm5, %v2825_v34 }
0x1ed4   :  { %13535 = vmatprep.mubr.msk.f32.mxu0 %vm16151_vm3, %v18408_v62  ;;  %v12588_v35 = vld [vmem:[#allocation28] ss:$0 sm:$0xff] }
0x1ed6   :  { %v2977_v36 = vpop.f32.mrb[34].mxu1 }
0x1ed7   :  { %v2981_v38 = vmul.f32 0.35355338, %v2977_v36  ;;  %v13532_v39 = vpop.f32.mrb[35].mxu1 }
0x1ed9   :  { %v2982_v41 = vsel %vm991_vm7, %v2981_v38, -inf }
0x1eda   :  { %2983 = vmax.xlane.f32.xlu1 %v2982_v41 }
0x1f67   :  { %v2984_v42 = vpop.xlane.xlu1 %2983 }
0x1f68   :  { %v2985_v43 = vsub.f32 %v2981_v38, %v2984_v42  ;;  %v12589_v38 = vld [vmem:[#allocation26] ss:$0 sm:$0xff]  ;;  %v680_v42 = vld [vmem:[%s18483_s1 + $0x10] sm:$0xff] }
0x1f6a   :  { %v2986_v44 = vmul.f32 1.442695, %v2985_v43  ;;  %v681_v43 = vld [vmem:[%s18483_s1 + $0x18] sm:$0xff] }
0x1f6c   :  { %15284 = vpow2.f32 %v2986_v44  ;;  %v16971_v44 = vpack.c.bf16 %v681_v43, %v680_v42 }
0x1f76   :  { %v15285_v46 = vpop.eup %15284 }
0x1f77   :  { %v2988_v47 = vsel %vm991_vm7, %v15285_v46, 0.0 }
0x1f78   :  { %2989 = vadd.xlane.f32.xlu0 %v2988_v47  ;;  %v683_v47 = vld [vmem:[%s18483_s1 + $0x28] sm:$0xff] }
0x1f8e   :  { %2993 = vrot.lane.b32.xlu0 %v16842_v16, %s16163_s23 }
0x1fa6   :  { %v2898_v49 = vpop.f32.mrb[16].mxu0 }
0x1fa7   :  { %v2902_v52 = vadd.f32 %v2898_v49, %v2659_v9  ;;  %v13527_v54 = vpop.f32.mrb[17].mxu0  ;;  %v684_v49 = vld [vmem:[%s18483_s1 + $0x30] sm:$0xff] }
0x2005   :  { %v2990_v55 = vpop.xlane.xlu0 %2989 }
0x2006   :  { %15286 = vrcp.f32 %v2990_v55  ;;  %v686_v55 = vld [vmem:[%s18483_s1 + $0x40] sm:$0xff] }
0x2009   :  { %v2994_v56 = vpop.permute.xlu0 %2993 }
0x200a   :  { %13534 = vmatpush3.msk.msra.mxu0 %vm1009_vm6, %v2994_v56  ;;  %v687_v56 = vld [vmem:[%s18483_s1 + $0x48] sm:$0xff] }
0x200b   :  { %14524 = vmatprep.subr.bf16.mxu0 %v16150_v0 }
0x2010   :  { %v15287_v40 = vpop.eup %15286 }
0x2011   :  { %v2992_v58 = vmul.f32 %v15287_v40, %v15285_v46  ;;  %v682_v46 = vld [vmem:[%s18483_s1 + $0x20] sm:$0xff]  ;;  %v688_v40 = vld [vmem:[%s18483_s1 + $0x50] sm:$0xff] }
0x2012   :  { %v16977_v48 = vpack.c.bf16 %v683_v47, %v682_v46 }
0x2013   :  { %13536 = vmatmul.mubr.msk.f32.vlgmr.msra.gmra.mrb[18].mxu0 %vm1005_vm8, %v2992_v58  ;;  %v16990_v58 = vpack.c.bf16 %v687_v56, %v686_v55 }
0x2014   :  { %13551 = vmatprep.mubr.msk.f32.mxu0 %vm16151_vm3, %v18408_v62  ;;  %14526 = vmatpush3.bf16.msra.mxu0 %v16950_v23 }
0x2015   :  { %14527 = vmatprep.subr.bf16.mxu0 %v16150_v0 }
0x20e6   :  { %v3066_v16 = vpop.f32.mrb[18].mxu0 }
0x20e7   :  { %v13537_v61 = vpop.f32.mrb[19].mxu0  ;;  %13541 = vmatmul.mubr.msk.f32.vlgmr.msra.gmra.mrb[36].mxu1 %vm915_vm5, %v3066_v16  ;;  %v689_v16 = vld [vmem:[%s18483_s1 + $0x58] sm:$0xff] }
0x20e8   :  { %13586 = vmatprep.mubr.msk.f32.mxu1 %vm16151_vm3, %v18408_v62  ;;  %14532 = vmatpush3.bf16.msra.mxu1 %v16962_v30  ;;  %v16994_v61 = vpack.c.bf16 %v689_v16, %v688_v40  ;;  %v711_v16 = vld [vmem:[%s16489_s30] sm:$0xff] }
0x20e9   :  { %14533 = vmatprep.subr.bf16.mxu1 %v16150_v0 }
0x20ec   :  { %14535 = vmatpush3.bf16.msra.mxu1 %v16971_v44 }
0x20ed   :  { %14536 = vmatprep.subr.bf16.mxu1 %v16150_v0 }
0x20f0   :  { %14538 = vmatpush3.bf16.msra.mxu1 %v16977_v48 }
0x20f1   :  { %14539 = vmatprep.subr.bf16.mxu1 %v16150_v0 }
0x21ba   :  { %v3139_v1 = vpop.f32.mrb[36].mxu1 }
0x21bb   :  { %v3143_v2 = vadd.f32 %v3139_v1, %v2902_v52  ;;  %v13542_v3 = vpop.f32.mrb[37].mxu1  ;;  %v685_v52 = vld [vmem:[%s18483_s1 + $0x38] sm:$0xff]  ;;  %v690_v1 = vld [vmem:[%s18483_s1 + $0x60] sm:$0xff] }
0x21bc   :  { %v16983_v54 = vpack.c.bf16 %v685_v52, %v684_v49 }
0x21bd   :  { %v3144_v6 = vadd.f32 %v3143_v2, %v16821_v45  ;;  %v675_v45 = vld [vmem:[%s18482_s28 + $0x10] sm:$0xff]  ;;  %v691_v2 = vld [vmem:[%s18483_s1 + $0x68] sm:$0xff]  ;;  %s18514_s28 = sld [smem:[#allocation69_spill]] }
0x21be   :  { %v16956_v26 = vpack.c.bf16 %v676_v25, %v675_v45  ;;  %14541 = vmatpush3.bf16.msra.mxu1 %v16983_v54  ;;  %v17000_v3 = vpack.c.bf16 %v691_v2, %v690_v1  ;;  %v712_v1 = vld [vmem:[%s16489_s30 + $0x8] sm:$0xff] }
0x21bf   :  { %v16942_v7 = vadd.f32 %v12587_v5, %v3144_v6  ;;  %14542 = vmatprep.subr.bf16.mxu1 %v16150_v0  ;;  %v692_v5 = vld [vmem:[%s18483_s1 + $0x70] sm:$0xff]  ;;  %v693_v6 = vld [vmem:[%s18483_s1 + $0x78] sm:$0xff]  ;;  %v17028_v2 = vpack.c.bf16 %v712_v1, %v711_v16  ;;  %s18515_s1 = sld [smem:[#allocation71_spill]] }
0x21c0   :  { %14529 = vmatpush3.bf16.msra.mxu0 %v16956_v26 }
0x21c1   :  { %v3152_v9 = vsel %vm803_vm2, %v16942_v7, 0.0  ;;  %14554 = vmatprep.subr.bf16.mxu0 %v16150_v0 }
0x21c2   :  { %3153 = vadd.xlane.f32.xlu1 %v3152_v9  ;;  %14544 = vmatpush3.bf16.msra.mxu1 %v16990_v58  ;;  %v17006_v9 = vpack.c.bf16 %v693_v6, %v692_v5  ;;  %v713_v5 = vld [vmem:[%s16489_s30 + $0x10] sm:$0xff]  ;;  %v714_v6 = vld [vmem:[%s16489_s30 + $0x18] sm:$0xff]  ;;  %s18485_s30 = sld [smem:[#allocation52_spill]] }
0x21c3   :  { %14545 = vmatprep.subr.bf16.mxu1 %v16150_v0 }
0x21c6   :  { %14547 = vmatpush3.bf16.msra.mxu1 %v16994_v61 }
0x21c7   :  { %14548 = vmatprep.subr.bf16.mxu1 %v16150_v0 }
0x21ca   :  { %14550 = vmatpush3.bf16.msra.mxu1 %v17000_v3 }
0x21cb   :  { %14551 = vmatprep.subr.bf16.mxu1 %v16150_v0 }
0x21ce   :  { %14553 = vmatpush3.bf16.msra.mxu1 %v17006_v9 }
0x21cf   :  { %13626 = vmatprep.subr.mxu1 %v18408_v62 }
0x224f   :  { %v3154_v10 = vpop.xlane.xlu1 %3153 }
0x2250   :  { %v3155_v13 = vmul.f32 0.03125, %v3154_v10  ;;  %v17011_v10 = vld [vmem:[#allocation20] ss:$0 sm:$0xff] }
0x2252   :  { %v3156_v14 = vsub.f32 %v16942_v7, %v3155_v13 }
0x2254   :  { %v3157_v17 = vmul.f32 %v3156_v14, %v3156_v14 }
0x2256   :  { %v3158_v18 = vsel %vm803_vm2, %v3157_v17, 0.0 }
0x2257   :  { %3159 = vadd.xlane.f32.xlu1 %v3158_v18 }
0x22e4   :  { %v3160_v31 = vpop.xlane.xlu1 %3159 }
0x22e5   :  { %v3161_v32 = vmul.f32 0.03125, %v3160_v31 }
0x22e7   :  { %v3162_v33 = vadd.f32 1e-05, %v3161_v32 }
0x22e9   :  { %15288 = vrsqrt.f32 %v3162_v33  ;;  %v17016_v33 = vld [vmem:[#allocation22] ss:$0 sm:$0xff] }
0x22f3   :  { %v15289_v34 = vpop.eup %15288 }
0x22f4   :  { %v3164_v36 = vmul.f32 %v15289_v34, %v3156_v14 }
0x22f6   :  { %v3171_v39 = vmul.f32 %v12588_v35, %v3164_v36 }
0x22f8   :  { %v3178_v41 = vadd.f32 %v12589_v38, %v3171_v39 }
0x22fa   :  { %13552 = vmatmul.mubr.msk.f32.vlgmr.msra.gmra.mrb[20].mxu0 %vm838_vm4, %v3178_v41  ;;  %v3456_v41 = vsel %vm803_vm2, %v16630_v50, 0.0 }
0x22fb   :  { %13597 = vmatprep.mubr.msk.f32.mxu0 %vm16151_vm3, %v18408_v62  ;;  %14556 = vmatpush3.bf16.msra.mxu0 %v17028_v2 }
0x22fc   :  { %14557 = vmatprep.subr.bf16.mxu0 %v16150_v0 }
0x23cd   :  { %v3254_v13 = vpop.f32.mrb[20].mxu0 }
0x23ce   :  { %v3255_v14 = vadd.f32 %v17011_v10, %v3254_v13  ;;  %v13553_v17 = vpop.f32.mrb[21].mxu0  ;;  %v17034_v13 = vpack.c.bf16 %v714_v6, %v713_v5 }
0x23d0   :  { %v3258_v18 = vmul.f32 %v3255_v14, %v3255_v14  ;;  %14559 = vmatpush3.bf16.msra.mxu0 %v17034_v13 }
0x23d1   :  { %14560 = vmatprep.subr.bf16.mxu0 %v16150_v0 }
0x23d2   :  { %v3259_v20 = vmul.f32 %v3258_v18, %v3255_v14 }
0x23d4   :  { %v3260_v22 = vmul.f32 0.044715, %v3259_v20 }
0x23d6   :  { %v3261_v45 = vadd.f32 %v3260_v22, %v3255_v14 }
0x23d8   :  { %v3262_v25 = vmul.f32 0.7978846, %v3261_v45 }
0x23da   :  { %15290 = vtanh.f32 %v3262_v25 }
0x23e4   :  { %v15291_v28 = vpop.eup %15290 }
0x23e5   :  { %v3264_v29 = vadd.f32 1.0, %v15291_v28  ;;  %v12593_v28 = vld [vmem:[#allocation34] ss:$0 sm:$0xff] }
0x23e7   :  { %v3265_v31 = vmul.f32 0.5, %v3264_v29 }
0x23e9   :  { %v3266_v32 = vmul.f32 %v3265_v31, %v3255_v14  ;;  %v12594_v31 = vld [vmem:[#allocation32] ss:$0 sm:$0xff] }
0x23eb   :  { %13587 = vmatmul.mubr.f32.vlgmr.msra.gmra.mrb[38].mxu1 %v3266_v32 }
0x23ec   :  { %13628 = vmatprep.mubr.msk.f32.mxu1 %vm16151_vm3, %v18408_v62 }
0x24be   :  { %v3339_v34 = vpop.f32.mrb[38].mxu1 }
0x24bf   :  { %v3340_v35 = vadd.f32 %v17016_v33, %v3339_v34  ;;  %v13588_v36 = vpop.f32.mrb[39].mxu1 }
0x24c1   :  { %v3343_v38 = vadd.f32 %v3340_v35, %v16942_v7 }
0x24c3   :  { %v3344_v39 = vsel %vm803_vm2, %v3343_v38, 0.0 }
0x24c4   :  { %3345 = vadd.xlane.f32.xlu1 %v3344_v39 }
0x24c8   :  { %3457 = vadd.xlane.f32.xlu1 %v3456_v41  ;;  %v15497_v41 = vld [vmem:[#allocation11] ss:$0 sm:$0xff] }
0x2551   :  { %v3346_v42 = vpop.xlane.xlu1 %3345 }
0x2552   :  { %v3347_v43 = vmul.f32 0.03125, %v3346_v42 }
0x2554   :  { %v3348_v46 = vsub.f32 %v3343_v38, %v3347_v43  ;;  %v15496_v38 = vld [vmem:[#allocation13] ss:$0 sm:$0xff] }
0x2555   :  { %v3458_v47 = vpop.xlane.xlu1 %3457 }
0x2556   :  { %v3459_v49 = vmul.f32 0.03125, %v3458_v47  ;;  %v3349_v52 = vmul.f32 %v3348_v46, %v3348_v46  ;;  %v15498_v47 = vld [vmem:[#allocation19] ss:$0 sm:$0xff] }
0x2558   :  { %v3460_v55 = vsub.f32 %v16630_v50, %v3459_v49  ;;  %v3350_v7 = vsel %vm803_vm2, %v3349_v52, 0.0 }
0x2559   :  { %3351 = vadd.xlane.f32.xlu1 %v3350_v7 }
0x255a   :  { %v3461_v56 = vmul.f32 %v3460_v55, %v3460_v55 }
0x255c   :  { %v3462_v40 = vsel %vm803_vm2, %v3461_v56, 0.0 }
0x255d   :  { %3463 = vadd.xlane.f32.xlu0 %v3462_v40 }
0x25e6   :  { %v3352_v14 = vpop.xlane.xlu1 %3351 }
0x25e7   :  { %v3353_v17 = vmul.f32 0.03125, %v3352_v14 }
0x25e9   :  { %v3354_v18 = vadd.f32 1e-05, %v3353_v17 }
0x25ea   :  { %v3464_v20 = vpop.xlane.xlu0 %3463 }
0x25eb   :  { %15292 = vrsqrt.f32 %v3354_v18  ;;  %v3465_v22 = vmul.f32 0.03125, %v3464_v20 }
0x25ed   :  { %v3466_v45 = vadd.f32 1e-05, %v3465_v22 }
0x25ef   :  { %15294 = vrsqrt.f32 %v3466_v45 }
0x25f5   :  { %v15293_v25 = vpop.eup %15292 }
0x25f6   :  { %v3356_v29 = vmul.f32 %v15293_v25, %v3348_v46 }
0x25f8   :  { %v3363_v32 = vmul.f32 %v12593_v28, %v3356_v29  ;;  %v15499_v28 = vld [vmem:[%s18477_s24 + $0x8] sm:$0xff] }
0x25f9   :  { %v15295_v34 = vpop.eup %15294 }
0x25fa   :  { %v3468_v35 = vmul.f32 %v15295_v34, %v3460_v55  ;;  %v3370_v36 = vadd.f32 %v12594_v31, %v3363_v32 }
0x25fc   :  { %13598 = vmatmul.mubr.msk.f32.vlgmr.msra.gmra.mrb[22].mxu0 %vm838_vm4, %v3370_v36  ;;  %v3469_v39 = vmul.f32 %v15496_v38, %v3468_v35 }
0x25fd   :  { %14562 = vmatpush3.bf16.msra.mxu0 %v16639_v60  ;;  %13608 = vmatprep.mubr.msk.f32.mxu0 %vm16151_vm3, %v18408_v62 }
0x25fe   :  { %14563 = vmatprep.subr.bf16.mxu0 %v16150_v0  ;;  %v3470_v42 = vadd.f32 %v15497_v41, %v3469_v39 }
0x2601   :  { %14565 = vmatpush3.bf16.msra.mxu0 %v16647_v63 }
0x2602   :  { %13611 = vmatprep.subr.mxu0 %v18408_v62 }
0x2604   :  { %13609 = vmatmul.mubr.msk.f32.vlgmr.msra.gmra.mrb[24].mxu0 %vm838_vm4, %v3470_v42 }
0x2605   :  { %13613 = vmatprep.mubr.msk.f32.mxu0 %vm16151_vm3, %v18408_v62 }
0x26cf   :  { %v17048_v43 = vpop.f32.mrb[22].mxu0 }
0x26d0   :  { %18484 = vst [vmem:[#allocation98_spill] sm:$0xff] %v17048_v43  ;;  %v13599_v60 = vpop.f32.mrb[23].mxu0 }
0x26d7   :  { %v3540_v46 = vpop.f32.mrb[24].mxu0 }
0x26d8   :  { %v17050_v49 = vadd.f32 %v15498_v47, %v3540_v46  ;;  %v13610_v52 = vpop.f32.mrb[25].mxu0 }
0x26da   :  { %3633 = vrot.lane.b32.xlu0 %v17050_v49, %s16153_s13  ;;  %3545 = vrot.lane.b32.xlu1 %v17050_v49, %s16154_s11 }
0x274c   :  { %v3546_v63 = vpop.permute.xlu1 %3545  ;;  %v3634_v55 = vpop.permute.xlu0 %3633 }
0x274d   :  { %13612 = vmatpush3.xpose.msk.msra.mxu0 %vm915_vm5, %v3546_v63 }
0x274e   :  { %13616 = vmatprep.subr.mxu0 %v18408_v62 }
0x2750   :  { %13614 = vmatmul.mubr.msk.f32.vlgmr.msra.gmra.mrb[26].mxu0 %vm915_vm5, %v17050_v49 }
0x2751   :  { %13617 = vmatpush3.msk.msra.mxu0 %vm1009_vm6, %v3634_v55  ;;  %13618 = vmatprep.mubr.msk.f32.mxu0 %vm16151_vm3, %v18408_v62  ;;  %v15500_v55 = vld [vmem:[%s18477_s24] sm:$0xff] }
0x2752   :  { %13621 = vmatprep.subr.mxu0 %v18408_v62 }
0x2823   :  { %v3617_v7 = vpop.f32.mrb[26].mxu0 }
0x2824   :  { %v3621_v56 = vmul.f32 0.35355338, %v3617_v7  ;;  %v13615_v40 = vpop.f32.mrb[27].mxu0 }
0x2826   :  { %v3622_v16 = vsel %vm991_vm7, %v3621_v56, -inf }
0x2827   :  { %3623 = vmax.xlane.f32.xlu1 %v3622_v16 }
0x2838   :  { %3712 = vrot.lane.b32.xlu1 %v17050_v49, %s16155_s4 }
0x28b4   :  { %v3624_v1 = vpop.xlane.xlu1 %3623 }
0x28b5   :  { %v3625_v5 = vsub.f32 %v3621_v56, %v3624_v1 }
0x28b7   :  { %v3626_v6 = vmul.f32 1.442695, %v3625_v5 }
0x28b8   :  { %v3713_v45 = vpop.permute.xlu1 %3712 }
0x28b9   :  { %15296 = vpow2.f32 %v3626_v6  ;;  %v15501_v6 = vld [vmem:[%s18477_s24 + $0x10] sm:$0xff] }
0x28c3   :  { %v15297_v14 = vpop.eup %15296 }
0x28c4   :  { %v3628_v17 = vsel %vm991_vm7, %v15297_v14, 0.0 }
0x28c5   :  { %3629 = vadd.xlane.f32.xlu0 %v3628_v17 }
0x28db   :  { %3710 = vrot.lane.b32.xlu0 %v17050_v49, %s16156_s15 }
0x2952   :  { %v3630_v18 = vpop.xlane.xlu0 %3629 }
0x2953   :  { %15298 = vrcp.f32 %v3630_v18 }
0x2956   :  { %v3711_v25 = vpop.permute.xlu0 %3710 }
0x295d   :  { %v15299_v20 = vpop.eup %15298 }
0x295e   :  { %v3632_v22 = vmul.f32 %v15299_v20, %v15297_v14 }
0x2960   :  { %13619 = vmatmul.mubr.msk.f32.vlgmr.msra.gmra.mrb[28].mxu0 %vm1005_vm8, %v3632_v22 }
0x2961   :  { %13622 = vmatpush3.xpose.msk.msra.mxu0 %vm915_vm5, %v3713_v45  ;;  %13623 = vmatprep.mubr.msk.f32.mxu0 %vm16151_vm3, %v18408_v62 }
0x2962   :  { %13631 = vmatprep.subr.mxu0 %v18408_v62 }
0x2964   :  { %13624 = vmatmul.mubr.msk.f32.vlgmr.msra.gmra.mrb[30].mxu0 %vm915_vm5, %v3711_v25 }
0x2965   :  { %13632 = vmatpush3.msra.mxu0 %v15499_v28  ;;  %13633 = vmatprep.mubr.msk.f32.mxu0 %vm16151_vm3, %v18408_v62 }
0x2966   :  { %13641 = vmatprep.subr.mxu0 %v18408_v62 }
0x2a33   :  { %v3706_v29 = vpop.f32.mrb[28].mxu0 }
0x2a34   :  { %v13620_v31 = vpop.f32.mrb[29].mxu0 }
0x2a37   :  { %v3784_v32 = vpop.f32.mrb[30].mxu0 }
0x2a38   :  { %v3788_v34 = vmul.f32 0.35355338, %v3784_v32  ;;  %v13625_v35 = vpop.f32.mrb[31].mxu0 }
0x2a3a   :  { %v3789_v36 = vsel %vm991_vm7, %v3788_v34, -inf }
0x2a3b   :  { %3790 = vmax.xlane.f32.xlu0 %v3789_v36 }
0x2a51   :  { %3800 = vrot.lane.b32.xlu0 %v17050_v49, %s16157_s16 }
0x2a55   :  { %4023 = vrot.lane.b32.xlu0 %v17050_v49, %s16159_s22 }
0x2ac8   :  { %v3791_v38 = vpop.xlane.xlu0 %3790 }
0x2ac9   :  { %v3792_v39 = vsub.f32 %v3788_v34, %v3791_v38 }
0x2acb   :  { %v3793_v41 = vmul.f32 1.442695, %v3792_v39 }
0x2acc   :  { %v3801_v42 = vpop.permute.xlu0 %3800 }
0x2acd   :  { %15300 = vpow2.f32 %v3793_v41  ;;  %13627 = vmatpush3.msk.msra.mxu1 %vm1009_vm6, %v3801_v42 }
0x2ace   :  { %13636 = vmatprep.subr.mxu1 %v18408_v62 }
0x2ad0   :  { %v4024_v16 = vpop.permute.xlu0 %4023 }
0x2ad7   :  { %v15301_v60 = vpop.eup %15300 }
0x2ad8   :  { %v3795_v46 = vsel %vm991_vm7, %v15301_v60, 0.0 }
0x2ad9   :  { %3796 = vadd.xlane.f32.xlu1 %v3795_v46 }
0x2aea   :  { %4025 = vrot.lane.b32.xlu1 %v17050_v49, %s16158_s18 }
0x2b66   :  { %v3797_v47 = vpop.xlane.xlu1 %3796 }
0x2b67   :  { %15302 = vrcp.f32 %v3797_v47 }
0x2b6a   :  { %v4026_v56 = vpop.permute.xlu1 %4025 }
0x2b71   :  { %v15303_v52 = vpop.eup %15302 }
0x2b72   :  { %v3799_v63 = vmul.f32 %v15303_v52, %v15301_v60  ;;  %v15502_v60 = vld [vmem:[%s18477_s24 + $0x18] sm:$0xff]  ;;  %s18506_s24 = sld [smem:[#allocation79_spill]] }
0x2b74   :  { %13629 = vmatmul.mubr.msk.f32.vlgmr.msra.gmra.mrb[40].mxu1 %vm1005_vm8, %v3799_v63 }
0x2b75   :  { %13637 = vmatpush3.msra.mxu1 %v15500_v55  ;;  %13638 = vmatprep.mubr.msk.f32.mxu1 %vm16151_vm3, %v18408_v62 }
0x2b76   :  { %13646 = vmatprep.subr.mxu1 %v18408_v62 }
0x2b78   :  { %13639 = vmatmul.mubr.msk.f32.vlgmr.msra.gmra.mrb[42].mxu1 %vm915_vm5, %v3706_v29 }
0x2b79   :  { %13648 = vmatprep.mubr.msk.f32.mxu1 %vm16151_vm3, %v18408_v62 }
0x2c47   :  { %v3873_v7 = vpop.f32.mrb[40].mxu1 }
0x2c48   :  { %v13630_v40 = vpop.f32.mrb[41].mxu1  ;;  %13634 = vmatmul.mubr.msk.f32.vlgmr.msra.gmra.mrb[32].mxu0 %vm915_vm5, %v3873_v7 }
0x2c49   :  { %13642 = vmatpush3.xpose.msk.msra.mxu0 %vm915_vm5, %v4026_v56  ;;  %13643 = vmatprep.mubr.msk.f32.mxu0 %vm16151_vm3, %v18408_v62 }
0x2c4a   :  { %13651 = vmatprep.subr.mxu0 %v18408_v62 }
0x2c4b   :  { %v4019_v1 = vpop.f32.mrb[42].mxu1 }
0x2c4c   :  { %v13640_v5 = vpop.f32.mrb[43].mxu1  ;;  %13644 = vmatmul.mubr.msk.f32.vlgmr.msra.gmra.mrb[34].mxu0 %vm915_vm5, %v4024_v16 }
0x2c4d   :  { %13652 = vmatpush3.msra.mxu0 %v15501_v6  ;;  %13653 = vmatprep.mubr.msk.f32.mxu0 %vm16151_vm3, %v18408_v62 }
0x2c4e   :  { %13661 = vmatprep.subr.mxu0 %v18408_v62 }
0x2d1b   :  { %v3946_v14 = vpop.f32.mrb[32].mxu0 }
0x2d1c   :  { %v4020_v17 = vadd.f32 %v4019_v1, %v3946_v14  ;;  %v13635_v18 = vpop.f32.mrb[33].mxu0 }
0x2d1f   :  { %v4097_v20 = vpop.f32.mrb[34].mxu0 }
0x2d20   :  { %v4101_v22 = vmul.f32 0.35355338, %v4097_v20  ;;  %v13645_v45 = vpop.f32.mrb[35].mxu0 }
0x2d22   :  { %v4102_v25 = vsel %vm991_vm7, %v4101_v22, -inf }
0x2d23   :  { %4103 = vmax.xlane.f32.xlu0 %v4102_v25 }
0x2d39   :  { %4113 = vrot.lane.b32.xlu0 %v17050_v49, %s16160_s5 }
0x2d3d   :  { %4264 = vrot.lane.b32.xlu0 %v17050_v49, %s16162_s29 }
0x2db0   :  { %v4104_v28 = vpop.xlane.xlu0 %4103 }
0x2db1   :  { %v4105_v29 = vsub.f32 %v4101_v22, %v4104_v28 }
0x2db3   :  { %v4106_v31 = vmul.f32 1.442695, %v4105_v29 }
0x2db4   :  { %v4114_v32 = vpop.permute.xlu0 %4113 }
0x2db5   :  { %15304 = vpow2.f32 %v4106_v31  ;;  %13647 = vmatpush3.msk.msra.mxu1 %vm1009_vm6, %v4114_v32 }
0x2db6   :  { %13656 = vmatprep.subr.mxu1 %v18408_v62 }
0x2db8   :  { %v4265_v42 = vpop.permute.xlu0 %4264 }
0x2dbf   :  { %v15305_v34 = vpop.eup %15304 }
0x2dc0   :  { %v4108_v35 = vsel %vm991_vm7, %v15305_v34, 0.0 }
0x2dc1   :  { %4109 = vadd.xlane.f32.xlu1 %v4108_v35 }
0x2dd2   :  { %4266 = vrot.lane.b32.xlu1 %v17050_v49, %s16161_s12 }
0x2e4e   :  { %v4110_v36 = vpop.xlane.xlu1 %4109 }
0x2e4f   :  { %15306 = vrcp.f32 %v4110_v36 }
0x2e52   :  { %v4267_v41 = vpop.permute.xlu1 %4266 }
0x2e59   :  { %v15307_v38 = vpop.eup %15306 }
0x2e5a   :  { %v4112_v39 = vmul.f32 %v15307_v38, %v15305_v34  ;;  %v15504_v38 = vld [vmem:[#allocation16] ss:$0 sm:$0xff] }
0x2e5c   :  { %13649 = vmatmul.mubr.msk.f32.vlgmr.msra.gmra.mrb[44].mxu1 %vm1005_vm8, %v4112_v39  ;;  %v15505_v39 = vld [vmem:[#allocation14] ss:$0 sm:$0xff] }
0x2e5d   :  { %13657 = vmatpush3.xpose.msk.msra.mxu1 %vm915_vm5, %v4267_v41  ;;  %13658 = vmatprep.mubr.msk.f32.mxu1 %vm16151_vm3, %v18408_v62 }
0x2e5e   :  { %13666 = vmatprep.subr.mxu1 %v18408_v62 }
0x2e60   :  { %13659 = vmatmul.mubr.msk.f32.vlgmr.msra.gmra.mrb[46].mxu1 %vm915_vm5, %v4265_v42 }
0x2e61   :  { %13667 = vmatpush3.msra.mxu1 %v15502_v60  ;;  %13668 = vmatprep.mubr.msk.f32.mxu1 %vm16151_vm3, %v18408_v62  ;;  %v15506_v60 = vld [vmem:[#allocation8] ss:$0 sm:$0xff] }
0x2e62   :  { %14572 = vmatprep.subr.bf16.mxu1 %v16150_v0 }
0x2f2f   :  { %v4186_v46 = vpop.f32.mrb[44].mxu1 }
0x2f30   :  { %v13650_v47 = vpop.f32.mrb[45].mxu1  ;;  %13654 = vmatmul.mubr.msk.f32.vlgmr.msra.gmra.mrb[36].mxu0 %vm915_vm5, %v4186_v46 }
0x2f31   :  { %13663 = vmatprep.mubr.msk.f32.mxu0 %vm16151_vm3, %v18408_v62 }
0x2f33   :  { %v4338_v52 = vpop.f32.mrb[46].mxu1 }
0x2f34   :  { %v4342_v63 = vmul.f32 0.35355338, %v4338_v52  ;;  %v13660_v55 = vpop.f32.mrb[47].mxu1 }
0x2f36   :  { %v4343_v7 = vsel %vm991_vm7, %v4342_v63, -inf }
0x2f37   :  { %4344 = vmax.xlane.f32.xlu0 %v4343_v7 }
0x2f4d   :  { %4354 = vrot.lane.b32.xlu0 %v17050_v49, %s16163_s23 }
0x2fc4   :  { %v4345_v56 = vpop.xlane.xlu0 %4344 }
0x2fc5   :  { %v4346_v40 = vsub.f32 %v4342_v63, %v4345_v56 }
0x2fc7   :  { %v4347_v16 = vmul.f32 1.442695, %v4346_v40 }
0x2fc8   :  { %v4355_v1 = vpop.permute.xlu0 %4354 }
0x2fc9   :  { %15308 = vpow2.f32 %v4347_v16  ;;  %13662 = vmatpush3.msk.msra.mxu0 %vm1009_vm6, %v4355_v1 }
0x2fca   :  { %14566 = vmatprep.subr.bf16.mxu0 %v16150_v0 }
0x2fd3   :  { %v15309_v5 = vpop.eup %15308 }
0x2fd4   :  { %v4349_v6 = vsel %vm991_vm7, %v15309_v5, 0.0 }
0x2fd5   :  { %4350 = vadd.xlane.f32.xlu1 %v4349_v6 }
0x3003   :  { %v4259_v14 = vpop.f32.mrb[36].mxu0 }
0x3004   :  { %v4263_v18 = vadd.f32 %v4259_v14, %v4020_v17  ;;  %v13655_v20 = vpop.f32.mrb[37].mxu0 }
0x3062   :  { %v4351_v22 = vpop.xlane.xlu1 %4350 }
0x3063   :  { %15310 = vrcp.f32 %v4351_v22 }
0x306d   :  { %v15311_v45 = vpop.eup %15310 }
0x306e   :  { %v4353_v49 = vmul.f32 %v15311_v45, %v15309_v5  ;;  %v15507_v5 = vld [vmem:[#allocation10] ss:$0 sm:$0xff] }
0x3070   :  { %13664 = vmatmul.mubr.msk.f32.vlgmr.msra.gmra.mrb[38].mxu0 %vm1005_vm8, %v4353_v49 }
0x3071   :  { %14568 = vmatpush3.bf16.msra.mxu0 %v16757_v51  ;;  %13679 = vmatprep.mubr.msk.f32.mxu0 %vm16151_vm3, %v18408_v62 }
0x3072   :  { %14569 = vmatprep.subr.bf16.mxu0 %v16150_v0 }
0x3075   :  { %14571 = vmatpush3.bf16.msra.mxu0 %v16763_v53 }
0x3076   :  { %14596 = vmatprep.subr.bf16.mxu0 %v16150_v0 }
0x3143   :  { %v4427_v25 = vpop.f32.mrb[38].mxu0 }
0x3144   :  { %v13665_v17 = vpop.f32.mrb[39].mxu0  ;;  %13669 = vmatmul.mubr.msk.f32.vlgmr.msra.gmra.mrb[48].mxu1 %vm915_vm5, %v4427_v25 }
0x3145   :  { %14574 = vmatpush3.bf16.msra.mxu1 %v16769_v4  ;;  %13714 = vmatprep.mubr.msk.f32.mxu1 %vm16151_vm3, %v18408_v62 }
0x3146   :  { %14575 = vmatprep.subr.bf16.mxu1 %v16150_v0 }
0x3149   :  { %14577 = vmatpush3.bf16.msra.mxu1 %v16778_v8 }
0x314a   :  { %14578 = vmatprep.subr.bf16.mxu1 %v16150_v0 }
0x314d   :  { %14580 = vmatpush3.bf16.msra.mxu1 %v16784_v11  ;;  %v15503_v11 = vld [vmem:[#allocation17] ss:$0 sm:$0xff] }
0x314e   :  { %14581 = vmatprep.subr.bf16.mxu1 %v16150_v0 }
0x3151   :  { %14583 = vmatpush3.bf16.msra.mxu1 %v16790_v15 }
0x3152   :  { %14584 = vmatprep.subr.bf16.mxu1 %v16150_v0 }
0x3155   :  { %14586 = vmatpush3.bf16.msra.mxu1 %v16797_v19 }
0x3156   :  { %14587 = vmatprep.subr.bf16.mxu1 %v16150_v0 }
0x3159   :  { %14589 = vmatpush3.bf16.msra.mxu1 %v16801_v21 }
0x315a   :  { %14590 = vmatprep.subr.bf16.mxu1 %v16150_v0 }
0x315d   :  { %14592 = vmatpush3.bf16.msra.mxu1 %v16807_v24 }
0x315e   :  { %14593 = vmatprep.subr.bf16.mxu1 %v16150_v0 }
0x3161   :  { %14595 = vmatpush3.bf16.msra.mxu1 %v16813_v27 }
0x3162   :  { %13753 = vmatprep.subr.mxu1 %v18408_v62 }
0x3217   :  { %v4500_v51 = vpop.f32.mrb[48].mxu1 }
0x3218   :  { %v4504_v53 = vadd.f32 %v4500_v51, %v4263_v18  ;;  %v13670_v4 = vpop.f32.mrb[49].mxu1 }
0x321a   :  { %v4505_v8 = vadd.f32 %v4504_v53, %v16630_v50 }
0x321c   :  { %v4506_v15 = vadd.f32 %v15503_v11, %v4505_v8  ;;  %v15508_v11 = vld [vmem:[#allocation25] ss:$0 sm:$0xff] }
0x321e   :  { %v4507_v19 = vsel %vm803_vm2, %v4506_v15, 0.0 }
0x321f   :  { %4508 = vadd.xlane.f32.xlu1 %v4507_v19  ;;  %v15509_v19 = vld [vmem:[#allocation23] ss:$0 sm:$0xff] }
0x32ac   :  { %v4509_v21 = vpop.xlane.xlu1 %4508 }
0x32ad   :  { %v4510_v28 = vmul.f32 0.03125, %v4509_v21 }
0x32af   :  { %v4511_v29 = vsub.f32 %v4506_v15, %v4510_v28 }
0x32b1   :  { %v4512_v24 = vmul.f32 %v4511_v29, %v4511_v29 }
0x32b3   :  { %v4513_v31 = vsel %vm803_vm2, %v4512_v24, 0.0 }
0x32b4   :  { %4514 = vadd.xlane.f32.xlu1 %v4513_v31 }
0x3341   :  { %v4515_v27 = vpop.xlane.xlu1 %4514 }
0x3342   :  { %v4516_v32 = vmul.f32 0.03125, %v4515_v27 }
0x3344   :  { %v4517_v34 = vadd.f32 1e-05, %v4516_v32 }
0x3346   :  { %15312 = vrsqrt.f32 %v4517_v34 }
0x3350   :  { %v15313_v35 = vpop.eup %15312 }
0x3351   :  { %v4519_v36 = vmul.f32 %v15313_v35, %v4511_v29  ;;  %v15510_v29 = vld [vmem:[#allocation31] ss:$0 sm:$0xff] }
0x3353   :  { %v4520_v50 = vmul.f32 %v15504_v38, %v4519_v36 }
0x3355   :  { %v4521_v41 = vadd.f32 %v15505_v39, %v4520_v50 }
0x3357   :  { %13680 = vmatmul.mubr.msk.f32.vlgmr.msra.gmra.mrb[40].mxu0 %vm838_vm4, %v4521_v41 }
0x3358   :  { %14598 = vmatpush3.bf16.msra.mxu0 %v16829_v57  ;;  %13725 = vmatprep.mubr.msk.f32.mxu0 %vm16151_vm3, %v18408_v62 }
0x3359   :  { %14599 = vmatprep.subr.bf16.mxu0 %v16150_v0 }
0x335c   :  { %14601 = vmatpush3.bf16.msra.mxu0 %v16835_v59 }
0x335d   :  { %13728 = vmatprep.subr.mxu0 %v18408_v62 }
0x342a   :  { %v4591_v42 = vpop.f32.mrb[40].mxu0 }
0x342b   :  { %v4592_v46 = vadd.f32 %v15506_v60, %v4591_v42  ;;  %v13681_v47 = vpop.f32.mrb[41].mxu0 }
0x342d   :  { %v4595_v52 = vmul.f32 %v4592_v46, %v4592_v46 }
0x342f   :  { %v4596_v63 = vmul.f32 %v4595_v52, %v4592_v46 }
0x3431   :  { %v4597_v55 = vmul.f32 0.044715, %v4596_v63 }
0x3433   :  { %v4598_v7 = vadd.f32 %v4597_v55, %v4592_v46 }
0x3435   :  { %v4599_v56 = vmul.f32 0.7978846, %v4598_v7 }
0x3437   :  { %15314 = vtanh.f32 %v4599_v56 }
0x3441   :  { %v15315_v57 = vpop.eup %15314 }
0x3442   :  { %v4601_v40 = vadd.f32 1.0, %v15315_v57 }
0x3444   :  { %v4602_v16 = vmul.f32 0.5, %v4601_v40 }
0x3446   :  { %v4603_v1 = vmul.f32 %v4602_v16, %v4592_v46 }
0x3448   :  { %13715 = vmatmul.mubr.f32.vlgmr.msra.gmra.mrb[50].mxu1 %v4603_v1 }
0x3449   :  { %13754 = vmatpush3.msra.mxu1 %v16871_v37  ;;  %13755 = vmatprep.mubr.msk.f32.mxu1 %vm16151_vm3, %v18408_v62 }
0x344a   :  { %13763 = vmatprep.subr.mxu1 %v18408_v62 }
0x351b   :  { %v4670_v59 = vpop.f32.mrb[50].mxu1 }
0x351c   :  { %v4671_v6 = vadd.f32 %v15507_v5, %v4670_v59  ;;  %v13716_v14 = vpop.f32.mrb[51].mxu1 }
0x351e   :  { %v17177_v18 = vadd.f32 %v4671_v6, %v4506_v15 }
0x3520   :  { %v4675_v20 = vsel %vm803_vm2, %v17177_v18, 0.0 }
0x3521   :  { %4676 = vadd.xlane.f32.xlu1 %v4675_v20 }
0x35ae   :  { %v4677_v22 = vpop.xlane.xlu1 %4676 }
0x35af   :  { %v4678_v45 = vmul.f32 0.03125, %v4677_v22 }
0x35b1   :  { %v4679_v49 = vsub.f32 %v17177_v18, %v4678_v45 }
0x35b3   :  { %v4680_v37 = vmul.f32 %v4679_v49, %v4679_v49 }
0x35b5   :  { %v4681_v25 = vsel %vm803_vm2, %v4680_v37, 0.0 }
0x35b6   :  { %4682 = vadd.xlane.f32.xlu1 %v4681_v25 }
0x3643   :  { %v4683_v17 = vpop.xlane.xlu1 %4682 }
0x3644   :  { %v4684_v51 = vmul.f32 0.03125, %v4683_v17 }
0x3646   :  { %v4685_v53 = vadd.f32 1e-05, %v4684_v51  ;;  %v15511_v51 = vld [vmem:[%s18481_s8 + $0x8] sm:$0xff] }
0x3648   :  { %15316 = vrsqrt.f32 %v4685_v53 }
0x3652   :  { %v15317_v4 = vpop.eup %15316 }
0x3653   :  { %v4687_v8 = vmul.f32 %v15317_v4, %v4679_v49 }
0x3655   :  { %v4688_v15 = vmul.f32 %v15508_v11, %v4687_v8 }
0x3657   :  { %v4689_v21 = vadd.f32 %v15509_v19, %v4688_v15 }
0x3659   :  { %13726 = vmatmul.mubr.msk.f32.vlgmr.msra.gmra.mrb[42].mxu0 %vm838_vm4, %v4689_v21 }
0x365a   :  { %13730 = vmatprep.mubr.msk.f32.mxu0 %vm16151_vm3, %v18408_v62 }
0x372c   :  { %v4759_v28 = vpop.f32.mrb[42].mxu0 }
0x372d   :  { %v17186_v24 = vadd.f32 %v15510_v29, %v4759_v28  ;;  %v13727_v31 = vpop.f32.mrb[43].mxu0 }
0x372f   :  { %4764 = vrot.lane.b32.xlu0 %v17186_v24, %s16154_s11  ;;  %s18501_s11 = sld [smem:[#allocation60_spill]] }
0x37a1   :  { %v4765_v27 = vpop.permute.xlu0 %4764 }
0x37a2   :  { %13729 = vmatpush3.xpose.msk.msra.mxu0 %vm915_vm5, %v4765_v27 }
0x37a3   :  { %13733 = vmatprep.subr.mxu0 %v18408_v62 }
0x37a5   :  { %13731 = vmatmul.mubr.msk.f32.vlgmr.msra.gmra.mrb[44].mxu0 %vm915_vm5, %v17186_v24 }
0x37a6   :  { %13735 = vmatprep.mubr.msk.f32.mxu0 %vm16151_vm3, %v18408_v62 }
0x3878   :  { %v4836_v32 = vpop.f32.mrb[44].mxu0 }
0x3879   :  { %v4840_v34 = vmul.f32 0.35355338, %v4836_v32  ;;  %v13732_v35 = vpop.f32.mrb[45].mxu0 }
0x387b   :  { %v4841_v36 = vsel %vm991_vm7, %v4840_v34, -inf }
0x387c   :  { %4842 = vmax.xlane.f32.xlu1 %v4841_v36 }
0x388d   :  { %4852 = vrot.lane.b32.xlu1 %v17186_v24, %s16153_s13  ;;  %s18500_s13 = sld [smem:[#allocation61_spill]] }
0x3891   :  { %4931 = vrot.lane.b32.xlu1 %v17186_v24, %s16155_s4  ;;  %s18502_s4 = sld [smem:[#allocation57_spill]] }
0x3895   :  { %4929 = vrot.lane.b32.xlu1 %v17186_v24, %s16156_s15  ;;  %s18503_s15 = sld [smem:[#allocation54_spill]] }
0x3909   :  { %v4843_v38 = vpop.xlane.xlu1 %4842 }
0x390a   :  { %v4844_v50 = vsub.f32 %v4840_v34, %v4843_v38 }
0x390c   :  { %v4845_v39 = vmul.f32 1.442695, %v4844_v50 }
0x390d   :  { %v4853_v41 = vpop.permute.xlu1 %4852 }
0x390e   :  { %15318 = vpow2.f32 %v4845_v39  ;;  %13734 = vmatpush3.msk.msra.mxu0 %vm1009_vm6, %v4853_v41 }
0x390f   :  { %13738 = vmatprep.subr.mxu0 %v18408_v62 }
0x3911   :  { %v4932_v52 = vpop.permute.xlu1 %4931 }
0x3915   :  { %v4930_v55 = vpop.permute.xlu1 %4929 }
0x3918   :  { %v15319_v42 = vpop.eup %15318 }
0x3919   :  { %v4847_v60 = vsel %vm991_vm7, %v15319_v42, 0.0 }
0x391a   :  { %4848 = vadd.xlane.f32.xlu0 %v4847_v60 }
0x39a7   :  { %v4849_v46 = vpop.xlane.xlu0 %4848 }
0x39a8   :  { %15320 = vrcp.f32 %v4849_v46  ;;  %v15512_v46 = vld [vmem:[%s18481_s8 + $0x18] sm:$0xff]  ;;  %s18512_s8 = sld [smem:[#allocation76_spill]] }
0x39b2   :  { %v15321_v47 = vpop.eup %15320 }
0x39b3   :  { %v4851_v63 = vmul.f32 %v15321_v47, %v15319_v42 }
0x39b5   :  { %13736 = vmatmul.mubr.msk.f32.vlgmr.msra.gmra.mrb[46].mxu0 %vm1005_vm8, %v4851_v63 }
0x39b6   :  { %13739 = vmatpush3.xpose.msk.msra.mxu0 %vm915_vm5, %v4932_v52  ;;  %13740 = vmatprep.mubr.msk.f32.mxu0 %vm16151_vm3, %v18408_v62 }
0x39b7   :  { %13743 = vmatprep.subr.mxu0 %v18408_v62 }
0x39b9   :  { %13741 = vmatmul.mubr.msk.f32.vlgmr.msra.gmra.mrb[48].mxu0 %vm915_vm5, %v4930_v55 }
0x39ba   :  { %13745 = vmatprep.mubr.msk.f32.mxu0 %vm16151_vm3, %v18408_v62 }
0x3a88   :  { %v4925_v7 = vpop.f32.mrb[46].mxu0 }
0x3a89   :  { %v13737_v56 = vpop.f32.mrb[47].mxu0  ;;  %13756 = vmatmul.mubr.msk.f32.vlgmr.msra.gmra.mrb[52].mxu1 %vm915_vm5, %v4925_v7 }
0x3a8a   :  { %13765 = vmatprep.mubr.msk.f32.mxu1 %vm16151_vm3, %v18408_v62 }
0x3a8c   :  { %v5003_v57 = vpop.f32.mrb[48].mxu0 }
0x3a8d   :  { %v5007_v40 = vmul.f32 0.35355338, %v5003_v57  ;;  %v13742_v16 = vpop.f32.mrb[49].mxu0 }
0x3a8f   :  { %v5008_v1 = vsel %vm991_vm7, %v5007_v40, -inf }
0x3a90   :  { %5009 = vmax.xlane.f32.xlu1 %v5008_v1 }
0x3b1d   :  { %v5010_v59 = vpop.xlane.xlu1 %5009 }
0x3b1e   :  { %v5011_v5 = vsub.f32 %v5007_v40, %v5010_v59 }
0x3b20   :  { %v5012_v6 = vmul.f32 1.442695, %v5011_v5 }
0x3b22   :  { %15322 = vpow2.f32 %v5012_v6 }
0x3b2c   :  { %v15323_v14 = vpop.eup %15322 }
0x3b2d   :  { %v5014_v20 = vsel %vm991_vm7, %v15323_v14, 0.0 }
0x3b2e   :  { %5015 = vadd.xlane.f32.xlu0 %v5014_v20 }
0x3b44   :  { %5019 = vrot.lane.b32.xlu0 %v17186_v24, %s16157_s16  ;;  %s18504_s16 = sld [smem:[#allocation56_spill]] }
0x3b48   :  { %5244 = vrot.lane.b32.xlu0 %v17186_v24, %s16158_s18  ;;  %s18505_s18 = sld [smem:[#allocation80_spill]] }
0x3b4c   :  { %5242 = vrot.lane.b32.xlu0 %v17186_v24, %s16159_s22 }
0x3b5c   :  { %v5238_v22 = vpop.f32.mrb[52].mxu1 }
0x3b5d   :  { %v13757_v45 = vpop.f32.mrb[53].mxu1 }
0x3bbb   :  { %v5016_v49 = vpop.xlane.xlu0 %5015 }
0x3bbc   :  { %15324 = vrcp.f32 %v5016_v49 }
0x3bbf   :  { %v5020_v37 = vpop.permute.xlu0 %5019 }
0x3bc0   :  { %13744 = vmatpush3.msk.msra.mxu0 %vm1009_vm6, %v5020_v37 }
0x3bc1   :  { %13748 = vmatprep.subr.mxu0 %v18408_v62 }
0x3bc3   :  { %v5245_v53 = vpop.permute.xlu0 %5244 }
0x3bc6   :  { %v15325_v25 = vpop.eup %15324 }
0x3bc7   :  { %v5018_v17 = vmul.f32 %v15325_v25, %v15323_v14  ;;  %v5243_v11 = vpop.permute.xlu0 %5242 }
0x3bc9   :  { %13746 = vmatmul.mubr.msk.f32.vlgmr.msra.gmra.mrb[50].mxu0 %vm1005_vm8, %v5018_v17 }
0x3bca   :  { %13749 = vmatpush3.msra.mxu0 %v15511_v51  ;;  %13750 = vmatprep.mubr.msk.f32.mxu0 %vm16151_vm3, %v18408_v62 }
0x3bcb   :  { %13758 = vmatprep.subr.mxu0 %v18408_v62 }
0x3c9c   :  { %v5092_v4 = vpop.f32.mrb[50].mxu0 }
0x3c9d   :  { %v13747_v8 = vpop.f32.mrb[51].mxu0  ;;  %13751 = vmatmul.mubr.msk.f32.vlgmr.msra.gmra.mrb[52].mxu0 %vm915_vm5, %v5092_v4 }
0x3c9e   :  { %13759 = vmatpush3.xpose.msk.msra.mxu0 %vm915_vm5, %v5245_v53  ;;  %13760 = vmatprep.mubr.msk.f32.mxu0 %vm16151_vm3, %v18408_v62 }
0x3c9f   :  { %13768 = vmatprep.subr.mxu0 %v18408_v62 }
0x3ca1   :  { %13761 = vmatmul.mubr.msk.f32.vlgmr.msra.gmra.mrb[54].mxu0 %vm915_vm5, %v5243_v11 }
0x3ca2   :  { %13769 = vmatpush3.msra.mxu0 %v16920_v12  ;;  %13770 = vmatprep.mubr.msk.f32.mxu0 %vm16151_vm3, %v18408_v62 }
0x3ca3   :  { %13778 = vmatprep.subr.mxu0 %v18408_v62 }
0x3d70   :  { %v5165_v15 = vpop.f32.mrb[52].mxu0 }
0x3d71   :  { %v5239_v19 = vadd.f32 %v5238_v22, %v5165_v15  ;;  %v13752_v21 = vpop.f32.mrb[53].mxu0  ;;  %v15514_v15 = vld [vmem:[#allocation28] ss:$0 sm:$0xff] }
0x3d74   :  { %v5316_v28 = vpop.f32.mrb[54].mxu0 }
0x3d75   :  { %v5320_v29 = vmul.f32 0.35355338, %v5316_v28  ;;  %v13762_v31 = vpop.f32.mrb[55].mxu0 }
0x3d77   :  { %v5321_v27 = vsel %vm991_vm7, %v5320_v29, -inf }
0x3d78   :  { %5322 = vmax.xlane.f32.xlu1 %v5321_v27 }
0x3d89   :  { %5332 = vrot.lane.b32.xlu1 %v17186_v24, %s16160_s5  ;;  %s18507_s5 = sld [smem:[#allocation78_spill]] }
0x3d8d   :  { %5485 = vrot.lane.b32.xlu1 %v17186_v24, %s16161_s12  ;;  %s18508_s12 = sld [smem:[#allocation73_spill]] }
0x3d91   :  { %5483 = vrot.lane.b32.xlu1 %v17186_v24, %s16162_s29  ;;  %s18509_s29 = sld [smem:[#allocation72_spill]] }
0x3e05   :  { %v5323_v12 = vpop.xlane.xlu1 %5322 }
0x3e06   :  { %v5324_v32 = vsub.f32 %v5320_v29, %v5323_v12 }
0x3e08   :  { %v5325_v34 = vmul.f32 1.442695, %v5324_v32 }
0x3e09   :  { %v5333_v35 = vpop.permute.xlu1 %5332 }
0x3e0a   :  { %15326 = vpow2.f32 %v5325_v34  ;;  %13764 = vmatpush3.msk.msra.mxu1 %vm1009_vm6, %v5333_v35 }
0x3e0b   :  { %13773 = vmatprep.subr.mxu1 %v18408_v62 }
0x3e0d   :  { %v5486_v41 = vpop.permute.xlu1 %5485 }
0x3e11   :  { %v5484_v60 = vpop.permute.xlu1 %5483 }
0x3e14   :  { %v15327_v36 = vpop.eup %15326 }
0x3e15   :  { %v5327_v38 = vsel %vm991_vm7, %v15327_v36, 0.0 }
0x3e16   :  { %5328 = vadd.xlane.f32.xlu0 %v5327_v38 }
0x3ea3   :  { %v5329_v50 = vpop.xlane.xlu0 %5328 }
0x3ea4   :  { %15328 = vrcp.f32 %v5329_v50 }
0x3eae   :  { %v15329_v39 = vpop.eup %15328 }
0x3eaf   :  { %v5331_v42 = vmul.f32 %v15329_v39, %v15327_v36 }
0x3eb1   :  { %13766 = vmatmul.mubr.msk.f32.vlgmr.msra.gmra.mrb[54].mxu1 %vm1005_vm8, %v5331_v42 }
0x3eb2   :  { %13774 = vmatpush3.xpose.msk.msra.mxu1 %vm915_vm5, %v5486_v41  ;;  %13775 = vmatprep.mubr.msk.f32.mxu1 %vm16151_vm3, %v18408_v62 }
0x3eb3   :  { %13783 = vmatprep.subr.mxu1 %v18408_v62 }
0x3eb5   :  { %13776 = vmatmul.mubr.msk.f32.vlgmr.msra.gmra.mrb[56].mxu1 %vm915_vm5, %v5484_v60 }
0x3eb6   :  { %13784 = vmatpush3.msra.mxu1 %v15512_v46  ;;  %13785 = vmatprep.mubr.msk.f32.mxu1 %vm16151_vm3, %v18408_v62  ;;  %v17314_v46 = vld [vmem:[%s18485_s30 + $0x8] sm:$0xff] }
0x3eb7   :  { %14608 = vmatprep.subr.bf16.mxu1 %v16150_v0 }
0x3f84   :  { %v5405_v47 = vpop.f32.mrb[54].mxu1 }
0x3f85   :  { %v13767_v52 = vpop.f32.mrb[55].mxu1  ;;  %13771 = vmatmul.mubr.msk.f32.vlgmr.msra.gmra.mrb[56].mxu0 %vm915_vm5, %v5405_v47  ;;  %v5995_v47 = vsel %vm3445_vm9, %v17314_v46, 0.0 }
0x3f86   :  { %13780 = vmatprep.mubr.msk.f32.mxu0 %vm16151_vm3, %v18408_v62 }
0x3f88   :  { %v5557_v63 = vpop.f32.mrb[56].mxu1 }
0x3f89   :  { %v5561_v55 = vmul.f32 0.35355338, %v5557_v63  ;;  %v13777_v7 = vpop.f32.mrb[57].mxu1 }
0x3f8b   :  { %v5562_v56 = vsel %vm991_vm7, %v5561_v55, -inf }
0x3f8c   :  { %5563 = vmax.xlane.f32.xlu1 %v5562_v56 }
0x4019   :  { %v5564_v57 = vpop.xlane.xlu1 %5563 }
0x401a   :  { %v5565_v40 = vsub.f32 %v5561_v55, %v5564_v57 }
0x401c   :  { %v5566_v16 = vmul.f32 1.442695, %v5565_v40 }
0x401e   :  { %15330 = vpow2.f32 %v5566_v16 }
0x4028   :  { %v15331_v1 = vpop.eup %15330 }
0x4029   :  { %v5568_v59 = vsel %vm991_vm7, %v15331_v1, 0.0 }
0x402a   :  { %5569 = vadd.xlane.f32.xlu0 %v5568_v59 }
0x4040   :  { %5573 = vrot.lane.b32.xlu0 %v17186_v24, %s16163_s23  ;;  %s18510_s23 = sld [smem:[#allocation81_spill]] }
0x4058   :  { %v5478_v5 = vpop.f32.mrb[56].mxu0 }
0x4059   :  { %v5482_v6 = vadd.f32 %v5478_v5, %v5239_v19  ;;  %v13772_v14 = vpop.f32.mrb[57].mxu0  ;;  %v15515_v19 = vld [vmem:[#allocation26] ss:$0 sm:$0xff] }
0x40b7   :  { %v5570_v20 = vpop.xlane.xlu0 %5569 }
0x40b8   :  { %15332 = vrcp.f32 %v5570_v20 }
0x40bb   :  { %v5574_v22 = vpop.permute.xlu0 %5573 }
0x40bc   :  { %13779 = vmatpush3.msk.msra.mxu0 %vm1009_vm6, %v5574_v22  ;;  %v555_v22 = vld [vmem:[%s18486_s0] sm:$0xff]  ;;  %vm12439_vm6 = vcmask 9216  }
0x40bd   :  { %14602 = vmatprep.subr.bf16.mxu0 %v16150_v0 }
0x40c2   :  { %v15333_v45 = vpop.eup %15332 }
0x40c3   :  { %v5572_v49 = vmul.f32 %v15333_v45, %v15331_v1  ;;  %v556_v45 = vld [vmem:[%s18486_s0 + $0x8] sm:$0xff] }
0x40c5   :  { %13781 = vmatmul.mubr.msk.f32.vlgmr.msra.gmra.mrb[58].mxu0 %vm1005_vm8, %v5572_v49  ;;  %v17325_v49 = vpack.c.bf16 %v556_v45, %v555_v22 }
0x40c6   :  { %14604 = vmatpush3.bf16.msra.mxu0 %v16950_v23  ;;  %13796 = vmatprep.mubr.msk.f32.mxu0 %vm16151_vm3, %v18408_v62 }
0x40c7   :  { %14605 = vmatprep.subr.bf16.mxu0 %v16150_v0 }
0x40ca   :  { %14607 = vmatpush3.bf16.msra.mxu0 %v16956_v26 }
0x40cb   :  { %14632 = vmatprep.subr.bf16.mxu0 %v16150_v0 }
0x4198   :  { %v5646_v24 = vpop.f32.mrb[58].mxu0 }
0x4199   :  { %v13782_v37 = vpop.f32.mrb[59].mxu0  ;;  %13786 = vmatmul.mubr.msk.f32.vlgmr.msra.gmra.mrb[58].mxu1 %vm915_vm5, %v5646_v24  ;;  %vm9244_vm5 = vcmask 1046528  }
0x419a   :  { %14610 = vmatpush3.bf16.msra.mxu1 %v16962_v30  ;;  %13831 = vmatprep.mubr.msk.f32.mxu1 %vm16151_vm3, %v18408_v62 }
0x419b   :  { %14611 = vmatprep.subr.bf16.mxu1 %v16150_v0 }
0x419e   :  { %14613 = vmatpush3.bf16.msra.mxu1 %v16971_v44 }
0x419f   :  { %14614 = vmatprep.subr.bf16.mxu1 %v16150_v0 }
0x41a2   :  { %14616 = vmatpush3.bf16.msra.mxu1 %v16977_v48  ;;  %v15513_v48 = vld [vmem:[#allocation29] ss:$0 sm:$0xff] }
0x41a3   :  { %14617 = vmatprep.subr.bf16.mxu1 %v16150_v0 }
0x41a6   :  { %14619 = vmatpush3.bf16.msra.mxu1 %v16983_v54 }
0x41a7   :  { %14620 = vmatprep.subr.bf16.mxu1 %v16150_v0 }
0x41aa   :  { %14622 = vmatpush3.bf16.msra.mxu1 %v16990_v58 }
0x41ab   :  { %14623 = vmatprep.subr.bf16.mxu1 %v16150_v0 }
0x41ae   :  { %14625 = vmatpush3.bf16.msra.mxu1 %v16994_v61 }
0x41af   :  { %14626 = vmatprep.subr.bf16.mxu1 %v16150_v0 }
0x41b2   :  { %14628 = vmatpush3.bf16.msra.mxu1 %v17000_v3 }
0x41b3   :  { %14629 = vmatprep.subr.bf16.mxu1 %v16150_v0 }
0x41b6   :  { %14631 = vmatpush3.bf16.msra.mxu1 %v17006_v9 }
0x426c   :  { %v5719_v23 = vpop.f32.mrb[58].mxu1 }
0x426d   :  { %v5723_v26 = vadd.f32 %v5719_v23, %v5482_v6  ;;  %v13787_v30 = vpop.f32.mrb[59].mxu1 }
0x426f   :  { %v5724_v44 = vadd.f32 %v5723_v26, %v17177_v18 }
0x4271   :  { %v5725_v54 = vadd.f32 %v15513_v48, %v5724_v44 }
0x4273   :  { %v5726_v58 = vsel %vm803_vm2, %v5725_v54, 0.0 }
0x4274   :  { %5727 = vadd.xlane.f32.xlu0 %v5726_v58 }
0x4301   :  { %v5728_v25 = vpop.xlane.xlu0 %5727 }
0x4302   :  { %v5729_v61 = vmul.f32 0.03125, %v5728_v25 }
0x4304   :  { %v5730_v17 = vsub.f32 %v5725_v54, %v5729_v61 }
0x4306   :  { %v5731_v51 = vmul.f32 %v5730_v17, %v5730_v17 }
0x4308   :  { %v5732_v3 = vsel %vm803_vm2, %v5731_v51, 0.0  ;;  %v558_v51 = vld [vmem:[%s18486_s0 + $0x18] sm:$0xff] }
0x4309   :  { %5733 = vadd.xlane.f32.xlu1 %v5732_v3  ;;  %v15516_v3 = vld [vmem:[#allocation34] ss:$0 sm:$0xff] }
0x4396   :  { %v5734_v53 = vpop.xlane.xlu1 %5733 }
0x4397   :  { %v5735_v4 = vmul.f32 0.03125, %v5734_v53 }
0x4399   :  { %v5736_v9 = vadd.f32 1e-05, %v5735_v4 }
0x439b   :  { %15334 = vrsqrt.f32 %v5736_v9  ;;  %v12641_v9 = vld [vmem:[%s18487_s9] ss:$0 sm:$0xff] }
0x43a5   :  { %v15335_v8 = vpop.eup %15334 }
0x43a6   :  { %v5738_v11 = vmul.f32 %v15335_v8, %v5730_v17  ;;  %v557_v17 = vld [vmem:[%s18486_s0 + $0x10] sm:$0xff]  ;;  %v15517_v8 = vld [vmem:[#allocation32] ss:$0 sm:$0xff]  ;;  %s18517_s0 = sld [smem:[#allocation74_spill]] }
0x43a8   :  { %v5739_v18 = vmul.f32 %v15514_v15, %v5738_v11  ;;  %v17331_v15 = vpack.c.bf16 %v558_v51, %v557_v17 }
0x43aa   :  { %v5740_v21 = vadd.f32 %v15515_v19, %v5739_v18  ;;  %v12642_v19 = vld [vmem:[%s18488_s19] ss:$0 sm:$0xff] }
0x43ac   :  { %13797 = vmatmul.mubr.msk.f32.vlgmr.msra.gmra.mrb[60].mxu0 %vm838_vm4, %v5740_v21  ;;  %v551_v21 = vld [vmem:[%s18489_s2] sm:$0xff] }
0x43ad   :  { %14634 = vmatpush3.bf16.msra.mxu0 %v17028_v2  ;;  %13842 = vmatprep.mubr.msk.f32.mxu0 %vm16151_vm3, %v18408_v62 }
0x43ae   :  { %14635 = vmatprep.subr.bf16.mxu0 %v16150_v0 }
0x43b1   :  { %14637 = vmatpush3.bf16.msra.mxu0 %v17034_v13 }
0x43b2   :  { %14639 = vmatprep.subr.bf16.mxu0 %v17325_v49 }
0x447f   :  { %v5810_v28 = vpop.f32.mrb[60].mxu0 }
0x4480   :  { %v5811_v29 = vadd.f32 %v17011_v10, %v5810_v28  ;;  %v13798_v31 = vpop.f32.mrb[61].mxu0  ;;  %v17308_v10 = vld [vmem:[%s18485_s30] sm:$0xff]  ;;  %v552_v28 = vld [vmem:[%s18489_s2 + $0x8] sm:$0xff] }
0x4481   :  { %v5992_v60 = vsel %vm838_vm4, %v17308_v10, 0.0 }
0x4482   :  { %v5814_v27 = vmul.f32 %v5811_v29, %v5811_v29 }
0x4484   :  { %v5815_v12 = vmul.f32 %v5814_v27, %v5811_v29 }
0x4486   :  { %v5816_v32 = vmul.f32 0.044715, %v5815_v12 }
0x4488   :  { %v5817_v34 = vadd.f32 %v5816_v32, %v5811_v29  ;;  %v17339_v32 = vpack.c.bf16 %v552_v28, %v551_v21 }
0x448a   :  { %v5818_v35 = vmul.f32 0.7978846, %v5817_v34  ;;  %v553_v34 = vld [vmem:[%s18489_s2 + $0x10] sm:$0xff] }
0x448c   :  { %15336 = vtanh.f32 %v5818_v35  ;;  %v554_v35 = vld [vmem:[%s18489_s2 + $0x18] sm:$0xff] }
0x4496   :  { %v15337_v2 = vpop.eup %15336 }
0x4497   :  { %v5820_v36 = vadd.f32 1.0, %v15337_v2 }
0x4499   :  { %v5821_v38 = vmul.f32 0.5, %v5820_v36 }
0x449b   :  { %v5822_v50 = vmul.f32 %v5821_v38, %v5811_v29  ;;  %v17346_v38 = vpack.c.bf16 %v554_v35, %v553_v34 }
0x449d   :  { %13832 = vmatmul.mubr.f32.vlgmr.msra.gmra.mrb[60].mxu1 %v5822_v50  ;;  %v559_v50 = vld [vmem:[%s18490_s21] sm:$0xff] }
0x4570   :  { %v5889_v0 = vpop.f32.mrb[60].mxu1 }
0x4571   :  { %v5890_v13 = vadd.f32 %v17016_v33, %v5889_v0  ;;  %v13833_v39 = vpop.f32.mrb[61].mxu1  ;;  %v560_v0 = vld [vmem:[%s18490_s21 + $0x8] sm:$0xff] }
0x4572   :  { %v561_v39 = vld [vmem:[%s18490_s21 + $0x10] sm:$0xff] }
0x4573   :  { %v5893_v41 = vadd.f32 %v5890_v13, %v5725_v54  ;;  %v17354_v13 = vpack.c.bf16 %v560_v0, %v559_v50 }
0x4575   :  { %v5894_v42 = vsel %vm803_vm2, %v5893_v41, 0.0 }
0x4576   :  { %5895 = vadd.xlane.f32.xlu1 %v5894_v42 }
0x457a   :  { %5993 = vadd.xlane.f32.xlu1 %v5992_v60  ;;  %v549_v60 = vld [vmem:[%s18491_s17] sm:$0xff] }
0x457e   :  { %5996 = vadd.xlane.f32.xlu1 %v5995_v47  ;;  %v550_v47 = vld [vmem:[%s18491_s17 + $0x8] sm:$0xff]  ;;  %s18530_s17 = sld [smem:[#allocation70_spill]] }
0x4603   :  { %v5896_v52 = vpop.xlane.xlu1 %5895 }
0x4604   :  { %v5897_v33 = vmul.f32 0.03125, %v5896_v52  ;;  %v17370_v52 = vpack.c.bf16 %v550_v47, %v549_v60 }
0x4606   :  { %v5898_v63 = vsub.f32 %v5893_v41, %v5897_v33  ;;  %v562_v41 = vld [vmem:[%s18490_s21 + $0x18] sm:$0xff]  ;;  %14664 = vmatprep.subr.msk.bf16.mxu1 %vm17374_vm11, %v17370_v52 }
0x4607   :  { %v5994_v55 = vpop.xlane.xlu1 %5993  ;;  %v17360_v42 = vpack.c.bf16 %v562_v41, %v561_v39  ;;  %14667 = vmatpush3.bf16.xpose.msk.msra.mxu1 %vm17374_vm11, %v17370_v52 }
0x4608   :  { %v5998_v7 = vmul.f32 0.03125, %v5994_v55  ;;  %v5899_v56 = vmul.f32 %v5898_v63, %v5898_v63 }
0x460a   :  { %v6000_v57 = vsub.f32 %v17308_v10, %v5998_v7  ;;  %v5900_v40 = vsel %vm803_vm2, %v5899_v56, 0.0  ;;  %vm9214_vm2 = vcmask 254976  }
0x460b   :  { %5901 = vadd.xlane.f32.xlu1 %v5900_v40  ;;  %v5997_v16 = vpop.xlane.xlu1 %5996 }
0x460c   :  { %v5999_v1 = vmul.f32 0.03125, %v5997_v16  ;;  %v6002_v59 = vmul.f32 %v6000_v57, %v6000_v57 }
0x460e   :  { %v6001_v5 = vsub.f32 %v17314_v46, %v5999_v1  ;;  %v6004_v6 = vsel %vm838_vm4, %v6002_v59, 0.0 }
0x460f   :  { %6005 = vadd.xlane.f32.xlu1 %v6004_v6 }
0x4610   :  { %v6003_v14 = vmul.f32 %v6001_v5, %v6001_v5 }
0x4612   :  { %v6007_v20 = vsel %vm3445_vm9, %v6003_v14, 0.0 }
0x4613   :  { %6008 = vadd.xlane.f32.xlu1 %v6007_v20 }
0x4698   :  { %v5902_v24 = vpop.xlane.xlu1 %5901 }
0x4699   :  { %v5903_v37 = vmul.f32 0.03125, %v5902_v24 }
0x469b   :  { %v5904_v23 = vadd.f32 1e-05, %v5903_v37 }
0x469c   :  { %v6006_v26 = vpop.xlane.xlu1 %6005 }
0x469d   :  { %15338 = vrsqrt.f32 %v5904_v23  ;;  %v6010_v30 = vmul.f32 0.03125, %v6006_v26 }
0x469f   :  { %v6012_v44 = vadd.f32 1e-05, %v6010_v30 }
0x46a0   :  { %v6009_v48 = vpop.xlane.xlu1 %6008 }
0x46a1   :  { %15340 = vrsqrt.f32 %v6012_v44  ;;  %v6011_v54 = vmul.f32 0.03125, %v6009_v48 }
0x46a3   :  { %v6013_v58 = vadd.f32 1e-05, %v6011_v54 }
0x46a5   :  { %15342 = vrsqrt.f32 %v6013_v58 }
0x46a7   :  { %v15339_v25 = vpop.eup %15338 }
0x46a8   :  { %v5906_v61 = vmul.f32 %v15339_v25, %v5898_v63 }
0x46aa   :  { %v5907_v53 = vmul.f32 %v15516_v3, %v5906_v61 }
0x46ab   :  { %v15341_v4 = vpop.eup %15340 }
0x46ac   :  { %v5908_v11 = vadd.f32 %v15517_v8, %v5907_v53  ;;  %v6016_v18 = vmul.f32 %v15341_v4, %v6000_v57 }
0x46ae   :  { %13843 = vmatmul.mubr.msk.f32.vlgmr.msra.gmra.mrb[62].mxu0 %vm838_vm4, %v5908_v11  ;;  %v6024_v29 = vmul.f32 %v12641_v9, %v6016_v18 }
0x46af   :  { %v15343_v31 = vpop.eup %15342  ;;  %14641 = vmatpush3.bf16.msra.mxu0 %v17325_v49 }
0x46b0   :  { %v6017_v27 = vmul.f32 %v15343_v31, %v6001_v5  ;;  %14643 = vmatprep.subr.bf16.mxu0 %v17331_v15  ;;  %v6032_v12 = vadd.f32 %v12642_v19, %v6024_v29 }
0x46b2   :  { %13853 = vmatprep.mubr.msk.f32.mxu0 %vm838_vm4, %v6032_v12  ;;  %v6025_v2 = vmul.f32 %v12641_v9, %v6017_v27 }
0x46b3   :  { %14645 = vmatpush3.bf16.msra.mxu0 %v17331_v15 }
0x46b4   :  { %14647 = vmatprep.subr.bf16.mxu0 %v17339_v32  ;;  %v6033_v36 = vadd.f32 %v12642_v19, %v6025_v2 }
0x46b6   :  { %13854 = vmatmul.mubr.msk.f32.vlgmr.msra.gmra.mrb[64].mxu0 %vm838_vm4, %v6033_v36 }
0x46b7   :  { %14649 = vmatpush3.bf16.msra.mxu0 %v17339_v32  ;;  %13864 = vmatprep.mubr.msk.f32.mxu0 %vm838_vm4, %v6032_v12 }
0x46b8   :  { %14651 = vmatprep.subr.bf16.mxu0 %v17346_v38 }
0x46bb   :  { %14653 = vmatpush3.bf16.msra.mxu0 %v17346_v38 }
0x46bc   :  { %14655 = vmatprep.subr.bf16.mxu0 %v17354_v13 }
0x46be   :  { %13865 = vmatmul.mubr.msk.f32.vlgmr.msra.gmra.mrb[66].mxu0 %vm838_vm4, %v6033_v36 }
0x46bf   :  { %14657 = vmatpush3.bf16.msra.mxu0 %v17354_v13  ;;  %13875 = vmatprep.mubr.msk.f32.mxu0 %vm838_vm4, %v6032_v12 }
0x46c0   :  { %14659 = vmatprep.subr.bf16.mxu0 %v17360_v42 }
0x46c3   :  { %14661 = vmatpush3.bf16.msra.mxu0 %v17360_v42 }
0x46c4   :  { %14670 = vmatprep.subr.msk.bf16.mxu0 %vm17374_vm11, %v17370_v52 }
0x46c6   :  { %13876 = vmatmul.mubr.msk.f32.vlgmr.msra.gmra.mrb[68].mxu0 %vm838_vm4, %v6033_v36 }
0x46cc   :  { %14673 = vmatpush3.bf16.xpose.msk.msra.mxu0 %vm17374_vm11, %v17370_v52 }
0x46cd   :  { %14686 = vmatprep.subr.msk.bf16.mxu0 %vm17374_vm11, %v17370_v52 }
0x4781   :  { %v17393_v63 = vpop.f32.mrb[62].mxu0 }
0x4782   :  { %18494 = vst [vmem:[#allocation99_spill] sm:$0xff] %v17393_v63  ;;  %v13844_v55 = vpop.f32.mrb[63].mxu0 }
0x4789   :  { %v13855_v7 = vpop.f32.mrb[64].mxu0 }
0x478a   :  { %v6106_v56 = vpop.f32.mrb[65].mxu0  ;;  %v17397_v40 = vmul.f32 0.5, %v13855_v7 }
0x478b   :  { %v17395_v57 = vmul.f32 0.5, %v6106_v56 }
0x478c   :  { %v6439_v3 = vmul.f32 %v17397_v40, %v17397_v40 }
0x478d   :  { %13882 = vmatprep.mubr.msk.f32.mxu1 %vm6269_vm10, %v17395_v57  ;;  %v6438_v17 = vmul.f32 %v17395_v57, %v17395_v57 }
0x478e   :  { %13883 = vmatmul.mubr.msk.f32.vlgmr.msra.gmra.mrb[62].mxu1 %vm6269_vm10, %v17397_v40  ;;  %v6444_v53 = vsel %vm6443_vm14, %v6439_v3, 0.0 }
0x478f   :  { %v6440_v51 = vsel %vm6269_vm10, %v6438_v17, 0.0 }
0x4791   :  { %v13866_v16 = vpop.f32.mrb[66].mxu0 }
0x4792   :  { %v6181_v1 = vpop.f32.mrb[67].mxu0  ;;  %v6268_v5 = vmul.f32 0.5, %v13866_v16 }
0x4793   :  { %v6267_v59 = vmul.f32 0.5, %v6181_v1 }
0x4794   :  { %v6450_v25 = vmul.f32 %v6268_v5, %v6268_v5 }
0x4795   :  { %13889 = vmatprep.mubr.msk.f32.mxu0 %vm6269_vm10, %v6267_v59  ;;  %v6449_v6 = vmul.f32 %v6267_v59, %v6267_v59 }
0x4796   :  { %13890 = vmatmul.mubr.msk.f32.vlgmr.msra.gmra.mrb[70].mxu0 %vm6269_vm10, %v6268_v5  ;;  %v6454_v61 = vsel %vm6443_vm14, %v6450_v25, 0.0 }
0x4797   :  { %v6451_v14 = vsel %vm6269_vm10, %v6449_v6, 0.0  ;;  %14689 = vmatpush3.bf16.xpose.msk.msra.mxu0 %vm17374_vm11, %v17370_v52 }
0x4798   :  { %6452 = vadd.xlane.f32.xlu1 %v6451_v14 }
0x4799   :  { %v17409_v20 = vpop.f32.mrb[68].mxu0 }
0x479a   :  { %v17416_v45 = vpop.f32.mrb[69].mxu0 }
0x479b   :  { %v15228_v24 = vpack.i.bf16 %v17409_v20, %v17416_v45  ;;  %v14674_v37 = vpack.c.bf16 %v17409_v20, %v17416_v45 }
0x479d   :  { %14676 = vmatprep.subr.msk.bf16.mxu1 %vm17412_vm13, %v14674_v37 }
0x479e   :  { %14679 = vmatpush3.bf16.msk.msra.mxu1 %vm17412_vm13, %v14674_v37 }
0x4825   :  { %v6453_v27 = vpop.xlane.xlu1 %6452 }
0x4826   :  { %v6457_v34 = vmul.f32 0.5, %v6453_v27 }
0x4861   :  { %v17426_v23 = vpop.f32.mrb[62].mxu1 }
0x4862   :  { %v17428_v26 = vpop.f32.mrb[63].mxu1  ;;  %v6464_v9 = vsel %vm6443_vm14, %v17426_v23, -inf }
0x4863   :  { %v6461_v4 = vsel %vm6269_vm10, %v17428_v26, -inf }
0x4869   :  { %v13891_v30 = vpop.f32.mrb[70].mxu0 }
0x486a   :  { %v6480_v44 = vsel %vm6443_vm14, %v13891_v30, -inf  ;;  %v6429_v48 = vpop.f32.mrb[71].mxu0 }
0x486b   :  { %v6479_v54 = vsel %vm6269_vm10, %v6429_v48, -inf  ;;  %v6477_v35 = vsub.f32 %v6429_v48, %v6457_v34 }
0x486c   :  { %v6481_v58 = vmax.f32 %v6479_v54, %v6480_v44 }
0x486e   :  { %6482 = vmax.xlane.f32.xlu0 %v6481_v58 }
0x4872   :  { %6455 = vadd.xlane.f32.xlu0 %v6454_v61 }
0x4876   :  { %6441 = vadd.xlane.f32.xlu0 %v6440_v51 }
0x487a   :  { %6445 = vadd.xlane.f32.xlu0 %v6444_v53 }
0x487e   :  { %6462 = vmax.xlane.f32.xlu0 %v6461_v4 }
0x4882   :  { %6465 = vmax.xlane.f32.xlu0 %v6464_v9 }
0x4898   :  { %6804 = vrot.lane.b32.xlu0 %v6267_v59, %s16159_s22 }
0x489c   :  { %6806 = vrot.lane.b32.xlu0 %v6268_v5, %s16159_s22 }
0x48a0   :  { %6905 = vrot.lane.b32.xlu0 %v6449_v6, %s16159_s22 }
0x48fb   :  { %v6483_v8 = vpop.xlane.xlu0 %6482 }
0x48fc   :  { %v6484_v11 = vrot.slane %v6483_v8, 4 }
0x48fe   :  { %v6485_v18 = vmax.f32 %v6483_v8, %v6484_v11 }
0x48ff   :  { %v6456_v31 = vpop.xlane.xlu0 %6455 }
0x4900   :  { %v6486_v19 = vrot.slane %v6485_v18, 2  ;;  %v6458_v12 = vmul.f32 0.5, %v6456_v31 }
0x4902   :  { %v6487_v21 = vmax.f32 %v6485_v18, %v6486_v19  ;;  %v6478_v2 = vsub.f32 %v13891_v30, %v6458_v12 }
0x4903   :  { %v6442_v6 = vpop.xlane.xlu0 %6441 }
0x4904   :  { %v6488_v28 = vrot.slane %v6487_v21, 1 }
0x4906   :  { %v6489_v29 = vmax.f32 %v6487_v21, %v6488_v28 }
0x4907   :  { %v6446_v14 = vpop.xlane.xlu0 %6445 }
0x4908   :  { %15110 = vpush %v6489_v29  ;;  %v6448_v28 = vmul.f32 0.5, %v6446_v14 }
0x490a   :  { %v6460_v29 = vsub.f32 %v17426_v23, %v6448_v28 }
0x490b   :  { %v6463_v37 = vpop.xlane.xlu0 %6462 }
0x490f   :  { %v6466_v30 = vpop.xlane.xlu0 %6465 }
0x4910   :  { %v6468_v31 = vsub.f32 %v6460_v29, %v6466_v30 }
0x4912   :  { %v6471_v27 = vmul.f32 1.442695, %v6468_v31 }
0x4913   :  { %v6805_v44 = vpop.permute.xlu0 %6804 }
0x4917   :  { %v6807_v48 = vpop.permute.xlu0 %6806 }
0x491b   :  { %v6906_v54 = vpop.permute.xlu0 %6905 }
0x491c   :  { %v6911_v58 = vsel %vm6269_vm10, %v6906_v54, 0.0 }
0x4939   :  { %s15111_s14 = spop %15110 }
0x493a   :  { %v6491_v36 = vstv %s15111_s14  ;;  %s16165_s14 = smov [#allocation37]  }
0x493b   :  { %v6492_v50 = vsub.f32 %v6477_v35, %v6491_v36  ;;  %v6493_v0 = vsub.f32 %v6478_v2, %v6491_v36 }
0x493d   :  { %v6494_v39 = vmul.f32 1.442695, %v6492_v50  ;;  %v6496_v41 = vmul.f32 1.442695, %v6493_v0 }
0x493f   :  { %15344 = vpow2.f32 %v6494_v39 }
0x4940   :  { %15346 = vpow2.f32 %v6496_v41 }
0x4949   :  { %v15345_v60 = vpop.eup %15344 }
0x494a   :  { %v15347_v47 = vpop.eup %15346  ;;  %v6498_v55 = vadd.f32 0.0001, %v15345_v60 }
0x494b   :  { %v6499_v7 = vadd.f32 0.0001, %v15347_v47 }
0x494c   :  { %v6500_v56 = vmul.f32 0.25, %v6498_v55 }
0x494d   :  { %v6501_v16 = vmul.f32 0.25, %v6499_v7 }
0x494e   :  { %6502 = vxpose.xlu1.b32.start [1/2] (short) (narrow) %v6500_v56, 16  ;;  %v6619_v1 = vsel %vm6269_vm10, %v6500_v56, 0.0 }
0x494f   :  { %v6620_v59 = vsel %vm6443_vm14, %v6501_v16, 0.0 }
0x4950   :  { %v17448_v5 = vadd.f32 %v6620_v59, %v6619_v1 }
0x4952   :  { %6503 = vxpose.xlu1.b32.end [2/2] (short) (narrow) %v6501_v16, 16 }
0x4970   :  { %6907 = vrot.lane.b32.xlu1 %v6450_v25, %s16159_s22  ;;  %v6447_v25 = vmul.f32 0.5, %v6442_v6 }
0x4974   :  { %6723 = vrot.lane.b32.xlu1 %v17397_v40, %s16159_s22  ;;  %v6459_v40 = vsub.f32 %v17428_v26, %v6447_v25 }
0x4976   :  { %v6467_v61 = vsub.f32 %v6459_v40, %v6463_v37 }
0x4978   :  { %v6469_v51 = vmul.f32 1.442695, %v6467_v61 }
0x497a   :  { %15348 = vpow2.f32 %v6469_v51 }
0x497b   :  { %15350 = vpow2.f32 %v6471_v27 }
0x4984   :  { %v15349_v53 = vpop.eup %15348 }
0x4985   :  { %v6473_v4 = vadd.f32 0.0001, %v15349_v53  ;;  %v15351_v12 = vpop.eup %15350 }
0x4986   :  { %v6474_v2 = vadd.f32 0.0001, %v15351_v12 }
0x4987   :  { %v17462_v8 = vmul.f32 0.25, %v6473_v4 }
0x4988   :  { %v17471_v50 = vmul.f32 0.25, %v6474_v2 }
0x4998   :  { %6912 = vadd.xlane.f32.xlu1 %v6911_v58 }
0x49a9   :  { %15229 = vrot.lane.b32.xlu1 %v15228_v24, %s16159_s22 }
0x49ad   :  { %6889 = vrot.lane.b32.xlu1 %v6438_v17, %s16159_s22 }
0x49b1   :  { %6891 = vrot.lane.b32.xlu1 %v6439_v3, %s16159_s22 }
0x49ce   :  { %v6518_v9 = vpop.trf.xlu1 }
0x49cf   :  { %13896 = vmatprep.mubr.msk.f32.mxu1 %vm6534_vm15, %v6518_v9 }
0x49d2   :  { %v6519_v20 = vpop.trf.xlu1 }
0x49d3   :  { %13897 = vmatmul.mubr.msk.f32.vlgmr.msra.gmra.mrb[64].mxu1 %vm6534_vm15, %v6519_v20 }
0x49d4   :  { %13903 = vmatprep.mubr.msk.f32.mxu1 %vm6269_vm10, %v17462_v8 }
0x49e2   :  { %v6908_v45 = vpop.permute.xlu1 %6907 }
0x49e3   :  { %v6914_v7 = vsel %vm6443_vm14, %v6908_v45, 0.0 }
0x49e6   :  { %v6724_v24 = vpop.permute.xlu1 %6723 }
0x4a25   :  { %v6913_v26 = vpop.xlane.xlu1 %6912 }
0x4a29   :  { %v15230_v17 = vpop.permute.xlu1 %15229 }
0x4a2a   :  { %v15232_v3 = vunpack.i.h.bf16 %v15230_v17  ;;  %v15231_v11 = vunpack.i.l.bf16 %v15230_v17 }
0x4a2c   :  { %v14696_v18 = vpack.c.bf16 %v15232_v3, %v15231_v11 }
0x4a2d   :  { %v6890_v19 = vpop.permute.xlu1 %6889 }
0x4a2e   :  { %v6895_v21 = vsel %vm6269_vm10, %v6890_v19, 0.0  ;;  %14698 = vmatprep.subr.msk.bf16.mxu0 %vm17412_vm13, %v14696_v18 }
0x4a2f   :  { %6896 = vadd.xlane.f32.xlu1 %v6895_v21 }
0x4aa6   :  { %v13898_v34 = vpop.f32.mrb[64].mxu1 }
0x4aa7   :  { %v6610_v35 = vpop.f32.mrb[65].mxu1 }
0x4aa8   :  { %v14680_v36 = vpack.c.bf16 %v13898_v34, %v6610_v35 }
0x4aaa   :  { %14681 = vmatprep.subr.bf16.mxu1 %v14680_v36 }
0x4aab   :  { %14683 = vmatpush3.bf16.msra.mxu1 %v14680_v36 }
0x4aac   :  { %14692 = vmatprep.subr.msk.bf16.mxu1 %vm17374_vm11, %v17370_v52 }
0x4aae   :  { %13904 = vmatmul.mubr.msk.f32.vlgmr.msra.gmra.mrb[66].mxu1 %vm6269_vm10, %v17471_v50 }
0x4aaf   :  { %13917 = vmatprep.mubr.msk.f32.mxu1 %vm6269_vm10, %v6805_v44 }
0x4ab4   :  { %14695 = vmatpush3.bf16.xpose.msk.msra.mxu1 %vm17374_vm11, %v17370_v52 }
0x4abb   :  { %13918 = vmatmul.mubr.msk.f32.vlgmr.msra.gmra.mrb[68].mxu1 %vm6269_vm10, %v6807_v48  ;;  %v6917_v48 = vmul.f32 0.5, %v6913_v26 }
0x4b81   :  { %v17483_v23 = vpop.f32.mrb[66].mxu1 }
0x4b82   :  { %v17485_v0 = vpop.f32.mrb[67].mxu1 }
0x4b8e   :  { %v13919_v39 = vpop.f32.mrb[68].mxu1 }
0x4b8f   :  { %v6940_v41 = vsel %vm6443_vm14, %v13919_v39, -inf  ;;  %v6878_v60 = vpop.f32.mrb[69].mxu1 }
0x4b90   :  { %v6939_v47 = vsel %vm6269_vm10, %v6878_v60, -inf  ;;  %v6937_v54 = vsub.f32 %v6878_v60, %v6917_v48 }
0x4b91   :  { %v6941_v55 = vmax.f32 %v6939_v47, %v6940_v41 }
0x4b93   :  { %6942 = vmax.xlane.f32.xlu0 %v6941_v55  ;;  %v6622_v55 = vrot.slane %v17448_v5, 4 }
0x4ba9   :  { %6721 = vrot.lane.b32.xlu0 %v17395_v57, %s16159_s22 }
0x4bc8   :  { %6915 = vadd.xlane.f32.xlu0 %v6914_v7 }
0x4c20   :  { %v6943_v56 = vpop.xlane.xlu0 %6942 }
0x4c21   :  { %v6944_v16 = vrot.slane %v6943_v56, 4 }
0x4c23   :  { %v6945_v1 = vmax.f32 %v6943_v56, %v6944_v16 }
0x4c24   :  { %v6722_v59 = vpop.permute.xlu0 %6721 }
0x4c25   :  { %13910 = vmatprep.mubr.msk.f32.mxu0 %vm6269_vm10, %v6722_v59  ;;  %v6946_v6 = vrot.slane %v6945_v1, 2 }
0x4c26   :  { %13911 = vmatmul.mubr.msk.f32.vlgmr.msra.gmra.mrb[72].mxu0 %vm6269_vm10, %v6724_v24 }
0x4c27   :  { %14701 = vmatpush3.bf16.msk.msra.mxu0 %vm17412_vm13, %v14696_v18  ;;  %v6947_v14 = vmax.f32 %v6945_v1, %v6946_v6  ;;  %v6892_v18 = vpop.permute.xlu1 %6891  ;;  %v6623_v6 = vadd.f32 %v6622_v55, %v17448_v5 }
0x4c28   :  { %v6898_v19 = vsel %vm6443_vm14, %v6892_v18, 0.0 }
0x4c29   :  { %v6948_v37 = vrot.slane %v6947_v14, 1 }
0x4c2b   :  { %v6949_v30 = vmax.f32 %v6947_v14, %v6948_v37  ;;  %v6897_v34 = vpop.xlane.xlu1 %6896 }
0x4c2c   :  { %v6901_v2 = vmul.f32 0.5, %v6897_v34 }
0x4c2d   :  { %15112 = vpush %v6949_v30 }
0x4c55   :  { %v6916_v57 = vpop.xlane.xlu0 %6915 }
0x4c56   :  { %v6918_v44 = vmul.f32 0.5, %v6916_v57  ;;  %v6624_v57 = vrot.slane %v6623_v6, 2 }
0x4c58   :  { %v6938_v58 = vsub.f32 %v13919_v39, %v6918_v44  ;;  %v6625_v48 = vadd.f32 %v6624_v57, %v6623_v6  ;;  %v12679_v6 = vld [vmem:[%s18498_s10] ss:$0 sm:$0xff] }
0x4c5e   :  { %s15113_s20 = spop %15112 }
0x4c5f   :  { %v6951_v25 = vstv %s15113_s20  ;;  %s12447_s20 = sshll.u32 %s16165_s14, 4  ;;  %s12448_s20 = int_to_ptr.vmem [resolvable:$true] %s12447_s20 }
0x4c60   :  { %v6952_v40 = vsub.f32 %v6937_v54, %v6951_v25  ;;  %v6953_v61 = vsub.f32 %v6938_v58, %v6951_v25  ;;  %p16021_p9 = scmp.lt.s32.totalorder %s12448_s20, %s12448_s20 }
0x4c62   :  { %v6954_v51 = vmul.f32 1.442695, %v6952_v40  ;;  %v6956_v53 = vmul.f32 1.442695, %v6953_v61  ;;  %v6626_v61 = vrot.slane %v6625_v48, 1 }
0x4c64   :  { %15352 = vpow2.f32 %v6954_v51 }
0x4c65   :  { %15354 = vpow2.f32 %v6956_v53 }
0x4c6e   :  { %v15353_v4 = vpop.eup %15352 }
0x4c6f   :  { %v15355_v9 = vpop.eup %15354  ;;  %v6958_v20 = vadd.f32 0.0001, %v15353_v4 }
0x4c70   :  { %v6959_v45 = vadd.f32 0.0001, %v15355_v9 }
0x4c71   :  { %v6960_v24 = vmul.f32 0.25, %v6958_v20  ;;  %v6627_v20 = vadd.f32 %v6626_v61, %v6625_v48 }
0x4c72   :  { %v6961_v17 = vmul.f32 0.25, %v6959_v45 }
0x4c73   :  { %6962 = vxpose.xlu0.b32.start [1/2] (short) (narrow) %v6960_v24, 16  ;;  %v7083_v3 = vsel %vm6269_vm10, %v6960_v24, 0.0 }
0x4c74   :  { %v7084_v26 = vsel %vm6443_vm14, %v6961_v17, 0.0 }
0x4c75   :  { %v7085_v11 = vadd.f32 %v7084_v26, %v7083_v3  ;;  %v6710_v26 = vmul.f32 %v6627_v20, %v17471_v50  ;;  %v545_v50 = vld [vmem:[%s18497_s7] sm:$0xff] }
0x4c77   :  { %6963 = vxpose.xlu0.b32.end [2/2] (short) (narrow) %v6961_v17, 16  ;;  %v7086_v36 = vrot.slane %v7085_v11, 4  ;;  %v6709_v17 = vmul.f32 %v6627_v20, %v17462_v8  ;;  %v548_v8 = vld [vmem:[%s18497_s7 + $0x18] sm:$0xff]  ;;  %v521_v20 = vld [vmem:[%s18499_s6 + $0x10] sm:$0xff] }
0x4c79   :  { %v7087_v7 = vadd.f32 %v7086_v36, %v7085_v11  ;;  %v6711_v3 = vsel %vm6269_vm10, %v6709_v17, 0.0  ;;  %v6714_v11 = vsel %vm6443_vm14, %v6710_v26, 0.0 }
0x4c7b   :  { %v7088_v14 = vrot.slane %v7087_v7, 2 }
0x4c7d   :  { %v7089_v30 = vadd.f32 %v7088_v14, %v7087_v7 }
0x4c7f   :  { %v7090_v44 = vrot.slane %v7089_v30, 1 }
0x4c81   :  { %v7091_v40 = vadd.f32 %v7090_v44, %v7089_v30 }
0x4ca4   :  { %6899 = vadd.xlane.f32.xlu0 %v6898_v19 }
0x4cf3   :  { %v6978_v21 = vpop.trf.xlu0 }
0x4cf4   :  { %13924 = vmatprep.mubr.msk.f32.mxu0 %vm6534_vm15, %v6978_v21 }
0x4cf7   :  { %v6979_v28 = vpop.trf.xlu0 }
0x4cf8   :  { %13925 = vmatmul.mubr.msk.f32.vlgmr.msra.gmra.mrb[74].mxu0 %vm6534_vm15, %v6979_v28  ;;  %v547_v28 = vld [vmem:[%s18497_s7 + $0x10] sm:$0xff] }
0x4cf9   :  { %v13912_v29 = vpop.f32.mrb[72].mxu0 }
0x4cfa   :  { %v6795_v31 = vpop.f32.mrb[73].mxu0  ;;  %v6924_v12 = vsel %vm6443_vm14, %v13912_v29, -inf }
0x4cfb   :  { %v6921_v27 = vsel %vm6269_vm10, %v6795_v31, -inf  ;;  %v6919_v39 = vsub.f32 %v6795_v31, %v6901_v2  ;;  %v546_v31 = vld [vmem:[%s18497_s7 + $0x8] sm:$0xff]  ;;  %s16016_s7 = scalar_lea.vmem %s12448_s20, 32 }
0x4cfc   :  { %6922 = vmax.xlane.f32.xlu1 %v6921_v27  ;;  %v17521_v27 = vpack.c.bf16 %v546_v31, %v545_v50  ;;  %v12681_v50 = vld [vmem:[%s18501_s11] ss:$0 sm:$0xff]  ;;  %p16017_p8 = scmp.ne.s32.totalorder %s12448_s20, %s16016_s7  ;;  %p16022_p10 = scmp.lt.s32.totalorder %s16016_s7, %s16016_s7 }
0x4cfe   :  { %p16023_p11 = por %p16022_p10, %p16021_p9 }
0x4d00   :  { %6925 = vmax.xlane.f32.xlu1 %v6924_v12  ;;  %p16024_p12 = pnand %p16023_p11, %p16017_p8 }
0x4d31   :  { %v6900_v35 = vpop.xlane.xlu0 %6899 }
0x4d32   :  { %v6902_v41 = vmul.f32 0.5, %v6900_v35 }
0x4d34   :  { %v6920_v16 = vsub.f32 %v13912_v29, %v6902_v41  ;;  %v17515_v29 = vpack.c.bf16 %v548_v8, %v547_v28  ;;  %v12680_v28 = vld [vmem:[%s18500_s13] ss:$0 sm:$0xff] }
0x4d36   :  { %14707 = vmatprep.subr.bf16.mxu0 %v17515_v29 }
0x4d37   :  { %14709 = vmatpush3.bf16.msra.mxu0 %v17515_v29 }
0x4d38   :  { %14711 = vmatprep.subr.bf16.mxu0 %v17521_v27 }
0x4d89   :  { %v6923_v60 = vpop.xlane.xlu1 %6922 }
0x4d8a   :  { %v6927_v47 = vsub.f32 %v6919_v39, %v6923_v60 }
0x4d8c   :  { %v6929_v56 = vmul.f32 1.442695, %v6927_v47 }
0x4d8d   :  { %v6926_v1 = vpop.xlane.xlu1 %6925 }
0x4d8e   :  { %15356 = vpow2.f32 %v6929_v56  ;;  %v6928_v59 = vsub.f32 %v6920_v16, %v6926_v1 }
0x4d90   :  { %v6931_v37 = vmul.f32 1.442695, %v6928_v59 }
0x4d92   :  { %15358 = vpow2.f32 %v6931_v37 }
0x4d98   :  { %v15357_v54 = vpop.eup %15356 }
0x4d99   :  { %v6933_v58 = vadd.f32 0.0001, %v15357_v54 }
0x4d9b   :  { %v6935_v25 = vmul.f32 0.25, %v6933_v58 }
0x4d9c   :  { %v15359_v51 = vpop.eup %15358 }
0x4d9d   :  { %v6934_v53 = vadd.f32 0.0001, %v15359_v51  ;;  %13931 = vmatprep.mubr.msk.f32.mxu1 %vm6269_vm10, %v6935_v25  ;;  %v7173_v4 = vmul.f32 %v7091_v40, %v6935_v25 }
0x4d9f   :  { %v7175_v9 = vsel %vm6269_vm10, %v7173_v4, 0.0  ;;  %v6936_v5 = vmul.f32 0.25, %v6934_v53  ;;  %v519_v4 = vld [vmem:[%s18499_s6] sm:$0xff] }
0x4da0   :  { %7176 = vadd.xlane.f32.xlu1 %v7175_v9  ;;  %v520_v9 = vld [vmem:[%s18499_s6 + $0x8] sm:$0xff] }
0x4da1   :  { %v7174_v45 = vmul.f32 %v7091_v40, %v6936_v5 }
0x4da3   :  { %v7178_v24 = vsel %vm6443_vm14, %v7174_v45, 0.0  ;;  %v522_v45 = vld [vmem:[%s18499_s6 + $0x18] sm:$0xff] }
0x4da4   :  { %7179 = vadd.xlane.f32.xlu1 %v7178_v24  ;;  %v17554_v24 = vpack.c.bf16 %v522_v45, %v521_v20 }
0x4da8   :  { %6712 = vadd.xlane.f32.xlu1 %v6711_v3 }
0x4dac   :  { %6715 = vadd.xlane.f32.xlu1 %v6714_v11 }
0x4dcb   :  { %v13926_v18 = vpop.f32.mrb[74].mxu0 }
0x4dcc   :  { %v7074_v19 = vpop.f32.mrb[75].mxu0 }
0x4dcd   :  { %v14702_v21 = vpack.c.bf16 %v13926_v18, %v7074_v19 }
0x4dcf   :  { %14703 = vmatprep.subr.bf16.mxu1 %v14702_v21 }
0x4dd0   :  { %14705 = vmatpush3.bf16.msra.mxu1 %v14702_v21 }
0x4dd3   :  { %13932 = vmatmul.mubr.msk.f32.vlgmr.msra.gmra.mrb[70].mxu1 %vm6269_vm10, %v6936_v5  ;;  %v17548_v5 = vpack.c.bf16 %v520_v9, %v519_v4 }
0x4dd5   :  { %14715 = vmatprep.subr.bf16.mxu1 %v17548_v5 }
0x4dd6   :  { %14717 = vmatpush3.bf16.msra.mxu1 %v17548_v5 }
0x4dd7   :  { %14719 = vmatprep.subr.bf16.mxu1 %v17554_v24 }
0x4dda   :  { %14721 = vmatpush3.bf16.msra.mxu1 %v17554_v24 }
0x4e2d   :  { %v7177_v12 = vpop.xlane.xlu1 %7176 }
0x4e2e   :  { %15360 = vrcp.f32 %v7177_v12 }
0x4e31   :  { %v7180_v34 = vpop.xlane.xlu1 %7179 }
0x4e35   :  { %v6713_v35 = vpop.xlane.xlu1 %6712 }
0x4e36   :  { %15362 = vrcp.f32 %v6713_v35 }
0x4e37   :  { %15364 = vrcp.f32 %v7180_v34 }
0x4e38   :  { %v15361_v36 = vpop.eup %15360 }
0x4e39   :  { %v6716_v2 = vpop.xlane.xlu1 %6715 }
0x4e3a   :  { %15366 = vrcp.f32 %v6716_v2 }
0x4e40   :  { %v15363_v41 = vpop.eup %15362 }
0x4e41   :  { %v15365_v47 = vpop.eup %15364  ;;  %v6718_v56 = vmul.f32 %v15363_v41, %v17485_v0  ;;  %v525_v41 = vld [vmem:[%s18502_s4 + $0x8] sm:$0xff] }
0x4e44   :  { %v15367_v16 = vpop.eup %15366 }
0x4e45   :  { %v6720_v1 = vmul.f32 %v15367_v16, %v17483_v23  ;;  %v529_v16 = vld [vmem:[%s18502_s4 + $0x28] sm:$0xff] }
0x4ea6   :  { %v13933_v39 = vpop.f32.mrb[70].mxu1 }
0x4ea7   :  { %v7164_v60 = vpop.f32.mrb[71].mxu1  ;;  %v7184_v7 = vmul.f32 %v15365_v47, %v13933_v39  ;;  %v524_v39 = vld [vmem:[%s18502_s4] sm:$0xff]  ;;  %v526_v47 = vld [vmem:[%s18502_s4 + $0x10] sm:$0xff] }
0x4ea8   :  { %v7182_v55 = vmul.f32 %v15361_v36, %v7164_v60  ;;  %v17564_v60 = vpack.c.bf16 %v525_v41, %v524_v39  ;;  %v12685_v41 = vld [vmem:[%s18504_s16] ss:$0 sm:$0xff] }
0x4eaa   :  { %13938 = vmatprep.mubr.msk.f32.mxu0 %vm6269_vm10, %v7182_v55  ;;  %v527_v55 = vld [vmem:[%s18502_s4 + $0x18] sm:$0xff] }
0x4eab   :  { %13939 = vmatmul.mubr.msk.f32.vlgmr.msra.gmra.mrb[76].mxu0 %vm6269_vm10, %v7184_v7  ;;  %v17570_v7 = vpack.c.bf16 %v527_v55, %v526_v47 }
0x4eac   :  { %14713 = vmatpush3.bf16.msra.mxu0 %v17521_v27  ;;  %13945 = vmatprep.mubr.msk.f32.mxu0 %vm6269_vm10, %v6718_v56  ;;  %v528_v56 = vld [vmem:[%s18502_s4 + $0x20] sm:$0xff] }
0x4ead   :  { %14723 = vmatprep.subr.bf16.mxu0 %v17564_v60 }
0x4eb3   :  { %13946 = vmatmul.mubr.msk.f32.vlgmr.msra.gmra.mrb[76].mxu0 %vm6269_vm10, %v6720_v1  ;;  %v17576_v1 = vpack.c.bf16 %v529_v16, %v528_v56 }
0x4eb4   :  { %14725 = vmatpush3.bf16.msra.mxu0 %v17564_v60 }
0x4eb5   :  { %14727 = vmatprep.subr.bf16.mxu0 %v17570_v7 }
0x4eb8   :  { %14729 = vmatpush3.bf16.msra.mxu0 %v17570_v7 }
0x4eb9   :  { %14731 = vmatprep.subr.bf16.mxu0 %v17576_v1 }
0x4ebc   :  { %14733 = vmatpush3.bf16.msra.mxu0 %v17576_v1 }
0x4f86   :  { %v13947_v59 = vpop.f32.mrb[76].mxu0 }
0x4f87   :  { %v7338_v14 = vpop.f32.mrb[77].mxu0  ;;  %v7348_v37 = vadd.f32 %v13947_v59, %v17314_v46  ;;  %v530_v59 = vld [vmem:[%s18502_s4 + $0x30] sm:$0xff] }
0x4f88   :  { %v7347_v30 = vadd.f32 %v7338_v14, %v17308_v10 }
0x4f89   :  { %v17536_v0 = vadd.f32 %v12679_v6, %v7348_v37  ;;  %v532_v37 = vld [vmem:[%s18502_s4 + $0x40] sm:$0xff] }
0x4f8a   :  { %v17534_v57 = vadd.f32 %v12679_v6, %v7347_v30  ;;  %v531_v6 = vld [vmem:[%s18502_s4 + $0x38] sm:$0xff]  ;;  %v533_v30 = vld [vmem:[%s18502_s4 + $0x48] sm:$0xff] }
0x4f8b   :  { %v7360_v23 = vsel %vm3445_vm9, %v17536_v0, 0.0  ;;  %v17582_v14 = vpack.c.bf16 %v531_v6, %v530_v59 }
0x4f8c   :  { %v7357_v44 = vsel %vm838_vm4, %v17534_v57, 0.0 }
0x4f8d   :  { %7358 = vadd.xlane.f32.xlu1 %v7357_v44  ;;  %14735 = vmatprep.subr.bf16.mxu0 %v17582_v14  ;;  %v534_v44 = vld [vmem:[%s18502_s4 + $0x50] sm:$0xff] }
0x4f8e   :  { %14737 = vmatpush3.bf16.msra.mxu0 %v17582_v14 }
0x4f91   :  { %7361 = vadd.xlane.f32.xlu1 %v7360_v23  ;;  %v17589_v23 = vpack.c.bf16 %v533_v30, %v532_v37 }
0x4f93   :  { %14739 = vmatprep.subr.bf16.mxu0 %v17589_v23 }
0x4f94   :  { %14741 = vmatpush3.bf16.msra.mxu0 %v17589_v23 }
0x501a   :  { %v7359_v48 = vpop.xlane.xlu1 %7358 }
0x501b   :  { %v7363_v54 = vmul.f32 0.03125, %v7359_v48  ;;  %v535_v48 = vld [vmem:[%s18502_s4 + $0x58] sm:$0xff] }
0x501d   :  { %v7365_v46 = vsub.f32 %v17534_v57, %v7363_v54  ;;  %v17592_v54 = vpack.c.bf16 %v535_v48, %v534_v44 }
0x501e   :  { %v7362_v10 = vpop.xlane.xlu1 %7361 }
0x501f   :  { %v7364_v58 = vmul.f32 0.03125, %v7362_v10  ;;  %v7367_v25 = vmul.f32 %v7365_v46, %v7365_v46  ;;  %v537_v10 = vld [vmem:[%s18502_s4 + $0x68] sm:$0xff]  ;;  %14743 = vmatprep.subr.bf16.mxu0 %v17592_v54 }
0x5020   :  { %14745 = vmatpush3.bf16.msra.mxu0 %v17592_v54 }
0x5021   :  { %v7366_v40 = vsub.f32 %v17536_v0, %v7364_v58  ;;  %v7369_v61 = vsel %vm838_vm4, %v7367_v25, 0.0  ;;  %v538_v25 = vld [vmem:[%s18502_s4 + $0x70] sm:$0xff] }
0x5022   :  { %7370 = vadd.xlane.f32.xlu1 %v7369_v61 }
0x5023   :  { %v7368_v51 = vmul.f32 %v7366_v40, %v7366_v40 }
0x5025   :  { %v7372_v53 = vsel %vm3445_vm9, %v7368_v51, 0.0  ;;  %v12682_v51 = vld [vmem:[%s18503_s15] ss:$0 sm:$0xff] }
0x5026   :  { %7373 = vadd.xlane.f32.xlu1 %v7372_v53 }
0x50af   :  { %v7371_v17 = vpop.xlane.xlu1 %7370 }
0x50b0   :  { %v7375_v3 = vmul.f32 0.03125, %v7371_v17 }
0x50b2   :  { %v7377_v26 = vadd.f32 1e-05, %v7375_v3 }
0x50b3   :  { %v7374_v11 = vpop.xlane.xlu1 %7373 }
0x50b4   :  { %15368 = vrsqrt.f32 %v7377_v26  ;;  %v7376_v18 = vmul.f32 0.03125, %v7374_v11 }
0x50b6   :  { %v7378_v19 = vadd.f32 1e-05, %v7376_v18 }
0x50b8   :  { %15370 = vrsqrt.f32 %v7378_v19 }
0x50be   :  { %v15369_v21 = vpop.eup %15368 }
0x50bf   :  { %v7381_v8 = vmul.f32 %v15369_v21, %v7365_v46  ;;  %v536_v46 = vld [vmem:[%s18502_s4 + $0x60] sm:$0xff] }
0x50c0   :  { %v17599_v58 = vpack.c.bf16 %v537_v10, %v536_v46 }
0x50c1   :  { %v7389_v31 = vmul.f32 %v12680_v28, %v7381_v8 }
0x50c2   :  { %v15371_v12 = vpop.eup %15370  ;;  %14747 = vmatprep.subr.bf16.mxu0 %v17599_v58 }
0x50c3   :  { %v7382_v34 = vmul.f32 %v15371_v12, %v7366_v40  ;;  %v7397_v35 = vadd.f32 %v12681_v50, %v7389_v31  ;;  %v539_v40 = vld [vmem:[%s18502_s4 + $0x78] sm:$0xff]  ;;  %14749 = vmatpush3.bf16.msra.mxu0 %v17599_v58 }
0x50c4   :  { %v17605_v61 = vpack.c.bf16 %v539_v40, %v538_v25 }
0x50c5   :  { %13956 = vmatprep.mubr.msk.f32.mxu1 %vm838_vm4, %v7397_v35  ;;  %v7390_v2 = vmul.f32 %v12680_v28, %v7382_v34 }
0x50c6   :  { %14751 = vmatprep.subr.bf16.mxu0 %v17605_v61 }
0x50c7   :  { %v7398_v36 = vadd.f32 %v12681_v50, %v7390_v2  ;;  %14753 = vmatpush3.bf16.msra.mxu0 %v17605_v61 }
0x50c9   :  { %13957 = vmatmul.mubr.msk.f32.vlgmr.msra.gmra.mrb[72].mxu1 %vm838_vm4, %v7398_v36 }
0x519c   :  { %v13958_v53 = vpop.f32.mrb[72].mxu1 }
0x519d   :  { %v7483_v4 = vadd.f32 %v13958_v53, %v12682_v51  ;;  %v7477_v9 = vpop.f32.mrb[73].mxu1 }
0x519e   :  { %v7478_v20 = vadd.f32 %v12682_v51, %v7477_v9  ;;  %v601_v9 = vld [vmem:[%s18505_s18 + $0x8] sm:$0xff] }
0x519f   :  { %v7487_v45 = vmul.f32 %v7483_v4, %v7483_v4 }
0x51a0   :  { %v7486_v17 = vmul.f32 %v7478_v20, %v7478_v20 }
0x51a1   :  { %v7489_v3 = vmul.f32 %v7487_v45, %v7483_v4  ;;  %v602_v45 = vld [vmem:[%s18505_s18 + $0x10] sm:$0xff] }
0x51a2   :  { %v7488_v26 = vmul.f32 %v7486_v17, %v7478_v20  ;;  %v603_v17 = vld [vmem:[%s18505_s18 + $0x18] sm:$0xff] }
0x51a3   :  { %v7491_v11 = vmul.f32 0.044715, %v7489_v3  ;;  %v17634_v3 = vpack.c.bf16 %v603_v17, %v602_v45 }
0x51a4   :  { %v7490_v18 = vmul.f32 0.044715, %v7488_v26  ;;  %v596_v26 = vld [vmem:[%s18506_s24] sm:$0xff] }
0x51a5   :  { %v7493_v19 = vadd.f32 %v7491_v11, %v7483_v4  ;;  %v597_v11 = vld [vmem:[%s18506_s24 + $0x8] sm:$0xff] }
0x51a6   :  { %v7492_v21 = vadd.f32 %v7490_v18, %v7478_v20  ;;  %v17640_v18 = vpack.c.bf16 %v597_v11, %v596_v26 }
0x51a7   :  { %v7495_v28 = vmul.f32 0.7978846, %v7493_v19  ;;  %v594_v19 = vld [vmem:[%s18507_s5] sm:$0xff] }
0x51a8   :  { %v7494_v8 = vmul.f32 0.7978846, %v7492_v21  ;;  %v595_v21 = vld [vmem:[%s18507_s5 + $0x8] sm:$0xff] }
0x51a9   :  { %15372 = vtanh.f32 %v7495_v28  ;;  %v17645_v28 = vpack.c.bf16 %v595_v21, %v594_v19 }
0x51aa   :  { %15374 = vtanh.f32 %v7494_v8 }
0x51ab   :  { %14786 = vmatprep.subr.msk.bf16.mxu0 %vm17374_vm11, %v17645_v28 }
0x51b3   :  { %v15373_v50 = vpop.eup %15372 }
0x51b4   :  { %v15375_v31 = vpop.eup %15374  ;;  %v7499_v12 = vadd.f32 1.0, %v15373_v50 }
0x51b5   :  { %v7498_v34 = vadd.f32 1.0, %v15375_v31 }
0x51b6   :  { %v7501_v35 = vmul.f32 0.5, %v7499_v12 }
0x51b7   :  { %v7500_v2 = vmul.f32 0.5, %v7498_v34 }
0x51b8   :  { %v7503_v39 = vmul.f32 %v7501_v35, %v7483_v4  ;;  %v600_v4 = vld [vmem:[%s18505_s18] sm:$0xff] }
0x51b9   :  { %v7502_v36 = vmul.f32 %v7500_v2, %v7478_v20  ;;  %v17628_v20 = vpack.c.bf16 %v601_v9, %v600_v4 }
0x51bb   :  { %13991 = vmatprep.mubr.f32.mxu0 %v7502_v36  ;;  %14755 = vmatprep.subr.bf16.mxu1 %v17628_v20  ;;  %v12686_v36 = vld [vmem:[%s18508_s12] ss:$0 sm:$0xff] }
0x51bc   :  { %13992 = vmatmul.mubr.f32.vlgmr.msra.gmra.mrb[78].mxu0 %v7503_v39  ;;  %14757 = vmatpush3.bf16.msra.mxu1 %v17628_v20 }
0x51bd   :  { %14759 = vmatprep.subr.bf16.mxu1 %v17634_v3  ;;  %14789 = vmatpush3.bf16.xpose.msk.msra.mxu0 %vm17374_vm11, %v17645_v28 }
0x51be   :  { %14802 = vmatprep.subr.msk.bf16.mxu0 %vm17374_vm11, %v17645_v28 }
0x51c0   :  { %14761 = vmatpush3.bf16.msra.mxu1 %v17634_v3 }
0x51c1   :  { %14763 = vmatprep.subr.bf16.mxu1 %v17640_v18 }
0x528f   :  { %v13993_v47 = vpop.f32.mrb[78].mxu0 }
0x5290   :  { %v7582_v55 = vadd.f32 %v13993_v47, %v12685_v41  ;;  %v7576_v56 = vpop.f32.mrb[79].mxu0 }
0x5291   :  { %v7577_v16 = vadd.f32 %v12685_v41, %v7576_v56 }
0x5292   :  { %v17613_v59 = vadd.f32 %v7582_v55, %v17536_v0  ;;  %v12687_v55 = vld [vmem:[%s18509_s29] ss:$0 sm:$0xff] }
0x5293   :  { %v17616_v6 = vadd.f32 %v7577_v16, %v17534_v57 }
0x5294   :  { %v7590_v37 = vsel %vm3445_vm9, %v17613_v59, 0.0 }
0x5295   :  { %7591 = vadd.xlane.f32.xlu1 %v7590_v37  ;;  %v7587_v30 = vsel %vm838_vm4, %v17616_v6, 0.0  ;;  %v598_v37 = vld [vmem:[%s18506_s24 + $0x10] sm:$0xff] }
0x5296   :  { %7588 = vadd.xlane.f32.xlu0 %v7587_v30  ;;  %v599_v30 = vld [vmem:[%s18506_s24 + $0x18] sm:$0xff] }
0x5322   :  { %v7592_v44 = vpop.xlane.xlu1 %7591 }
0x5323   :  { %v7594_v48 = vmul.f32 0.03125, %v7592_v44  ;;  %v7589_v46 = vpop.xlane.xlu0 %7588 }
0x5324   :  { %v7593_v0 = vmul.f32 0.03125, %v7589_v46  ;;  %v17660_v46 = vpack.c.bf16 %v599_v30, %v598_v37 }
0x5325   :  { %v7596_v10 = vsub.f32 %v17613_v59, %v7594_v48 }
0x5326   :  { %v7595_v57 = vsub.f32 %v17616_v6, %v7593_v0  ;;  %v604_v0 = vld [vmem:[%s18510_s23] sm:$0xff] }
0x5327   :  { %v7598_v25 = vmul.f32 %v7596_v10, %v7596_v10 }
0x5328   :  { %v7597_v40 = vmul.f32 %v7595_v57, %v7595_v57 }
0x5329   :  { %v7602_v51 = vsel %vm3445_vm9, %v7598_v25, 0.0  ;;  %v605_v25 = vld [vmem:[%s18510_s23 + $0x8] sm:$0xff] }
0x532a   :  { %7603 = vadd.xlane.f32.xlu1 %v7602_v51  ;;  %v7599_v53 = vsel %vm838_vm4, %v7597_v40, 0.0  ;;  %v607_v40 = vld [vmem:[%s18510_s23 + $0x18] sm:$0xff] }
0x532b   :  { %7600 = vadd.xlane.f32.xlu0 %v7599_v53 }
0x53b7   :  { %v7604_v8 = vpop.xlane.xlu1 %7603 }
0x53b8   :  { %v7606_v50 = vmul.f32 0.03125, %v7604_v8  ;;  %v7601_v31 = vpop.xlane.xlu0 %7600 }
0x53b9   :  { %v7605_v12 = vmul.f32 0.03125, %v7601_v31 }
0x53ba   :  { %v7608_v34 = vadd.f32 1e-05, %v7606_v50 }
0x53bb   :  { %v7607_v35 = vadd.f32 1e-05, %v7605_v12 }
0x53bc   :  { %15376 = vrsqrt.f32 %v7608_v34 }
0x53bd   :  { %15378 = vrsqrt.f32 %v7607_v35 }
0x53c6   :  { %v15377_v2 = vpop.eup %15376 }
0x53c7   :  { %v15379_v39 = vpop.eup %15378  ;;  %v7612_v41 = vmul.f32 %v15377_v2, %v7596_v10  ;;  %v17669_v10 = vpack.c.bf16 %v605_v25, %v604_v0 }
0x53c8   :  { %v7611_v47 = vmul.f32 %v15379_v39, %v7595_v57  ;;  %v606_v57 = vld [vmem:[%s18510_s23 + $0x10] sm:$0xff] }
0x53c9   :  { %v7620_v56 = vmul.f32 %v12686_v36, %v7612_v41  ;;  %v17675_v51 = vpack.c.bf16 %v607_v40, %v606_v57 }
0x53ca   :  { %v7619_v16 = vmul.f32 %v12686_v36, %v7611_v47 }
0x53cb   :  { %v7628_v48 = vadd.f32 %v12687_v55, %v7620_v56 }
0x53cc   :  { %v7627_v44 = vadd.f32 %v12687_v55, %v7619_v16 }
0x53ce   :  { %14002 = vmatprep.mubr.msk.f32.mxu1 %vm838_vm4, %v7627_v44 }
0x53cf   :  { %14003 = vmatmul.mubr.msk.f32.vlgmr.msra.gmra.mrb[74].mxu1 %vm838_vm4, %v7628_v48 }
0x53d0   :  { %14765 = vmatpush3.bf16.msra.mxu1 %v17640_v18  ;;  %14013 = vmatprep.mubr.msk.f32.mxu1 %vm838_vm4, %v7627_v44 }
0x53d1   :  { %14767 = vmatprep.subr.bf16.mxu1 %v17660_v46 }
0x53d4   :  { %14769 = vmatpush3.bf16.msra.mxu1 %v17660_v46 }
0x53d5   :  { %14771 = vmatprep.subr.bf16.mxu1 %v17669_v10 }
0x53d7   :  { %14014 = vmatmul.mubr.msk.f32.vlgmr.msra.gmra.mrb[76].mxu1 %vm838_vm4, %v7628_v48 }
0x53d8   :  { %14773 = vmatpush3.bf16.msra.mxu1 %v17669_v10  ;;  %14024 = vmatprep.mubr.msk.f32.mxu1 %vm838_vm4, %v7627_v44 }
0x53d9   :  { %14775 = vmatprep.subr.bf16.mxu1 %v17675_v51 }
0x53dc   :  { %14777 = vmatpush3.bf16.msra.mxu1 %v17675_v51 }
0x53dd   :  { %14780 = vmatprep.subr.msk.bf16.mxu1 %vm17374_vm11, %v17645_v28 }
0x53df   :  { %14025 = vmatmul.mubr.msk.f32.vlgmr.msra.gmra.mrb[78].mxu1 %vm838_vm4, %v7628_v48 }
0x53e5   :  { %14783 = vmatpush3.bf16.xpose.msk.msra.mxu1 %vm17374_vm11, %v17645_v28 }
0x54a2   :  { %v14004_v53 = vpop.f32.mrb[74].mxu1 }
0x54a3   :  { %v7701_v4 = vpop.f32.mrb[75].mxu1  ;;  %v17691_v45 = vmul.f32 0.5, %v14004_v53 }
0x54a4   :  { %v17689_v9 = vmul.f32 0.5, %v7701_v4 }
0x54a5   :  { %v8033_v44 = vmul.f32 %v17691_v45, %v17691_v45 }
0x54a6   :  { %14031 = vmatprep.mubr.msk.f32.mxu1 %vm6269_vm10, %v17689_v9  ;;  %v8032_v37 = vmul.f32 %v17689_v9, %v17689_v9 }
0x54a7   :  { %14032 = vmatmul.mubr.msk.f32.vlgmr.msra.gmra.mrb[80].mxu1 %vm6269_vm10, %v17691_v45  ;;  %v8037_v48 = vsel %vm6443_vm14, %v8033_v44, 0.0 }
0x54a8   :  { %v8034_v30 = vsel %vm6269_vm10, %v8032_v37, 0.0 }
0x54aa   :  { %v14015_v17 = vpop.f32.mrb[76].mxu1 }
0x54ab   :  { %v7776_v26 = vpop.f32.mrb[77].mxu1  ;;  %v7863_v19 = vmul.f32 0.5, %v14015_v17 }
0x54ac   :  { %v7862_v11 = vmul.f32 0.5, %v7776_v26 }
0x54ad   :  { %v8043_v56 = vmul.f32 %v7863_v19, %v7863_v19 }
0x54ae   :  { %14038 = vmatprep.mubr.msk.f32.mxu0 %vm6269_vm10, %v7862_v11  ;;  %v8042_v21 = vmul.f32 %v7862_v11, %v7862_v11 }
0x54af   :  { %14039 = vmatmul.mubr.msk.f32.vlgmr.msra.gmra.mrb[80].mxu0 %vm6269_vm10, %v7863_v19  ;;  %v8047_v16 = vsel %vm6443_vm14, %v8043_v56, 0.0 }
0x54b0   :  { %v8044_v8 = vsel %vm6269_vm10, %v8042_v21, 0.0  ;;  %14805 = vmatpush3.bf16.xpose.msk.msra.mxu0 %vm17374_vm11, %v17645_v28 }
0x54b1   :  { %8045 = vadd.xlane.f32.xlu1 %v8044_v8 }
0x54b2   :  { %v17703_v50 = vpop.f32.mrb[78].mxu1 }
0x54b3   :  { %v17705_v31 = vpop.f32.mrb[79].mxu1 }
0x54b4   :  { %v15233_v12 = vpack.i.bf16 %v17703_v50, %v17705_v31  ;;  %v14790_v34 = vpack.c.bf16 %v17703_v50, %v17705_v31 }
0x54b6   :  { %14792 = vmatprep.subr.msk.bf16.mxu1 %vm17412_vm13, %v14790_v34 }
0x54b7   :  { %14795 = vmatpush3.bf16.msk.msra.mxu1 %vm17412_vm13, %v14790_v34 }
0x557a   :  { %v17715_v35 = vpop.f32.mrb[80].mxu1 }
0x557b   :  { %v17717_v2 = vpop.f32.mrb[81].mxu1  ;;  %v8057_v25 = vsel %vm6443_vm14, %v17715_v35, -inf }
0x557c   :  { %v8054_v0 = vsel %vm6269_vm10, %v17717_v2, -inf }
0x5582   :  { %v14040_v36 = vpop.f32.mrb[80].mxu0 }
0x5583   :  { %v8073_v39 = vsel %vm6443_vm14, %v14040_v36, -inf  ;;  %v8023_v41 = vpop.f32.mrb[81].mxu0 }
0x5584   :  { %v8072_v47 = vsel %vm6269_vm10, %v8023_v41, -inf }
0x5585   :  { %v8074_v55 = vmax.f32 %v8072_v47, %v8073_v39  ;;  %v8046_v39 = vpop.xlane.xlu1 %8045 }
0x5587   :  { %8075 = vmax.xlane.f32.xlu0 %v8074_v55  ;;  %v8050_v55 = vmul.f32 0.5, %v8046_v39 }
0x558b   :  { %8048 = vadd.xlane.f32.xlu0 %v8047_v16  ;;  %v8070_v16 = vsub.f32 %v8023_v41, %v8050_v55 }
0x558f   :  { %8035 = vadd.xlane.f32.xlu0 %v8034_v30 }
0x5593   :  { %8038 = vadd.xlane.f32.xlu0 %v8037_v48 }
0x5597   :  { %8055 = vmax.xlane.f32.xlu0 %v8054_v0 }
0x559b   :  { %8058 = vmax.xlane.f32.xlu0 %v8057_v25 }
0x55b1   :  { %8396 = vrot.lane.b32.xlu0 %v7862_v11, %s16159_s22 }
0x55b5   :  { %8398 = vrot.lane.b32.xlu0 %v7863_v19, %s16159_s22 }
0x55b9   :  { %8497 = vrot.lane.b32.xlu0 %v8042_v21, %s16159_s22 }
0x5614   :  { %v8076_v57 = vpop.xlane.xlu0 %8075 }
0x5615   :  { %v8077_v40 = vrot.slane %v8076_v57, 4 }
0x5617   :  { %v8078_v53 = vmax.f32 %v8076_v57, %v8077_v40 }
0x5618   :  { %v8049_v34 = vpop.xlane.xlu0 %8048 }
0x5619   :  { %v8079_v4 = vrot.slane %v8078_v53, 2  ;;  %v8051_v47 = vmul.f32 0.5, %v8049_v34 }
0x561b   :  { %v8080_v17 = vmax.f32 %v8078_v53, %v8079_v4  ;;  %v8071_v30 = vsub.f32 %v14040_v36, %v8051_v47 }
0x561d   :  { %v8081_v26 = vrot.slane %v8080_v17, 1 }
0x561f   :  { %v8082_v8 = vmax.f32 %v8080_v17, %v8081_v26 }
0x5621   :  { %15114 = vpush %v8082_v8  ;;  %v8036_v8 = vpop.xlane.xlu0 %8035 }
0x5625   :  { %v8039_v34 = vpop.xlane.xlu0 %8038 }
0x5629   :  { %v8056_v39 = vpop.xlane.xlu0 %8055 }
0x562d   :  { %v8059_v47 = vpop.xlane.xlu0 %8058 }
0x5631   :  { %v8397_v55 = vpop.permute.xlu0 %8396 }
0x5652   :  { %s15115_s25 = spop %15114 }
0x5653   :  { %v8084_v11 = vstv %s15115_s25 }
0x5654   :  { %v8085_v48 = vsub.f32 %v8070_v16, %v8084_v11  ;;  %v8086_v19 = vsub.f32 %v8071_v30, %v8084_v11  ;;  %v8399_v16 = vpop.permute.xlu0 %8398 }
0x5656   :  { %v8087_v0 = vmul.f32 1.442695, %v8085_v48  ;;  %v8089_v21 = vmul.f32 1.442695, %v8086_v19 }
0x5658   :  { %15380 = vpow2.f32 %v8087_v0  ;;  %v8498_v30 = vpop.permute.xlu0 %8497 }
0x5659   :  { %15382 = vpow2.f32 %v8089_v21  ;;  %v8503_v11 = vsel %vm6269_vm10, %v8498_v30, 0.0 }
0x5662   :  { %v15381_v25 = vpop.eup %15380 }
0x5663   :  { %v15383_v57 = vpop.eup %15382  ;;  %v8091_v40 = vadd.f32 0.0001, %v15381_v25 }
0x5664   :  { %v8092_v53 = vadd.f32 0.0001, %v15383_v57 }
0x5665   :  { %v8093_v4 = vmul.f32 0.25, %v8091_v40 }
0x5666   :  { %v8094_v17 = vmul.f32 0.25, %v8092_v53 }
0x5667   :  { %v8211_v26 = vsel %vm6269_vm10, %v8093_v4, 0.0  ;;  %8095 = vxpose.xlu1.b32.start [1/2] (short) (narrow) %v8093_v4, 16 }
0x5668   :  { %v8212_v41 = vsel %vm6443_vm14, %v8094_v17, 0.0 }
0x5669   :  { %v17737_v36 = vadd.f32 %v8212_v41, %v8211_v26  ;;  %v8041_v26 = vmul.f32 0.5, %v8039_v34 }
0x566b   :  { %8096 = vxpose.xlu1.b32.end [2/2] (short) (narrow) %v8094_v17, 16  ;;  %v8053_v41 = vsub.f32 %v17715_v35, %v8041_v26 }
0x5689   :  { %8499 = vrot.lane.b32.xlu1 %v8043_v56, %s16159_s22  ;;  %v8040_v56 = vmul.f32 0.5, %v8036_v8  ;;  %v8061_v8 = vsub.f32 %v8053_v41, %v8059_v47 }
0x568d   :  { %8315 = vrot.lane.b32.xlu1 %v17691_v45, %s16159_s22  ;;  %v8052_v45 = vsub.f32 %v17717_v2, %v8040_v56 }
0x568f   :  { %v8060_v48 = vsub.f32 %v8052_v45, %v8056_v39  ;;  %v8064_v39 = vmul.f32 1.442695, %v8061_v8 }
0x5691   :  { %v8062_v19 = vmul.f32 1.442695, %v8060_v48 }
0x5693   :  { %15384 = vpow2.f32 %v8062_v19 }
0x5694   :  { %15386 = vpow2.f32 %v8064_v39 }
0x569d   :  { %v15385_v0 = vpop.eup %15384 }
0x569e   :  { %v8066_v21 = vadd.f32 0.0001, %v15385_v0  ;;  %v15387_v30 = vpop.eup %15386 }
0x569f   :  { %v8067_v45 = vadd.f32 0.0001, %v15387_v30 }
0x56a0   :  { %v17751_v57 = vmul.f32 0.25, %v8066_v21 }
0x56a1   :  { %v17760_v19 = vmul.f32 0.25, %v8067_v45 }
0x56b1   :  { %8504 = vadd.xlane.f32.xlu1 %v8503_v11 }
0x56c2   :  { %15234 = vrot.lane.b32.xlu1 %v15233_v12, %s16159_s22 }
0x56c6   :  { %8481 = vrot.lane.b32.xlu1 %v8032_v37, %s16159_s22 }
0x56ca   :  { %8483 = vrot.lane.b32.xlu1 %v8033_v44, %s16159_s22 }
0x56e7   :  { %v8111_v25 = vpop.trf.xlu1 }
0x56e8   :  { %14045 = vmatprep.mubr.msk.f32.mxu1 %vm6534_vm15, %v8111_v25 }
0x56eb   :  { %v8112_v40 = vpop.trf.xlu1 }
0x56ec   :  { %14046 = vmatmul.mubr.msk.f32.vlgmr.msra.gmra.mrb[82].mxu1 %vm6534_vm15, %v8112_v40 }
0x56ed   :  { %14052 = vmatprep.mubr.msk.f32.mxu1 %vm6269_vm10, %v17751_v57 }
0x56fb   :  { %v8500_v50 = vpop.permute.xlu1 %8499 }
0x56ff   :  { %v8316_v31 = vpop.permute.xlu1 %8315 }
0x573e   :  { %v8505_v12 = vpop.xlane.xlu1 %8504 }
0x5742   :  { %v15235_v2 = vpop.permute.xlu1 %15234 }
0x5743   :  { %v15237_v37 = vunpack.i.h.bf16 %v15235_v2  ;;  %v15236_v44 = vunpack.i.l.bf16 %v15235_v2 }
0x5745   :  { %v14812_v53 = vpack.c.bf16 %v15237_v37, %v15236_v44 }
0x5746   :  { %v8482_v4 = vpop.permute.xlu1 %8481 }
0x5747   :  { %14814 = vmatprep.subr.msk.bf16.mxu0 %vm17412_vm13, %v14812_v53  ;;  %v8487_v17 = vsel %vm6269_vm10, %v8482_v4, 0.0 }
0x5748   :  { %8488 = vadd.xlane.f32.xlu1 %v8487_v17 }
0x57bf   :  { %v14047_v11 = vpop.f32.mrb[82].mxu1 }
0x57c0   :  { %v8202_v56 = vpop.f32.mrb[83].mxu1 }
0x57c1   :  { %v14796_v48 = vpack.c.bf16 %v14047_v11, %v8202_v56 }
0x57c3   :  { %14797 = vmatprep.subr.bf16.mxu1 %v14796_v48 }
0x57c4   :  { %14799 = vmatpush3.bf16.msra.mxu1 %v14796_v48 }
0x57c5   :  { %14808 = vmatprep.subr.msk.bf16.mxu1 %vm17374_vm11, %v17645_v28 }
0x57c7   :  { %14053 = vmatmul.mubr.msk.f32.vlgmr.msra.gmra.mrb[84].mxu1 %vm6269_vm10, %v17760_v19 }
0x57c8   :  { %14066 = vmatprep.mubr.msk.f32.mxu1 %vm6269_vm10, %v8397_v55  ;;  %v8506_v55 = vsel %vm6443_vm14, %v8500_v50, 0.0  ;;  %v8509_v50 = vmul.f32 0.5, %v8505_v12 }
0x57cd   :  { %14811 = vmatpush3.bf16.xpose.msk.msra.mxu1 %vm17374_vm11, %v17645_v28 }
0x57d4   :  { %14067 = vmatmul.mubr.msk.f32.vlgmr.msra.gmra.mrb[86].mxu1 %vm6269_vm10, %v8399_v16 }
0x589a   :  { %v17772_v35 = vpop.f32.mrb[84].mxu1 }
0x589b   :  { %v17774_v34 = vpop.f32.mrb[85].mxu1 }
0x58a7   :  { %v14068_v47 = vpop.f32.mrb[86].mxu1 }
0x58a8   :  { %v8532_v0 = vsel %vm6443_vm14, %v14068_v47, -inf  ;;  %v8470_v21 = vpop.f32.mrb[87].mxu1 }
0x58a9   :  { %v8531_v25 = vsel %vm6269_vm10, %v8470_v21, -inf  ;;  %v8529_v39 = vsub.f32 %v8470_v21, %v8509_v50  ;;  %v8484_v21 = vpop.permute.xlu1 %8483 }
0x58aa   :  { %v8533_v40 = vmax.f32 %v8531_v25, %v8532_v0 }
0x58ac   :  { %8534 = vmax.xlane.f32.xlu0 %v8533_v40 }
0x58c2   :  { %8313 = vrot.lane.b32.xlu0 %v17689_v9, %s16159_s22 }
0x58e1   :  { %8507 = vadd.xlane.f32.xlu0 %v8506_v55 }
0x5939   :  { %v8535_v2 = vpop.xlane.xlu0 %8534 }
0x593a   :  { %v8536_v16 = vrot.slane %v8535_v2, 4 }
0x593c   :  { %v8537_v37 = vmax.f32 %v8535_v2, %v8536_v16 }
0x593d   :  { %v8314_v44 = vpop.permute.xlu0 %8313 }
0x593e   :  { %v8538_v4 = vrot.slane %v8537_v37, 2  ;;  %14059 = vmatprep.mubr.msk.f32.mxu0 %vm6269_vm10, %v8314_v44 }
0x593f   :  { %14060 = vmatmul.mubr.msk.f32.vlgmr.msra.gmra.mrb[82].mxu0 %vm6269_vm10, %v8316_v31 }
0x5940   :  { %14817 = vmatpush3.bf16.msk.msra.mxu0 %vm17412_vm13, %v14812_v53  ;;  %v8539_v17 = vmax.f32 %v8537_v37, %v8538_v4  ;;  %v8490_v37 = vsel %vm6443_vm14, %v8484_v21, 0.0 }
0x5942   :  { %v8540_v26 = vrot.slane %v8539_v17, 1 }
0x5944   :  { %v8541_v41 = vmax.f32 %v8539_v17, %v8540_v26 }
0x5946   :  { %15116 = vpush %v8541_v41 }
0x596e   :  { %v8508_v9 = vpop.xlane.xlu0 %8507 }
0x596f   :  { %v8510_v8 = vmul.f32 0.5, %v8508_v9 }
0x5971   :  { %v8530_v30 = vsub.f32 %v14068_v47, %v8510_v8  ;;  %v8489_v8 = vpop.xlane.xlu1 %8488 }
0x5977   :  { %s15117_s27 = spop %15116 }
0x5978   :  { %v8543_v11 = vstv %s15117_s27 }
0x5979   :  { %v8544_v56 = vsub.f32 %v8529_v39, %v8543_v11  ;;  %v8545_v45 = vsub.f32 %v8530_v30, %v8543_v11  ;;  %v8493_v39 = vmul.f32 0.5, %v8489_v8 }
0x597b   :  { %v8546_v48 = vmul.f32 1.442695, %v8544_v56  ;;  %v8548_v0 = vmul.f32 1.442695, %v8545_v45 }
0x597d   :  { %15388 = vpow2.f32 %v8546_v48 }
0x597e   :  { %15390 = vpow2.f32 %v8548_v0  ;;  %v8214_v0 = vrot.slane %v17737_v36, 4 }
0x5987   :  { %v15389_v31 = vpop.eup %15388 }
0x5988   :  { %v15391_v25 = vpop.eup %15390  ;;  %v8550_v53 = vadd.f32 0.0001, %v15389_v31 }
0x5989   :  { %v8551_v40 = vadd.f32 0.0001, %v15391_v25 }
0x598a   :  { %v8552_v55 = vmul.f32 0.25, %v8550_v53 }
0x598b   :  { %v8553_v2 = vmul.f32 0.25, %v8551_v40 }
0x598c   :  { %v8675_v16 = vsel %vm6269_vm10, %v8552_v55, 0.0  ;;  %8554 = vxpose.xlu0.b32.start [1/2] (short) (narrow) %v8552_v55, 16 }
0x598d   :  { %v8676_v12 = vsel %vm6443_vm14, %v8553_v2, 0.0 }
0x598e   :  { %v8677_v47 = vadd.f32 %v8676_v12, %v8675_v16  ;;  %v8215_v16 = vadd.f32 %v8214_v0, %v17737_v36 }
0x5990   :  { %8555 = vxpose.xlu0.b32.end [2/2] (short) (narrow) %v8553_v2, 16  ;;  %v8678_v30 = vrot.slane %v8677_v47, 4 }
0x5992   :  { %v8679_v31 = vadd.f32 %v8678_v30, %v8677_v47 }
0x5994   :  { %v8680_v2 = vrot.slane %v8679_v31, 2 }
0x5996   :  { %v8681_v21 = vadd.f32 %v8680_v2, %v8679_v31  ;;  %v592_v2 = vld [vmem:[%s18511_s26 + $0x10] sm:$0xff] }
0x59bd   :  { %8491 = vadd.xlane.f32.xlu0 %v8490_v37  ;;  %v8216_v37 = vrot.slane %v8215_v16, 2 }
0x5a0c   :  { %v8570_v44 = vpop.trf.xlu0 }
0x5a0d   :  { %14073 = vmatprep.mubr.msk.f32.mxu0 %vm6534_vm15, %v8570_v44  ;;  %v8682_v44 = vrot.slane %v8681_v21, 1 }
0x5a0f   :  { %v8683_v8 = vadd.f32 %v8682_v44, %v8681_v21 }
0x5a10   :  { %v8571_v4 = vpop.trf.xlu0 }
0x5a11   :  { %14074 = vmatmul.mubr.msk.f32.vlgmr.msra.gmra.mrb[84].mxu0 %vm6534_vm15, %v8571_v4  ;;  %v8217_v4 = vadd.f32 %v8216_v37, %v8215_v16 }
0x5a12   :  { %v14061_v17 = vpop.f32.mrb[82].mxu0 }
0x5a13   :  { %v8387_v26 = vpop.f32.mrb[83].mxu0  ;;  %v8516_v9 = vsel %vm6443_vm14, %v14061_v17, -inf }
0x5a14   :  { %v8513_v41 = vsel %vm6269_vm10, %v8387_v26, -inf  ;;  %v8511_v11 = vsub.f32 %v8387_v26, %v8493_v39 }
0x5a15   :  { %8514 = vmax.xlane.f32.xlu1 %v8513_v41 }
0x5a19   :  { %8517 = vmax.xlane.f32.xlu1 %v8516_v9 }
0x5a4a   :  { %v8492_v50 = vpop.xlane.xlu0 %8491 }
0x5a4b   :  { %v8494_v56 = vmul.f32 0.5, %v8492_v50  ;;  %v8218_v50 = vrot.slane %v8217_v4, 1 }
0x5a4d   :  { %v8512_v25 = vsub.f32 %v14061_v17, %v8494_v56  ;;  %v8219_v36 = vadd.f32 %v8218_v50, %v8217_v4 }
0x5a4f   :  { %v8302_v31 = vmul.f32 %v8219_v36, %v17760_v19  ;;  %v590_v19 = vld [vmem:[%s18511_s26] sm:$0xff] }
0x5aa2   :  { %v8515_v45 = vpop.xlane.xlu1 %8514 }
0x5aa3   :  { %v8519_v48 = vsub.f32 %v8511_v11, %v8515_v45 }
0x5aa5   :  { %v8521_v53 = vmul.f32 1.442695, %v8519_v48  ;;  %v8301_v48 = vmul.f32 %v8219_v36, %v17751_v57  ;;  %v593_v57 = vld [vmem:[%s18511_s26 + $0x18] sm:$0xff] }
0x5aa6   :  { %v8518_v40 = vpop.xlane.xlu1 %8517  ;;  %v17804_v16 = vpack.c.bf16 %v593_v57, %v592_v2  ;;  %v17834_v2 = vld [vmem:[%s18485_s30 + $0x10] sm:$0x3] }
0x5aa7   :  { %15392 = vpow2.f32 %v8521_v53  ;;  %v8520_v55 = vsub.f32 %v8512_v25, %v8518_v40  ;;  %v8303_v0 = vsel %vm6269_vm10, %v8301_v48, 0.0  ;;  %v8306_v25 = vsel %vm6443_vm14, %v8302_v31, 0.0 }
0x5aa8   :  { %14823 = vmatprep.subr.bf16.mxu0 %v17804_v16 }
0x5aa9   :  { %v8523_v12 = vmul.f32 1.442695, %v8520_v55  ;;  %14825 = vmatpush3.bf16.msra.mxu0 %v17804_v16 }
0x5aab   :  { %15394 = vpow2.f32 %v8523_v12  ;;  %v591_v12 = vld [vmem:[%s18511_s26 + $0x8] sm:$0xff] }
0x5aac   :  { %v17810_v21 = vpack.c.bf16 %v591_v12, %v590_v19 }
0x5aae   :  { %14827 = vmatprep.subr.bf16.mxu0 %v17810_v21 }
0x5ab1   :  { %v15393_v26 = vpop.eup %15392 }
0x5ab2   :  { %v8525_v41 = vadd.f32 0.0001, %v15393_v26 }
0x5ab4   :  { %v8527_v9 = vmul.f32 0.25, %v8525_v41 }
0x5ab5   :  { %v15395_v47 = vpop.eup %15394 }
0x5ab6   :  { %v8526_v17 = vadd.f32 0.0001, %v15395_v47  ;;  %14080 = vmatprep.mubr.msk.f32.mxu1 %vm6269_vm10, %v8527_v9  ;;  %v8765_v39 = vmul.f32 %v8683_v8, %v8527_v9 }
0x5ab8   :  { %v8767_v30 = vsel %vm6269_vm10, %v8765_v39, 0.0  ;;  %v8528_v11 = vmul.f32 0.25, %v8526_v17 }
0x5ab9   :  { %8768 = vadd.xlane.f32.xlu1 %v8767_v30 }
0x5aba   :  { %v8766_v56 = vmul.f32 %v8683_v8, %v8528_v11 }
0x5abc   :  { %v8770_v45 = vsel %vm6443_vm14, %v8766_v56, 0.0 }
0x5abd   :  { %8771 = vadd.xlane.f32.xlu1 %v8770_v45  ;;  %v12724_v45 = vld [vmem:[%s18512_s8] ss:$0 sm:$0xff] }
0x5ac1   :  { %8304 = vadd.xlane.f32.xlu1 %v8303_v0 }
0x5ac5   :  { %8307 = vadd.xlane.f32.xlu1 %v8306_v25 }
0x5ae4   :  { %v14075_v53 = vpop.f32.mrb[84].mxu0 }
0x5ae5   :  { %v8666_v40 = vpop.f32.mrb[85].mxu0 }
0x5ae6   :  { %v14818_v55 = vpack.c.bf16 %v14075_v53, %v8666_v40  ;;  %v17829_v40 = vld [vmem:[%s18485_s30 + $0x8] sm:$0xff]  ;;  %s18516_s30 = sld [smem:[#allocation75_spill]] }
0x5ae8   :  { %14819 = vmatprep.subr.bf16.mxu1 %v14818_v55 }
0x5ae9   :  { %14821 = vmatpush3.bf16.msra.mxu1 %v14818_v55  ;;  %v9211_v55 = vsel %vm9210_vm0, %v17829_v40, 0.0 }
0x5aec   :  { %14081 = vmatmul.mubr.msk.f32.vlgmr.msra.gmra.mrb[88].mxu1 %vm6269_vm10, %v8528_v11 }
0x5b46   :  { %v8769_v37 = vpop.xlane.xlu1 %8768 }
0x5b47   :  { %15396 = vrcp.f32 %v8769_v37 }
0x5b4a   :  { %v8772_v44 = vpop.xlane.xlu1 %8771 }
0x5b4e   :  { %v8305_v4 = vpop.xlane.xlu1 %8304 }
0x5b4f   :  { %15398 = vrcp.f32 %v8305_v4 }
0x5b50   :  { %15400 = vrcp.f32 %v8772_v44 }
0x5b51   :  { %v15397_v41 = vpop.eup %15396 }
0x5b52   :  { %v8308_v26 = vpop.xlane.xlu1 %8307 }
0x5b53   :  { %15402 = vrcp.f32 %v8308_v26 }
0x5b59   :  { %v15399_v8 = vpop.eup %15398 }
0x5b5a   :  { %v15401_v47 = vpop.eup %15400  ;;  %v8310_v30 = vmul.f32 %v15399_v8, %v17774_v34 }
0x5b5d   :  { %v15403_v11 = vpop.eup %15402 }
0x5b5e   :  { %v8312_v36 = vmul.f32 %v15403_v11, %v17772_v35 }
0x5bbf   :  { %v14082_v9 = vpop.f32.mrb[88].mxu1 }
0x5bc0   :  { %v8756_v50 = vpop.f32.mrb[89].mxu1  ;;  %v8776_v39 = vmul.f32 %v15401_v47, %v14082_v9 }
0x5bc1   :  { %v8774_v17 = vmul.f32 %v15397_v41, %v8756_v50 }
0x5bc3   :  { %14087 = vmatprep.mubr.msk.f32.mxu0 %vm6269_vm10, %v8774_v17 }
0x5bc4   :  { %14088 = vmatmul.mubr.msk.f32.vlgmr.msra.gmra.mrb[86].mxu0 %vm6269_vm10, %v8776_v39 }
0x5bc5   :  { %14829 = vmatpush3.bf16.msra.mxu0 %v17810_v21  ;;  %14094 = vmatprep.mubr.msk.f32.mxu0 %vm6269_vm10, %v8310_v30 }
0x5bcc   :  { %14095 = vmatmul.mubr.msk.f32.vlgmr.msra.gmra.mrb[86].mxu0 %vm6269_vm10, %v8312_v36 }
0x5c9f   :  { %v14096_v56 = vpop.f32.mrb[86].mxu0 }
0x5ca0   :  { %v8930_v48 = vpop.f32.mrb[87].mxu0  ;;  %v8940_v0 = vadd.f32 %v14096_v56, %v17613_v59  ;;  %v9215_v59 = vsel %vm9214_vm2, %v17834_v2, 0.0 }
0x5ca1   :  { %v8939_v34 = vadd.f32 %v8930_v48, %v17616_v6  ;;  %v564_v48 = vld [vmem:[%s18514_s28] sm:$0xff] }
0x5ca2   :  { %v8948_v25 = vadd.f32 %v12724_v45, %v8940_v0  ;;  %v565_v0 = vld [vmem:[%s18514_s28 + $0x8] sm:$0xff] }
0x5ca3   :  { %v17823_v31 = vadd.f32 %v12724_v45, %v8939_v34  ;;  %v17847_v34 = vpack.c.bf16 %v565_v0, %v564_v48  ;;  %v12725_v0 = vld [vmem:[%s18516_s30] ss:$0 sm:$0xff] }
0x5ca4   :  { %v8952_v35 = vsel %vm3445_vm9, %v8948_v25, 0.0 }
0x5ca5   :  { %18513 = vst [vmem:[#allocation100_spill] sm:$0xff] %v17823_v31  ;;  %v8949_v53 = vsel %vm838_vm4, %v17823_v31, 0.0  ;;  %14831 = vmatprep.subr.bf16.mxu1 %v17847_v34 }
0x5ca6   :  { %8950 = vadd.xlane.f32.xlu1 %v8949_v53  ;;  %14833 = vmatpush3.bf16.msra.mxu1 %v17847_v34  ;;  %v567_v53 = vld [vmem:[%s18514_s28 + $0x18] sm:$0xff] }
0x5caa   :  { %8953 = vadd.xlane.f32.xlu1 %v8952_v35 }
0x5cae   :  { %9212 = vadd.xlane.f32.xlu1 %v9211_v55  ;;  %v569_v55 = vld [vmem:[%s18515_s1] sm:$0xff] }
0x5cb2   :  { %9216 = vadd.xlane.f32.xlu1 %v9215_v59  ;;  %v570_v59 = vld [vmem:[%s18515_s1 + $0x8] sm:$0xff] }
0x5d33   :  { %v8951_v6 = vpop.xlane.xlu1 %8950 }
0x5d34   :  { %v8955_v57 = vmul.f32 0.03125, %v8951_v6  ;;  %v571_v6 = vld [vmem:[%s18515_s1 + $0x10] sm:$0xff] }
0x5d36   :  { %v8957_v19 = vsub.f32 %v17823_v31, %v8955_v57  ;;  %v17861_v57 = vpack.c.bf16 %v570_v59, %v569_v55 }
0x5d37   :  { %v8954_v12 = vpop.xlane.xlu1 %8953 }
0x5d38   :  { %v8956_v37 = vmul.f32 0.03125, %v8954_v12  ;;  %v8959_v44 = vmul.f32 %v8957_v19, %v8957_v19  ;;  %v572_v12 = vld [vmem:[%s18515_s1 + $0x18] sm:$0xff]  ;;  %14839 = vmatprep.subr.bf16.mxu0 %v17861_v57 }
0x5d39   :  { %14841 = vmatpush3.bf16.msra.mxu0 %v17861_v57 }
0x5d3a   :  { %v8958_v4 = vsub.f32 %v8948_v25, %v8956_v37  ;;  %v8961_v26 = vsel %vm838_vm4, %v8959_v44, 0.0  ;;  %v566_v25 = vld [vmem:[%s18514_s28 + $0x10] sm:$0xff]  ;;  %v17864_v37 = vpack.c.bf16 %v572_v12, %v571_v6 }
0x5d3b   :  { %8962 = vadd.xlane.f32.xlu1 %v8961_v26  ;;  %v9213_v41 = vpop.xlane.xlu1 %9212  ;;  %v17853_v35 = vpack.c.bf16 %v567_v53, %v566_v25  ;;  %v12726_v53 = vld [vmem:[%s18517_s0] ss:$0 sm:$0xff] }
0x5d3c   :  { %v9218_v9 = vmul.f32 0.03125, %v9213_v41  ;;  %v8960_v8 = vmul.f32 %v8958_v4, %v8958_v4  ;;  %14843 = vmatprep.subr.bf16.mxu0 %v17864_v37 }
0x5d3d   :  { %14835 = vmatprep.subr.bf16.mxu1 %v17853_v35  ;;  %14845 = vmatpush3.bf16.msra.mxu0 %v17864_v37 }
0x5d3e   :  { %v9220_v50 = vsub.f32 %v17829_v40, %v9218_v9  ;;  %v8964_v47 = vsel %vm3445_vm9, %v8960_v8, 0.0  ;;  %14837 = vmatpush3.bf16.msra.mxu1 %v17853_v35 }
0x5d3f   :  { %8965 = vadd.xlane.f32.xlu0 %v8964_v47  ;;  %v9217_v17 = vpop.xlane.xlu1 %9216  ;;  %14871 = vmatprep.subr.bf16.mxu1 %v17325_v49 }
0x5d40   :  { %v9219_v39 = vmul.f32 0.03125, %v9217_v17  ;;  %v9222_v30 = vmul.f32 %v9220_v50, %v9220_v50 }
0x5d42   :  { %v9221_v11 = vsub.f32 %v17834_v2, %v9219_v39  ;;  %v9224_v36 = vsel %vm9210_vm0, %v9222_v30, 0.0 }
0x5d43   :  { %9225 = vadd.xlane.f32.xlu1 %v9224_v36 }
0x5d44   :  { %v9223_v56 = vmul.f32 %v9221_v11, %v9221_v11 }
0x5d46   :  { %v9227_v45 = vsel %vm9214_vm2, %v9223_v56, 0.0 }
0x5d47   :  { %9228 = vadd.xlane.f32.xlu0 %v9227_v45 }
0x5dc8   :  { %v8963_v44 = vpop.xlane.xlu1 %8962 }
0x5dc9   :  { %v8967_v26 = vmul.f32 0.03125, %v8963_v44 }
0x5dcb   :  { %v8969_v41 = vadd.f32 1e-05, %v8967_v26 }
0x5dcc   :  { %v8966_v9 = vpop.xlane.xlu0 %8965 }
0x5dcd   :  { %15404 = vrsqrt.f32 %v8969_v41  ;;  %v8968_v8 = vmul.f32 0.03125, %v8966_v9 }
0x5dcf   :  { %v8970_v47 = vadd.f32 1e-05, %v8968_v8  ;;  %v15519_v8 = vld [vmem:[%s18487_s9] ss:$0 sm:$0xff]  ;;  %s18519_s9 = sld [smem:[#allocation68_spill]] }
0x5dd0   :  { %v9226_v17 = vpop.xlane.xlu1 %9225 }
0x5dd1   :  { %15406 = vrsqrt.f32 %v8970_v47  ;;  %v9230_v39 = vmul.f32 0.03125, %v9226_v17 }
0x5dd3   :  { %v9232_v30 = vadd.f32 1e-05, %v9230_v39 }
0x5dd4   :  { %v9229_v36 = vpop.xlane.xlu0 %9228 }
0x5dd5   :  { %15408 = vrsqrt.f32 %v9232_v30  ;;  %v9231_v56 = vmul.f32 0.03125, %v9229_v36  ;;  %v15520_v30 = vld [vmem:[%s18488_s19] ss:$0 sm:$0xff] }
0x5dd7   :  { %v15405_v45 = vpop.eup %15404  ;;  %v9233_v48 = vadd.f32 1e-05, %v9231_v56 }
0x5dd8   :  { %v8973_v25 = vmul.f32 %v15405_v45, %v8957_v19 }
0x5dd9   :  { %15410 = vrsqrt.f32 %v9233_v48  ;;  %v578_v48 = vld [vmem:[%s18515_s1 + $0x48] sm:$0xff] }
0x5dda   :  { %v8981_v55 = vmul.f32 %v12725_v0, %v8973_v25  ;;  %v579_v25 = vld [vmem:[%s18515_s1 + $0x50] sm:$0xff] }
0x5ddb   :  { %v15407_v59 = vpop.eup %15406 }
0x5ddc   :  { %v8974_v6 = vmul.f32 %v15407_v59, %v8958_v4  ;;  %v8989_v12 = vadd.f32 %v12726_v53, %v8981_v55  ;;  %v581_v59 = vld [vmem:[%s18515_s1 + $0x60] sm:$0xff] }
0x5dde   :  { %14105 = vmatprep.mubr.msk.f32.mxu1 %vm838_vm4, %v8989_v12  ;;  %v8982_v44 = vmul.f32 %v12725_v0, %v8974_v6  ;;  %v582_v6 = vld [vmem:[%s18515_s1 + $0x68] sm:$0xff] }
0x5ddf   :  { %v15409_v26 = vpop.eup %15408  ;;  %v17926_v12 = vpack.c.bf16 %v582_v6, %v581_v59 }
0x5de0   :  { %v8990_v41 = vadd.f32 %v12726_v53, %v8982_v44  ;;  %v9236_v9 = vmul.f32 %v15409_v26, %v9220_v50  ;;  %v580_v53 = vld [vmem:[%s18515_s1 + $0x58] sm:$0xff]  ;;  %v583_v44 = vld [vmem:[%s18515_s1 + $0x70] sm:$0xff] }
0x5de1   :  { %v17920_v55 = vpack.c.bf16 %v580_v53, %v579_v25  ;;  %18521 = vst [vmem:[#allocation103_spill] sm:$0xff] %v17926_v12  ;;  %v584_v26 = vld [vmem:[%s18515_s1 + $0x78] sm:$0xff] }
0x5de2   :  { %14106 = vmatmul.mubr.msk.f32.vlgmr.msra.gmra.mrb[90].mxu1 %vm838_vm4, %v8990_v41  ;;  %v9238_v47 = vmul.f32 %v15519_v8, %v9236_v9  ;;  %v17932_v41 = vpack.c.bf16 %v584_v26, %v583_v44  ;;  %v12727_v9 = vld [vmem:[%s18519_s9] ss:$0 sm:$0xff] }
0x5de3   :  { %v15411_v17 = vpop.eup %15410  ;;  %14873 = vmatpush3.bf16.msra.mxu1 %v17325_v49  ;;  %v573_v49 = vld [vmem:[%s18515_s1 + $0x20] sm:$0xff]  ;;  %18520 = vst [vmem:[#allocation102_spill] sm:$0xff] %v17920_v55 }
0x5de4   :  { %v9237_v19 = vmul.f32 %v15411_v17, %v9221_v11  ;;  %14875 = vmatprep.subr.bf16.mxu1 %v17331_v15  ;;  %v9240_v4 = vadd.f32 %v15520_v30, %v9238_v47  ;;  %v577_v11 = vld [vmem:[%s18515_s1 + $0x40] sm:$0xff]  ;;  %18522 = vst [vmem:[#allocation104_spill] sm:$0xff] %v17932_v41 }
0x5de5   :  { %v17914_v0 = vpack.c.bf16 %v578_v48, %v577_v11 }
0x5de6   :  { %v9239_v39 = vmul.f32 %v15519_v8, %v9237_v19  ;;  %v9245_v50 = vrot.slane %v9240_v4, 1 }
0x5de7   :  { %14877 = vmatpush3.bf16.msra.mxu1 %v17331_v15  ;;  %v574_v15 = vld [vmem:[%s18515_s1 + $0x28] sm:$0xff]  ;;  %18518 = vst [vmem:[#allocation101_spill] sm:$0xff] %v17914_v0 }
0x5de8   :  { %v9241_v36 = vadd.f32 %v15520_v30, %v9239_v39  ;;  %14879 = vmatprep.subr.bf16.mxu1 %v17339_v32 }
0x5dea   :  { %v9246_v56 = vrot.slane %v9241_v36, 1 }
0x5dec   :  { %v9247_v45 = vsel %vm9244_vm5, %v9245_v50, %v9246_v56 }
0x5ded   :  { %14151 = vmatprep.mubr.msk.f32.mxu1 %vm838_vm4, %v9247_v45 }
0x5dee   :  { %14152 = vmatmul.mubr.msk.f32.vlgmr.msra.gmra.mrb[92].mxu1 %vm838_vm4, %v9246_v56 }
0x5def   :  { %14881 = vmatpush3.bf16.msra.mxu1 %v17339_v32  ;;  %14162 = vmatprep.mubr.msk.f32.mxu1 %vm838_vm4, %v9247_v45  ;;  %v17902_v32 = vpack.c.bf16 %v574_v15, %v573_v49 }
0x5df0   :  { %14883 = vmatprep.subr.bf16.mxu1 %v17346_v38 }
0x5df1   :  { %14847 = vmatprep.subr.bf16.mxu0 %v17902_v32 }
0x5df2   :  { %14849 = vmatpush3.bf16.msra.mxu0 %v17902_v32 }
0x5df3   :  { %14885 = vmatpush3.bf16.msra.mxu1 %v17346_v38  ;;  %v575_v38 = vld [vmem:[%s18515_s1 + $0x30] sm:$0xff] }
0x5df4   :  { %14887 = vmatprep.subr.bf16.mxu1 %v17354_v13 }
0x5df6   :  { %14163 = vmatmul.mubr.msk.f32.vlgmr.msra.gmra.mrb[94].mxu1 %vm838_vm4, %v9246_v56 }
0x5df7   :  { %14889 = vmatpush3.bf16.msra.mxu1 %v17354_v13  ;;  %14173 = vmatprep.mubr.msk.f32.mxu1 %vm838_vm4, %v9247_v45  ;;  %v576_v13 = vld [vmem:[%s18515_s1 + $0x38] sm:$0xff] }
0x5df8   :  { %14891 = vmatprep.subr.bf16.mxu1 %v17360_v42 }
0x5dfb   :  { %14893 = vmatpush3.bf16.msra.mxu1 %v17360_v42  ;;  %v17908_v42 = vpack.c.bf16 %v576_v13, %v575_v38 }
0x5dfc   :  { %14896 = vmatprep.subr.msk.bf16.mxu1 %vm17374_vm11, %v17370_v52 }
0x5dfd   :  { %14851 = vmatprep.subr.bf16.mxu0 %v17908_v42 }
0x5dfe   :  { %14174 = vmatmul.mubr.msk.f32.vlgmr.msra.gmra.mrb[96].mxu1 %vm838_vm4, %v9246_v56  ;;  %14853 = vmatpush3.bf16.msra.mxu0 %v17908_v42 }
0x5dff   :  { %14855 = vmatprep.subr.bf16.mxu0 %v17914_v0 }
0x5e02   :  { %14857 = vmatpush3.bf16.msra.mxu0 %v17914_v0 }
0x5e03   :  { %14859 = vmatprep.subr.bf16.mxu0 %v17920_v55 }
0x5e04   :  { %14899 = vmatpush3.bf16.xpose.msk.msra.mxu1 %vm17374_vm11, %v17370_v52 }
0x5e06   :  { %14861 = vmatpush3.bf16.msra.mxu0 %v17920_v55 }
0x5e07   :  { %14863 = vmatprep.subr.bf16.mxu0 %v17926_v12 }
0x5e0a   :  { %14865 = vmatpush3.bf16.msra.mxu0 %v17926_v12 }
0x5e0b   :  { %14867 = vmatprep.subr.bf16.mxu0 %v17932_v41 }
0x5e0e   :  { %14869 = vmatpush3.bf16.msra.mxu0 %v17932_v41 }
0x5e0f   :  { %14902 = vmatprep.subr.msk.bf16.mxu0 %vm17374_vm11, %v17370_v52 }
0x5eb5   :  { %v14107_v8 = vpop.f32.mrb[90].mxu1 }
0x5eb6   :  { %v9075_v47 = vadd.f32 %v14107_v8, %v12727_v9  ;;  %v9069_v17 = vpop.f32.mrb[91].mxu1 }
0x5eb7   :  { %v9070_v19 = vadd.f32 %v12727_v9, %v9069_v17 }
0x5eb8   :  { %v9079_v39 = vmul.f32 %v9075_v47, %v9075_v47 }
0x5eb9   :  { %v9078_v30 = vmul.f32 %v9070_v19, %v9070_v19 }
0x5eba   :  { %v9081_v4 = vmul.f32 %v9079_v39, %v9075_v47 }
0x5ebb   :  { %v9080_v36 = vmul.f32 %v9078_v30, %v9070_v19 }
0x5ebc   :  { %v9083_v50 = vmul.f32 0.044715, %v9081_v4 }
0x5ebd   :  { %v9082_v56 = vmul.f32 0.044715, %v9080_v36 }
0x5ebe   :  { %v9085_v45 = vadd.f32 %v9083_v50, %v9075_v47 }
0x5ebf   :  { %v9084_v49 = vadd.f32 %v9082_v56, %v9070_v19 }
0x5ec0   :  { %v9087_v15 = vmul.f32 0.7978846, %v9085_v45 }
0x5ec1   :  { %v9086_v38 = vmul.f32 0.7978846, %v9084_v49  ;;  %v14153_v13 = vpop.f32.mrb[92].mxu1 }
0x5ec2   :  { %15412 = vtanh.f32 %v9087_v15  ;;  %v9318_v11 = vpop.f32.mrb[93].mxu1  ;;  %v17942_v25 = vmul.f32 0.5, %v14153_v13 }
0x5ec3   :  { %v17940_v48 = vmul.f32 0.5, %v9318_v11  ;;  %15414 = vtanh.f32 %v9086_v38 }
0x5ec5   :  { %14180 = vmatprep.mubr.msk.f32.mxu1 %vm6269_vm10, %v17940_v48 }
0x5ec6   :  { %14181 = vmatmul.mubr.msk.f32.vlgmr.msra.gmra.mrb[98].mxu1 %vm6269_vm10, %v17942_v25 }
0x5ec9   :  { %v14164_v53 = vpop.f32.mrb[94].mxu1 }
0x5eca   :  { %v9393_v59 = vpop.f32.mrb[95].mxu1 }
0x5ecb   :  { %v9479_v6 = vmul.f32 0.5, %v9393_v59 }
0x5ecc   :  { %v15413_v44 = vpop.eup %15412 }
0x5ecd   :  { %v15415_v26 = vpop.eup %15414  ;;  %v9653_v9 = vmul.f32 %v9479_v6, %v9479_v6  ;;  %v9091_v8 = vadd.f32 1.0, %v15413_v44 }
0x5ece   :  { %v9090_v17 = vadd.f32 1.0, %v15415_v26 }
0x5ecf   :  { %v9655_v39 = vsel %vm6269_vm10, %v9653_v9, 0.0  ;;  %v9093_v30 = vmul.f32 0.5, %v9091_v8 }
0x5ed0   :  { %9656 = vadd.xlane.f32.xlu0 %v9655_v39  ;;  %v9092_v4 = vmul.f32 0.5, %v9090_v17 }
0x5ed1   :  { %v17949_v36 = vpop.f32.mrb[96].mxu1  ;;  %v9095_v15 = vmul.f32 %v9093_v30, %v9075_v47  ;;  %v17981_v30 = vmul.f32 %v17940_v48, %v17940_v48 }
0x5ed2   :  { %v17951_v50 = vpop.f32.mrb[97].mxu1  ;;  %v9094_v56 = vmul.f32 %v9092_v4, %v9070_v19  ;;  %v9480_v19 = vmul.f32 0.5, %v14164_v53 }
0x5ed3   :  { %v14906_v49 = vpack.c.bf16 %v17949_v36, %v17951_v50  ;;  %v9645_v4 = vsel %vm6269_vm10, %v17981_v30, 0.0 }
0x5ed4   :  { %14140 = vmatprep.mubr.f32.mxu0 %v9094_v56  ;;  %v9654_v53 = vmul.f32 %v9480_v19, %v9480_v19  ;;  %v17987_v56 = vmul.f32 %v17942_v25, %v17942_v25 }
0x5ed5   :  { %14908 = vmatprep.subr.msk.bf16.mxu1 %vm17412_vm13, %v14906_v49  ;;  %14141 = vmatmul.mubr.f32.vlgmr.msra.gmra.mrb[88].mxu0 %v9095_v15 }
0x5ed6   :  { %14905 = vmatpush3.bf16.xpose.msk.msra.mxu0 %vm17374_vm11, %v17370_v52  ;;  %14911 = vmatpush3.bf16.msk.msra.mxu1 %vm17412_vm13, %v14906_v49  ;;  %v9658_v39 = vsel %vm6443_vm14, %v9654_v53, 0.0  ;;  %v9648_v49 = vsel %vm6443_vm14, %v17987_v56, 0.0 }
0x5ed7   :  { %14187 = vmatprep.mubr.msk.f32.mxu0 %vm6269_vm10, %v9479_v6  ;;  %14918 = vmatprep.subr.msk.bf16.mxu0 %vm17374_vm11, %v17370_v52 }
0x5edd   :  { %14188 = vmatmul.mubr.msk.f32.vlgmr.msra.gmra.mrb[90].mxu0 %vm6269_vm10, %v9480_v19 }
0x5ede   :  { %14921 = vmatpush3.bf16.xpose.msk.msra.mxu0 %vm17374_vm11, %v17370_v52 }
0x5f5d   :  { %v9657_v41 = vpop.xlane.xlu0 %9656 }
0x5f5e   :  { %v9661_v12 = vmul.f32 0.5, %v9657_v41 }
0x5f99   :  { %v14182_v47 = vpop.f32.mrb[98].mxu1 }
0x5f9a   :  { %v17972_v38 = vpop.f32.mrb[99].mxu1 }
0x5f9b   :  { %v9665_v15 = vsel %vm6269_vm10, %v17972_v38, -inf }
0x5fa8   :  { %v14142_v13 = vpop.f32.mrb[88].mxu0 }
0x5fa9   :  { %v17974_v11 = vpop.f32.mrb[89].mxu0  ;;  %v9668_v13 = vsel %vm6443_vm14, %v14182_v47, -inf }
0x5faa   :  { %18523 = vst [vmem:[#allocation105_spill] sm:$0xff] %v17974_v11 }
0x5fb0   :  { %v14189_v59 = vpop.f32.mrb[90].mxu0 }
0x5fb1   :  { %v9684_v44 = vsel %vm6443_vm14, %v14189_v59, -inf  ;;  %v9634_v26 = vpop.f32.mrb[91].mxu0 }
0x5fb2   :  { %v9683_v8 = vsel %vm6269_vm10, %v9634_v26, -inf }
0x5fb3   :  { %v9685_v17 = vmax.f32 %v9683_v8, %v9684_v44 }
0x5fb5   :  { %9686 = vmax.xlane.f32.xlu1 %v9685_v17 }
0x5fb9   :  { %9659 = vadd.xlane.f32.xlu1 %v9658_v39 }
0x5fbd   :  { %9646 = vadd.xlane.f32.xlu1 %v9645_v4 }
0x5fc1   :  { %9649 = vadd.xlane.f32.xlu1 %v9648_v49 }
0x5fc5   :  { %9666 = vmax.xlane.f32.xlu1 %v9665_v15 }
0x5fc9   :  { %9669 = vmax.xlane.f32.xlu1 %v9668_v13 }
0x5fda   :  { %10007 = vrot.lane.b32.xlu1 %v9479_v6, %s16159_s22 }
0x5fde   :  { %10009 = vrot.lane.b32.xlu1 %v9480_v19, %s16159_s22 }
0x5fe2   :  { %10108 = vrot.lane.b32.xlu1 %v9653_v9, %s16159_s22  ;;  %v9681_v9 = vsub.f32 %v9634_v26, %v9661_v12 }
0x6042   :  { %v9687_v44 = vpop.xlane.xlu1 %9686 }
0x6043   :  { %v9688_v8 = vrot.slane %v9687_v44, 4 }
0x6045   :  { %v9689_v17 = vmax.f32 %v9687_v44, %v9688_v8 }
0x6046   :  { %v9660_v39 = vpop.xlane.xlu1 %9659 }
0x6047   :  { %v9690_v4 = vrot.slane %v9689_v17, 2  ;;  %v9662_v19 = vmul.f32 0.5, %v9660_v39  ;;  %v18524_v39 = vpack.i.bf16 %v17949_v36, %v17951_v50 }
0x6049   :  { %v9691_v62 = vmax.f32 %v9689_v17, %v9690_v4  ;;  %v9682_v55 = vsub.f32 %v14189_v59, %v9662_v19 }
0x604a   :  { %v9647_v49 = vpop.xlane.xlu1 %9646 }
0x604b   :  { %v9692_v45 = vrot.slane %v9691_v62, 1  ;;  %v9651_v26 = vmul.f32 0.5, %v9647_v49 }
0x604d   :  { %v9693_v43 = vmax.f32 %v9691_v62, %v9692_v45  ;;  %v9663_v19 = vsub.f32 %v17972_v38, %v9651_v26 }
0x604e   :  { %v9650_v63 = vpop.xlane.xlu1 %9649 }
0x604f   :  { %v9652_v15 = vmul.f32 0.5, %v9650_v63  ;;  %15118 = vpush %v9693_v43 }
0x6051   :  { %v9664_v31 = vsub.f32 %v14182_v47, %v9652_v15 }
0x6052   :  { %v9667_v13 = vpop.xlane.xlu1 %9666 }
0x6056   :  { %v9670_v11 = vpop.xlane.xlu1 %9669 }
0x6057   :  { %v9672_v6 = vsub.f32 %v9664_v31, %v9670_v11 }
0x6080   :  { %s15119_s19 = spop %15118 }
0x6081   :  { %v9695_v44 = vstv %s15119_s19 }
0x6082   :  { %v9696_v8 = vsub.f32 %v9681_v9, %v9695_v44  ;;  %v9697_v0 = vsub.f32 %v9682_v55, %v9695_v44 }
0x6084   :  { %v9698_v17 = vmul.f32 1.442695, %v9696_v8  ;;  %v9700_v4 = vmul.f32 1.442695, %v9697_v0  ;;  %v10008_v0 = vpop.permute.xlu1 %10007 }
0x6086   :  { %15416 = vpow2.f32 %v9698_v17 }
0x6087   :  { %15418 = vpow2.f32 %v9700_v4 }
0x6088   :  { %v10010_v55 = vpop.permute.xlu1 %10009 }
0x608c   :  { %v10109_v11 = vpop.permute.xlu1 %10108 }
0x608d   :  { %v10114_v59 = vsel %vm6269_vm10, %v10109_v11, 0.0 }
0x6090   :  { %v15417_v62 = vpop.eup %15416 }
0x6091   :  { %v15419_v63 = vpop.eup %15418  ;;  %v9702_v43 = vadd.f32 0.0001, %v15417_v62 }
0x6092   :  { %v9703_v45 = vadd.f32 0.0001, %v15419_v63 }
0x6093   :  { %v9704_v47 = vmul.f32 0.25, %v9702_v43 }
0x6094   :  { %v9705_v15 = vmul.f32 0.25, %v9703_v45 }
0x6095   :  { %v9822_v31 = vsel %vm6269_vm10, %v9704_v47, 0.0  ;;  %9706 = vxpose.xlu0.b32.start [1/2] (short) (narrow) %v9704_v47, 16  ;;  %v9675_v47 = vmul.f32 1.442695, %v9672_v6 }
0x6096   :  { %v9823_v12 = vsel %vm6443_vm14, %v9705_v15, 0.0 }
0x6097   :  { %v17999_v41 = vadd.f32 %v9823_v12, %v9822_v31 }
0x6099   :  { %9707 = vxpose.xlu0.b32.end [2/2] (short) (narrow) %v9705_v15, 16 }
0x60c2   :  { %10110 = vrot.lane.b32.xlu0 %v9654_v53, %s16159_s22  ;;  %v9671_v53 = vsub.f32 %v9663_v19, %v9667_v13 }
0x60c6   :  { %9926 = vrot.lane.b32.xlu0 %v17942_v25, %s16159_s22  ;;  %v9673_v25 = vmul.f32 1.442695, %v9671_v53 }
0x60c8   :  { %15420 = vpow2.f32 %v9673_v25 }
0x60c9   :  { %15422 = vpow2.f32 %v9675_v47 }
0x60d2   :  { %v15421_v9 = vpop.eup %15420 }
0x60d3   :  { %v9677_v44 = vadd.f32 0.0001, %v15421_v9  ;;  %v15423_v15 = vpop.eup %15422 }
0x60d4   :  { %v9678_v11 = vadd.f32 0.0001, %v15423_v15 }
0x60d5   :  { %v18015_v49 = vmul.f32 0.25, %v9677_v44 }
0x60d6   :  { %v18024_v26 = vmul.f32 0.25, %v9678_v11 }
0x60e5   :  { %10115 = vadd.xlane.f32.xlu0 %v10114_v59 }
0x60fb   :  { %15239 = vrot.lane.b32.xlu0 %v18524_v39, %s16159_s22 }
0x60ff   :  { %10092 = vrot.lane.b32.xlu0 %v17981_v30, %s16159_s22 }
0x6103   :  { %10094 = vrot.lane.b32.xlu0 %v17987_v56, %s16159_s22 }
0x6115   :  { %v9722_v8 = vpop.trf.xlu0 }
0x6116   :  { %14194 = vmatprep.mubr.msk.f32.mxu1 %vm6534_vm15, %v9722_v8 }
0x6119   :  { %v9723_v36 = vpop.trf.xlu0 }
0x611a   :  { %14195 = vmatmul.mubr.msk.f32.vlgmr.msra.gmra.mrb[100].mxu1 %vm6534_vm15, %v9723_v36 }
0x611b   :  { %14201 = vmatprep.mubr.msk.f32.mxu1 %vm6269_vm10, %v18015_v49 }
0x6134   :  { %v10111_v50 = vpop.permute.xlu0 %10110 }
0x6138   :  { %v9927_v38 = vpop.permute.xlu0 %9926 }
0x6172   :  { %v10116_v30 = vpop.xlane.xlu0 %10115 }
0x6173   :  { %v10120_v19 = vmul.f32 0.5, %v10116_v30 }
0x6176   :  { %v15240_v13 = vpop.permute.xlu0 %15239 }
0x6177   :  { %v15242_v56 = vunpack.i.h.bf16 %v15240_v13  ;;  %v15241_v17 = vunpack.i.l.bf16 %v15240_v13 }
0x6179   :  { %v14928_v4 = vpack.c.bf16 %v15242_v56, %v15241_v17 }
0x617a   :  { %v10093_v62 = vpop.permute.xlu0 %10092 }
0x617b   :  { %v10098_v63 = vsel %vm6269_vm10, %v10093_v62, 0.0  ;;  %14930 = vmatprep.subr.msk.bf16.mxu0 %vm17412_vm13, %v14928_v4 }
0x617c   :  { %10099 = vadd.xlane.f32.xlu0 %v10098_v63 }
0x617e   :  { %v10095_v43 = vpop.permute.xlu0 %10094 }
0x617f   :  { %v10101_v45 = vsel %vm6443_vm14, %v10095_v43, 0.0 }
0x6180   :  { %10102 = vadd.xlane.f32.xlu0 %v10101_v45 }
0x61ed   :  { %v14196_v31 = vpop.f32.mrb[100].mxu1 }
0x61ee   :  { %v9813_v12 = vpop.f32.mrb[101].mxu1 }
0x61ef   :  { %v14912_v59 = vpack.c.bf16 %v14196_v31, %v9813_v12 }
0x61f1   :  { %14913 = vmatprep.subr.bf16.mxu1 %v14912_v59 }
0x61f2   :  { %14915 = vmatpush3.bf16.msra.mxu1 %v14912_v59 }
0x61f3   :  { %14924 = vmatprep.subr.msk.bf16.mxu1 %vm17374_vm11, %v17370_v52 }
0x61f5   :  { %14202 = vmatmul.mubr.msk.f32.vlgmr.msra.gmra.mrb[102].mxu1 %vm6269_vm10, %v18024_v26 }
0x61f6   :  { %14215 = vmatprep.mubr.msk.f32.mxu1 %vm6269_vm10, %v10008_v0 }
0x61fb   :  { %14927 = vmatpush3.bf16.xpose.msk.msra.mxu1 %vm17374_vm11, %v17370_v52  ;;  %v10117_v52 = vsel %vm6443_vm14, %v10111_v50, 0.0 }
0x6202   :  { %14216 = vmatmul.mubr.msk.f32.vlgmr.msra.gmra.mrb[104].mxu1 %vm6269_vm10, %v10010_v55 }
0x62c8   :  { %v18036_v6 = vpop.f32.mrb[102].mxu1 }
0x62c9   :  { %v18038_v39 = vpop.f32.mrb[103].mxu1 }
0x62d5   :  { %v14217_v53 = vpop.f32.mrb[104].mxu1 }
0x62d6   :  { %v10143_v25 = vsel %vm6443_vm14, %v14217_v53, -inf  ;;  %v10081_v9 = vpop.f32.mrb[105].mxu1 }
0x62d7   :  { %v10140_v44 = vsub.f32 %v10081_v9, %v10120_v19  ;;  %v10142_v8 = vsel %vm6269_vm10, %v10081_v9, -inf }
0x62d8   :  { %v10144_v36 = vmax.f32 %v10142_v8, %v10143_v25 }
0x62da   :  { %10145 = vmax.xlane.f32.xlu1 %v10144_v36 }
0x62eb   :  { %9924 = vrot.lane.b32.xlu1 %v17940_v48, %s16159_s22 }
0x630f   :  { %10118 = vadd.xlane.f32.xlu1 %v10117_v52 }
0x6367   :  { %v10146_v0 = vpop.xlane.xlu1 %10145 }
0x6368   :  { %v10147_v55 = vrot.slane %v10146_v0, 4 }
0x636a   :  { %v10148_v13 = vmax.f32 %v10146_v0, %v10147_v55 }
0x636b   :  { %v9925_v56 = vpop.permute.xlu1 %9924 }
0x636c   :  { %v10149_v30 = vrot.slane %v10148_v13, 2  ;;  %14208 = vmatprep.mubr.msk.f32.mxu0 %vm6269_vm10, %v9925_v56  ;;  %v10100_v56 = vpop.xlane.xlu0 %10099 }
0x636d   :  { %14209 = vmatmul.mubr.msk.f32.vlgmr.msra.gmra.mrb[92].mxu0 %vm6269_vm10, %v9927_v38 }
0x636e   :  { %14933 = vmatpush3.bf16.msk.msra.mxu0 %vm17412_vm13, %v14928_v4  ;;  %v10150_v17 = vmax.f32 %v10148_v13, %v10149_v30 }
0x636f   :  { %14939 = vmatprep.subr.bf16.mxu0 %v17515_v29 }
0x6370   :  { %v10151_v62 = vrot.slane %v10150_v17, 1  ;;  %v10103_v30 = vpop.xlane.xlu0 %10102 }
0x6372   :  { %v10152_v48 = vmax.f32 %v10150_v17, %v10151_v62  ;;  %v10105_v17 = vmul.f32 0.5, %v10103_v30  ;;  %v10104_v62 = vmul.f32 0.5, %v10100_v56 }
0x6374   :  { %15120 = vpush %v10152_v48 }
0x639c   :  { %v10119_v50 = vpop.xlane.xlu1 %10118 }
0x639d   :  { %v10121_v63 = vmul.f32 0.5, %v10119_v50 }
0x639f   :  { %v10141_v43 = vsub.f32 %v14217_v53, %v10121_v63 }
0x63a5   :  { %s15121_s2 = spop %15120 }
0x63a6   :  { %v10154_v45 = vstv %s15121_s2 }
0x63a7   :  { %v10155_v47 = vsub.f32 %v10140_v44, %v10154_v45  ;;  %v10156_v15 = vsub.f32 %v10141_v43, %v10154_v45 }
0x63a9   :  { %v10157_v31 = vmul.f32 1.442695, %v10155_v47  ;;  %v10159_v12 = vmul.f32 1.442695, %v10156_v15 }
0x63ab   :  { %15424 = vpow2.f32 %v10157_v31  ;;  %v9825_v31 = vrot.slane %v17999_v41, 4 }
0x63ac   :  { %15426 = vpow2.f32 %v10159_v12 }
0x63b5   :  { %v15425_v38 = vpop.eup %15424 }
0x63b6   :  { %v15427_v11 = vpop.eup %15426  ;;  %v10161_v4 = vadd.f32 0.0001, %v15425_v38 }
0x63b7   :  { %v10162_v59 = vadd.f32 0.0001, %v15427_v11 }
0x63b8   :  { %v10163_v19 = vmul.f32 0.25, %v10161_v4  ;;  %v9826_v4 = vadd.f32 %v9825_v31, %v17999_v41 }
0x63b9   :  { %v10164_v25 = vmul.f32 0.25, %v10162_v59 }
0x63ba   :  { %v10286_v9 = vsel %vm6269_vm10, %v10163_v19, 0.0  ;;  %10165 = vxpose.xlu1.b32.start [1/2] (short) (narrow) %v10163_v19, 16  ;;  %v9827_v19 = vrot.slane %v9826_v4, 2 }
0x63bb   :  { %v10287_v8 = vsel %vm6443_vm14, %v10164_v25, 0.0 }
0x63bc   :  { %v10288_v53 = vadd.f32 %v10287_v8, %v10286_v9  ;;  %v9828_v8 = vadd.f32 %v9827_v19, %v9826_v4 }
0x63be   :  { %10166 = vxpose.xlu1.b32.end [2/2] (short) (narrow) %v10164_v25, 16  ;;  %v10289_v48 = vrot.slane %v10288_v53, 4 }
0x63c0   :  { %v10290_v15 = vadd.f32 %v10289_v48, %v10288_v53 }
0x63c2   :  { %v10291_v11 = vrot.slane %v10290_v15, 2 }
0x63c4   :  { %v10292_v59 = vadd.f32 %v10291_v11, %v10290_v15 }
0x63c6   :  { %v10293_v25 = vrot.slane %v10292_v59, 1 }
0x643a   :  { %v10181_v36 = vpop.trf.xlu1 }
0x643b   :  { %14222 = vmatprep.mubr.msk.f32.mxu0 %vm6534_vm15, %v10181_v36 }
0x643e   :  { %v10182_v44 = vpop.trf.xlu1 }
0x643f   :  { %14223 = vmatmul.mubr.msk.f32.vlgmr.msra.gmra.mrb[94].mxu0 %vm6534_vm15, %v10182_v44 }
0x6440   :  { %v14210_v52 = vpop.f32.mrb[92].mxu0  ;;  %14941 = vmatpush3.bf16.msra.mxu0 %v17515_v29 }
0x6441   :  { %v9998_v0 = vpop.f32.mrb[93].mxu0  ;;  %v10127_v55 = vsel %vm6443_vm14, %v14210_v52, -inf  ;;  %14943 = vmatprep.subr.bf16.mxu0 %v17521_v27  ;;  %v10123_v50 = vsub.f32 %v14210_v52, %v10105_v17 }
0x6442   :  { %10128 = vmax.xlane.f32.xlu0 %v10127_v55  ;;  %v10124_v13 = vsel %vm6269_vm10, %v9998_v0, -inf  ;;  %v10122_v63 = vsub.f32 %v9998_v0, %v10104_v62  ;;  %v10294_v55 = vadd.f32 %v10293_v25, %v10292_v59 }
0x6443   :  { %10125 = vmax.xlane.f32.xlu1 %v10124_v13  ;;  %v9829_v13 = vrot.slane %v9828_v8, 1 }
0x6445   :  { %v9830_v62 = vadd.f32 %v9829_v13, %v9828_v8 }
0x6447   :  { %v9912_v48 = vmul.f32 %v9830_v62, %v18015_v49 }
0x64cf   :  { %v10129_v43 = vpop.xlane.xlu0 %10128 }
0x64d0   :  { %v10131_v45 = vsub.f32 %v10123_v50, %v10129_v43  ;;  %v10126_v47 = vpop.xlane.xlu1 %10125  ;;  %v9914_v50 = vsel %vm6269_vm10, %v9912_v48, 0.0 }
0x64d1   :  { %v10130_v29 = vsub.f32 %v10122_v63, %v10126_v47  ;;  %v9913_v63 = vmul.f32 %v9830_v62, %v18024_v26 }
0x64d2   :  { %v10134_v12 = vmul.f32 1.442695, %v10131_v45 }
0x64d3   :  { %v10132_v38 = vmul.f32 1.442695, %v10130_v29  ;;  %v9917_v43 = vsel %vm6443_vm14, %v9913_v63, 0.0 }
0x64d4   :  { %15428 = vpow2.f32 %v10134_v12 }
0x64d5   :  { %15430 = vpow2.f32 %v10132_v38 }
0x64de   :  { %v15429_v9 = vpop.eup %15428 }
0x64df   :  { %v15431_v36 = vpop.eup %15430  ;;  %v10137_v44 = vadd.f32 0.0001, %v15429_v9 }
0x64e0   :  { %v10136_v52 = vadd.f32 0.0001, %v15431_v36 }
0x64e1   :  { %v10139_v0 = vmul.f32 0.25, %v10137_v44 }
0x64e2   :  { %v10138_v53 = vmul.f32 0.25, %v10136_v52 }
0x64e3   :  { %v10377_v56 = vmul.f32 %v10294_v55, %v10139_v0 }
0x64e4   :  { %14229 = vmatprep.mubr.msk.f32.mxu1 %vm6269_vm10, %v10138_v53  ;;  %v10376_v30 = vmul.f32 %v10294_v55, %v10138_v53 }
0x64e5   :  { %v10381_v41 = vsel %vm6443_vm14, %v10377_v56, 0.0 }
0x64e6   :  { %v10378_v17 = vsel %vm6269_vm10, %v10376_v30, 0.0 }
0x64e7   :  { %10379 = vadd.xlane.f32.xlu0 %v10378_v17 }
0x64eb   :  { %10382 = vadd.xlane.f32.xlu0 %v10381_v41 }
0x64ef   :  { %9915 = vadd.xlane.f32.xlu0 %v9914_v50 }
0x64f3   :  { %9918 = vadd.xlane.f32.xlu0 %v9917_v43 }
0x6512   :  { %v14224_v45 = vpop.f32.mrb[94].mxu0 }
0x6513   :  { %v10277_v47 = vpop.f32.mrb[95].mxu0 }
0x6514   :  { %v14934_v29 = vpack.c.bf16 %v14224_v45, %v10277_v47  ;;  %v15522_v45 = vld [vmem:[%s18500_s13] ss:$0 sm:$0xff] }
0x6516   :  { %14935 = vmatprep.subr.bf16.mxu1 %v14934_v29 }
0x6517   :  { %14937 = vmatpush3.bf16.msra.mxu1 %v14934_v29 }
0x6518   :  { %14947 = vmatprep.subr.bf16.mxu1 %v17548_v5 }
0x651a   :  { %14230 = vmatmul.mubr.msk.f32.vlgmr.msra.gmra.mrb[106].mxu1 %vm6269_vm10, %v10139_v0 }
0x651b   :  { %14949 = vmatpush3.bf16.msra.mxu1 %v17548_v5 }
0x651c   :  { %14951 = vmatprep.subr.bf16.mxu1 %v17554_v24 }
0x651f   :  { %14953 = vmatpush3.bf16.msra.mxu1 %v17554_v24 }
0x6520   :  { %14987 = vmatprep.subr.bf16.mxu1 %v17628_v20 }
0x6574   :  { %v10380_v49 = vpop.xlane.xlu0 %10379 }
0x6575   :  { %15432 = vrcp.f32 %v10380_v49 }
0x6578   :  { %v10383_v26 = vpop.xlane.xlu0 %10382 }
0x657c   :  { %v9916_v15 = vpop.xlane.xlu0 %9915 }
0x657d   :  { %15434 = vrcp.f32 %v9916_v15  ;;  %v15523_v15 = vld [vmem:[%s18501_s11] ss:$0 sm:$0xff] }
0x657e   :  { %15436 = vrcp.f32 %v10383_v26 }
0x657f   :  { %v15433_v12 = vpop.eup %15432 }
0x6580   :  { %v9919_v31 = vpop.xlane.xlu0 %9918 }
0x6581   :  { %15438 = vrcp.f32 %v9919_v31 }
0x6587   :  { %v15435_v11 = vpop.eup %15434 }
0x6588   :  { %v15437_v59 = vpop.eup %15436  ;;  %v9921_v24 = vmul.f32 %v15435_v11, %v18038_v39 }
0x658b   :  { %v15439_v25 = vpop.eup %15438 }
0x658c   :  { %v9923_v9 = vmul.f32 %v15439_v25, %v18036_v6  ;;  %v15521_v6 = vld [vmem:[%s18498_s10] ss:$0 sm:$0xff] }
0x65ed   :  { %v14231_v38 = vpop.f32.mrb[106].mxu1 }
0x65ee   :  { %v10367_v4 = vpop.f32.mrb[107].mxu1  ;;  %v10387_v19 = vmul.f32 %v15437_v59, %v14231_v38 }
0x65ef   :  { %v10385_v5 = vmul.f32 %v15433_v12, %v10367_v4 }
0x65f1   :  { %14236 = vmatprep.mubr.msk.f32.mxu0 %vm6269_vm10, %v10385_v5  ;;  %v15524_v5 = vld [vmem:[%s18503_s15] ss:$0 sm:$0xff] }
0x65f2   :  { %14237 = vmatmul.mubr.msk.f32.vlgmr.msra.gmra.mrb[96].mxu0 %vm6269_vm10, %v10387_v19 }
0x65f3   :  { %14945 = vmatpush3.bf16.msra.mxu0 %v17521_v27  ;;  %14243 = vmatprep.mubr.msk.f32.mxu0 %vm6269_vm10, %v9921_v24 }
0x65f4   :  { %14955 = vmatprep.subr.bf16.mxu0 %v17564_v60 }
0x65fa   :  { %14244 = vmatmul.mubr.msk.f32.vlgmr.msra.gmra.mrb[96].mxu0 %vm6269_vm10, %v9923_v9 }
0x65fb   :  { %14957 = vmatpush3.bf16.msra.mxu0 %v17564_v60 }
0x65fc   :  { %14959 = vmatprep.subr.bf16.mxu0 %v17570_v7 }
0x65ff   :  { %14961 = vmatpush3.bf16.msra.mxu0 %v17570_v7 }
0x6600   :  { %14963 = vmatprep.subr.bf16.mxu0 %v17576_v1 }
0x6603   :  { %14965 = vmatpush3.bf16.msra.mxu0 %v17576_v1 }
0x6604   :  { %14967 = vmatprep.subr.bf16.mxu0 %v17582_v14 }
0x6607   :  { %14969 = vmatpush3.bf16.msra.mxu0 %v17582_v14 }
0x6608   :  { %14971 = vmatprep.subr.bf16.mxu0 %v17589_v23 }
0x660b   :  { %14973 = vmatpush3.bf16.msra.mxu0 %v17589_v23 }
0x660c   :  { %14975 = vmatprep.subr.bf16.mxu0 %v17592_v54 }
0x660f   :  { %14977 = vmatpush3.bf16.msra.mxu0 %v17592_v54 }
0x6610   :  { %14979 = vmatprep.subr.bf16.mxu0 %v17599_v58 }
0x6613   :  { %14981 = vmatpush3.bf16.msra.mxu0 %v17599_v58 }
0x6614   :  { %14983 = vmatprep.subr.bf16.mxu0 %v17605_v61 }
0x6617   :  { %14985 = vmatpush3.bf16.msra.mxu0 %v17605_v61 }
0x6618   :  { %15018 = vmatprep.subr.msk.bf16.mxu0 %vm17374_vm11, %v17645_v28 }
0x66cd   :  { %v14245_v27 = vpop.f32.mrb[96].mxu0 }
0x66ce   :  { %v10553_v60 = vrot.slane %v14245_v27, 7  ;;  %v10541_v7 = vpop.f32.mrb[97].mxu0 }
0x66cf   :  { %v10552_v1 = vrot.slane %v10541_v7, 7 }
0x66d1   :  { %v10554_v14 = vsel %vm800_vm1, %v10552_v1, %v10553_v60  ;;  %v10557_v23 = vadd.f32 %v17829_v40, %v10552_v1 }
0x66d2   :  { %v10558_v54 = vadd.f32 %v10554_v14, %v17834_v2 }
0x66d3   :  { %v18103_v58 = vadd.f32 %v15521_v6, %v10557_v23 }
0x66d4   :  { %v18107_v39 = vadd.f32 %v15521_v6, %v10558_v54 }
0x66d5   :  { %v10561_v61 = vsel %vm9210_vm0, %v18103_v58, 0.0 }
0x66d6   :  { %10562 = vadd.xlane.f32.xlu0 %v10561_v61  ;;  %v10564_v8 = vsel %vm9214_vm2, %v18107_v39, 0.0 }
0x66da   :  { %10565 = vadd.xlane.f32.xlu0 %v10564_v8 }
0x6763   :  { %v10563_v36 = vpop.xlane.xlu0 %10562 }
0x6764   :  { %v10567_v44 = vmul.f32 0.03125, %v10563_v36 }
0x6766   :  { %v10569_v52 = vsub.f32 %v18103_v58, %v10567_v44 }
0x6767   :  { %v10566_v40 = vpop.xlane.xlu0 %10565 }
0x6768   :  { %v10568_v0 = vmul.f32 0.03125, %v10566_v40  ;;  %v10571_v2 = vmul.f32 %v10569_v52, %v10569_v52 }
0x676a   :  { %v10570_v55 = vsub.f32 %v18107_v39, %v10568_v0  ;;  %v10573_v53 = vsel %vm9210_vm0, %v10571_v2, 0.0 }
0x676b   :  { %10574 = vadd.xlane.f32.xlu0 %v10573_v53 }
0x676c   :  { %v10572_v13 = vmul.f32 %v10570_v55, %v10570_v55 }
0x676e   :  { %v10576_v56 = vsel %vm9214_vm2, %v10572_v13, 0.0 }
0x676f   :  { %10577 = vadd.xlane.f32.xlu0 %v10576_v56 }
0x67f8   :  { %v10575_v30 = vpop.xlane.xlu0 %10574 }
0x67f9   :  { %v10579_v17 = vmul.f32 0.03125, %v10575_v30 }
0x67fb   :  { %v10581_v62 = vadd.f32 1e-05, %v10579_v17 }
0x67fc   :  { %v10578_v41 = vpop.xlane.xlu0 %10577 }
0x67fd   :  { %15440 = vrsqrt.f32 %v10581_v62  ;;  %v10580_v48 = vmul.f32 0.03125, %v10578_v41 }
0x67ff   :  { %v10582_v50 = vadd.f32 1e-05, %v10580_v48 }
0x6801   :  { %15442 = vrsqrt.f32 %v10582_v50 }
0x6807   :  { %v15441_v63 = vpop.eup %15440 }
0x6808   :  { %v10585_v43 = vmul.f32 %v15441_v63, %v10569_v52 }
0x680a   :  { %v10587_v47 = vmul.f32 %v15522_v45, %v10585_v43 }
0x680b   :  { %v15443_v29 = vpop.eup %15442 }
0x680c   :  { %v10586_v49 = vmul.f32 %v15443_v29, %v10570_v55  ;;  %v10589_v31 = vadd.f32 %v15523_v15, %v10587_v47  ;;  %v15525_v55 = vld [vmem:[%s18504_s16] ss:$0 sm:$0xff] }
0x680e   :  { %v10588_v26 = vmul.f32 %v15522_v45, %v10586_v49  ;;  %v10593_v38 = vrot.slane %v10589_v31, 1 }
0x6810   :  { %v10590_v12 = vadd.f32 %v15523_v15, %v10588_v26 }
0x6812   :  { %v10594_v11 = vrot.slane %v10590_v12, 1 }
0x6814   :  { %v10595_v4 = vsel %vm9244_vm5, %v10593_v38, %v10594_v11 }
0x6815   :  { %14254 = vmatprep.mubr.msk.f32.mxu1 %vm838_vm4, %v10595_v4 }
0x6816   :  { %14255 = vmatmul.mubr.msk.f32.vlgmr.msra.gmra.mrb[108].mxu1 %vm838_vm4, %v10594_v11 }
0x6817   :  { %14989 = vmatpush3.bf16.msra.mxu1 %v17628_v20 }
0x6818   :  { %14991 = vmatprep.subr.bf16.mxu1 %v17634_v3 }
0x681b   :  { %14993 = vmatpush3.bf16.msra.mxu1 %v17634_v3 }
0x681c   :  { %14995 = vmatprep.subr.bf16.mxu1 %v17640_v18 }
0x68e9   :  { %v14256_v59 = vpop.f32.mrb[108].mxu1 }
0x68ea   :  { %v10672_v19 = vadd.f32 %v15524_v5, %v14256_v59  ;;  %v10666_v24 = vpop.f32.mrb[109].mxu1 }
0x68eb   :  { %v10667_v25 = vadd.f32 %v15524_v5, %v10666_v24 }
0x68ec   :  { %v10676_v9 = vmul.f32 %v10672_v19, %v10672_v19 }
0x68ed   :  { %v10675_v27 = vmul.f32 %v10667_v25, %v10667_v25 }
0x68ee   :  { %v10678_v60 = vmul.f32 %v10676_v9, %v10672_v19 }
0x68ef   :  { %v10677_v7 = vmul.f32 %v10675_v27, %v10667_v25  ;;  %v15526_v27 = vld [vmem:[%s18508_s12] ss:$0 sm:$0xff] }
0x68f0   :  { %v10680_v1 = vmul.f32 0.044715, %v10678_v60 }
0x68f1   :  { %v10679_v14 = vmul.f32 0.044715, %v10677_v7 }
0x68f2   :  { %v10682_v23 = vadd.f32 %v10680_v1, %v10672_v19  ;;  %v15527_v1 = vld [vmem:[%s18509_s29] ss:$0 sm:$0xff] }
0x68f3   :  { %v10681_v54 = vadd.f32 %v10679_v14, %v10667_v25 }
0x68f4   :  { %v10684_v20 = vmul.f32 0.7978846, %v10682_v23 }
0x68f5   :  { %v10683_v6 = vmul.f32 0.7978846, %v10681_v54 }
0x68f6   :  { %15444 = vtanh.f32 %v10684_v20 }
0x68f7   :  { %15446 = vtanh.f32 %v10683_v6 }
0x6900   :  { %v15445_v3 = vpop.eup %15444 }
0x6901   :  { %v15447_v61 = vpop.eup %15446  ;;  %v10688_v8 = vadd.f32 1.0, %v15445_v3 }
0x6902   :  { %v10687_v36 = vadd.f32 1.0, %v15447_v61 }
0x6903   :  { %v10690_v44 = vmul.f32 0.5, %v10688_v8 }
0x6904   :  { %v10689_v52 = vmul.f32 0.5, %v10687_v36 }
0x6905   :  { %v10692_v0 = vmul.f32 %v10690_v44, %v10672_v19 }
0x6906   :  { %v10691_v40 = vmul.f32 %v10689_v52, %v10667_v25 }
0x6908   :  { %14289 = vmatprep.mubr.f32.mxu0 %v10691_v40 }
0x6909   :  { %14290 = vmatmul.mubr.f32.vlgmr.msra.gmra.mrb[98].mxu0 %v10692_v0 }
0x690a   :  { %15021 = vmatpush3.bf16.xpose.msk.msra.mxu0 %vm17374_vm11, %v17645_v28 }
0x690b   :  { %15034 = vmatprep.subr.msk.bf16.mxu0 %vm17374_vm11, %v17645_v28 }
0x69dc   :  { %v14291_v2 = vpop.f32.mrb[98].mxu0 }
0x69dd   :  { %v10765_v53 = vadd.f32 %v15525_v55, %v14291_v2  ;;  %v10759_v13 = vpop.f32.mrb[99].mxu0 }
0x69de   :  { %v10760_v56 = vadd.f32 %v15525_v55, %v10759_v13 }
0x69df   :  { %v10771_v30 = vrot.slane %v10765_v53, 7 }
0x69e0   :  { %v10770_v17 = vrot.slane %v10760_v56, 7 }
0x69e2   :  { %v10772_v62 = vsel %vm800_vm1, %v10770_v17, %v10771_v30  ;;  %v18134_v41 = vadd.f32 %v10770_v17, %v18103_v58 }
0x69e3   :  { %v18137_v48 = vadd.f32 %v10772_v62, %v18107_v39 }
0x69e4   :  { %v10777_v50 = vsel %vm9210_vm0, %v18134_v41, 0.0 }
0x69e5   :  { %10778 = vadd.xlane.f32.xlu0 %v10777_v50  ;;  %v10780_v63 = vsel %vm9214_vm2, %v18137_v48, 0.0 }
0x69e6   :  { %10781 = vadd.xlane.f32.xlu1 %v10780_v63 }
0x6a72   :  { %v10779_v43 = vpop.xlane.xlu0 %10778 }
0x6a73   :  { %v10783_v45 = vmul.f32 0.03125, %v10779_v43  ;;  %v10782_v47 = vpop.xlane.xlu1 %10781 }
0x6a74   :  { %v10784_v29 = vmul.f32 0.03125, %v10782_v47 }
0x6a75   :  { %v10785_v49 = vsub.f32 %v18134_v41, %v10783_v45 }
0x6a76   :  { %v10786_v58 = vsub.f32 %v18137_v48, %v10784_v29 }
0x6a77   :  { %v10787_v26 = vmul.f32 %v10785_v49, %v10785_v49 }
0x6a78   :  { %v10788_v15 = vmul.f32 %v10786_v58, %v10786_v58 }
0x6a79   :  { %v10789_v39 = vsel %vm9210_vm0, %v10787_v26, 0.0 }
0x6a7a   :  { %10790 = vadd.xlane.f32.xlu0 %v10789_v39  ;;  %v10792_v31 = vsel %vm9214_vm2, %v10788_v15, 0.0 }
0x6a7b   :  { %10793 = vadd.xlane.f32.xlu1 %v10792_v31 }
0x6b07   :  { %v10791_v12 = vpop.xlane.xlu0 %10790 }
0x6b08   :  { %v10795_v38 = vmul.f32 0.03125, %v10791_v12  ;;  %v10794_v11 = vpop.xlane.xlu1 %10793 }
0x6b09   :  { %v10796_v4 = vmul.f32 0.03125, %v10794_v11 }
0x6b0a   :  { %v10797_v59 = vadd.f32 1e-05, %v10795_v38 }
0x6b0b   :  { %v10798_v5 = vadd.f32 1e-05, %v10796_v4 }
0x6b0c   :  { %15448 = vrsqrt.f32 %v10797_v59 }
0x6b0d   :  { %15450 = vrsqrt.f32 %v10798_v5 }
0x6b16   :  { %v15449_v19 = vpop.eup %15448 }
0x6b17   :  { %v15451_v24 = vpop.eup %15450  ;;  %v10801_v25 = vmul.f32 %v15449_v19, %v10785_v49 }
0x6b18   :  { %v10802_v9 = vmul.f32 %v15451_v24, %v10786_v58 }
0x6b19   :  { %v10803_v60 = vmul.f32 %v15526_v27, %v10801_v25 }
0x6b1a   :  { %v10804_v7 = vmul.f32 %v15526_v27, %v10802_v9 }
0x6b1b   :  { %v10805_v14 = vadd.f32 %v15527_v1, %v10803_v60 }
0x6b1c   :  { %v10806_v23 = vadd.f32 %v15527_v1, %v10804_v7 }
0x6b1d   :  { %v10809_v54 = vrot.slane %v10805_v14, 1 }
0x6b1e   :  { %v10810_v20 = vrot.slane %v10806_v23, 1 }
0x6b20   :  { %v10811_v6 = vsel %vm9244_vm5, %v10809_v54, %v10810_v20 }
0x6b21   :  { %14300 = vmatprep.mubr.msk.f32.mxu1 %vm838_vm4, %v10811_v6 }
0x6b22   :  { %14301 = vmatmul.mubr.msk.f32.vlgmr.msra.gmra.mrb[110].mxu1 %vm838_vm4, %v10810_v20 }
0x6b23   :  { %14997 = vmatpush3.bf16.msra.mxu1 %v17640_v18  ;;  %14311 = vmatprep.mubr.msk.f32.mxu1 %vm838_vm4, %v10811_v6 }
0x6b24   :  { %14999 = vmatprep.subr.bf16.mxu1 %v17660_v46 }
0x6b27   :  { %15001 = vmatpush3.bf16.msra.mxu1 %v17660_v46 }
0x6b28   :  { %15003 = vmatprep.subr.bf16.mxu1 %v17669_v10 }
0x6b2a   :  { %14312 = vmatmul.mubr.msk.f32.vlgmr.msra.gmra.mrb[112].mxu1 %vm838_vm4, %v10810_v20 }
0x6b2b   :  { %15005 = vmatpush3.bf16.msra.mxu1 %v17669_v10  ;;  %14322 = vmatprep.mubr.msk.f32.mxu1 %vm838_vm4, %v10811_v6 }
0x6b2c   :  { %15007 = vmatprep.subr.bf16.mxu1 %v17675_v51 }
0x6b2f   :  { %15009 = vmatpush3.bf16.msra.mxu1 %v17675_v51 }
0x6b30   :  { %15012 = vmatprep.subr.msk.bf16.mxu1 %vm17374_vm11, %v17645_v28 }
0x6b32   :  { %14323 = vmatmul.mubr.msk.f32.vlgmr.msra.gmra.mrb[114].mxu1 %vm838_vm4, %v10810_v20 }
0x6b38   :  { %15015 = vmatpush3.bf16.xpose.msk.msra.mxu1 %vm17374_vm11, %v17645_v28 }
0x6bf5   :  { %v14302_v18 = vpop.f32.mrb[110].mxu1 }
0x6bf6   :  { %v10882_v46 = vpop.f32.mrb[111].mxu1  ;;  %v18171_v10 = vmul.f32 0.5, %v14302_v18 }
0x6bf7   :  { %v18169_v3 = vmul.f32 0.5, %v10882_v46 }
0x6bf8   :  { %v11208_v29 = vmul.f32 %v18171_v10, %v18171_v10 }
0x6bf9   :  { %14329 = vmatprep.mubr.msk.f32.mxu1 %vm6269_vm10, %v18169_v3  ;;  %v11207_v45 = vmul.f32 %v18169_v3, %v18169_v3 }
0x6bfa   :  { %14330 = vmatmul.mubr.msk.f32.vlgmr.msra.gmra.mrb[116].mxu1 %vm6269_vm10, %v18171_v10  ;;  %v11212_v49 = vsel %vm6443_vm14, %v11208_v29, 0.0 }
0x6bfb   :  { %v11209_v47 = vsel %vm6269_vm10, %v11207_v45, 0.0 }
0x6bfd   :  { %v14313_v51 = vpop.f32.mrb[112].mxu1 }
0x6bfe   :  { %v10957_v61 = vpop.f32.mrb[113].mxu1  ;;  %v11044_v36 = vmul.f32 0.5, %v14313_v51 }
0x6bff   :  { %v11043_v8 = vmul.f32 0.5, %v10957_v61 }
0x6c00   :  { %v11218_v63 = vmul.f32 %v11044_v36, %v11044_v36 }
0x6c01   :  { %14336 = vmatprep.mubr.msk.f32.mxu0 %vm6269_vm10, %v11043_v8  ;;  %v11217_v44 = vmul.f32 %v11043_v8, %v11043_v8 }
0x6c02   :  { %14337 = vmatmul.mubr.msk.f32.vlgmr.msra.gmra.mrb[100].mxu0 %vm6269_vm10, %v11044_v36  ;;  %v11222_v43 = vsel %vm6443_vm14, %v11218_v63, 0.0 }
0x6c03   :  { %v11219_v52 = vsel %vm6269_vm10, %v11217_v44, 0.0  ;;  %15037 = vmatpush3.bf16.xpose.msk.msra.mxu0 %vm17374_vm11, %v17645_v28 }
0x6c04   :  { %11220 = vadd.xlane.f32.xlu1 %v11219_v52 }
0x6c05   :  { %v18183_v40 = vpop.f32.mrb[114].mxu1 }
0x6c06   :  { %v18185_v0 = vpop.f32.mrb[115].mxu1 }
0x6c07   :  { %v15243_v2 = vpack.i.bf16 %v18183_v40, %v18185_v0  ;;  %v15022_v55 = vpack.c.bf16 %v18183_v40, %v18185_v0 }
0x6c09   :  { %15024 = vmatprep.subr.msk.bf16.mxu1 %vm17412_vm13, %v15022_v55 }
0x6c0a   :  { %15027 = vmatpush3.bf16.msk.msra.mxu1 %vm17412_vm13, %v15022_v55 }
0x6c91   :  { %v11221_v7 = vpop.xlane.xlu1 %11220 }
0x6c92   :  { %v11225_v14 = vmul.f32 0.5, %v11221_v7 }
0x6ccd   :  { %v14331_v53 = vpop.f32.mrb[116].mxu1 }
0x6cce   :  { %v18195_v13 = vpop.f32.mrb[117].mxu1  ;;  %v11232_v26 = vsel %vm6443_vm14, %v14331_v53, -inf }
0x6ccf   :  { %v11229_v58 = vsel %vm6269_vm10, %v18195_v13, -inf }
0x6cd5   :  { %v14338_v56 = vpop.f32.mrb[100].mxu0 }
0x6cd6   :  { %v11248_v30 = vsel %vm6443_vm14, %v14338_v56, -inf  ;;  %v11198_v17 = vpop.f32.mrb[101].mxu0 }
0x6cd7   :  { %v11247_v62 = vsel %vm6269_vm10, %v11198_v17, -inf  ;;  %v11245_v23 = vsub.f32 %v11198_v17, %v11225_v14 }
0x6cd8   :  { %v11249_v50 = vmax.f32 %v11247_v62, %v11248_v30 }
0x6cda   :  { %11250 = vmax.xlane.f32.xlu0 %v11249_v50 }
0x6cde   :  { %11223 = vadd.xlane.f32.xlu0 %v11222_v43 }
0x6ce2   :  { %11210 = vadd.xlane.f32.xlu0 %v11209_v47 }
0x6ce6   :  { %11213 = vadd.xlane.f32.xlu0 %v11212_v49 }
0x6cea   :  { %11230 = vmax.xlane.f32.xlu0 %v11229_v58 }
0x6cee   :  { %11233 = vmax.xlane.f32.xlu0 %v11232_v26 }
0x6d04   :  { %11571 = vrot.lane.b32.xlu0 %v11043_v8, %s16159_s22 }
0x6d08   :  { %11573 = vrot.lane.b32.xlu0 %v11044_v36, %s16159_s22 }
0x6d0c   :  { %11672 = vrot.lane.b32.xlu0 %v11217_v44, %s16159_s22 }
0x6d67   :  { %v11251_v15 = vpop.xlane.xlu0 %11250 }
0x6d68   :  { %v11252_v39 = vrot.slane %v11251_v15, 4 }
0x6d6a   :  { %v11253_v31 = vmax.f32 %v11251_v15, %v11252_v39 }
0x6d6b   :  { %v11224_v12 = vpop.xlane.xlu0 %11223 }
0x6d6c   :  { %v11254_v38 = vrot.slane %v11253_v31, 2  ;;  %v11226_v1 = vmul.f32 0.5, %v11224_v12 }
0x6d6e   :  { %v11255_v11 = vmax.f32 %v11253_v31, %v11254_v38  ;;  %v11246_v54 = vsub.f32 %v14338_v56, %v11226_v1 }
0x6d6f   :  { %v11211_v4 = vpop.xlane.xlu0 %11210 }
0x6d70   :  { %v11256_v59 = vrot.slane %v11255_v11, 1  ;;  %v11215_v47 = vmul.f32 0.5, %v11211_v4 }
0x6d72   :  { %v11257_v5 = vmax.f32 %v11255_v11, %v11256_v59 }
0x6d73   :  { %v11214_v19 = vpop.xlane.xlu0 %11213 }
0x6d74   :  { %v11216_v24 = vmul.f32 0.5, %v11214_v19  ;;  %15122 = vpush %v11257_v5 }
0x6d76   :  { %v11228_v25 = vsub.f32 %v14331_v53, %v11216_v24 }
0x6d77   :  { %v11231_v9 = vpop.xlane.xlu0 %11230 }
0x6d7b   :  { %v11234_v27 = vpop.xlane.xlu0 %11233 }
0x6d7c   :  { %v11236_v60 = vsub.f32 %v11228_v25, %v11234_v27 }
0x6d7e   :  { %v11239_v4 = vmul.f32 1.442695, %v11236_v60 }
0x6d7f   :  { %v11572_v17 = vpop.permute.xlu0 %11571 }
0x6d83   :  { %v11574_v62 = vpop.permute.xlu0 %11573 }
0x6d87   :  { %v11673_v50 = vpop.permute.xlu0 %11672 }
0x6d88   :  { %v11678_v43 = vsel %vm6269_vm10, %v11673_v50, 0.0 }
0x6da5   :  { %s15123_s21 = spop %15122 }
0x6da6   :  { %v11259_v20 = vstv %s15123_s21 }
0x6da7   :  { %v11260_v6 = vsub.f32 %v11245_v23, %v11259_v20  ;;  %v11261_v18 = vsub.f32 %v11246_v54, %v11259_v20 }
0x6da9   :  { %v11262_v46 = vmul.f32 1.442695, %v11260_v6  ;;  %v11264_v51 = vmul.f32 1.442695, %v11261_v18 }
0x6dab   :  { %15452 = vpow2.f32 %v11262_v46 }
0x6dac   :  { %15454 = vpow2.f32 %v11264_v51 }
0x6db5   :  { %v15453_v61 = vpop.eup %15452 }
0x6db6   :  { %v15455_v8 = vpop.eup %15454  ;;  %v11266_v36 = vadd.f32 0.0001, %v15453_v61 }
0x6db7   :  { %v11267_v44 = vadd.f32 0.0001, %v15455_v8 }
0x6db8   :  { %v11268_v52 = vmul.f32 0.25, %v11266_v36 }
0x6db9   :  { %v11269_v55 = vmul.f32 0.25, %v11267_v44 }
0x6dba   :  { %v11386_v53 = vsel %vm6269_vm10, %v11268_v52, 0.0  ;;  %11270 = vxpose.xlu1.b32.start [1/2] (short) (narrow) %v11268_v52, 16 }
0x6dbb   :  { %v11387_v30 = vsel %vm6443_vm14, %v11269_v55, 0.0 }
0x6dbc   :  { %v18214_v56 = vadd.f32 %v11387_v30, %v11386_v53 }
0x6dbe   :  { %11271 = vxpose.xlu1.b32.end [2/2] (short) (narrow) %v11269_v55, 16 }
0x6ddc   :  { %11674 = vrot.lane.b32.xlu1 %v11218_v63, %s16159_s22  ;;  %v11227_v63 = vsub.f32 %v18195_v13, %v11215_v47 }
0x6dde   :  { %v11235_v49 = vsub.f32 %v11227_v63, %v11231_v9 }
0x6de0   :  { %11490 = vrot.lane.b32.xlu1 %v18171_v10, %s16159_s22  ;;  %v11237_v10 = vmul.f32 1.442695, %v11235_v49 }
0x6de2   :  { %15456 = vpow2.f32 %v11237_v10 }
0x6de3   :  { %15458 = vpow2.f32 %v11239_v4 }
0x6dec   :  { %v15457_v58 = vpop.eup %15456 }
0x6ded   :  { %v11241_v26 = vadd.f32 0.0001, %v15457_v58  ;;  %v15459_v59 = vpop.eup %15458 }
0x6dee   :  { %v11242_v24 = vadd.f32 0.0001, %v15459_v59 }
0x6def   :  { %v18228_v39 = vmul.f32 0.25, %v11241_v26 }
0x6df0   :  { %v18236_v9 = vmul.f32 0.25, %v11242_v24 }
0x6e04   :  { %11679 = vadd.xlane.f32.xlu1 %v11678_v43 }
0x6e15   :  { %15244 = vrot.lane.b32.xlu1 %v15243_v2, %s16159_s22 }
0x6e19   :  { %11656 = vrot.lane.b32.xlu1 %v11207_v45, %s16159_s22 }
0x6e1d   :  { %11658 = vrot.lane.b32.xlu1 %v11208_v29, %s16159_s22 }
0x6e3a   :  { %v11286_v15 = vpop.trf.xlu1 }
0x6e3b   :  { %14343 = vmatprep.mubr.msk.f32.mxu1 %vm6534_vm15, %v11286_v15 }
0x6e3e   :  { %v11287_v31 = vpop.trf.xlu1 }
0x6e3f   :  { %14344 = vmatmul.mubr.msk.f32.vlgmr.msra.gmra.mrb[118].mxu1 %vm6534_vm15, %v11287_v31 }
0x6e40   :  { %14350 = vmatprep.mubr.msk.f32.mxu1 %vm6269_vm10, %v18228_v39 }
0x6e4e   :  { %v11675_v40 = vpop.permute.xlu1 %11674 }
0x6e4f   :  { %v11681_v33 = vsel %vm6443_vm14, %v11675_v40, 0.0 }
0x6e52   :  { %v11491_v0 = vpop.permute.xlu1 %11490 }
0x6e91   :  { %v11680_v2 = vpop.xlane.xlu1 %11679 }
0x6e92   :  { %v11684_v7 = vmul.f32 0.5, %v11680_v2 }
0x6e95   :  { %v15245_v13 = vpop.permute.xlu1 %15244 }
0x6e96   :  { %v15247_v45 = vunpack.i.h.bf16 %v15245_v13  ;;  %v15246_v29 = vunpack.i.l.bf16 %v15245_v13 }
0x6e98   :  { %v15044_v12 = vpack.c.bf16 %v15247_v45, %v15246_v29 }
0x6e99   :  { %v11657_v38 = vpop.permute.xlu1 %11656 }
0x6e9a   :  { %v11662_v11 = vsel %vm6269_vm10, %v11657_v38, 0.0  ;;  %15046 = vmatprep.subr.msk.bf16.mxu0 %vm17412_vm13, %v15044_v12 }
0x6e9b   :  { %11663 = vadd.xlane.f32.xlu1 %v11662_v11 }
0x6e9d   :  { %v11659_v31 = vpop.permute.xlu1 %11658 }
0x6e9e   :  { %v11665_v40 = vsel %vm6443_vm14, %v11659_v31, 0.0 }
0x6f12   :  { %v14345_v5 = vpop.f32.mrb[118].mxu1 }
0x6f13   :  { %v11377_v19 = vpop.f32.mrb[119].mxu1 }
0x6f14   :  { %v15028_v25 = vpack.c.bf16 %v14345_v5, %v11377_v19 }
0x6f16   :  { %15029 = vmatprep.subr.bf16.mxu1 %v15028_v25 }
0x6f17   :  { %15031 = vmatpush3.bf16.msra.mxu1 %v15028_v25 }
0x6f18   :  { %15040 = vmatprep.subr.msk.bf16.mxu1 %vm17374_vm11, %v17645_v28 }
0x6f1a   :  { %14351 = vmatmul.mubr.msk.f32.vlgmr.msra.gmra.mrb[120].mxu1 %vm6269_vm10, %v18236_v9 }
0x6f1b   :  { %14364 = vmatprep.mubr.msk.f32.mxu1 %vm6269_vm10, %v11572_v17 }
0x6f20   :  { %15043 = vmatpush3.bf16.xpose.msk.msra.mxu1 %vm17374_vm11, %v17645_v28 }
0x6f27   :  { %14365 = vmatmul.mubr.msk.f32.vlgmr.msra.gmra.mrb[122].mxu1 %vm6269_vm10, %v11574_v62 }
0x6f28   :  { %v11664_v38 = vpop.xlane.xlu1 %11663 }
0x6f29   :  { %v11668_v4 = vmul.f32 0.5, %v11664_v38 }
0x6fed   :  { %v18248_v27 = vpop.f32.mrb[120].mxu1 }
0x6fee   :  { %v18250_v60 = vpop.f32.mrb[121].mxu1 }
0x6ffa   :  { %v14366_v1 = vpop.f32.mrb[122].mxu1 }
0x6ffb   :  { %v11707_v14 = vsel %vm6443_vm14, %v14366_v1, -inf  ;;  %v11645_v23 = vpop.f32.mrb[123].mxu1 }
0x6ffc   :  { %v11704_v54 = vsub.f32 %v11645_v23, %v11684_v7  ;;  %v11706_v20 = vsel %vm6269_vm10, %v11645_v23, -inf  ;;  %v11389_v7 = vrot.slane %v18214_v56, 4 }
0x6ffd   :  { %v11708_v6 = vmax.f32 %v11706_v20, %v11707_v14 }
0x6fff   :  { %11709 = vmax.xlane.f32.xlu0 %v11708_v6  ;;  %v11390_v6 = vadd.f32 %v11389_v7, %v18214_v56 }
0x7015   :  { %11488 = vrot.lane.b32.xlu0 %v18169_v3, %s16159_s22 }
0x7034   :  { %11682 = vadd.xlane.f32.xlu0 %v11681_v33 }
0x708c   :  { %v11710_v28 = vpop.xlane.xlu0 %11709 }
0x708d   :  { %v11711_v18 = vrot.slane %v11710_v28, 4 }
0x708f   :  { %v11712_v46 = vmax.f32 %v11710_v28, %v11711_v18  ;;  %v11391_v18 = vrot.slane %v11390_v6, 2 }
0x7090   :  { %v11489_v51 = vpop.permute.xlu0 %11488 }
0x7091   :  { %v11713_v61 = vrot.slane %v11712_v46, 2  ;;  %14357 = vmatprep.mubr.msk.f32.mxu0 %vm6269_vm10, %v11489_v51  ;;  %v11392_v51 = vadd.f32 %v11391_v18, %v11390_v6  ;;  %v18531_v6 = vld [vmem:[#allocation105_spill] sm:$0xff] }
0x7092   :  { %14358 = vmatmul.mubr.msk.f32.vlgmr.msra.gmra.mrb[102].mxu0 %vm6269_vm10, %v11491_v0 }
0x7093   :  { %15049 = vmatpush3.bf16.msk.msra.mxu0 %vm17412_vm13, %v15044_v12  ;;  %v11714_v8 = vmax.f32 %v11712_v46, %v11713_v61 }
0x7094   :  { %15055 = vmatprep.subr.bf16.mxu0 %v17804_v16 }
0x7095   :  { %v11715_v36 = vrot.slane %v11714_v8, 1 }
0x7097   :  { %v11716_v3 = vmax.f32 %v11714_v8, %v11715_v36 }
0x7099   :  { %15124 = vpush %v11716_v3 }
0x70c1   :  { %v11683_v44 = vpop.xlane.xlu0 %11682 }
0x70c2   :  { %v11685_v52 = vmul.f32 0.5, %v11683_v44  ;;  %v11393_v44 = vrot.slane %v11392_v51, 1 }
0x70c4   :  { %v11705_v55 = vsub.f32 %v14366_v1, %v11685_v52  ;;  %v11394_v56 = vadd.f32 %v11393_v44, %v11392_v51  ;;  %v18532_v51 = vld [vmem:[#allocation100_spill] sm:$0xff] }
0x70ca   :  { %s15125_s22 = spop %15124 }
0x70cb   :  { %v11718_v53 = vstv %s15125_s22 }
0x70cc   :  { %v11719_v30 = vsub.f32 %v11704_v54, %v11718_v53  ;;  %v11720_v17 = vsub.f32 %v11705_v55, %v11718_v53 }
0x70ce   :  { %v11721_v62 = vmul.f32 1.442695, %v11719_v30  ;;  %v11723_v50 = vmul.f32 1.442695, %v11720_v17 }
0x70d0   :  { %15460 = vpow2.f32 %v11721_v62 }
0x70d1   :  { %15462 = vpow2.f32 %v11723_v50 }
0x70da   :  { %v15461_v43 = vpop.eup %15460 }
0x70db   :  { %v15463_v22 = vpop.eup %15462  ;;  %v11725_v47 = vadd.f32 0.0001, %v15461_v43  ;;  %v11476_v43 = vmul.f32 %v11394_v56, %v18228_v39  ;;  %v18525_v39 = vmov 0.0  }
0x70dc   :  { %v11726_v63 = vadd.f32 0.0001, %v15463_v22 }
0x70dd   :  { %v11727_v49 = vmul.f32 0.25, %v11725_v47  ;;  %v11478_v22 = vsel %vm6269_vm10, %v11476_v43, 0.0  ;;  %v11477_v47 = vmul.f32 %v11394_v56, %v18236_v9 }
0x70de   :  { %v11728_v10 = vmul.f32 0.25, %v11726_v63 }
0x70df   :  { %v11850_v58 = vsel %vm6269_vm10, %v11727_v49, 0.0  ;;  %11729 = vxpose.xlu0.b32.start [1/2] (short) (narrow) %v11727_v49, 16  ;;  %v11481_v63 = vsel %vm6443_vm14, %v11477_v47, 0.0 }
0x70e0   :  { %v11851_v26 = vsel %vm6443_vm14, %v11728_v10, 0.0 }
0x70e1   :  { %v11852_v15 = vadd.f32 %v11851_v26, %v11850_v58 }
0x70e3   :  { %11730 = vxpose.xlu0.b32.end [2/2] (short) (narrow) %v11728_v10, 16  ;;  %v11853_v59 = vrot.slane %v11852_v15, 4 }
0x7110   :  { %11666 = vadd.xlane.f32.xlu0 %v11665_v40 }
0x715f   :  { %v11745_v0 = vpop.trf.xlu0 }
0x7160   :  { %14371 = vmatprep.mubr.msk.f32.mxu0 %vm6534_vm15, %v11745_v0 }
0x7163   :  { %v11746_v2 = vpop.trf.xlu0 }
0x7164   :  { %14372 = vmatmul.mubr.msk.f32.vlgmr.msra.gmra.mrb[104].mxu0 %vm6534_vm15, %v11746_v2 }
0x7165   :  { %v14359_v13 = vpop.f32.mrb[102].mxu0  ;;  %15057 = vmatpush3.bf16.msra.mxu0 %v17804_v16  ;;  %v11854_v16 = vadd.f32 %v11853_v59, %v11852_v15 }
0x7166   :  { %v11562_v45 = vpop.f32.mrb[103].mxu0  ;;  %15059 = vmatprep.subr.bf16.mxu0 %v17810_v21  ;;  %v11691_v12 = vsel %vm6443_vm14, %v14359_v13, -inf }
0x7167   :  { %v11688_v29 = vsel %vm6269_vm10, %v11562_v45, -inf  ;;  %v11686_v5 = vsub.f32 %v11562_v45, %v11668_v4  ;;  %v11855_v20 = vrot.slane %v11854_v16, 2 }
0x7168   :  { %11689 = vmax.xlane.f32.xlu1 %v11688_v29 }
0x7169   :  { %v11856_v28 = vadd.f32 %v11855_v20, %v11854_v16 }
0x716b   :  { %v11857_v46 = vrot.slane %v11856_v28, 1 }
0x716c   :  { %11692 = vmax.xlane.f32.xlu1 %v11691_v12 }
0x716d   :  { %v11858_v3 = vadd.f32 %v11857_v46, %v11856_v28 }
0x719d   :  { %v11667_v11 = vpop.xlane.xlu0 %11666 }
0x719e   :  { %v11669_v19 = vmul.f32 0.5, %v11667_v11 }
0x71a0   :  { %v11687_v14 = vsub.f32 %v14359_v13, %v11669_v19  ;;  %v15528_v19 = vld [vmem:[%s18512_s8] ss:$0 sm:$0xff] }
0x71f5   :  { %v11690_v24 = vpop.xlane.xlu1 %11689 }
0x71f6   :  { %v11694_v25 = vsub.f32 %v11686_v5, %v11690_v24 }
0x71f8   :  { %v11696_v1 = vmul.f32 1.442695, %v11694_v25 }
0x71f9   :  { %v11693_v23 = vpop.xlane.xlu1 %11692 }
0x71fa   :  { %15464 = vpow2.f32 %v11696_v1  ;;  %v11695_v54 = vsub.f32 %v11687_v14, %v11693_v23 }
0x71fc   :  { %v11698_v33 = vmul.f32 1.442695, %v11695_v54  ;;  %v18320_v54 = vld [vmem:[%s18530_s17] ss:$0 sm:$0xff] }
0x71fe   :  { %15466 = vpow2.f32 %v11698_v33  ;;  %v9169_v33 = vadd.f32 %v18320_v54, %v18531_v6 }
0x7204   :  { %v15465_v61 = vpop.eup %15464 }
0x7205   :  { %v11700_v8 = vadd.f32 0.0001, %v15465_v61  ;;  %v9176_v61 = vadd.f32 %v9169_v33, %v18532_v51 }
0x7207   :  { %v11702_v36 = vmul.f32 0.25, %v11700_v8 }
0x7208   :  { %v15467_v52 = vpop.eup %15466 }
0x7209   :  { %v11701_v55 = vadd.f32 0.0001, %v15467_v52  ;;  %14378 = vmatprep.mubr.msk.f32.mxu1 %vm6269_vm10, %v11702_v36  ;;  %v11940_v53 = vmul.f32 %v11858_v3, %v11702_v36  ;;  %v9177_v36 = vsel %vm838_vm4, %v9176_v61, 0.0 }
0x720b   :  { %v11703_v30 = vmul.f32 0.25, %v11701_v55  ;;  %v11942_v17 = vsel %vm6269_vm10, %v11940_v53, 0.0 }
0x720c   :  { %11943 = vadd.xlane.f32.xlu1 %v11942_v17 }
0x720d   :  { %v11941_v62 = vmul.f32 %v11858_v3, %v11703_v30 }
0x720f   :  { %v11945_v50 = vsel %vm6443_vm14, %v11941_v62, 0.0  ;;  %v18328_v62 = vld [vmem:[#allocation35] sm:$0x1] }
0x7210   :  { %11946 = vadd.xlane.f32.xlu1 %v11945_v50  ;;  %v18533_v50 = vld [vmem:[#allocation99_spill] sm:$0xff] }
0x7211   :  { %v18332_v43 = vadd.f32 %v18533_v50, %v18328_v62  ;;  %v18534_v50 = vld [vmem:[#allocation98_spill] sm:$0xff] }
0x7214   :  { %11479 = vadd.xlane.f32.xlu1 %v11478_v22 }
0x7218   :  { %11482 = vadd.xlane.f32.xlu1 %v11481_v63 }
0x7237   :  { %v14373_v49 = vpop.f32.mrb[104].mxu0 }
0x7238   :  { %v11841_v10 = vpop.f32.mrb[105].mxu0 }
0x7239   :  { %v15050_v58 = vpack.c.bf16 %v14373_v49, %v11841_v10  ;;  %v5982_v49 = vmul.f32 %v18332_v43, %v18332_v43 }
0x723b   :  { %15051 = vmatprep.subr.bf16.mxu1 %v15050_v58 }
0x723c   :  { %15053 = vmatpush3.bf16.msra.mxu1 %v15050_v58 }
0x723d   :  { %15063 = vmatprep.subr.bf16.mxu1 %v17847_v34 }
0x723f   :  { %14379 = vmatmul.mubr.msk.f32.vlgmr.msra.gmra.mrb[124].mxu1 %vm6269_vm10, %v11703_v30 }
0x7240   :  { %15065 = vmatpush3.bf16.msra.mxu1 %v17847_v34 }
0x7241   :  { %15067 = vmatprep.subr.bf16.mxu1 %v17853_v35 }
0x7244   :  { %15069 = vmatpush3.bf16.msra.mxu1 %v17853_v35 }
0x7245   :  { %14441 = vmatprep.subr.mxu1 %v18525_v39 }
0x7299   :  { %v11944_v9 = vpop.xlane.xlu1 %11943 }
0x729a   :  { %15468 = vrcp.f32 %v11944_v9  ;;  %v15529_v9 = vld [vmem:[%s18516_s30] ss:$0 sm:$0xff] }
0x729d   :  { %v11947_v26 = vpop.xlane.xlu1 %11946 }
0x72a1   :  { %v11480_v15 = vpop.xlane.xlu1 %11479 }
0x72a2   :  { %15470 = vrcp.f32 %v11480_v15 }
0x72a3   :  { %15472 = vrcp.f32 %v11947_v26 }
0x72a4   :  { %v15469_v40 = vpop.eup %15468 }
0x72a5   :  { %v11483_v31 = vpop.xlane.xlu1 %11482 }
0x72a6   :  { %15474 = vrcp.f32 %v11483_v31  ;;  %v5983_v31 = vsel %vm3445_vm9, %v5982_v49, 0.0 }
0x72ac   :  { %v15471_v2 = vpop.eup %15470 }
0x72ad   :  { %v15473_v45 = vpop.eup %15472  ;;  %v11485_v35 = vmul.f32 %v15471_v2, %v18250_v60  ;;  %v15530_v2 = vld [vmem:[%s18517_s0] ss:$0 sm:$0xff] }
0x72b0   :  { %v15475_v12 = vpop.eup %15474 }
0x72b1   :  { %v11487_v38 = vmul.f32 %v15475_v12, %v18248_v27  ;;  %v18527_v27 = vld [vmem:[#allocation102_spill] sm:$0xff] }
0x7312   :  { %v14380_v0 = vpop.f32.mrb[124].mxu1 }
0x7313   :  { %v11931_v13 = vpop.f32.mrb[125].mxu1  ;;  %v11951_v29 = vmul.f32 %v15473_v45, %v14380_v0 }
0x7314   :  { %v11949_v34 = vmul.f32 %v15469_v40, %v11931_v13 }
0x7316   :  { %14385 = vmatprep.mubr.msk.f32.mxu0 %vm6269_vm10, %v11949_v34 }
0x7317   :  { %14386 = vmatmul.mubr.msk.f32.vlgmr.msra.gmra.mrb[106].mxu0 %vm6269_vm10, %v11951_v29 }
0x7318   :  { %15061 = vmatpush3.bf16.msra.mxu0 %v17810_v21  ;;  %14392 = vmatprep.mubr.msk.f32.mxu0 %vm6269_vm10, %v11485_v35  ;;  %v18526_v21 = vld [vmem:[#allocation101_spill] sm:$0xff] }
0x7319   :  { %15071 = vmatprep.subr.bf16.mxu0 %v17861_v57 }
0x731f   :  { %14393 = vmatmul.mubr.msk.f32.vlgmr.msra.gmra.mrb[106].mxu0 %vm6269_vm10, %v11487_v38  ;;  %v15531_v38 = vld [vmem:[%s18519_s9] ss:$0 sm:$0xff] }
0x7320   :  { %15073 = vmatpush3.bf16.msra.mxu0 %v17861_v57  ;;  %v18528_v57 = vld [vmem:[#allocation103_spill] sm:$0xff] }
0x7321   :  { %15075 = vmatprep.subr.bf16.mxu0 %v17864_v37 }
0x7324   :  { %15077 = vmatpush3.bf16.msra.mxu0 %v17864_v37  ;;  %v18529_v37 = vld [vmem:[#allocation104_spill] sm:$0xff] }
0x7325   :  { %15079 = vmatprep.subr.bf16.mxu0 %v17902_v32 }
0x7328   :  { %15081 = vmatpush3.bf16.msra.mxu0 %v17902_v32 }
0x7329   :  { %15083 = vmatprep.subr.bf16.mxu0 %v17908_v42 }
0x732c   :  { %15085 = vmatpush3.bf16.msra.mxu0 %v17908_v42 }
0x732d   :  { %15087 = vmatprep.subr.bf16.mxu0 %v18526_v21 }
0x7330   :  { %15089 = vmatpush3.bf16.msra.mxu0 %v18526_v21 }
0x7331   :  { %15091 = vmatprep.subr.bf16.mxu0 %v18527_v27 }
0x7334   :  { %15093 = vmatpush3.bf16.msra.mxu0 %v18527_v27 }
0x7335   :  { %15095 = vmatprep.subr.bf16.mxu0 %v18528_v57 }
0x7338   :  { %15097 = vmatpush3.bf16.msra.mxu0 %v18528_v57 }
0x7339   :  { %15099 = vmatprep.subr.bf16.mxu0 %v18529_v37 }
0x733c   :  { %15101 = vmatpush3.bf16.msra.mxu0 %v18529_v37 }
0x73f2   :  { %v14394_v32 = vpop.f32.mrb[106].mxu0 }
0x73f3   :  { %v12117_v60 = vrot.slane %v14394_v32, 7  ;;  %v12105_v42 = vpop.f32.mrb[107].mxu0 }
0x73f4   :  { %v12116_v11 = vrot.slane %v12105_v42, 7 }
0x73f6   :  { %v12118_v4 = vsel %vm800_vm1, %v12116_v11, %v12117_v60  ;;  %v12121_v59 = vadd.f32 %v12116_v11, %v18134_v41 }
0x73f7   :  { %v12122_v5 = vadd.f32 %v12118_v4, %v18137_v48 }
0x73f8   :  { %v18313_v24 = vadd.f32 %v15528_v19, %v12121_v59 }
0x73f9   :  { %v12124_v7 = vadd.f32 %v15528_v19, %v12122_v5 }
0x73fa   :  { %v12125_v25 = vsel %vm9210_vm0, %v18313_v24, 0.0 }
0x73fb   :  { %12126 = vadd.xlane.f32.xlu1 %v12125_v25  ;;  %v12128_v16 = vsel %vm9214_vm2, %v12124_v7, 0.0 }
0x73ff   :  { %12129 = vadd.xlane.f32.xlu1 %v12128_v16 }
0x7488   :  { %v12127_v1 = vpop.xlane.xlu1 %12126 }
0x7489   :  { %v12131_v14 = vmul.f32 0.03125, %v12127_v1 }
0x748b   :  { %v12133_v23 = vsub.f32 %v18313_v24, %v12131_v14 }
0x748c   :  { %v12130_v41 = vpop.xlane.xlu1 %12129 }
0x748d   :  { %v12132_v20 = vmul.f32 0.03125, %v12130_v41  ;;  %v12135_v48 = vmul.f32 %v12133_v23, %v12133_v23 }
0x748f   :  { %v12134_v28 = vsub.f32 %v12124_v7, %v12132_v20  ;;  %v12137_v18 = vsel %vm9210_vm0, %v12135_v48, 0.0 }
0x7490   :  { %12138 = vadd.xlane.f32.xlu1 %v12137_v18 }
0x7491   :  { %v12136_v46 = vmul.f32 %v12134_v28, %v12134_v28 }
0x7493   :  { %v12140_v8 = vsel %vm9214_vm2, %v12136_v46, 0.0 }
0x7494   :  { %12141 = vadd.xlane.f32.xlu1 %v12140_v8 }
0x7498   :  { %9178 = vadd.xlane.f32.xlu1 %v9177_v36 }
0x751d   :  { %v12139_v3 = vpop.xlane.xlu1 %12138 }
0x751e   :  { %v12143_v44 = vmul.f32 0.03125, %v12139_v3 }
0x7520   :  { %v12145_v52 = vadd.f32 1e-05, %v12143_v44  ;;  %v12731_v44 = vld [vmem:[#allocation5] ss:$0 sm:$0xff] }
0x7521   :  { %v12142_v55 = vpop.xlane.xlu1 %12141 }
0x7522   :  { %15476 = vrsqrt.f32 %v12145_v52  ;;  %v12144_v53 = vmul.f32 0.03125, %v12142_v55 }
0x7524   :  { %v12146_v30 = vadd.f32 1e-05, %v12144_v53  ;;  %v12732_v53 = vld [vmem:[#allocation2] ss:$0 sm:$0xff] }
0x7525   :  { %v9179_v17 = vpop.xlane.xlu1 %9178 }
0x7526   :  { %15478 = vrsqrt.f32 %v12146_v30  ;;  %v9180_v56 = vmul.f32 0.03125, %v9179_v17 }
0x7528   :  { %v9181_v22 = vsub.f32 %v9176_v61, %v9180_v56 }
0x752a   :  { %v9182_v47 = vmul.f32 %v9181_v22, %v9181_v22 }
0x752c   :  { %v15477_v63 = vpop.eup %15476  ;;  %v9183_v10 = vsel %vm838_vm4, %v9182_v47, 0.0 }
0x752d   :  { %9184 = vadd.xlane.f32.xlu1 %v9183_v10  ;;  %v12149_v58 = vmul.f32 %v15477_v63, %v12133_v23 }
0x752f   :  { %v12151_v26 = vmul.f32 %v15529_v9, %v12149_v58 }
0x7530   :  { %v15479_v15 = vpop.eup %15478 }
0x7531   :  { %5984 = vadd.xlane.f32.xlu1 %v5983_v31  ;;  %v12150_v40 = vmul.f32 %v15479_v15, %v12134_v28  ;;  %v12153_v13 = vadd.f32 %v15530_v2, %v12151_v26 }
0x7533   :  { %v12152_v0 = vmul.f32 %v15529_v9, %v12150_v40  ;;  %v12157_v34 = vrot.slane %v12153_v13, 1 }
0x7535   :  { %v12154_v45 = vadd.f32 %v15530_v2, %v12152_v0 }
0x7537   :  { %v12158_v29 = vrot.slane %v12154_v45, 1 }
0x7539   :  { %v12159_v35 = vsel %vm9244_vm5, %v12157_v34, %v12158_v29 }
0x753a   :  { %14403 = vmatprep.mubr.msk.f32.mxu1 %vm838_vm4, %v12159_v35 }
0x753b   :  { %14404 = vmatmul.mubr.msk.f32.vlgmr.msra.gmra.mrb[126].mxu1 %vm838_vm4, %v12158_v29 }
0x753c   :  { %14443 = vmatprep.mubr.msk.f32.mxu1 %vm16151_vm3, %v18525_v39  ;;  %vm12351_vm3 = vcmask 254977  }
0x75ba   :  { %v9185_v51 = vpop.xlane.xlu1 %9184 }
0x75bb   :  { %v9186_v61 = vmul.f32 0.03125, %v9185_v51 }
0x75bd   :  { %v9187_v8 = vadd.f32 1e-05, %v9186_v61 }
0x75be   :  { %v5985_v45 = vpop.xlane.xlu1 %5984 }
0x75bf   :  { %v5986_v29 = vmax.f32 %v5985_v45, 1e-24 }
0x760e   :  { %v14405_v12 = vpop.f32.mrb[126].mxu1 }
0x760f   :  { %v12236_v21 = vadd.f32 %v15531_v38, %v14405_v12  ;;  %v12230_v27 = vpop.f32.mrb[127].mxu1 }
0x7610   :  { %v12231_v57 = vadd.f32 %v15531_v38, %v12230_v27 }
0x7611   :  { %v12240_v37 = vmul.f32 %v12236_v21, %v12236_v21 }
0x7612   :  { %v12239_v32 = vmul.f32 %v12231_v57, %v12231_v57 }
0x7613   :  { %v12242_v60 = vmul.f32 %v12240_v37, %v12236_v21 }
0x7614   :  { %v12241_v42 = vmul.f32 %v12239_v32, %v12231_v57 }
0x7615   :  { %v12244_v11 = vmul.f32 0.044715, %v12242_v60 }
0x7616   :  { %v12243_v4 = vmul.f32 0.044715, %v12241_v42 }
0x7617   :  { %v12246_v59 = vadd.f32 %v12244_v11, %v12236_v21 }
0x7618   :  { %v12245_v5 = vadd.f32 %v12243_v4, %v12231_v57 }
0x7619   :  { %v12248_v19 = vmul.f32 0.7978846, %v12246_v59 }
0x761a   :  { %v12247_v25 = vmul.f32 0.7978846, %v12245_v5 }
0x761b   :  { %15480 = vtanh.f32 %v12248_v19 }
0x761c   :  { %15482 = vtanh.f32 %v12247_v25 }
0x761d   :  { %15484 = vrsqrt.f32 %v9187_v8 }
0x7625   :  { %v15481_v7 = vpop.eup %15480 }
0x7626   :  { %v15483_v16 = vpop.eup %15482  ;;  %v12252_v39 = vadd.f32 1.0, %v15481_v7 }
0x7627   :  { %v12251_v1 = vadd.f32 1.0, %v15483_v16  ;;  %v15485_v36 = vpop.eup %15484 }
0x7628   :  { %v12254_v14 = vmul.f32 0.5, %v12252_v39  ;;  %v9189_v3 = vmul.f32 %v15485_v36, %v9181_v22 }
0x7629   :  { %v12253_v23 = vmul.f32 0.5, %v12251_v1 }
0x762a   :  { %v12256_v20 = vmul.f32 %v12254_v14, %v12236_v21  ;;  %v9196_v52 = vmul.f32 %v12731_v44, %v9189_v3 }
0x762b   :  { %v12255_v41 = vmul.f32 %v12253_v23, %v12231_v57 }
0x762c   :  { %v9203_v56 = vadd.f32 %v12732_v53, %v9196_v52 }
0x762d   :  { %14438 = vmatprep.mubr.f32.mxu0 %v12255_v41 }
0x762e   :  { %14439 = vmatmul.mubr.f32.vlgmr.msra.gmra.mrb[108].mxu0 %v12256_v20  ;;  %v9204_v63 = vmul.f32 %v9203_v56, %v9203_v56 }
0x7630   :  { %v9205_v10 = vsel %vm3445_vm9, %v9204_v63, 0.0 }
0x7701   :  { %v14440_v48 = vpop.f32.mrb[108].mxu0 }
0x7702   :  { %v12323_v6 = vpop.f32.mrb[109].mxu0 }
0x7703   :  { %v12324_v33 = vadd.f32 %v18320_v54, %v12323_v6 }
0x7705   :  { %v12332_v28 = vrot.slane %v12324_v33, 7 }
0x7707   :  { %v12334_v18 = vadd.f32 %v12332_v28, %v18313_v24  ;;  %v3441_v24 = vadd.f32 %v18534_v50, %v18328_v62 }
0x7709   :  { %v12335_v46 = vsel %vm9210_vm0, %v12334_v18, 0.0  ;;  %v3444_v49 = vmul.f32 %v3441_v24, %v3441_v24 }
0x770a   :  { %12336 = vadd.xlane.f32.xlu0 %v12335_v46 }
0x770b   :  { %v3446_v22 = vsel %vm3445_vm9, %v3444_v49, 0.0 }
0x7797   :  { %v12337_v55 = vpop.xlane.xlu0 %12336 }
0x7798   :  { %v12338_v30 = vmul.f32 0.03125, %v12337_v55 }
0x779a   :  { %v12339_v17 = vsub.f32 %v12334_v18, %v12338_v30 }
0x779c   :  { %v12340_v54 = vmul.f32 %v12339_v17, %v12339_v17 }
0x779e   :  { %v12341_v47 = vsel %vm9210_vm0, %v12340_v54, 0.0 }
0x779f   :  { %12342 = vadd.xlane.f32.xlu0 %v12341_v47 }
0x77a3   :  { %9206 = vadd.xlane.f32.xlu0 %v9205_v10 }
0x77a7   :  { %3447 = vadd.xlane.f32.xlu0 %v3446_v22 }
0x782c   :  { %v12343_v58 = vpop.xlane.xlu0 %12342 }
0x782d   :  { %v12344_v9 = vmul.f32 0.03125, %v12343_v58 }
0x782f   :  { %v12345_v26 = vadd.f32 1e-05, %v12344_v9 }
0x7830   :  { %v9207_v13 = vpop.xlane.xlu0 %9206 }
0x7831   :  { %15486 = vrsqrt.f32 %v12345_v26 }
0x7832   :  { %15488 = vrsqrt.f32 %v5986_v29 }
0x7833   :  { %15490 = vrsqrt.f32 %v9207_v13 }
0x7834   :  { %v3448_v34 = vpop.xlane.xlu0 %3447 }
0x7835   :  { %v3449_v35 = vmax.f32 %v3448_v34, 1e-24 }
0x7837   :  { %15492 = vrsqrt.f32 %v3449_v35 }
0x783b   :  { %v15487_v15 = vpop.eup %15486 }
0x783c   :  { %v12347_v31 = vmul.f32 %v15487_v15, %v12339_v17  ;;  %v15489_v38 = vpop.eup %15488 }
0x783d   :  { %v15491_v21 = vpop.eup %15490  ;;  %v5988_v37 = vmul.f32 %v15489_v38, %v18332_v43 }
0x783e   :  { %v12348_v40 = vmul.f32 %v12731_v44, %v12347_v31  ;;  %v9209_v32 = vmul.f32 %v15491_v21, %v9203_v56 }
0x783f   :  { %v12358_v4 = vrot.slane %v5988_v37, 7 }
0x7840   :  { %v12349_v0 = vadd.f32 %v12732_v53, %v12348_v40 }
0x7841   :  { %v15493_v27 = vpop.eup %15492 }
0x7842   :  { %v12350_v62 = vmul.f32 %v12349_v0, %v12349_v0  ;;  %v3451_v42 = vmul.f32 %v15493_v27, %v3441_v24 }
0x7844   :  { %v12352_v2 = vsel %vm12351_vm3, %v12350_v62, 0.0  ;;  %v12360_v59 = vsel %vm800_vm1, %v3451_v42, %v12358_v4 }
0x7845   :  { %12353 = vadd.xlane.f32.xlu1 %v12352_v2 }
0x78d2   :  { %v12354_v12 = vpop.xlane.xlu1 %12353 }
0x78d3   :  { %15494 = vrsqrt.f32 %v12354_v12 }
0x78dd   :  { %v15495_v57 = vpop.eup %15494 }
0x78de   :  { %v12356_v60 = vmul.f32 %v15495_v57, %v12349_v0 }
0x78e0   :  { %v12361_v11 = vsel %vm800_vm1, %v9209_v32, %v12356_v60 }
0x78e1   :  { %14442 = vmatpush3.xpose.msk.msra.mxu1 %vm838_vm4, %v12361_v11 }
0x78e4   :  { %14444 = vmatmul.mubr.msk.f32.vlgmr.msra.gmra.mrb[128].mxu1 %vm838_vm4, %v12360_v59 }
0x79b7   :  { %v12434_v5 = vpop.f32.mrb[128].mxu1 }
0x79b8   :  { %v12438_v19 = vmul.f32 14.285714, %v12434_v5  ;;  %v14445_v25 = vpop.f32.mrb[129].mxu1 }
0x79ba   :  { %12440 = vst.msk [vmem:[#allocation37] sm:$0x3] %vm12439_vm6, %v12438_v19 }
0x79bb   :  { %16027 = shalt.err (!%p16024_p12)
}
0x79bc   :  { %s16028_s10 = scalar_lea.hbm %s16494_s3, 32 }
0x79bd   :  { %p16029_p13 = scmp.ne.s32.totalorder %s16494_s3, %s16028_s10  ;;  %p16032_p0 = scmp.lt.u32.totalorder %s16028_s10, %s16494_s3 }
0x79bf   :  { %p16034_p1 = pnand %p16032_p0, %p16029_p13 }
0x79c1   :  { %16037 = shalt.err (!%p16034_p1)
}
0x79c2   :  { %12450 = dma.vmem_to_hbm [thread:$0]  %s12448_s20, 32, %s16494_s3, [#allocation4]  }
0x79c3   :  { %16062 = dma.done.wait [#allocation4], 32  }
0x79c4   :  { %16063 = vsyncadd [#allocation4], 4294967264 }
0x79c5   :  { %12454 = vsyncpa [#allocation3], 1 }
0x79c6   :  { %12455 = vsyncpa [#allocation6], 1 }
0x79c7   :  { %12456 = vsyncpa [#allocation9], 1 }
0x79c8   :  { %12457 = vsyncpa [#allocation12], 1 }
0x79c9   :  { %12458 = vsyncpa [#allocation15], 1 }
0x79ca   :  { %12459 = vsyncpa [#allocation18], 1 }
0x79cb   :  { %12460 = vsyncpa [#allocation21], 1 }
0x79cc   :  { %12461 = vsyncpa [#allocation24], 1 }
0x79cd   :  { %12462 = vsyncpa [#allocation27], 1 }
0x79ce   :  { %12463 = vsyncpa [#allocation30], 1 }
0x79cf   :  { %12464 = vsyncpa [#allocation33], 1 }
0x79d0   :  { %12465 = vsyncpa [#allocation36], 1 }
0x79d1   :  { %12466 = vsyncpa [#allocation4], 1 }

</bundles_post_ra>
